<compile_context>
chip_gen: v5e
topology: v5e:2x2
jax: 0.10.0
libtpu: 0.0.40
codegen_flags: <defaults>
</compile_context>

<pallas_src>
import functools

import jax
import jax.numpy as jnp
import numpy as np
from jax import lax
from jax.experimental import pallas as pl
from jax.experimental.pallas import tpu as pltpu


# -----------------------------------------------------------------------------
# Small, MNIST-LeNet-consistent config (mirrors cfg['MODEL'] parsed in parse_cfg)
# -----------------------------------------------------------------------------
CFG = dict(
    c_in=2, c_hidden=4, c_s1=8,
    h_hidden=16, w_hidden=16,          # == input H, W (stride_x == 1)
    fc_num=32, num_classes=10,
    kernel_size_x=5, stride_x=1, padding_x=2,
    kernel_size_s=3,
    time_step=8, time_step_back=8,
    vth=1.0, leaky=None,               # leaky=None -> IF neurons (SNNIFFuncMultiLayer)
)

_LANE = 128
_SUB = 8


def _round_up(n, m):
    return (n + m - 1) // m * m


def _cdiv(a, b):
    return (a + b - 1) // b


# -----------------------------------------------------------------------------
# Pallas kernel: time-chunked IF dynamics with interleaved MXU matmuls + classifier
# -----------------------------------------------------------------------------
def _spide_if_kernel(x1_ref, a1_ref, b2_ref, a2_ref, b3_ref, wc_ref, bc_ref,
                     z_ref, y_ref,
                     s1_buf, d2_buf, s2_buf, d3_buf,
                     u1_buf, u2_buf, u3_buf, acc_buf,
                     *, time_step, time_chunk, vth):
    T, CT = time_step, time_chunk
    NC = T // CT                       # number of time chunks
    NB = s1_buf.shape[0]               # spike/drive buffer parity depth (1 or 2)
    Bb, n1 = x1_ref.shape              # batch rows in this block / layer-1 width
    n2 = a1_ref.shape[1]               # layer-2 width
    nf = a2_ref.shape[1]               # FC width (zero-padded to a 128-lane multiple)
    f32, bf16 = jnp.float32, jnp.bfloat16

    # Static Python loops everywhere: chunk counts are tiny compile-time constants, all
    # row/lane offsets are static & (8,128)-aligned (unmasked vst), and the whole body is
    # one basic block so the LLO scheduler overlaps the VPU scans with the MXU matmuls
    # (spike/drive buffers are parity double-buffered so only true RAW deps remain).
    for c in range(NC):
        p = c % NB                     # parity slot for this time chunk
        first, last = (c == 0), (c == NC - 1)

        # ---- layer 1 (hidden conv layer; feedback network_s3 is SNNZero): CT IF steps.
        #      Feature-chunked: the [Bb,128] membrane chunk stays register-resident
        #      across all CT steps; only bf16 spike frames touch the vst slot.
        for j in range(n1 // _LANE):
            col = j * _LANE
            xj = x1_ref[:, pl.ds(col, _LANE)]
            u = jnp.zeros((Bb, _LANE), f32) if first else u1_buf[:, pl.ds(col, _LANE)]
            for t in range(CT):
                u = u + xj
                ge = u >= vth
                s1_buf[p, pl.ds(t * Bb, Bb), pl.ds(col, _LANE)] = ge.astype(bf16)
                u = jnp.where(ge, u - vth, u)        # reset by subtraction (u_rest=None)
            if not last:                             # final membrane is never read again
                u1_buf[:, pl.ds(col, _LANE)] = u

        # ---- layer-2 drive: one [CT*Bb, n1] x [n1, n2] MXU matmul (bf16 x bf16, f32 acc).
        #      Per-step bias injection == broadcast-add over all CT*Bb frames.
        d2_buf[p] = jnp.dot(s1_buf[p], a1_ref[...],
                            preferred_element_type=f32) + b2_ref[...]

        # ---- layer 2 (network_p1 avgpool + network_s1 conv): CT IF steps.
        for j in range(n2 // _LANE):
            col = j * _LANE
            u = jnp.zeros((Bb, _LANE), f32) if first else u2_buf[:, pl.ds(col, _LANE)]
            for t in range(CT):
                u = u + d2_buf[p, pl.ds(t * Bb, Bb), pl.ds(col, _LANE)]
                ge = u >= vth
                s2_buf[p, pl.ds(t * Bb, Bb), pl.ds(col, _LANE)] = ge.astype(bf16)
                u = jnp.where(ge, u - vth, u)
            if not last:
                u2_buf[:, pl.ds(col, _LANE)] = u

        # ---- layer-3 drive: one [CT*Bb, n2] x [n2, nf] MXU matmul.
        d3_buf[p] = jnp.dot(s2_buf[p], a2_ref[...],
                            preferred_element_type=f32) + b3_ref[...]

        # ---- layer 3 (network_p2 avgpool + network_s2 FC): CT IF steps + spike count.
        for j in range(nf // _LANE):
            col = j * _LANE
            u = jnp.zeros((Bb, _LANE), f32) if first else u3_buf[:, pl.ds(col, _LANE)]
            acc = (jnp.zeros((Bb, _LANE), f32) if first
                   else acc_buf[:, pl.ds(col, _LANE)])
            for t in range(CT):
                u = u + d3_buf[p, pl.ds(t * Bb, Bb), pl.ds(col, _LANE)]
                ge = u >= vth
                acc = acc + ge.astype(f32)
                u = jnp.where(ge, u - vth, u)
            if not last:
                u3_buf[:, pl.ds(col, _LANE)] = u
            acc_buf[:, pl.ds(col, _LANE)] = acc

    # z = mean FC-layer firing rate; padded lanes never spike (vth > 0) -> stay 0.
    z = acc_buf[...] * (1.0 / T)
    z_ref[...] = z                                    # full 128-lane unmasked store
    # classifier: Linear(fc_num, num_classes), zero-padded to [128, 128] (tiny, f32).
    y_ref[...] = jnp.dot(z, wc_ref[...], preferred_element_type=f32) + bc_ref[...]


# -----------------------------------------------------------------------------
# Parameter init (kaiming, mirrors SNNConv/SNNFC init='kaiming')
# -----------------------------------------------------------------------------
def init_params(key, cfg):
    c_in, c1, c2 = cfg['c_in'], cfg['c_hidden'], cfg['c_s1']
    h, w = cfg['h_hidden'], cfg['w_hidden']
    kx, ks = cfg['kernel_size_x'], cfg['kernel_size_s']
    fc, nc = cfg['fc_num'], cfg['num_classes']
    fc_in = h * w * c2 // 16

    keys = jax.random.split(key, 8)

    def kaiming(k, shape, fan_in):
        return jax.random.normal(k, shape, jnp.float32) * jnp.sqrt(2.0 / fan_in)

    return dict(
        wx=kaiming(keys[0], (c1, c_in, kx, kx), c_in * kx * kx),     # network_x conv  (OIHW)
        bx=jax.random.uniform(keys[1], (c1,), jnp.float32, -0.1, 0.1),
        ws=kaiming(keys[2], (c2, c1, ks, ks), c1 * ks * ks),         # network_s1 conv (OIHW)
        bs=jax.random.uniform(keys[3], (c2,), jnp.float32, -0.1, 0.1),
        wfc=kaiming(keys[4], (fc, fc_in), fc_in),                    # network_s2 FC
        bfc=jax.random.uniform(keys[5], (fc,), jnp.float32, -0.1, 0.1),
        wcls=kaiming(keys[6], (nc, fc), fc),                         # classifier
        bcls=jax.random.uniform(keys[7], (nc,), jnp.float32, -0.1, 0.1),
    )


# -----------------------------------------------------------------------------
# Operator folding (done ONCE, outside the per-forward hot path)
# -----------------------------------------------------------------------------
def _avgpool2(x_nchw):
    return lax.reduce_window(x_nchw, 0.0, lax.add,
                             (1, 1, 2, 2), (1, 1, 2, 2), 'VALID') * 0.25


def _conv2d(x_nchw, w_oihw, pad):
    return lax.conv_general_dilated(
        x_nchw, w_oihw, window_strides=(1, 1),
        padding=((pad, pad), (pad, pad)),
        dimension_numbers=('NCHW', 'OIHW', 'NCHW'))


def build_operators(params, cfg):
    """Fold conv / avgpool / fc layers into dense NCHW-flattened linear operators.

    Matmul operands a1/a2 are returned in bf16 (spikes are exactly {0,1}); biases and the
    tiny classifier stay f32.  FC / classifier widths are zero-padded to 128 lanes.
    """
    c_in, c1, c2 = cfg['c_in'], cfg['c_hidden'], cfg['c_s1']
    h, w = cfg['h_hidden'], cfg['w_hidden']
    h1, w1, h2, w2 = h // 2, w // 2, h // 4, w // 4
    fc, nc = cfg['fc_num'], cfg['num_classes']
    n0, n1, n2 = c_in * h * w, c1 * h * w, c2 * h1 * w1
    fpad = _round_up(fc, _LANE)
    npad = _round_up(nc, _LANE)

    # A0: flatten(x) -> flatten(conv_x(x))                       (network_x, wrapper-side)
    eye0 = jnp.eye(n0, dtype=jnp.float32).reshape(n0, c_in, h, w)
    a0 = _conv2d(eye0, params['wx'], cfg['padding_x']).reshape(n0, n1)
    b1 = jnp.repeat(params['bx'], h * w)[None, :]

    # A1: flatten(s1) -> flatten(conv_s1(avgpool2(s1)))          (network_p1 + network_s1)
    eye1 = jnp.eye(n1, dtype=jnp.float32).reshape(n1, c1, h, w)
    a1 = _conv2d(_avgpool2(eye1), params['ws'],
                 cfg['kernel_size_s'] // 2).reshape(n1, n2)
    b2 = jnp.repeat(params['bs'], h1 * w1)[None, :]

    # A2: flatten(s2) -> fc(flatten(avgpool2(s2)))               (network_p2 + network_s2)
    eye2 = jnp.eye(n2, dtype=jnp.float32).reshape(n2, c2, h1, w1)
    a2 = _avgpool2(eye2).reshape(n2, c2 * h2 * w2) @ params['wfc'].T
    a2p = jnp.zeros((n2, fpad), jnp.float32).at[:, :fc].set(a2)
    b3p = jnp.zeros((1, fpad), jnp.float32).at[:, :fc].set(params['bfc'])

    # classifier, zero-padded to [fpad, npad] (extra rows/cols are zeros)
    wcp = jnp.zeros((fpad, npad), jnp.float32).at[:fc, :nc].set(params['wcls'].T)
    bcp = jnp.zeros((1, npad), jnp.float32).at[:, :nc].set(params['bcls'])

    return dict(a0=a0, b1=b1,
                a1=a1.astype(jnp.bfloat16), b2=b2,
                a2=a2p.astype(jnp.bfloat16), b3=b3p,
                wc=wcp, bc=bcp)


# -----------------------------------------------------------------------------
# Forward wrapper
# -----------------------------------------------------------------------------
@functools.partial(jax.jit,
                   static_argnames=("time_step", "vth", "fc_num", "num_classes"))
def _spide_forward_impl(x, a0, b1, a1, b2, a2, b3, wc, bc,
                        *, time_step, vth, fc_num, num_classes):
    B = x.shape[0]
    n1, n2 = a1.shape
    fpad = a2.shape[1]
    npad = wc.shape[1]
    T = int(time_step)
    assert n1 % _LANE == 0 and n2 % _LANE == 0 and fpad % _LANE == 0

    # network_x on the constant input, applied once in plain XLA (a0 used exactly once;
    # keeping it outside the kernel keeps its folded operator out of VMEM).
    x_flat = x.reshape(B, -1).astype(jnp.float32)
    x1 = jnp.dot(x_flat, a0, precision=jax.lax.Precision.HIGHEST) + b1     # [B, n1]

    # --- batch blocking -------------------------------------------------------
    #  * rows padded to a sublane multiple (8) so every per-frame spike/drive store is
    #    sublane-aligned (unmasked vst); padded rows get zero drive and never spike,
    #  * >= 2 batch blocks whenever possible so dimension_semantics=("parallel",)
    #    actually shards the grid across both v7x TensorCores.
    b8 = _round_up(max(B, _SUB), _SUB)
    b_blk = min(128, _round_up(_cdiv(b8, 2), _SUB))
    B_pad = _round_up(b8, b_blk)
    if B_pad != B:
        x1 = jnp.concatenate([x1, jnp.zeros((B_pad - B, n1), jnp.float32)], axis=0)
    grid = (B_pad // b_blk,)

    # --- time chunking ----------------------------------------------------------
    # CT frames at a time: M = CT*b_blk >= 256 keeps the 256-row MXU full on v6e/v7x,
    # while spike/drive scratch is O(CT*b_blk) (independent of time_step).
    ct = max(1, min(T, 256 // b_blk))
    while T % ct:
        ct -= 1
    n_chunks = T // ct
    nbuf = 2 if n_chunks > 1 else 1      # parity double-buffer -> scan/matmul overlap

    kernel = functools.partial(_spide_if_kernel, time_step=T, time_chunk=ct,
                               vth=float(vth))
    const = lambda i: (0, 0)             # weights / biases stay resident across blocks
    batch = lambda i: (i, 0)

    z_pad, y_pad = pl.pallas_call(
        kernel,
        out_shape=(jax.ShapeDtypeStruct((B_pad, fpad), jnp.float32),   # FC firing rate
                   jax.ShapeDtypeStruct((B_pad, npad), jnp.float32)),  # logits (padded)
        grid=grid,
        in_specs=[
            pl.BlockSpec((b_blk, n1), batch),    # x1 drive
            pl.BlockSpec((n1, n2), const),       # a1 (bf16)
            pl.BlockSpec((1, n2), const),        # b2
            pl.BlockSpec((n2, fpad), const),     # a2 (bf16, lane-padded)
            pl.BlockSpec((1, fpad), const),      # b3
            pl.BlockSpec((fpad, npad), const),   # classifier W
            pl.BlockSpec((1, npad), const),      # classifier b
        ],
        out_specs=(
            pl.BlockSpec((b_blk, fpad), batch),
            pl.BlockSpec((b_blk, npad), batch),
        ),
        scratch_shapes=[
            pltpu.VMEM((nbuf, ct * b_blk, n1), jnp.bfloat16),   # S1 spike frames (bf16)
            pltpu.VMEM((nbuf, ct * b_blk, n2), jnp.float32),    # layer-2 drive chunk
            pltpu.VMEM((nbuf, ct * b_blk, n2), jnp.bfloat16),   # S2 spike frames (bf16)
            pltpu.VMEM((nbuf, ct * b_blk, fpad), jnp.float32),  # layer-3 drive chunk
            pltpu.VMEM((b_blk, n1), jnp.float32),               # u1 membrane carry
            pltpu.VMEM((b_blk, n2), jnp.float32),               # u2 membrane carry
            pltpu.VMEM((b_blk, fpad), jnp.float32),             # u3 membrane carry
            pltpu.VMEM((b_blk, fpad), jnp.float32),             # FC spike-count acc
        ],
        compiler_params=pltpu.CompilerParams(
            dimension_semantics=("parallel",)),                  # megacore sharding
    )(x1, a1, b2, a2, b3, wc, bc)

    return y_pad[:B, :num_classes], z_pad[:B, :fc_num]


def snn_spide_conv_multilayer_forward(x, ops, cfg):
    """Equivalent of SNNSPIDEConvMultiLayerNet.forward(x) (inference).

    Returns (logits y [B, num_classes], FC-layer firing rate z [B, fc_num]).
    `ops` is the cached output of build_operators(params, cfg).
    """
    return _spide_forward_impl(
        x, ops['a0'], ops['b1'], ops['a1'], ops['b2'], ops['a2'], ops['b3'],
        ops['wc'], ops['bc'],
        time_step=int(cfg['time_step']), vth=float(cfg['vth']),
        fc_num=int(cfg['fc_num']), num_classes=int(cfg['num_classes']))


# -----------------------------------------------------------------------------
# Pure-JAX (non-Pallas) reference of the same folded IF dynamics, for validation
# -----------------------------------------------------------------------------
def _reference_forward(x, ops, cfg):
    T, vth = cfg['time_step'], cfg['vth']
    B = x.shape[0]
    f32 = jnp.float32
    hi = jax.lax.Precision.HIGHEST
    a1 = ops['a1'].astype(f32)
    a2 = ops['a2'].astype(f32)
    x1 = jnp.dot(x.reshape(B, -1).astype(f32), ops['a0'], precision=hi) + ops['b1']
    u1 = jnp.zeros_like(x1)
    u2 = jnp.zeros((B, a1.shape[1]), f32)
    u3 = jnp.zeros((B, a2.shape[1]), f32)
    acc = jnp.zeros_like(u3)
    for _ in range(T):
        u1 = u1 + x1
        s1 = (u1 >= vth).astype(f32)
        u1 = jnp.where(s1 > 0, u1 - vth, u1)
        u2 = u2 + (jnp.dot(s1, a1, precision=hi) + ops['b2'])
        s2 = (u2 >= vth).astype(f32)
        u2 = jnp.where(s2 > 0, u2 - vth, u2)
        u3 = u3 + (jnp.dot(s2, a2, precision=hi) + ops['b3'])
        s3 = (u3 >= vth).astype(f32)
        u3 = jnp.where(s3 > 0, u3 - vth, u3)
        acc = acc + s3
    z = acc / T
    y = jnp.dot(z, ops['wc'], precision=hi) + ops['bc']
    return y[:, :cfg['num_classes']], z[:, :cfg['fc_num']]


# -----------------------------------------------------------------------------
if __name__ == "__main__":
    cfg = CFG
    key = jax.random.PRNGKey(0)
    k_params, k_x = jax.random.split(key)
    params = init_params(k_params, cfg)

    # Fold conv / pool / fc into dense operators ONCE (outside the per-forward hot path).
    ops = jax.tree_util.tree_map(jax.block_until_ready, build_operators(params, cfg))

    B = 2
    x = jax.random.uniform(
        k_x, (B, cfg['c_in'], cfg['h_hidden'], cfg['w_hidden']), jnp.float32)

    y, z = snn_spide_conv_multilayer_forward(x, ops, cfg)
    y = jax.block_until_ready(y)
    z = jax.block_until_ready(z)

    # structural sanity checks of the IF dynamics / shapes
    assert y.shape == (B, cfg['num_classes'])
    assert z.shape == (B, cfg['fc_num'])
    assert bool(jnp.all(jnp.isfinite(y)))
    zT = z * cfg['time_step']                       # spike counts must be integers
    assert bool(jnp.all(jnp.abs(zT - jnp.round(zT)) < 1e-4))
    assert bool(jnp.all((z >= -1e-6) & (z <= 1.0 + 1e-6)))

    # pure-JAX reference on the SAME bf16-rounded operators: only MXU accumulation-order
    # effects can differ, which at worst flip a borderline u >= vth crossing -> allow at
    # most one spike-step of drift per FC neuron.
    y_ref, z_ref = _reference_forward(x, ops, cfg)
    dz = np.abs(np.asarray(zT) - np.asarray(z_ref) * cfg['time_step'])
    assert float(dz.max()) <= 1.0 + 1e-3, f"spike-count mismatch: {dz.max()}"
    assert float(dz.mean()) <= 0.1, f"spike-count drift: {dz.mean()}"
    dy = np.abs(np.asarray(y) - np.asarray(y_ref))
    assert float(dy.max()) <= 0.25, f"logit mismatch: {dy.max()}"

    print("KERNEL_OK")
</pallas_src>

<mosaic_0001>
module attributes {stable_mosaic.version = 11 : i64} {
  func.func @_spide_if_kernel(%arg0: i32, %arg1: memref<8x1024xf32, #tpu.memory_space<vmem>>, %arg2: memref<1024x512xbf16, #tpu.memory_space<vmem>>, %arg3: memref<1x512xf32, #tpu.memory_space<vmem>>, %arg4: memref<512x128xbf16, #tpu.memory_space<vmem>>, %arg5: memref<1x128xf32, #tpu.memory_space<vmem>>, %arg6: memref<128x128xf32, #tpu.memory_space<vmem>>, %arg7: memref<1x128xf32, #tpu.memory_space<vmem>>, %arg8: memref<8x128xf32, #tpu.memory_space<vmem>>, %arg9: memref<8x128xf32, #tpu.memory_space<vmem>>, %arg10: memref<1x64x1024xbf16, #tpu.memory_space<vmem>>, %arg11: memref<1x64x512xf32, #tpu.memory_space<vmem>>, %arg12: memref<1x64x512xbf16, #tpu.memory_space<vmem>>, %arg13: memref<1x64x128xf32, #tpu.memory_space<vmem>>, %arg14: memref<8x1024xf32, #tpu.memory_space<vmem>>, %arg15: memref<8x512xf32, #tpu.memory_space<vmem>>, %arg16: memref<8x128xf32, #tpu.memory_space<vmem>>, %arg17: memref<8x128xf32, #tpu.memory_space<vmem>>) attributes {dimension_semantics = [#tpu.dimension_semantics<parallel>], iteration_bounds = array<i64: 1>, scalar_prefetch = 0 : i64, scratch_operands = 8 : i64, tpu.core_type = #tpu.core_type<tc>, window_params = [{transform_indices = @transform_0, window_bounds = array<i64: 8, 1024>}, {pipeline_mode = #tpu.pipeline_mode<synchronous>, transform_indices = @transform_1, window_bounds = array<i64: 1024, 512>}, {pipeline_mode = #tpu.pipeline_mode<synchronous>, transform_indices = @transform_2, window_bounds = array<i64: 1, 512>}, {pipeline_mode = #tpu.pipeline_mode<synchronous>, transform_indices = @transform_3, window_bounds = array<i64: 512, 128>}, {pipeline_mode = #tpu.pipeline_mode<synchronous>, transform_indices = @transform_4, window_bounds = array<i64: 1, 128>}, {pipeline_mode = #tpu.pipeline_mode<synchronous>, transform_indices = @transform_5, window_bounds = array<i64: 128, 128>}, {pipeline_mode = #tpu.pipeline_mode<synchronous>, transform_indices = @transform_6, window_bounds = array<i64: 1, 128>}, {transform_indices = @transform_7, window_bounds = array<i64: 8, 128>}, {transform_indices = @transform_8, window_bounds = array<i64: 8, 128>}]} {
    %c0 = arith.constant 0 : index
    %c0_0 = arith.constant 0 : index
    %0 = vector.load %arg1[%c0, %c0_0] : memref<8x1024xf32, #tpu.memory_space<vmem>>, vector<8x128xf32>
    %cst = arith.constant 0.000000e+00 : f32
    %1 = vector.broadcast %cst : f32 to vector<8x128xf32>
    %2 = arith.addf %1, %0 : vector<8x128xf32>
    %cst_1 = arith.constant 1.000000e+00 : f32
    %3 = vector.broadcast %cst_1 : f32 to vector<8x128xf32>
    %4 = arith.cmpf oge, %2, %3 : vector<8x128xf32>
    %5 = arith.extui %4 : vector<8x128xi1> to vector<8x128xi32>
    %6 = arith.sitofp %5 : vector<8x128xi32> to vector<8x128xf32>
    %7 = arith.truncf %6 : vector<8x128xf32> to vector<8x128xbf16>
    %c0_2 = arith.constant 0 : index
    %c0_3 = arith.constant 0 : index
    %c0_4 = arith.constant 0 : index
    %8 = vector.load %arg10[%c0_2, %c0_3, %c0_4] : memref<1x64x1024xbf16, #tpu.memory_space<vmem>>, vector<1x8x128xbf16>
    %9 = vector.shape_cast %8 : vector<1x8x128xbf16> to vector<8x128xbf16>
    %10 = vector.shape_cast %7 : vector<8x128xbf16> to vector<1x8x128xbf16>
    tpu.vector_store %arg10[%c0_2, %c0_3, %c0_4], %10 {strides = array<i32>} : memref<1x64x1024xbf16, #tpu.memory_space<vmem>>, vector<1x8x128xbf16>,
    %cst_5 = arith.constant 1.000000e+00 : f32
    %11 = vector.broadcast %cst_5 : f32 to vector<8x128xf32>
    %12 = arith.subf %2, %11 : vector<8x128xf32>
    %13 = arith.select %4, %12, %2 : vector<8x128xi1>, vector<8x128xf32>
    %14 = arith.addf %13, %0 : vector<8x128xf32>
    %cst_6 = arith.constant 1.000000e+00 : f32
    %15 = vector.broadcast %cst_6 : f32 to vector<8x128xf32>
    %16 = arith.cmpf oge, %14, %15 : vector<8x128xf32>
    %17 = arith.extui %16 : vector<8x128xi1> to vector<8x128xi32>
    %18 = arith.sitofp %17 : vector<8x128xi32> to vector<8x128xf32>
    %19 = arith.truncf %18 : vector<8x128xf32> to vector<8x128xbf16>
    %c0_7 = arith.constant 0 : index
    %c8 = arith.constant 8 : index
    %c0_8 = arith.constant 0 : index
    %20 = vector.load %arg10[%c0_7, %c8, %c0_8] : memref<1x64x1024xbf16, #tpu.memory_space<vmem>>, vector<1x8x128xbf16>
    %21 = vector.shape_cast %20 : vector<1x8x128xbf16> to vector<8x128xbf16>
    %22 = vector.shape_cast %19 : vector<8x128xbf16> to vector<1x8x128xbf16>
    tpu.vector_store %arg10[%c0_7, %c8, %c0_8], %22 {strides = array<i32>} : memref<1x64x1024xbf16, #tpu.memory_space<vmem>>, vector<1x8x128xbf16>,
    %cst_9 = arith.constant 1.000000e+00 : f32
    %23 = vector.broadcast %cst_9 : f32 to vector<8x128xf32>
    %24 = arith.subf %14, %23 : vector<8x128xf32>
    %25 = arith.select %16, %24, %14 : vector<8x128xi1>, vector<8x128xf32>
    %26 = arith.addf %25, %0 : vector<8x128xf32>
    %cst_10 = arith.constant 1.000000e+00 : f32
    %27 = vector.broadcast %cst_10 : f32 to vector<8x128xf32>
    %28 = arith.cmpf oge, %26, %27 : vector<8x128xf32>
    %29 = arith.extui %28 : vector<8x128xi1> to vector<8x128xi32>
    %30 = arith.sitofp %29 : vector<8x128xi32> to vector<8x128xf32>
    %31 = arith.truncf %30 : vector<8x128xf32> to vector<8x128xbf16>
    %c0_11 = arith.constant 0 : index
    %c16 = arith.constant 16 : index
    %c0_12 = arith.constant 0 : index
    %32 = vector.load %arg10[%c0_11, %c16, %c0_12] : memref<1x64x1024xbf16, #tpu.memory_space<vmem>>, vector<1x8x128xbf16>
    %33 = vector.shape_cast %32 : vector<1x8x128xbf16> to vector<8x128xbf16>
    %34 = vector.shape_cast %31 : vector<8x128xbf16> to vector<1x8x128xbf16>
    tpu.vector_store %arg10[%c0_11, %c16, %c0_12], %34 {strides = array<i32>} : memref<1x64x1024xbf16, #tpu.memory_space<vmem>>, vector<1x8x128xbf16>,
    %cst_13 = arith.constant 1.000000e+00 : f32
    %35 = vector.broadcast %cst_13 : f32 to vector<8x128xf32>
    %36 = arith.subf %26, %35 : vector<8x128xf32>
    %37 = arith.select %28, %36, %26 : vector<8x128xi1>, vector<8x128xf32>
    %38 = arith.addf %37, %0 : vector<8x128xf32>
    %cst_14 = arith.constant 1.000000e+00 : f32
    %39 = vector.broadcast %cst_14 : f32 to vector<8x128xf32>
    %40 = arith.cmpf oge, %38, %39 : vector<8x128xf32>
    %41 = arith.extui %40 : vector<8x128xi1> to vector<8x128xi32>
    %42 = arith.sitofp %41 : vector<8x128xi32> to vector<8x128xf32>
    %43 = arith.truncf %42 : vector<8x128xf32> to vector<8x128xbf16>
    %c0_15 = arith.constant 0 : index
    %c24 = arith.constant 24 : index
    %c0_16 = arith.constant 0 : index
    %44 = vector.load %arg10[%c0_15, %c24, %c0_16] : memref<1x64x1024xbf16, #tpu.memory_space<vmem>>, vector<1x8x128xbf16>
    %45 = vector.shape_cast %44 : vector<1x8x128xbf16> to vector<8x128xbf16>
    %46 = vector.shape_cast %43 : vector<8x128xbf16> to vector<1x8x128xbf16>
    tpu.vector_store %arg10[%c0_15, %c24, %c0_16], %46 {strides = array<i32>} : memref<1x64x1024xbf16, #tpu.memory_space<vmem>>, vector<1x8x128xbf16>,
    %cst_17 = arith.constant 1.000000e+00 : f32
    %47 = vector.broadcast %cst_17 : f32 to vector<8x128xf32>
    %48 = arith.subf %38, %47 : vector<8x128xf32>
    %49 = arith.select %40, %48, %38 : vector<8x128xi1>, vector<8x128xf32>
    %50 = arith.addf %49, %0 : vector<8x128xf32>
    %cst_18 = arith.constant 1.000000e+00 : f32
    %51 = vector.broadcast %cst_18 : f32 to vector<8x128xf32>
    %52 = arith.cmpf oge, %50, %51 : vector<8x128xf32>
    %53 = arith.extui %52 : vector<8x128xi1> to vector<8x128xi32>
    %54 = arith.sitofp %53 : vector<8x128xi32> to vector<8x128xf32>
    %55 = arith.truncf %54 : vector<8x128xf32> to vector<8x128xbf16>
    %c0_19 = arith.constant 0 : index
    %c32 = arith.constant 32 : index
    %c0_20 = arith.constant 0 : index
    %56 = vector.load %arg10[%c0_19, %c32, %c0_20] : memref<1x64x1024xbf16, #tpu.memory_space<vmem>>, vector<1x8x128xbf16>
    %57 = vector.shape_cast %56 : vector<1x8x128xbf16> to vector<8x128xbf16>
    %58 = vector.shape_cast %55 : vector<8x128xbf16> to vector<1x8x128xbf16>
    tpu.vector_store %arg10[%c0_19, %c32, %c0_20], %58 {strides = array<i32>} : memref<1x64x1024xbf16, #tpu.memory_space<vmem>>, vector<1x8x128xbf16>,
    %cst_21 = arith.constant 1.000000e+00 : f32
    %59 = vector.broadcast %cst_21 : f32 to vector<8x128xf32>
    %60 = arith.subf %50, %59 : vector<8x128xf32>
    %61 = arith.select %52, %60, %50 : vector<8x128xi1>, vector<8x128xf32>
    %62 = arith.addf %61, %0 : vector<8x128xf32>
    %cst_22 = arith.constant 1.000000e+00 : f32
    %63 = vector.broadcast %cst_22 : f32 to vector<8x128xf32>
    %64 = arith.cmpf oge, %62, %63 : vector<8x128xf32>
    %65 = arith.extui %64 : vector<8x128xi1> to vector<8x128xi32>
    %66 = arith.sitofp %65 : vector<8x128xi32> to vector<8x128xf32>
    %67 = arith.truncf %66 : vector<8x128xf32> to vector<8x128xbf16>
    %c0_23 = arith.constant 0 : index
    %c40 = arith.constant 40 : index
    %c0_24 = arith.constant 0 : index
    %68 = vector.load %arg10[%c0_23, %c40, %c0_24] : memref<1x64x1024xbf16, #tpu.memory_space<vmem>>, vector<1x8x128xbf16>
    %69 = vector.shape_cast %68 : vector<1x8x128xbf16> to vector<8x128xbf16>
    %70 = vector.shape_cast %67 : vector<8x128xbf16> to vector<1x8x128xbf16>
    tpu.vector_store %arg10[%c0_23, %c40, %c0_24], %70 {strides = array<i32>} : memref<1x64x1024xbf16, #tpu.memory_space<vmem>>, vector<1x8x128xbf16>,
    %cst_25 = arith.constant 1.000000e+00 : f32
    %71 = vector.broadcast %cst_25 : f32 to vector<8x128xf32>
    %72 = arith.subf %62, %71 : vector<8x128xf32>
    %73 = arith.select %64, %72, %62 : vector<8x128xi1>, vector<8x128xf32>
    %74 = arith.addf %73, %0 : vector<8x128xf32>
    %cst_26 = arith.constant 1.000000e+00 : f32
    %75 = vector.broadcast %cst_26 : f32 to vector<8x128xf32>
    %76 = arith.cmpf oge, %74, %75 : vector<8x128xf32>
    %77 = arith.extui %76 : vector<8x128xi1> to vector<8x128xi32>
    %78 = arith.sitofp %77 : vector<8x128xi32> to vector<8x128xf32>
    %79 = arith.truncf %78 : vector<8x128xf32> to vector<8x128xbf16>
    %c0_27 = arith.constant 0 : index
    %c48 = arith.constant 48 : index
    %c0_28 = arith.constant 0 : index
    %80 = vector.load %arg10[%c0_27, %c48, %c0_28] : memref<1x64x1024xbf16, #tpu.memory_space<vmem>>, vector<1x8x128xbf16>
    %81 = vector.shape_cast %80 : vector<1x8x128xbf16> to vector<8x128xbf16>
    %82 = vector.shape_cast %79 : vector<8x128xbf16> to vector<1x8x128xbf16>
    tpu.vector_store %arg10[%c0_27, %c48, %c0_28], %82 {strides = array<i32>} : memref<1x64x1024xbf16, #tpu.memory_space<vmem>>, vector<1x8x128xbf16>,
    %cst_29 = arith.constant 1.000000e+00 : f32
    %83 = vector.broadcast %cst_29 : f32 to vector<8x128xf32>
    %84 = arith.subf %74, %83 : vector<8x128xf32>
    %85 = arith.select %76, %84, %74 : vector<8x128xi1>, vector<8x128xf32>
    %86 = arith.addf %85, %0 : vector<8x128xf32>
    %cst_30 = arith.constant 1.000000e+00 : f32
    %87 = vector.broadcast %cst_30 : f32 to vector<8x128xf32>
    %88 = arith.cmpf oge, %86, %87 : vector<8x128xf32>
    %89 = arith.extui %88 : vector<8x128xi1> to vector<8x128xi32>
    %90 = arith.sitofp %89 : vector<8x128xi32> to vector<8x128xf32>
    %91 = arith.truncf %90 : vector<8x128xf32> to vector<8x128xbf16>
    %c0_31 = arith.constant 0 : index
    %c56 = arith.constant 56 : index
    %c0_32 = arith.constant 0 : index
    %92 = vector.load %arg10[%c0_31, %c56, %c0_32] : memref<1x64x1024xbf16, #tpu.memory_space<vmem>>, vector<1x8x128xbf16>
    %93 = vector.shape_cast %92 : vector<1x8x128xbf16> to vector<8x128xbf16>
    %94 = vector.shape_cast %91 : vector<8x128xbf16> to vector<1x8x128xbf16>
    tpu.vector_store %arg10[%c0_31, %c56, %c0_32], %94 {strides = array<i32>} : memref<1x64x1024xbf16, #tpu.memory_space<vmem>>, vector<1x8x128xbf16>,
    %c0_33 = arith.constant 0 : index
    %c128 = arith.constant 128 : index
    %95 = vector.load %arg1[%c0_33, %c128] : memref<8x1024xf32, #tpu.memory_space<vmem>>, vector<8x128xf32>
    %cst_34 = arith.constant 0.000000e+00 : f32
    %96 = vector.broadcast %cst_34 : f32 to vector<8x128xf32>
    %97 = arith.addf %96, %95 : vector<8x128xf32>
    %cst_35 = arith.constant 1.000000e+00 : f32
    %98 = vector.broadcast %cst_35 : f32 to vector<8x128xf32>
    %99 = arith.cmpf oge, %97, %98 : vector<8x128xf32>
    %100 = arith.extui %99 : vector<8x128xi1> to vector<8x128xi32>
    %101 = arith.sitofp %100 : vector<8x128xi32> to vector<8x128xf32>
    %102 = arith.truncf %101 : vector<8x128xf32> to vector<8x128xbf16>
    %c0_36 = arith.constant 0 : index
    %c0_37 = arith.constant 0 : index
    %c128_38 = arith.constant 128 : index
    %103 = vector.load %arg10[%c0_36, %c0_37, %c128_38] : memref<1x64x1024xbf16, #tpu.memory_space<vmem>>, vector<1x8x128xbf16>
    %104 = vector.shape_cast %103 : vector<1x8x128xbf16> to vector<8x128xbf16>
    %105 = vector.shape_cast %102 : vector<8x128xbf16> to vector<1x8x128xbf16>
    tpu.vector_store %arg10[%c0_36, %c0_37, %c128_38], %105 {strides = array<i32>} : memref<1x64x1024xbf16, #tpu.memory_space<vmem>>, vector<1x8x128xbf16>,
    %cst_39 = arith.constant 1.000000e+00 : f32
    %106 = vector.broadcast %cst_39 : f32 to vector<8x128xf32>
    %107 = arith.subf %97, %106 : vector<8x128xf32>
    %108 = arith.select %99, %107, %97 : vector<8x128xi1>, vector<8x128xf32>
    %109 = arith.addf %108, %95 : vector<8x128xf32>
    %cst_40 = arith.constant 1.000000e+00 : f32
    %110 = vector.broadcast %cst_40 : f32 to vector<8x128xf32>
    %111 = arith.cmpf oge, %109, %110 : vector<8x128xf32>
    %112 = arith.extui %111 : vector<8x128xi1> to vector<8x128xi32>
    %113 = arith.sitofp %112 : vector<8x128xi32> to vector<8x128xf32>
    %114 = arith.truncf %113 : vector<8x128xf32> to vector<8x128xbf16>
    %c0_41 = arith.constant 0 : index
    %c8_42 = arith.constant 8 : index
    %c128_43 = arith.constant 128 : index
    %115 = vector.load %arg10[%c0_41, %c8_42, %c128_43] : memref<1x64x1024xbf16, #tpu.memory_space<vmem>>, vector<1x8x128xbf16>
    %116 = vector.shape_cast %115 : vector<1x8x128xbf16> to vector<8x128xbf16>
    %117 = vector.shape_cast %114 : vector<8x128xbf16> to vector<1x8x128xbf16>
    tpu.vector_store %arg10[%c0_41, %c8_42, %c128_43], %117 {strides = array<i32>} : memref<1x64x1024xbf16, #tpu.memory_space<vmem>>, vector<1x8x128xbf16>,
    %cst_44 = arith.constant 1.000000e+00 : f32
    %118 = vector.broadcast %cst_44 : f32 to vector<8x128xf32>
    %119 = arith.subf %109, %118 : vector<8x128xf32>
    %120 = arith.select %111, %119, %109 : vector<8x128xi1>, vector<8x128xf32>
    %121 = arith.addf %120, %95 : vector<8x128xf32>
    %cst_45 = arith.constant 1.000000e+00 : f32
    %122 = vector.broadcast %cst_45 : f32 to vector<8x128xf32>
    %123 = arith.cmpf oge, %121, %122 : vector<8x128xf32>
    %124 = arith.extui %123 : vector<8x128xi1> to vector<8x128xi32>
    %125 = arith.sitofp %124 : vector<8x128xi32> to vector<8x128xf32>
    %126 = arith.truncf %125 : vector<8x128xf32> to vector<8x128xbf16>
    %c0_46 = arith.constant 0 : index
    %c16_47 = arith.constant 16 : index
    %c128_48 = arith.constant 128 : index
    %127 = vector.load %arg10[%c0_46, %c16_47, %c128_48] : memref<1x64x1024xbf16, #tpu.memory_space<vmem>>, vector<1x8x128xbf16>
    %128 = vector.shape_cast %127 : vector<1x8x128xbf16> to vector<8x128xbf16>
    %129 = vector.shape_cast %126 : vector<8x128xbf16> to vector<1x8x128xbf16>
    tpu.vector_store %arg10[%c0_46, %c16_47, %c128_48], %129 {strides = array<i32>} : memref<1x64x1024xbf16, #tpu.memory_space<vmem>>, vector<1x8x128xbf16>,
    %cst_49 = arith.constant 1.000000e+00 : f32
    %130 = vector.broadcast %cst_49 : f32 to vector<8x128xf32>
    %131 = arith.subf %121, %130 : vector<8x128xf32>
    %132 = arith.select %123, %131, %121 : vector<8x128xi1>, vector<8x128xf32>
    %133 = arith.addf %132, %95 : vector<8x128xf32>
    %cst_50 = arith.constant 1.000000e+00 : f32
    %134 = vector.broadcast %cst_50 : f32 to vector<8x128xf32>
    %135 = arith.cmpf oge, %133, %134 : vector<8x128xf32>
    %136 = arith.extui %135 : vector<8x128xi1> to vector<8x128xi32>
    %137 = arith.sitofp %136 : vector<8x128xi32> to vector<8x128xf32>
    %138 = arith.truncf %137 : vector<8x128xf32> to vector<8x128xbf16>
    %c0_51 = arith.constant 0 : index
    %c24_52 = arith.constant 24 : index
    %c128_53 = arith.constant 128 : index
    %139 = vector.load %arg10[%c0_51, %c24_52, %c128_53] : memref<1x64x1024xbf16, #tpu.memory_space<vmem>>, vector<1x8x128xbf16>
    %140 = vector.shape_cast %139 : vector<1x8x128xbf16> to vector<8x128xbf16>
    %141 = vector.shape_cast %138 : vector<8x128xbf16> to vector<1x8x128xbf16>
    tpu.vector_store %arg10[%c0_51, %c24_52, %c128_53], %141 {strides = array<i32>} : memref<1x64x1024xbf16, #tpu.memory_space<vmem>>, vector<1x8x128xbf16>,
    %cst_54 = arith.constant 1.000000e+00 : f32
    %142 = vector.broadcast %cst_54 : f32 to vector<8x128xf32>
    %143 = arith.subf %133, %142 : vector<8x128xf32>
    %144 = arith.select %135, %143, %133 : vector<8x128xi1>, vector<8x128xf32>
    %145 = arith.addf %144, %95 : vector<8x128xf32>
    %cst_55 = arith.constant 1.000000e+00 : f32
    %146 = vector.broadcast %cst_55 : f32 to vector<8x128xf32>
    %147 = arith.cmpf oge, %145, %146 : vector<8x128xf32>
    %148 = arith.extui %147 : vector<8x128xi1> to vector<8x128xi32>
    %149 = arith.sitofp %148 : vector<8x128xi32> to vector<8x128xf32>
    %150 = arith.truncf %149 : vector<8x128xf32> to vector<8x128xbf16>
    %c0_56 = arith.constant 0 : index
    %c32_57 = arith.constant 32 : index
    %c128_58 = arith.constant 128 : index
    %151 = vector.load %arg10[%c0_56, %c32_57, %c128_58] : memref<1x64x1024xbf16, #tpu.memory_space<vmem>>, vector<1x8x128xbf16>
    %152 = vector.shape_cast %151 : vector<1x8x128xbf16> to vector<8x128xbf16>
    %153 = vector.shape_cast %150 : vector<8x128xbf16> to vector<1x8x128xbf16>
    tpu.vector_store %arg10[%c0_56, %c32_57, %c128_58], %153 {strides = array<i32>} : memref<1x64x1024xbf16, #tpu.memory_space<vmem>>, vector<1x8x128xbf16>,
    %cst_59 = arith.constant 1.000000e+00 : f32
    %154 = vector.broadcast %cst_59 : f32 to vector<8x128xf32>
    %155 = arith.subf %145, %154 : vector<8x128xf32>
    %156 = arith.select %147, %155, %145 : vector<8x128xi1>, vector<8x128xf32>
    %157 = arith.addf %156, %95 : vector<8x128xf32>
    %cst_60 = arith.constant 1.000000e+00 : f32
    %158 = vector.broadcast %cst_60 : f32 to vector<8x128xf32>
    %159 = arith.cmpf oge, %157, %158 : vector<8x128xf32>
    %160 = arith.extui %159 : vector<8x128xi1> to vector<8x128xi32>
    %161 = arith.sitofp %160 : vector<8x128xi32> to vector<8x128xf32>
    %162 = arith.truncf %161 : vector<8x128xf32> to vector<8x128xbf16>
    %c0_61 = arith.constant 0 : index
    %c40_62 = arith.constant 40 : index
    %c128_63 = arith.constant 128 : index
    %163 = vector.load %arg10[%c0_61, %c40_62, %c128_63] : memref<1x64x1024xbf16, #tpu.memory_space<vmem>>, vector<1x8x128xbf16>
    %164 = vector.shape_cast %163 : vector<1x8x128xbf16> to vector<8x128xbf16>
    %165 = vector.shape_cast %162 : vector<8x128xbf16> to vector<1x8x128xbf16>
    tpu.vector_store %arg10[%c0_61, %c40_62, %c128_63], %165 {strides = array<i32>} : memref<1x64x1024xbf16, #tpu.memory_space<vmem>>, vector<1x8x128xbf16>,
    %cst_64 = arith.constant 1.000000e+00 : f32
    %166 = vector.broadcast %cst_64 : f32 to vector<8x128xf32>
    %167 = arith.subf %157, %166 : vector<8x128xf32>
    %168 = arith.select %159, %167, %157 : vector<8x128xi1>, vector<8x128xf32>
    %169 = arith.addf %168, %95 : vector<8x128xf32>
    %cst_65 = arith.constant 1.000000e+00 : f32
    %170 = vector.broadcast %cst_65 : f32 to vector<8x128xf32>
    %171 = arith.cmpf oge, %169, %170 : vector<8x128xf32>
    %172 = arith.extui %171 : vector<8x128xi1> to vector<8x128xi32>
    %173 = arith.sitofp %172 : vector<8x128xi32> to vector<8x128xf32>
    %174 = arith.truncf %173 : vector<8x128xf32> to vector<8x128xbf16>
    %c0_66 = arith.constant 0 : index
    %c48_67 = arith.constant 48 : index
    %c128_68 = arith.constant 128 : index
    %175 = vector.load %arg10[%c0_66, %c48_67, %c128_68] : memref<1x64x1024xbf16, #tpu.memory_space<vmem>>, vector<1x8x128xbf16>
    %176 = vector.shape_cast %175 : vector<1x8x128xbf16> to vector<8x128xbf16>
    %177 = vector.shape_cast %174 : vector<8x128xbf16> to vector<1x8x128xbf16>
    tpu.vector_store %arg10[%c0_66, %c48_67, %c128_68], %177 {strides = array<i32>} : memref<1x64x1024xbf16, #tpu.memory_space<vmem>>, vector<1x8x128xbf16>,
    %cst_69 = arith.constant 1.000000e+00 : f32
    %178 = vector.broadcast %cst_69 : f32 to vector<8x128xf32>
    %179 = arith.subf %169, %178 : vector<8x128xf32>
    %180 = arith.select %171, %179, %169 : vector<8x128xi1>, vector<8x128xf32>
    %181 = arith.addf %180, %95 : vector<8x128xf32>
    %cst_70 = arith.constant 1.000000e+00 : f32
    %182 = vector.broadcast %cst_70 : f32 to vector<8x128xf32>
    %183 = arith.cmpf oge, %181, %182 : vector<8x128xf32>
    %184 = arith.extui %183 : vector<8x128xi1> to vector<8x128xi32>
    %185 = arith.sitofp %184 : vector<8x128xi32> to vector<8x128xf32>
    %186 = arith.truncf %185 : vector<8x128xf32> to vector<8x128xbf16>
    %c0_71 = arith.constant 0 : index
    %c56_72 = arith.constant 56 : index
    %c128_73 = arith.constant 128 : index
    %187 = vector.load %arg10[%c0_71, %c56_72, %c128_73] : memref<1x64x1024xbf16, #tpu.memory_space<vmem>>, vector<1x8x128xbf16>
    %188 = vector.shape_cast %187 : vector<1x8x128xbf16> to vector<8x128xbf16>
    %189 = vector.shape_cast %186 : vector<8x128xbf16> to vector<1x8x128xbf16>
    tpu.vector_store %arg10[%c0_71, %c56_72, %c128_73], %189 {strides = array<i32>} : memref<1x64x1024xbf16, #tpu.memory_space<vmem>>, vector<1x8x128xbf16>,
    %c0_74 = arith.constant 0 : index
    %c256 = arith.constant 256 : index
    %190 = vector.load %arg1[%c0_74, %c256] : memref<8x1024xf32, #tpu.memory_space<vmem>>, vector<8x128xf32>
    %cst_75 = arith.constant 0.000000e+00 : f32
    %191 = vector.broadcast %cst_75 : f32 to vector<8x128xf32>
    %192 = arith.addf %191, %190 : vector<8x128xf32>
    %cst_76 = arith.constant 1.000000e+00 : f32
    %193 = vector.broadcast %cst_76 : f32 to vector<8x128xf32>
    %194 = arith.cmpf oge, %192, %193 : vector<8x128xf32>
    %195 = arith.extui %194 : vector<8x128xi1> to vector<8x128xi32>
    %196 = arith.sitofp %195 : vector<8x128xi32> to vector<8x128xf32>
    %197 = arith.truncf %196 : vector<8x128xf32> to vector<8x128xbf16>
    %c0_77 = arith.constant 0 : index
    %c0_78 = arith.constant 0 : index
    %c256_79 = arith.constant 256 : index
    %198 = vector.load %arg10[%c0_77, %c0_78, %c256_79] : memref<1x64x1024xbf16, #tpu.memory_space<vmem>>, vector<1x8x128xbf16>
    %199 = vector.shape_cast %198 : vector<1x8x128xbf16> to vector<8x128xbf16>
    %200 = vector.shape_cast %197 : vector<8x128xbf16> to vector<1x8x128xbf16>
    tpu.vector_store %arg10[%c0_77, %c0_78, %c256_79], %200 {strides = array<i32>} : memref<1x64x1024xbf16, #tpu.memory_space<vmem>>, vector<1x8x128xbf16>,
    %cst_80 = arith.constant 1.000000e+00 : f32
    %201 = vector.broadcast %cst_80 : f32 to vector<8x128xf32>
    %202 = arith.subf %192, %201 : vector<8x128xf32>
    %203 = arith.select %194, %202, %192 : vector<8x128xi1>, vector<8x128xf32>
    %204 = arith.addf %203, %190 : vector<8x128xf32>
    %cst_81 = arith.constant 1.000000e+00 : f32
    %205 = vector.broadcast %cst_81 : f32 to vector<8x128xf32>
    %206 = arith.cmpf oge, %204, %205 : vector<8x128xf32>
    %207 = arith.extui %206 : vector<8x128xi1> to vector<8x128xi32>
    %208 = arith.sitofp %207 : vector<8x128xi32> to vector<8x128xf32>
    %209 = arith.truncf %208 : vector<8x128xf32> to vector<8x128xbf16>
    %c0_82 = arith.constant 0 : index
    %c8_83 = arith.constant 8 : index
    %c256_84 = arith.constant 256 : index
    %210 = vector.load %arg10[%c0_82, %c8_83, %c256_84] : memref<1x64x1024xbf16, #tpu.memory_space<vmem>>, vector<1x8x128xbf16>
    %211 = vector.shape_cast %210 : vector<1x8x128xbf16> to vector<8x128xbf16>
    %212 = vector.shape_cast %209 : vector<8x128xbf16> to vector<1x8x128xbf16>
    tpu.vector_store %arg10[%c0_82, %c8_83, %c256_84], %212 {strides = array<i32>} : memref<1x64x1024xbf16, #tpu.memory_space<vmem>>, vector<1x8x128xbf16>,
    %cst_85 = arith.constant 1.000000e+00 : f32
    %213 = vector.broadcast %cst_85 : f32 to vector<8x128xf32>
    %214 = arith.subf %204, %213 : vector<8x128xf32>
    %215 = arith.select %206, %214, %204 : vector<8x128xi1>, vector<8x128xf32>
    %216 = arith.addf %215, %190 : vector<8x128xf32>
    %cst_86 = arith.constant 1.000000e+00 : f32
    %217 = vector.broadcast %cst_86 : f32 to vector<8x128xf32>
    %218 = arith.cmpf oge, %216, %217 : vector<8x128xf32>
    %219 = arith.extui %218 : vector<8x128xi1> to vector<8x128xi32>
    %220 = arith.sitofp %219 : vector<8x128xi32> to vector<8x128xf32>
    %221 = arith.truncf %220 : vector<8x128xf32> to vector<8x128xbf16>
    %c0_87 = arith.constant 0 : index
    %c16_88 = arith.constant 16 : index
    %c256_89 = arith.constant 256 : index
    %222 = vector.load %arg10[%c0_87, %c16_88, %c256_89] : memref<1x64x1024xbf16, #tpu.memory_space<vmem>>, vector<1x8x128xbf16>
    %223 = vector.shape_cast %222 : vector<1x8x128xbf16> to vector<8x128xbf16>
    %224 = vector.shape_cast %221 : vector<8x128xbf16> to vector<1x8x128xbf16>
    tpu.vector_store %arg10[%c0_87, %c16_88, %c256_89], %224 {strides = array<i32>} : memref<1x64x1024xbf16, #tpu.memory_space<vmem>>, vector<1x8x128xbf16>,
    %cst_90 = arith.constant 1.000000e+00 : f32
    %225 = vector.broadcast %cst_90 : f32 to vector<8x128xf32>
    %226 = arith.subf %216, %225 : vector<8x128xf32>
    %227 = arith.select %218, %226, %216 : vector<8x128xi1>, vector<8x128xf32>
    %228 = arith.addf %227, %190 : vector<8x128xf32>
    %cst_91 = arith.constant 1.000000e+00 : f32
    %229 = vector.broadcast %cst_91 : f32 to vector<8x128xf32>
    %230 = arith.cmpf oge, %228, %229 : vector<8x128xf32>
    %231 = arith.extui %230 : vector<8x128xi1> to vector<8x128xi32>
    %232 = arith.sitofp %231 : vector<8x128xi32> to vector<8x128xf32>
    %233 = arith.truncf %232 : vector<8x128xf32> to vector<8x128xbf16>
    %c0_92 = arith.constant 0 : index
    %c24_93 = arith.constant 24 : index
    %c256_94 = arith.constant 256 : index
    %234 = vector.load %arg10[%c0_92, %c24_93, %c256_94] : memref<1x64x1024xbf16, #tpu.memory_space<vmem>>, vector<1x8x128xbf16>
    %235 = vector.shape_cast %234 : vector<1x8x128xbf16> to vector<8x128xbf16>
    %236 = vector.shape_cast %233 : vector<8x128xbf16> to vector<1x8x128xbf16>
    tpu.vector_store %arg10[%c0_92, %c24_93, %c256_94], %236 {strides = array<i32>} : memref<1x64x1024xbf16, #tpu.memory_space<vmem>>, vector<1x8x128xbf16>,
    %cst_95 = arith.constant 1.000000e+00 : f32
    %237 = vector.broadcast %cst_95 : f32 to vector<8x128xf32>
    %238 = arith.subf %228, %237 : vector<8x128xf32>
    %239 = arith.select %230, %238, %228 : vector<8x128xi1>, vector<8x128xf32>
    %240 = arith.addf %239, %190 : vector<8x128xf32>
    %cst_96 = arith.constant 1.000000e+00 : f32
    %241 = vector.broadcast %cst_96 : f32 to vector<8x128xf32>
    %242 = arith.cmpf oge, %240, %241 : vector<8x128xf32>
    %243 = arith.extui %242 : vector<8x128xi1> to vector<8x128xi32>
    %244 = arith.sitofp %243 : vector<8x128xi32> to vector<8x128xf32>
    %245 = arith.truncf %244 : vector<8x128xf32> to vector<8x128xbf16>
    %c0_97 = arith.constant 0 : index
    %c32_98 = arith.constant 32 : index
    %c256_99 = arith.constant 256 : index
    %246 = vector.load %arg10[%c0_97, %c32_98, %c256_99] : memref<1x64x1024xbf16, #tpu.memory_space<vmem>>, vector<1x8x128xbf16>
    %247 = vector.shape_cast %246 : vector<1x8x128xbf16> to vector<8x128xbf16>
    %248 = vector.shape_cast %245 : vector<8x128xbf16> to vector<1x8x128xbf16>
    tpu.vector_store %arg10[%c0_97, %c32_98, %c256_99], %248 {strides = array<i32>} : memref<1x64x1024xbf16, #tpu.memory_space<vmem>>, vector<1x8x128xbf16>,
    %cst_100 = arith.constant 1.000000e+00 : f32
    %249 = vector.broadcast %cst_100 : f32 to vector<8x128xf32>
    %250 = arith.subf %240, %249 : vector<8x128xf32>
    %251 = arith.select %242, %250, %240 : vector<8x128xi1>, vector<8x128xf32>
    %252 = arith.addf %251, %190 : vector<8x128xf32>
    %cst_101 = arith.constant 1.000000e+00 : f32
    %253 = vector.broadcast %cst_101 : f32 to vector<8x128xf32>
    %254 = arith.cmpf oge, %252, %253 : vector<8x128xf32>
    %255 = arith.extui %254 : vector<8x128xi1> to vector<8x128xi32>
    %256 = arith.sitofp %255 : vector<8x128xi32> to vector<8x128xf32>
    %257 = arith.truncf %256 : vector<8x128xf32> to vector<8x128xbf16>
    %c0_102 = arith.constant 0 : index
    %c40_103 = arith.constant 40 : index
    %c256_104 = arith.constant 256 : index
    %258 = vector.load %arg10[%c0_102, %c40_103, %c256_104] : memref<1x64x1024xbf16, #tpu.memory_space<vmem>>, vector<1x8x128xbf16>
    %259 = vector.shape_cast %258 : vector<1x8x128xbf16> to vector<8x128xbf16>
    %260 = vector.shape_cast %257 : vector<8x128xbf16> to vector<1x8x128xbf16>
    tpu.vector_store %arg10[%c0_102, %c40_103, %c256_104], %260 {strides = array<i32>} : memref<1x64x1024xbf16, #tpu.memory_space<vmem>>, vector<1x8x128xbf16>,
    %cst_105 = arith.constant 1.000000e+00 : f32
    %261 = vector.broadcast %cst_105 : f32 to vector<8x128xf32>
    %262 = arith.subf %252, %261 : vector<8x128xf32>
    %263 = arith.select %254, %262, %252 : vector<8x128xi1>, vector<8x128xf32>
    %264 = arith.addf %263, %190 : vector<8x128xf32>
    %cst_106 = arith.constant 1.000000e+00 : f32
    %265 = vector.broadcast %cst_106 : f32 to vector<8x128xf32>
    %266 = arith.cmpf oge, %264, %265 : vector<8x128xf32>
    %267 = arith.extui %266 : vector<8x128xi1> to vector<8x128xi32>
    %268 = arith.sitofp %267 : vector<8x128xi32> to vector<8x128xf32>
    %269 = arith.truncf %268 : vector<8x128xf32> to vector<8x128xbf16>
    %c0_107 = arith.constant 0 : index
    %c48_108 = arith.constant 48 : index
    %c256_109 = arith.constant 256 : index
    %270 = vector.load %arg10[%c0_107, %c48_108, %c256_109] : memref<1x64x1024xbf16, #tpu.memory_space<vmem>>, vector<1x8x128xbf16>
    %271 = vector.shape_cast %270 : vector<1x8x128xbf16> to vector<8x128xbf16>
    %272 = vector.shape_cast %269 : vector<8x128xbf16> to vector<1x8x128xbf16>
    tpu.vector_store %arg10[%c0_107, %c48_108, %c256_109], %272 {strides = array<i32>} : memref<1x64x1024xbf16, #tpu.memory_space<vmem>>, vector<1x8x128xbf16>,
    %cst_110 = arith.constant 1.000000e+00 : f32
    %273 = vector.broadcast %cst_110 : f32 to vector<8x128xf32>
    %274 = arith.subf %264, %273 : vector<8x128xf32>
    %275 = arith.select %266, %274, %264 : vector<8x128xi1>, vector<8x128xf32>
    %276 = arith.addf %275, %190 : vector<8x128xf32>
    %cst_111 = arith.constant 1.000000e+00 : f32
    %277 = vector.broadcast %cst_111 : f32 to vector<8x128xf32>
    %278 = arith.cmpf oge, %276, %277 : vector<8x128xf32>
    %279 = arith.extui %278 : vector<8x128xi1> to vector<8x128xi32>
    %280 = arith.sitofp %279 : vector<8x128xi32> to vector<8x128xf32>
    %281 = arith.truncf %280 : vector<8x128xf32> to vector<8x128xbf16>
    %c0_112 = arith.constant 0 : index
    %c56_113 = arith.constant 56 : index
    %c256_114 = arith.constant 256 : index
    %282 = vector.load %arg10[%c0_112, %c56_113, %c256_114] : memref<1x64x1024xbf16, #tpu.memory_space<vmem>>, vector<1x8x128xbf16>
    %283 = vector.shape_cast %282 : vector<1x8x128xbf16> to vector<8x128xbf16>
    %284 = vector.shape_cast %281 : vector<8x128xbf16> to vector<1x8x128xbf16>
    tpu.vector_store %arg10[%c0_112, %c56_113, %c256_114], %284 {strides = array<i32>} : memref<1x64x1024xbf16, #tpu.memory_space<vmem>>, vector<1x8x128xbf16>,
    %c0_115 = arith.constant 0 : index
    %c384 = arith.constant 384 : index
    %285 = vector.load %arg1[%c0_115, %c384] : memref<8x1024xf32, #tpu.memory_space<vmem>>, vector<8x128xf32>
    %cst_116 = arith.constant 0.000000e+00 : f32
    %286 = vector.broadcast %cst_116 : f32 to vector<8x128xf32>
    %287 = arith.addf %286, %285 : vector<8x128xf32>
    %cst_117 = arith.constant 1.000000e+00 : f32
    %288 = vector.broadcast %cst_117 : f32 to vector<8x128xf32>
    %289 = arith.cmpf oge, %287, %288 : vector<8x128xf32>
    %290 = arith.extui %289 : vector<8x128xi1> to vector<8x128xi32>
    %291 = arith.sitofp %290 : vector<8x128xi32> to vector<8x128xf32>
    %292 = arith.truncf %291 : vector<8x128xf32> to vector<8x128xbf16>
    %c0_118 = arith.constant 0 : index
    %c0_119 = arith.constant 0 : index
    %c384_120 = arith.constant 384 : index
    %293 = vector.load %arg10[%c0_118, %c0_119, %c384_120] : memref<1x64x1024xbf16, #tpu.memory_space<vmem>>, vector<1x8x128xbf16>
    %294 = vector.shape_cast %293 : vector<1x8x128xbf16> to vector<8x128xbf16>
    %295 = vector.shape_cast %292 : vector<8x128xbf16> to vector<1x8x128xbf16>
    tpu.vector_store %arg10[%c0_118, %c0_119, %c384_120], %295 {strides = array<i32>} : memref<1x64x1024xbf16, #tpu.memory_space<vmem>>, vector<1x8x128xbf16>,
    %cst_121 = arith.constant 1.000000e+00 : f32
    %296 = vector.broadcast %cst_121 : f32 to vector<8x128xf32>
    %297 = arith.subf %287, %296 : vector<8x128xf32>
    %298 = arith.select %289, %297, %287 : vector<8x128xi1>, vector<8x128xf32>
    %299 = arith.addf %298, %285 : vector<8x128xf32>
    %cst_122 = arith.constant 1.000000e+00 : f32
    %300 = vector.broadcast %cst_122 : f32 to vector<8x128xf32>
    %301 = arith.cmpf oge, %299, %300 : vector<8x128xf32>
    %302 = arith.extui %301 : vector<8x128xi1> to vector<8x128xi32>
    %303 = arith.sitofp %302 : vector<8x128xi32> to vector<8x128xf32>
    %304 = arith.truncf %303 : vector<8x128xf32> to vector<8x128xbf16>
    %c0_123 = arith.constant 0 : index
    %c8_124 = arith.constant 8 : index
    %c384_125 = arith.constant 384 : index
    %305 = vector.load %arg10[%c0_123, %c8_124, %c384_125] : memref<1x64x1024xbf16, #tpu.memory_space<vmem>>, vector<1x8x128xbf16>
    %306 = vector.shape_cast %305 : vector<1x8x128xbf16> to vector<8x128xbf16>
    %307 = vector.shape_cast %304 : vector<8x128xbf16> to vector<1x8x128xbf16>
    tpu.vector_store %arg10[%c0_123, %c8_124, %c384_125], %307 {strides = array<i32>} : memref<1x64x1024xbf16, #tpu.memory_space<vmem>>, vector<1x8x128xbf16>,
    %cst_126 = arith.constant 1.000000e+00 : f32
    %308 = vector.broadcast %cst_126 : f32 to vector<8x128xf32>
    %309 = arith.subf %299, %308 : vector<8x128xf32>
    %310 = arith.select %301, %309, %299 : vector<8x128xi1>, vector<8x128xf32>
    %311 = arith.addf %310, %285 : vector<8x128xf32>
    %cst_127 = arith.constant 1.000000e+00 : f32
    %312 = vector.broadcast %cst_127 : f32 to vector<8x128xf32>
    %313 = arith.cmpf oge, %311, %312 : vector<8x128xf32>
    %314 = arith.extui %313 : vector<8x128xi1> to vector<8x128xi32>
    %315 = arith.sitofp %314 : vector<8x128xi32> to vector<8x128xf32>
    %316 = arith.truncf %315 : vector<8x128xf32> to vector<8x128xbf16>
    %c0_128 = arith.constant 0 : index
    %c16_129 = arith.constant 16 : index
    %c384_130 = arith.constant 384 : index
    %317 = vector.load %arg10[%c0_128, %c16_129, %c384_130] : memref<1x64x1024xbf16, #tpu.memory_space<vmem>>, vector<1x8x128xbf16>
    %318 = vector.shape_cast %317 : vector<1x8x128xbf16> to vector<8x128xbf16>
    %319 = vector.shape_cast %316 : vector<8x128xbf16> to vector<1x8x128xbf16>
    tpu.vector_store %arg10[%c0_128, %c16_129, %c384_130], %319 {strides = array<i32>} : memref<1x64x1024xbf16, #tpu.memory_space<vmem>>, vector<1x8x128xbf16>,
    %cst_131 = arith.constant 1.000000e+00 : f32
    %320 = vector.broadcast %cst_131 : f32 to vector<8x128xf32>
    %321 = arith.subf %311, %320 : vector<8x128xf32>
    %322 = arith.select %313, %321, %311 : vector<8x128xi1>, vector<8x128xf32>
    %323 = arith.addf %322, %285 : vector<8x128xf32>
    %cst_132 = arith.constant 1.000000e+00 : f32
    %324 = vector.broadcast %cst_132 : f32 to vector<8x128xf32>
    %325 = arith.cmpf oge, %323, %324 : vector<8x128xf32>
    %326 = arith.extui %325 : vector<8x128xi1> to vector<8x128xi32>
    %327 = arith.sitofp %326 : vector<8x128xi32> to vector<8x128xf32>
    %328 = arith.truncf %327 : vector<8x128xf32> to vector<8x128xbf16>
    %c0_133 = arith.constant 0 : index
    %c24_134 = arith.constant 24 : index
    %c384_135 = arith.constant 384 : index
    %329 = vector.load %arg10[%c0_133, %c24_134, %c384_135] : memref<1x64x1024xbf16, #tpu.memory_space<vmem>>, vector<1x8x128xbf16>
    %330 = vector.shape_cast %329 : vector<1x8x128xbf16> to vector<8x128xbf16>
    %331 = vector.shape_cast %328 : vector<8x128xbf16> to vector<1x8x128xbf16>
    tpu.vector_store %arg10[%c0_133, %c24_134, %c384_135], %331 {strides = array<i32>} : memref<1x64x1024xbf16, #tpu.memory_space<vmem>>, vector<1x8x128xbf16>,
    %cst_136 = arith.constant 1.000000e+00 : f32
    %332 = vector.broadcast %cst_136 : f32 to vector<8x128xf32>
    %333 = arith.subf %323, %332 : vector<8x128xf32>
    %334 = arith.select %325, %333, %323 : vector<8x128xi1>, vector<8x128xf32>
    %335 = arith.addf %334, %285 : vector<8x128xf32>
    %cst_137 = arith.constant 1.000000e+00 : f32
    %336 = vector.broadcast %cst_137 : f32 to vector<8x128xf32>
    %337 = arith.cmpf oge, %335, %336 : vector<8x128xf32>
    %338 = arith.extui %337 : vector<8x128xi1> to vector<8x128xi32>
    %339 = arith.sitofp %338 : vector<8x128xi32> to vector<8x128xf32>
    %340 = arith.truncf %339 : vector<8x128xf32> to vector<8x128xbf16>
    %c0_138 = arith.constant 0 : index
    %c32_139 = arith.constant 32 : index
    %c384_140 = arith.constant 384 : index
    %341 = vector.load %arg10[%c0_138, %c32_139, %c384_140] : memref<1x64x1024xbf16, #tpu.memory_space<vmem>>, vector<1x8x128xbf16>
    %342 = vector.shape_cast %341 : vector<1x8x128xbf16> to vector<8x128xbf16>
    %343 = vector.shape_cast %340 : vector<8x128xbf16> to vector<1x8x128xbf16>
    tpu.vector_store %arg10[%c0_138, %c32_139, %c384_140], %343 {strides = array<i32>} : memref<1x64x1024xbf16, #tpu.memory_space<vmem>>, vector<1x8x128xbf16>,
    %cst_141 = arith.constant 1.000000e+00 : f32
    %344 = vector.broadcast %cst_141 : f32 to vector<8x128xf32>
    %345 = arith.subf %335, %344 : vector<8x128xf32>
    %346 = arith.select %337, %345, %335 : vector<8x128xi1>, vector<8x128xf32>
    %347 = arith.addf %346, %285 : vector<8x128xf32>
    %cst_142 = arith.constant 1.000000e+00 : f32
    %348 = vector.broadcast %cst_142 : f32 to vector<8x128xf32>
    %349 = arith.cmpf oge, %347, %348 : vector<8x128xf32>
    %350 = arith.extui %349 : vector<8x128xi1> to vector<8x128xi32>
    %351 = arith.sitofp %350 : vector<8x128xi32> to vector<8x128xf32>
    %352 = arith.truncf %351 : vector<8x128xf32> to vector<8x128xbf16>
    %c0_143 = arith.constant 0 : index
    %c40_144 = arith.constant 40 : index
    %c384_145 = arith.constant 384 : index
    %353 = vector.load %arg10[%c0_143, %c40_144, %c384_145] : memref<1x64x1024xbf16, #tpu.memory_space<vmem>>, vector<1x8x128xbf16>
    %354 = vector.shape_cast %353 : vector<1x8x128xbf16> to vector<8x128xbf16>
    %355 = vector.shape_cast %352 : vector<8x128xbf16> to vector<1x8x128xbf16>
    tpu.vector_store %arg10[%c0_143, %c40_144, %c384_145], %355 {strides = array<i32>} : memref<1x64x1024xbf16, #tpu.memory_space<vmem>>, vector<1x8x128xbf16>,
    %cst_146 = arith.constant 1.000000e+00 : f32
    %356 = vector.broadcast %cst_146 : f32 to vector<8x128xf32>
    %357 = arith.subf %347, %356 : vector<8x128xf32>
    %358 = arith.select %349, %357, %347 : vector<8x128xi1>, vector<8x128xf32>
    %359 = arith.addf %358, %285 : vector<8x128xf32>
    %cst_147 = arith.constant 1.000000e+00 : f32
    %360 = vector.broadcast %cst_147 : f32 to vector<8x128xf32>
    %361 = arith.cmpf oge, %359, %360 : vector<8x128xf32>
    %362 = arith.extui %361 : vector<8x128xi1> to vector<8x128xi32>
    %363 = arith.sitofp %362 : vector<8x128xi32> to vector<8x128xf32>
    %364 = arith.truncf %363 : vector<8x128xf32> to vector<8x128xbf16>
    %c0_148 = arith.constant 0 : index
    %c48_149 = arith.constant 48 : index
    %c384_150 = arith.constant 384 : index
    %365 = vector.load %arg10[%c0_148, %c48_149, %c384_150] : memref<1x64x1024xbf16, #tpu.memory_space<vmem>>, vector<1x8x128xbf16>
    %366 = vector.shape_cast %365 : vector<1x8x128xbf16> to vector<8x128xbf16>
    %367 = vector.shape_cast %364 : vector<8x128xbf16> to vector<1x8x128xbf16>
    tpu.vector_store %arg10[%c0_148, %c48_149, %c384_150], %367 {strides = array<i32>} : memref<1x64x1024xbf16, #tpu.memory_space<vmem>>, vector<1x8x128xbf16>,
    %cst_151 = arith.constant 1.000000e+00 : f32
    %368 = vector.broadcast %cst_151 : f32 to vector<8x128xf32>
    %369 = arith.subf %359, %368 : vector<8x128xf32>
    %370 = arith.select %361, %369, %359 : vector<8x128xi1>, vector<8x128xf32>
    %371 = arith.addf %370, %285 : vector<8x128xf32>
    %cst_152 = arith.constant 1.000000e+00 : f32
    %372 = vector.broadcast %cst_152 : f32 to vector<8x128xf32>
    %373 = arith.cmpf oge, %371, %372 : vector<8x128xf32>
    %374 = arith.extui %373 : vector<8x128xi1> to vector<8x128xi32>
    %375 = arith.sitofp %374 : vector<8x128xi32> to vector<8x128xf32>
    %376 = arith.truncf %375 : vector<8x128xf32> to vector<8x128xbf16>
    %c0_153 = arith.constant 0 : index
    %c56_154 = arith.constant 56 : index
    %c384_155 = arith.constant 384 : index
    %377 = vector.load %arg10[%c0_153, %c56_154, %c384_155] : memref<1x64x1024xbf16, #tpu.memory_space<vmem>>, vector<1x8x128xbf16>
    %378 = vector.shape_cast %377 : vector<1x8x128xbf16> to vector<8x128xbf16>
    %379 = vector.shape_cast %376 : vector<8x128xbf16> to vector<1x8x128xbf16>
    tpu.vector_store %arg10[%c0_153, %c56_154, %c384_155], %379 {strides = array<i32>} : memref<1x64x1024xbf16, #tpu.memory_space<vmem>>, vector<1x8x128xbf16>,
    %c0_156 = arith.constant 0 : index
    %c512 = arith.constant 512 : index
    %380 = vector.load %arg1[%c0_156, %c512] : memref<8x1024xf32, #tpu.memory_space<vmem>>, vector<8x128xf32>
    %cst_157 = arith.constant 0.000000e+00 : f32
    %381 = vector.broadcast %cst_157 : f32 to vector<8x128xf32>
    %382 = arith.addf %381, %380 : vector<8x128xf32>
    %cst_158 = arith.constant 1.000000e+00 : f32
    %383 = vector.broadcast %cst_158 : f32 to vector<8x128xf32>
    %384 = arith.cmpf oge, %382, %383 : vector<8x128xf32>
    %385 = arith.extui %384 : vector<8x128xi1> to vector<8x128xi32>
    %386 = arith.sitofp %385 : vector<8x128xi32> to vector<8x128xf32>
    %387 = arith.truncf %386 : vector<8x128xf32> to vector<8x128xbf16>
    %c0_159 = arith.constant 0 : index
    %c0_160 = arith.constant 0 : index
    %c512_161 = arith.constant 512 : index
    %388 = vector.load %arg10[%c0_159, %c0_160, %c512_161] : memref<1x64x1024xbf16, #tpu.memory_space<vmem>>, vector<1x8x128xbf16>
    %389 = vector.shape_cast %388 : vector<1x8x128xbf16> to vector<8x128xbf16>
    %390 = vector.shape_cast %387 : vector<8x128xbf16> to vector<1x8x128xbf16>
    tpu.vector_store %arg10[%c0_159, %c0_160, %c512_161], %390 {strides = array<i32>} : memref<1x64x1024xbf16, #tpu.memory_space<vmem>>, vector<1x8x128xbf16>,
    %cst_162 = arith.constant 1.000000e+00 : f32
    %391 = vector.broadcast %cst_162 : f32 to vector<8x128xf32>
    %392 = arith.subf %382, %391 : vector<8x128xf32>
    %393 = arith.select %384, %392, %382 : vector<8x128xi1>, vector<8x128xf32>
    %394 = arith.addf %393, %380 : vector<8x128xf32>
    %cst_163 = arith.constant 1.000000e+00 : f32
    %395 = vector.broadcast %cst_163 : f32 to vector<8x128xf32>
    %396 = arith.cmpf oge, %394, %395 : vector<8x128xf32>
    %397 = arith.extui %396 : vector<8x128xi1> to vector<8x128xi32>
    %398 = arith.sitofp %397 : vector<8x128xi32> to vector<8x128xf32>
    %399 = arith.truncf %398 : vector<8x128xf32> to vector<8x128xbf16>
    %c0_164 = arith.constant 0 : index
    %c8_165 = arith.constant 8 : index
    %c512_166 = arith.constant 512 : index
    %400 = vector.load %arg10[%c0_164, %c8_165, %c512_166] : memref<1x64x1024xbf16, #tpu.memory_space<vmem>>, vector<1x8x128xbf16>
    %401 = vector.shape_cast %400 : vector<1x8x128xbf16> to vector<8x128xbf16>
    %402 = vector.shape_cast %399 : vector<8x128xbf16> to vector<1x8x128xbf16>
    tpu.vector_store %arg10[%c0_164, %c8_165, %c512_166], %402 {strides = array<i32>} : memref<1x64x1024xbf16, #tpu.memory_space<vmem>>, vector<1x8x128xbf16>,
    %cst_167 = arith.constant 1.000000e+00 : f32
    %403 = vector.broadcast %cst_167 : f32 to vector<8x128xf32>
    %404 = arith.subf %394, %403 : vector<8x128xf32>
    %405 = arith.select %396, %404, %394 : vector<8x128xi1>, vector<8x128xf32>
    %406 = arith.addf %405, %380 : vector<8x128xf32>
    %cst_168 = arith.constant 1.000000e+00 : f32
    %407 = vector.broadcast %cst_168 : f32 to vector<8x128xf32>
    %408 = arith.cmpf oge, %406, %407 : vector<8x128xf32>
    %409 = arith.extui %408 : vector<8x128xi1> to vector<8x128xi32>
    %410 = arith.sitofp %409 : vector<8x128xi32> to vector<8x128xf32>
    %411 = arith.truncf %410 : vector<8x128xf32> to vector<8x128xbf16>
    %c0_169 = arith.constant 0 : index
    %c16_170 = arith.constant 16 : index
    %c512_171 = arith.constant 512 : index
    %412 = vector.load %arg10[%c0_169, %c16_170, %c512_171] : memref<1x64x1024xbf16, #tpu.memory_space<vmem>>, vector<1x8x128xbf16>
    %413 = vector.shape_cast %412 : vector<1x8x128xbf16> to vector<8x128xbf16>
    %414 = vector.shape_cast %411 : vector<8x128xbf16> to vector<1x8x128xbf16>
    tpu.vector_store %arg10[%c0_169, %c16_170, %c512_171], %414 {strides = array<i32>} : memref<1x64x1024xbf16, #tpu.memory_space<vmem>>, vector<1x8x128xbf16>,
    %cst_172 = arith.constant 1.000000e+00 : f32
    %415 = vector.broadcast %cst_172 : f32 to vector<8x128xf32>
    %416 = arith.subf %406, %415 : vector<8x128xf32>
    %417 = arith.select %408, %416, %406 : vector<8x128xi1>, vector<8x128xf32>
    %418 = arith.addf %417, %380 : vector<8x128xf32>
    %cst_173 = arith.constant 1.000000e+00 : f32
    %419 = vector.broadcast %cst_173 : f32 to vector<8x128xf32>
    %420 = arith.cmpf oge, %418, %419 : vector<8x128xf32>
    %421 = arith.extui %420 : vector<8x128xi1> to vector<8x128xi32>
    %422 = arith.sitofp %421 : vector<8x128xi32> to vector<8x128xf32>
    %423 = arith.truncf %422 : vector<8x128xf32> to vector<8x128xbf16>
    %c0_174 = arith.constant 0 : index
    %c24_175 = arith.constant 24 : index
    %c512_176 = arith.constant 512 : index
    %424 = vector.load %arg10[%c0_174, %c24_175, %c512_176] : memref<1x64x1024xbf16, #tpu.memory_space<vmem>>, vector<1x8x128xbf16>
    %425 = vector.shape_cast %424 : vector<1x8x128xbf16> to vector<8x128xbf16>
    %426 = vector.shape_cast %423 : vector<8x128xbf16> to vector<1x8x128xbf16>
    tpu.vector_store %arg10[%c0_174, %c24_175, %c512_176], %426 {strides = array<i32>} : memref<1x64x1024xbf16, #tpu.memory_space<vmem>>, vector<1x8x128xbf16>,
    %cst_177 = arith.constant 1.000000e+00 : f32
    %427 = vector.broadcast %cst_177 : f32 to vector<8x128xf32>
    %428 = arith.subf %418, %427 : vector<8x128xf32>
    %429 = arith.select %420, %428, %418 : vector<8x128xi1>, vector<8x128xf32>
    %430 = arith.addf %429, %380 : vector<8x128xf32>
    %cst_178 = arith.constant 1.000000e+00 : f32
    %431 = vector.broadcast %cst_178 : f32 to vector<8x128xf32>
    %432 = arith.cmpf oge, %430, %431 : vector<8x128xf32>
    %433 = arith.extui %432 : vector<8x128xi1> to vector<8x128xi32>
    %434 = arith.sitofp %433 : vector<8x128xi32> to vector<8x128xf32>
    %435 = arith.truncf %434 : vector<8x128xf32> to vector<8x128xbf16>
    %c0_179 = arith.constant 0 : index
    %c32_180 = arith.constant 32 : index
    %c512_181 = arith.constant 512 : index
    %436 = vector.load %arg10[%c0_179, %c32_180, %c512_181] : memref<1x64x1024xbf16, #tpu.memory_space<vmem>>, vector<1x8x128xbf16>
    %437 = vector.shape_cast %436 : vector<1x8x128xbf16> to vector<8x128xbf16>
    %438 = vector.shape_cast %435 : vector<8x128xbf16> to vector<1x8x128xbf16>
    tpu.vector_store %arg10[%c0_179, %c32_180, %c512_181], %438 {strides = array<i32>} : memref<1x64x1024xbf16, #tpu.memory_space<vmem>>, vector<1x8x128xbf16>,
    %cst_182 = arith.constant 1.000000e+00 : f32
    %439 = vector.broadcast %cst_182 : f32 to vector<8x128xf32>
    %440 = arith.subf %430, %439 : vector<8x128xf32>
    %441 = arith.select %432, %440, %430 : vector<8x128xi1>, vector<8x128xf32>
    %442 = arith.addf %441, %380 : vector<8x128xf32>
    %cst_183 = arith.constant 1.000000e+00 : f32
    %443 = vector.broadcast %cst_183 : f32 to vector<8x128xf32>
    %444 = arith.cmpf oge, %442, %443 : vector<8x128xf32>
    %445 = arith.extui %444 : vector<8x128xi1> to vector<8x128xi32>
    %446 = arith.sitofp %445 : vector<8x128xi32> to vector<8x128xf32>
    %447 = arith.truncf %446 : vector<8x128xf32> to vector<8x128xbf16>
    %c0_184 = arith.constant 0 : index
    %c40_185 = arith.constant 40 : index
    %c512_186 = arith.constant 512 : index
    %448 = vector.load %arg10[%c0_184, %c40_185, %c512_186] : memref<1x64x1024xbf16, #tpu.memory_space<vmem>>, vector<1x8x128xbf16>
    %449 = vector.shape_cast %448 : vector<1x8x128xbf16> to vector<8x128xbf16>
    %450 = vector.shape_cast %447 : vector<8x128xbf16> to vector<1x8x128xbf16>
    tpu.vector_store %arg10[%c0_184, %c40_185, %c512_186], %450 {strides = array<i32>} : memref<1x64x1024xbf16, #tpu.memory_space<vmem>>, vector<1x8x128xbf16>,
    %cst_187 = arith.constant 1.000000e+00 : f32
    %451 = vector.broadcast %cst_187 : f32 to vector<8x128xf32>
    %452 = arith.subf %442, %451 : vector<8x128xf32>
    %453 = arith.select %444, %452, %442 : vector<8x128xi1>, vector<8x128xf32>
    %454 = arith.addf %453, %380 : vector<8x128xf32>
    %cst_188 = arith.constant 1.000000e+00 : f32
    %455 = vector.broadcast %cst_188 : f32 to vector<8x128xf32>
    %456 = arith.cmpf oge, %454, %455 : vector<8x128xf32>
    %457 = arith.extui %456 : vector<8x128xi1> to vector<8x128xi32>
    %458 = arith.sitofp %457 : vector<8x128xi32> to vector<8x128xf32>
    %459 = arith.truncf %458 : vector<8x128xf32> to vector<8x128xbf16>
    %c0_189 = arith.constant 0 : index
    %c48_190 = arith.constant 48 : index
    %c512_191 = arith.constant 512 : index
    %460 = vector.load %arg10[%c0_189, %c48_190, %c512_191] : memref<1x64x1024xbf16, #tpu.memory_space<vmem>>, vector<1x8x128xbf16>
    %461 = vector.shape_cast %460 : vector<1x8x128xbf16> to vector<8x128xbf16>
    %462 = vector.shape_cast %459 : vector<8x128xbf16> to vector<1x8x128xbf16>
    tpu.vector_store %arg10[%c0_189, %c48_190, %c512_191], %462 {strides = array<i32>} : memref<1x64x1024xbf16, #tpu.memory_space<vmem>>, vector<1x8x128xbf16>,
    %cst_192 = arith.constant 1.000000e+00 : f32
    %463 = vector.broadcast %cst_192 : f32 to vector<8x128xf32>
    %464 = arith.subf %454, %463 : vector<8x128xf32>
    %465 = arith.select %456, %464, %454 : vector<8x128xi1>, vector<8x128xf32>
    %466 = arith.addf %465, %380 : vector<8x128xf32>
    %cst_193 = arith.constant 1.000000e+00 : f32
    %467 = vector.broadcast %cst_193 : f32 to vector<8x128xf32>
    %468 = arith.cmpf oge, %466, %467 : vector<8x128xf32>
    %469 = arith.extui %468 : vector<8x128xi1> to vector<8x128xi32>
    %470 = arith.sitofp %469 : vector<8x128xi32> to vector<8x128xf32>
    %471 = arith.truncf %470 : vector<8x128xf32> to vector<8x128xbf16>
    %c0_194 = arith.constant 0 : index
    %c56_195 = arith.constant 56 : index
    %c512_196 = arith.constant 512 : index
    %472 = vector.load %arg10[%c0_194, %c56_195, %c512_196] : memref<1x64x1024xbf16, #tpu.memory_space<vmem>>, vector<1x8x128xbf16>
    %473 = vector.shape_cast %472 : vector<1x8x128xbf16> to vector<8x128xbf16>
    %474 = vector.shape_cast %471 : vector<8x128xbf16> to vector<1x8x128xbf16>
    tpu.vector_store %arg10[%c0_194, %c56_195, %c512_196], %474 {strides = array<i32>} : memref<1x64x1024xbf16, #tpu.memory_space<vmem>>, vector<1x8x128xbf16>,
    %c0_197 = arith.constant 0 : index
    %c640 = arith.constant 640 : index
    %475 = vector.load %arg1[%c0_197, %c640] : memref<8x1024xf32, #tpu.memory_space<vmem>>, vector<8x128xf32>
    %cst_198 = arith.constant 0.000000e+00 : f32
    %476 = vector.broadcast %cst_198 : f32 to vector<8x128xf32>
    %477 = arith.addf %476, %475 : vector<8x128xf32>
    %cst_199 = arith.constant 1.000000e+00 : f32
    %478 = vector.broadcast %cst_199 : f32 to vector<8x128xf32>
    %479 = arith.cmpf oge, %477, %478 : vector<8x128xf32>
    %480 = arith.extui %479 : vector<8x128xi1> to vector<8x128xi32>
    %481 = arith.sitofp %480 : vector<8x128xi32> to vector<8x128xf32>
    %482 = arith.truncf %481 : vector<8x128xf32> to vector<8x128xbf16>
    %c0_200 = arith.constant 0 : index
    %c0_201 = arith.constant 0 : index
    %c640_202 = arith.constant 640 : index
    %483 = vector.load %arg10[%c0_200, %c0_201, %c640_202] : memref<1x64x1024xbf16, #tpu.memory_space<vmem>>, vector<1x8x128xbf16>
    %484 = vector.shape_cast %483 : vector<1x8x128xbf16> to vector<8x128xbf16>
    %485 = vector.shape_cast %482 : vector<8x128xbf16> to vector<1x8x128xbf16>
    tpu.vector_store %arg10[%c0_200, %c0_201, %c640_202], %485 {strides = array<i32>} : memref<1x64x1024xbf16, #tpu.memory_space<vmem>>, vector<1x8x128xbf16>,
    %cst_203 = arith.constant 1.000000e+00 : f32
    %486 = vector.broadcast %cst_203 : f32 to vector<8x128xf32>
    %487 = arith.subf %477, %486 : vector<8x128xf32>
    %488 = arith.select %479, %487, %477 : vector<8x128xi1>, vector<8x128xf32>
    %489 = arith.addf %488, %475 : vector<8x128xf32>
    %cst_204 = arith.constant 1.000000e+00 : f32
    %490 = vector.broadcast %cst_204 : f32 to vector<8x128xf32>
    %491 = arith.cmpf oge, %489, %490 : vector<8x128xf32>
    %492 = arith.extui %491 : vector<8x128xi1> to vector<8x128xi32>
    %493 = arith.sitofp %492 : vector<8x128xi32> to vector<8x128xf32>
    %494 = arith.truncf %493 : vector<8x128xf32> to vector<8x128xbf16>
    %c0_205 = arith.constant 0 : index
    %c8_206 = arith.constant 8 : index
    %c640_207 = arith.constant 640 : index
    %495 = vector.load %arg10[%c0_205, %c8_206, %c640_207] : memref<1x64x1024xbf16, #tpu.memory_space<vmem>>, vector<1x8x128xbf16>
    %496 = vector.shape_cast %495 : vector<1x8x128xbf16> to vector<8x128xbf16>
    %497 = vector.shape_cast %494 : vector<8x128xbf16> to vector<1x8x128xbf16>
    tpu.vector_store %arg10[%c0_205, %c8_206, %c640_207], %497 {strides = array<i32>} : memref<1x64x1024xbf16, #tpu.memory_space<vmem>>, vector<1x8x128xbf16>,
    %cst_208 = arith.constant 1.000000e+00 : f32
    %498 = vector.broadcast %cst_208 : f32 to vector<8x128xf32>
    %499 = arith.subf %489, %498 : vector<8x128xf32>
    %500 = arith.select %491, %499, %489 : vector<8x128xi1>, vector<8x128xf32>
    %501 = arith.addf %500, %475 : vector<8x128xf32>
    %cst_209 = arith.constant 1.000000e+00 : f32
    %502 = vector.broadcast %cst_209 : f32 to vector<8x128xf32>
    %503 = arith.cmpf oge, %501, %502 : vector<8x128xf32>
    %504 = arith.extui %503 : vector<8x128xi1> to vector<8x128xi32>
    %505 = arith.sitofp %504 : vector<8x128xi32> to vector<8x128xf32>
    %506 = arith.truncf %505 : vector<8x128xf32> to vector<8x128xbf16>
    %c0_210 = arith.constant 0 : index
    %c16_211 = arith.constant 16 : index
    %c640_212 = arith.constant 640 : index
    %507 = vector.load %arg10[%c0_210, %c16_211, %c640_212] : memref<1x64x1024xbf16, #tpu.memory_space<vmem>>, vector<1x8x128xbf16>
    %508 = vector.shape_cast %507 : vector<1x8x128xbf16> to vector<8x128xbf16>
    %509 = vector.shape_cast %506 : vector<8x128xbf16> to vector<1x8x128xbf16>
    tpu.vector_store %arg10[%c0_210, %c16_211, %c640_212], %509 {strides = array<i32>} : memref<1x64x1024xbf16, #tpu.memory_space<vmem>>, vector<1x8x128xbf16>,
    %cst_213 = arith.constant 1.000000e+00 : f32
    %510 = vector.broadcast %cst_213 : f32 to vector<8x128xf32>
    %511 = arith.subf %501, %510 : vector<8x128xf32>
    %512 = arith.select %503, %511, %501 : vector<8x128xi1>, vector<8x128xf32>
    %513 = arith.addf %512, %475 : vector<8x128xf32>
    %cst_214 = arith.constant 1.000000e+00 : f32
    %514 = vector.broadcast %cst_214 : f32 to vector<8x128xf32>
    %515 = arith.cmpf oge, %513, %514 : vector<8x128xf32>
    %516 = arith.extui %515 : vector<8x128xi1> to vector<8x128xi32>
    %517 = arith.sitofp %516 : vector<8x128xi32> to vector<8x128xf32>
    %518 = arith.truncf %517 : vector<8x128xf32> to vector<8x128xbf16>
    %c0_215 = arith.constant 0 : index
    %c24_216 = arith.constant 24 : index
    %c640_217 = arith.constant 640 : index
    %519 = vector.load %arg10[%c0_215, %c24_216, %c640_217] : memref<1x64x1024xbf16, #tpu.memory_space<vmem>>, vector<1x8x128xbf16>
    %520 = vector.shape_cast %519 : vector<1x8x128xbf16> to vector<8x128xbf16>
    %521 = vector.shape_cast %518 : vector<8x128xbf16> to vector<1x8x128xbf16>
    tpu.vector_store %arg10[%c0_215, %c24_216, %c640_217], %521 {strides = array<i32>} : memref<1x64x1024xbf16, #tpu.memory_space<vmem>>, vector<1x8x128xbf16>,
    %cst_218 = arith.constant 1.000000e+00 : f32
    %522 = vector.broadcast %cst_218 : f32 to vector<8x128xf32>
    %523 = arith.subf %513, %522 : vector<8x128xf32>
    %524 = arith.select %515, %523, %513 : vector<8x128xi1>, vector<8x128xf32>
    %525 = arith.addf %524, %475 : vector<8x128xf32>
    %cst_219 = arith.constant 1.000000e+00 : f32
    %526 = vector.broadcast %cst_219 : f32 to vector<8x128xf32>
    %527 = arith.cmpf oge, %525, %526 : vector<8x128xf32>
    %528 = arith.extui %527 : vector<8x128xi1> to vector<8x128xi32>
    %529 = arith.sitofp %528 : vector<8x128xi32> to vector<8x128xf32>
    %530 = arith.truncf %529 : vector<8x128xf32> to vector<8x128xbf16>
    %c0_220 = arith.constant 0 : index
    %c32_221 = arith.constant 32 : index
    %c640_222 = arith.constant 640 : index
    %531 = vector.load %arg10[%c0_220, %c32_221, %c640_222] : memref<1x64x1024xbf16, #tpu.memory_space<vmem>>, vector<1x8x128xbf16>
    %532 = vector.shape_cast %531 : vector<1x8x128xbf16> to vector<8x128xbf16>
    %533 = vector.shape_cast %530 : vector<8x128xbf16> to vector<1x8x128xbf16>
    tpu.vector_store %arg10[%c0_220, %c32_221, %c640_222], %533 {strides = array<i32>} : memref<1x64x1024xbf16, #tpu.memory_space<vmem>>, vector<1x8x128xbf16>,
    %cst_223 = arith.constant 1.000000e+00 : f32
    %534 = vector.broadcast %cst_223 : f32 to vector<8x128xf32>
    %535 = arith.subf %525, %534 : vector<8x128xf32>
    %536 = arith.select %527, %535, %525 : vector<8x128xi1>, vector<8x128xf32>
    %537 = arith.addf %536, %475 : vector<8x128xf32>
    %cst_224 = arith.constant 1.000000e+00 : f32
    %538 = vector.broadcast %cst_224 : f32 to vector<8x128xf32>
    %539 = arith.cmpf oge, %537, %538 : vector<8x128xf32>
    %540 = arith.extui %539 : vector<8x128xi1> to vector<8x128xi32>
    %541 = arith.sitofp %540 : vector<8x128xi32> to vector<8x128xf32>
    %542 = arith.truncf %541 : vector<8x128xf32> to vector<8x128xbf16>
    %c0_225 = arith.constant 0 : index
    %c40_226 = arith.constant 40 : index
    %c640_227 = arith.constant 640 : index
    %543 = vector.load %arg10[%c0_225, %c40_226, %c640_227] : memref<1x64x1024xbf16, #tpu.memory_space<vmem>>, vector<1x8x128xbf16>
    %544 = vector.shape_cast %543 : vector<1x8x128xbf16> to vector<8x128xbf16>
    %545 = vector.shape_cast %542 : vector<8x128xbf16> to vector<1x8x128xbf16>
    tpu.vector_store %arg10[%c0_225, %c40_226, %c640_227], %545 {strides = array<i32>} : memref<1x64x1024xbf16, #tpu.memory_space<vmem>>, vector<1x8x128xbf16>,
    %cst_228 = arith.constant 1.000000e+00 : f32
    %546 = vector.broadcast %cst_228 : f32 to vector<8x128xf32>
    %547 = arith.subf %537, %546 : vector<8x128xf32>
    %548 = arith.select %539, %547, %537 : vector<8x128xi1>, vector<8x128xf32>
    %549 = arith.addf %548, %475 : vector<8x128xf32>
    %cst_229 = arith.constant 1.000000e+00 : f32
    %550 = vector.broadcast %cst_229 : f32 to vector<8x128xf32>
    %551 = arith.cmpf oge, %549, %550 : vector<8x128xf32>
    %552 = arith.extui %551 : vector<8x128xi1> to vector<8x128xi32>
    %553 = arith.sitofp %552 : vector<8x128xi32> to vector<8x128xf32>
    %554 = arith.truncf %553 : vector<8x128xf32> to vector<8x128xbf16>
    %c0_230 = arith.constant 0 : index
    %c48_231 = arith.constant 48 : index
    %c640_232 = arith.constant 640 : index
    %555 = vector.load %arg10[%c0_230, %c48_231, %c640_232] : memref<1x64x1024xbf16, #tpu.memory_space<vmem>>, vector<1x8x128xbf16>
    %556 = vector.shape_cast %555 : vector<1x8x128xbf16> to vector<8x128xbf16>
    %557 = vector.shape_cast %554 : vector<8x128xbf16> to vector<1x8x128xbf16>
    tpu.vector_store %arg10[%c0_230, %c48_231, %c640_232], %557 {strides = array<i32>} : memref<1x64x1024xbf16, #tpu.memory_space<vmem>>, vector<1x8x128xbf16>,
    %cst_233 = arith.constant 1.000000e+00 : f32
    %558 = vector.broadcast %cst_233 : f32 to vector<8x128xf32>
    %559 = arith.subf %549, %558 : vector<8x128xf32>
    %560 = arith.select %551, %559, %549 : vector<8x128xi1>, vector<8x128xf32>
    %561 = arith.addf %560, %475 : vector<8x128xf32>
    %cst_234 = arith.constant 1.000000e+00 : f32
    %562 = vector.broadcast %cst_234 : f32 to vector<8x128xf32>
    %563 = arith.cmpf oge, %561, %562 : vector<8x128xf32>
    %564 = arith.extui %563 : vector<8x128xi1> to vector<8x128xi32>
    %565 = arith.sitofp %564 : vector<8x128xi32> to vector<8x128xf32>
    %566 = arith.truncf %565 : vector<8x128xf32> to vector<8x128xbf16>
    %c0_235 = arith.constant 0 : index
    %c56_236 = arith.constant 56 : index
    %c640_237 = arith.constant 640 : index
    %567 = vector.load %arg10[%c0_235, %c56_236, %c640_237] : memref<1x64x1024xbf16, #tpu.memory_space<vmem>>, vector<1x8x128xbf16>
    %568 = vector.shape_cast %567 : vector<1x8x128xbf16> to vector<8x128xbf16>
    %569 = vector.shape_cast %566 : vector<8x128xbf16> to vector<1x8x128xbf16>
    tpu.vector_store %arg10[%c0_235, %c56_236, %c640_237], %569 {strides = array<i32>} : memref<1x64x1024xbf16, #tpu.memory_space<vmem>>, vector<1x8x128xbf16>,
    %c0_238 = arith.constant 0 : index
    %c768 = arith.constant 768 : index
    %570 = vector.load %arg1[%c0_238, %c768] : memref<8x1024xf32, #tpu.memory_space<vmem>>, vector<8x128xf32>
    %cst_239 = arith.constant 0.000000e+00 : f32
    %571 = vector.broadcast %cst_239 : f32 to vector<8x128xf32>
    %572 = arith.addf %571, %570 : vector<8x128xf32>
    %cst_240 = arith.constant 1.000000e+00 : f32
    %573 = vector.broadcast %cst_240 : f32 to vector<8x128xf32>
    %574 = arith.cmpf oge, %572, %573 : vector<8x128xf32>
    %575 = arith.extui %574 : vector<8x128xi1> to vector<8x128xi32>
    %576 = arith.sitofp %575 : vector<8x128xi32> to vector<8x128xf32>
    %577 = arith.truncf %576 : vector<8x128xf32> to vector<8x128xbf16>
    %c0_241 = arith.constant 0 : index
    %c0_242 = arith.constant 0 : index
    %c768_243 = arith.constant 768 : index
    %578 = vector.load %arg10[%c0_241, %c0_242, %c768_243] : memref<1x64x1024xbf16, #tpu.memory_space<vmem>>, vector<1x8x128xbf16>
    %579 = vector.shape_cast %578 : vector<1x8x128xbf16> to vector<8x128xbf16>
    %580 = vector.shape_cast %577 : vector<8x128xbf16> to vector<1x8x128xbf16>
    tpu.vector_store %arg10[%c0_241, %c0_242, %c768_243], %580 {strides = array<i32>} : memref<1x64x1024xbf16, #tpu.memory_space<vmem>>, vector<1x8x128xbf16>,
    %cst_244 = arith.constant 1.000000e+00 : f32
    %581 = vector.broadcast %cst_244 : f32 to vector<8x128xf32>
    %582 = arith.subf %572, %581 : vector<8x128xf32>
    %583 = arith.select %574, %582, %572 : vector<8x128xi1>, vector<8x128xf32>
    %584 = arith.addf %583, %570 : vector<8x128xf32>
    %cst_245 = arith.constant 1.000000e+00 : f32
    %585 = vector.broadcast %cst_245 : f32 to vector<8x128xf32>
    %586 = arith.cmpf oge, %584, %585 : vector<8x128xf32>
    %587 = arith.extui %586 : vector<8x128xi1> to vector<8x128xi32>
    %588 = arith.sitofp %587 : vector<8x128xi32> to vector<8x128xf32>
    %589 = arith.truncf %588 : vector<8x128xf32> to vector<8x128xbf16>
    %c0_246 = arith.constant 0 : index
    %c8_247 = arith.constant 8 : index
    %c768_248 = arith.constant 768 : index
    %590 = vector.load %arg10[%c0_246, %c8_247, %c768_248] : memref<1x64x1024xbf16, #tpu.memory_space<vmem>>, vector<1x8x128xbf16>
    %591 = vector.shape_cast %590 : vector<1x8x128xbf16> to vector<8x128xbf16>
    %592 = vector.shape_cast %589 : vector<8x128xbf16> to vector<1x8x128xbf16>
    tpu.vector_store %arg10[%c0_246, %c8_247, %c768_248], %592 {strides = array<i32>} : memref<1x64x1024xbf16, #tpu.memory_space<vmem>>, vector<1x8x128xbf16>,
    %cst_249 = arith.constant 1.000000e+00 : f32
    %593 = vector.broadcast %cst_249 : f32 to vector<8x128xf32>
    %594 = arith.subf %584, %593 : vector<8x128xf32>
    %595 = arith.select %586, %594, %584 : vector<8x128xi1>, vector<8x128xf32>
    %596 = arith.addf %595, %570 : vector<8x128xf32>
    %cst_250 = arith.constant 1.000000e+00 : f32
    %597 = vector.broadcast %cst_250 : f32 to vector<8x128xf32>
    %598 = arith.cmpf oge, %596, %597 : vector<8x128xf32>
    %599 = arith.extui %598 : vector<8x128xi1> to vector<8x128xi32>
    %600 = arith.sitofp %599 : vector<8x128xi32> to vector<8x128xf32>
    %601 = arith.truncf %600 : vector<8x128xf32> to vector<8x128xbf16>
    %c0_251 = arith.constant 0 : index
    %c16_252 = arith.constant 16 : index
    %c768_253 = arith.constant 768 : index
    %602 = vector.load %arg10[%c0_251, %c16_252, %c768_253] : memref<1x64x1024xbf16, #tpu.memory_space<vmem>>, vector<1x8x128xbf16>
    %603 = vector.shape_cast %602 : vector<1x8x128xbf16> to vector<8x128xbf16>
    %604 = vector.shape_cast %601 : vector<8x128xbf16> to vector<1x8x128xbf16>
    tpu.vector_store %arg10[%c0_251, %c16_252, %c768_253], %604 {strides = array<i32>} : memref<1x64x1024xbf16, #tpu.memory_space<vmem>>, vector<1x8x128xbf16>,
    %cst_254 = arith.constant 1.000000e+00 : f32
    %605 = vector.broadcast %cst_254 : f32 to vector<8x128xf32>
    %606 = arith.subf %596, %605 : vector<8x128xf32>
    %607 = arith.select %598, %606, %596 : vector<8x128xi1>, vector<8x128xf32>
    %608 = arith.addf %607, %570 : vector<8x128xf32>
    %cst_255 = arith.constant 1.000000e+00 : f32
    %609 = vector.broadcast %cst_255 : f32 to vector<8x128xf32>
    %610 = arith.cmpf oge, %608, %609 : vector<8x128xf32>
    %611 = arith.extui %610 : vector<8x128xi1> to vector<8x128xi32>
    %612 = arith.sitofp %611 : vector<8x128xi32> to vector<8x128xf32>
    %613 = arith.truncf %612 : vector<8x128xf32> to vector<8x128xbf16>
    %c0_256 = arith.constant 0 : index
    %c24_257 = arith.constant 24 : index
    %c768_258 = arith.constant 768 : index
    %614 = vector.load %arg10[%c0_256, %c24_257, %c768_258] : memref<1x64x1024xbf16, #tpu.memory_space<vmem>>, vector<1x8x128xbf16>
    %615 = vector.shape_cast %614 : vector<1x8x128xbf16> to vector<8x128xbf16>
    %616 = vector.shape_cast %613 : vector<8x128xbf16> to vector<1x8x128xbf16>
    tpu.vector_store %arg10[%c0_256, %c24_257, %c768_258], %616 {strides = array<i32>} : memref<1x64x1024xbf16, #tpu.memory_space<vmem>>, vector<1x8x128xbf16>,
    %cst_259 = arith.constant 1.000000e+00 : f32
    %617 = vector.broadcast %cst_259 : f32 to vector<8x128xf32>
    %618 = arith.subf %608, %617 : vector<8x128xf32>
    %619 = arith.select %610, %618, %608 : vector<8x128xi1>, vector<8x128xf32>
    %620 = arith.addf %619, %570 : vector<8x128xf32>
    %cst_260 = arith.constant 1.000000e+00 : f32
    %621 = vector.broadcast %cst_260 : f32 to vector<8x128xf32>
    %622 = arith.cmpf oge, %620, %621 : vector<8x128xf32>
    %623 = arith.extui %622 : vector<8x128xi1> to vector<8x128xi32>
    %624 = arith.sitofp %623 : vector<8x128xi32> to vector<8x128xf32>
    %625 = arith.truncf %624 : vector<8x128xf32> to vector<8x128xbf16>
    %c0_261 = arith.constant 0 : index
    %c32_262 = arith.constant 32 : index
    %c768_263 = arith.constant 768 : index
    %626 = vector.load %arg10[%c0_261, %c32_262, %c768_263] : memref<1x64x1024xbf16, #tpu.memory_space<vmem>>, vector<1x8x128xbf16>
    %627 = vector.shape_cast %626 : vector<1x8x128xbf16> to vector<8x128xbf16>
    %628 = vector.shape_cast %625 : vector<8x128xbf16> to vector<1x8x128xbf16>
    tpu.vector_store %arg10[%c0_261, %c32_262, %c768_263], %628 {strides = array<i32>} : memref<1x64x1024xbf16, #tpu.memory_space<vmem>>, vector<1x8x128xbf16>,
    %cst_264 = arith.constant 1.000000e+00 : f32
    %629 = vector.broadcast %cst_264 : f32 to vector<8x128xf32>
    %630 = arith.subf %620, %629 : vector<8x128xf32>
    %631 = arith.select %622, %630, %620 : vector<8x128xi1>, vector<8x128xf32>
    %632 = arith.addf %631, %570 : vector<8x128xf32>
    %cst_265 = arith.constant 1.000000e+00 : f32
    %633 = vector.broadcast %cst_265 : f32 to vector<8x128xf32>
    %634 = arith.cmpf oge, %632, %633 : vector<8x128xf32>
    %635 = arith.extui %634 : vector<8x128xi1> to vector<8x128xi32>
    %636 = arith.sitofp %635 : vector<8x128xi32> to vector<8x128xf32>
    %637 = arith.truncf %636 : vector<8x128xf32> to vector<8x128xbf16>
    %c0_266 = arith.constant 0 : index
    %c40_267 = arith.constant 40 : index
    %c768_268 = arith.constant 768 : index
    %638 = vector.load %arg10[%c0_266, %c40_267, %c768_268] : memref<1x64x1024xbf16, #tpu.memory_space<vmem>>, vector<1x8x128xbf16>
    %639 = vector.shape_cast %638 : vector<1x8x128xbf16> to vector<8x128xbf16>
    %640 = vector.shape_cast %637 : vector<8x128xbf16> to vector<1x8x128xbf16>
    tpu.vector_store %arg10[%c0_266, %c40_267, %c768_268], %640 {strides = array<i32>} : memref<1x64x1024xbf16, #tpu.memory_space<vmem>>, vector<1x8x128xbf16>,
    %cst_269 = arith.constant 1.000000e+00 : f32
    %641 = vector.broadcast %cst_269 : f32 to vector<8x128xf32>
    %642 = arith.subf %632, %641 : vector<8x128xf32>
    %643 = arith.select %634, %642, %632 : vector<8x128xi1>, vector<8x128xf32>
    %644 = arith.addf %643, %570 : vector<8x128xf32>
    %cst_270 = arith.constant 1.000000e+00 : f32
    %645 = vector.broadcast %cst_270 : f32 to vector<8x128xf32>
    %646 = arith.cmpf oge, %644, %645 : vector<8x128xf32>
    %647 = arith.extui %646 : vector<8x128xi1> to vector<8x128xi32>
    %648 = arith.sitofp %647 : vector<8x128xi32> to vector<8x128xf32>
    %649 = arith.truncf %648 : vector<8x128xf32> to vector<8x128xbf16>
    %c0_271 = arith.constant 0 : index
    %c48_272 = arith.constant 48 : index
    %c768_273 = arith.constant 768 : index
    %650 = vector.load %arg10[%c0_271, %c48_272, %c768_273] : memref<1x64x1024xbf16, #tpu.memory_space<vmem>>, vector<1x8x128xbf16>
    %651 = vector.shape_cast %650 : vector<1x8x128xbf16> to vector<8x128xbf16>
    %652 = vector.shape_cast %649 : vector<8x128xbf16> to vector<1x8x128xbf16>
    tpu.vector_store %arg10[%c0_271, %c48_272, %c768_273], %652 {strides = array<i32>} : memref<1x64x1024xbf16, #tpu.memory_space<vmem>>, vector<1x8x128xbf16>,
    %cst_274 = arith.constant 1.000000e+00 : f32
    %653 = vector.broadcast %cst_274 : f32 to vector<8x128xf32>
    %654 = arith.subf %644, %653 : vector<8x128xf32>
    %655 = arith.select %646, %654, %644 : vector<8x128xi1>, vector<8x128xf32>
    %656 = arith.addf %655, %570 : vector<8x128xf32>
    %cst_275 = arith.constant 1.000000e+00 : f32
    %657 = vector.broadcast %cst_275 : f32 to vector<8x128xf32>
    %658 = arith.cmpf oge, %656, %657 : vector<8x128xf32>
    %659 = arith.extui %658 : vector<8x128xi1> to vector<8x128xi32>
    %660 = arith.sitofp %659 : vector<8x128xi32> to vector<8x128xf32>
    %661 = arith.truncf %660 : vector<8x128xf32> to vector<8x128xbf16>
    %c0_276 = arith.constant 0 : index
    %c56_277 = arith.constant 56 : index
    %c768_278 = arith.constant 768 : index
    %662 = vector.load %arg10[%c0_276, %c56_277, %c768_278] : memref<1x64x1024xbf16, #tpu.memory_space<vmem>>, vector<1x8x128xbf16>
    %663 = vector.shape_cast %662 : vector<1x8x128xbf16> to vector<8x128xbf16>
    %664 = vector.shape_cast %661 : vector<8x128xbf16> to vector<1x8x128xbf16>
    tpu.vector_store %arg10[%c0_276, %c56_277, %c768_278], %664 {strides = array<i32>} : memref<1x64x1024xbf16, #tpu.memory_space<vmem>>, vector<1x8x128xbf16>,
    %c0_279 = arith.constant 0 : index
    %c896 = arith.constant 896 : index
    %665 = vector.load %arg1[%c0_279, %c896] : memref<8x1024xf32, #tpu.memory_space<vmem>>, vector<8x128xf32>
    %cst_280 = arith.constant 0.000000e+00 : f32
    %666 = vector.broadcast %cst_280 : f32 to vector<8x128xf32>
    %667 = arith.addf %666, %665 : vector<8x128xf32>
    %cst_281 = arith.constant 1.000000e+00 : f32
    %668 = vector.broadcast %cst_281 : f32 to vector<8x128xf32>
    %669 = arith.cmpf oge, %667, %668 : vector<8x128xf32>
    %670 = arith.extui %669 : vector<8x128xi1> to vector<8x128xi32>
    %671 = arith.sitofp %670 : vector<8x128xi32> to vector<8x128xf32>
    %672 = arith.truncf %671 : vector<8x128xf32> to vector<8x128xbf16>
    %c0_282 = arith.constant 0 : index
    %c0_283 = arith.constant 0 : index
    %c896_284 = arith.constant 896 : index
    %673 = vector.load %arg10[%c0_282, %c0_283, %c896_284] : memref<1x64x1024xbf16, #tpu.memory_space<vmem>>, vector<1x8x128xbf16>
    %674 = vector.shape_cast %673 : vector<1x8x128xbf16> to vector<8x128xbf16>
    %675 = vector.shape_cast %672 : vector<8x128xbf16> to vector<1x8x128xbf16>
    tpu.vector_store %arg10[%c0_282, %c0_283, %c896_284], %675 {strides = array<i32>} : memref<1x64x1024xbf16, #tpu.memory_space<vmem>>, vector<1x8x128xbf16>,
    %cst_285 = arith.constant 1.000000e+00 : f32
    %676 = vector.broadcast %cst_285 : f32 to vector<8x128xf32>
    %677 = arith.subf %667, %676 : vector<8x128xf32>
    %678 = arith.select %669, %677, %667 : vector<8x128xi1>, vector<8x128xf32>
    %679 = arith.addf %678, %665 : vector<8x128xf32>
    %cst_286 = arith.constant 1.000000e+00 : f32
    %680 = vector.broadcast %cst_286 : f32 to vector<8x128xf32>
    %681 = arith.cmpf oge, %679, %680 : vector<8x128xf32>
    %682 = arith.extui %681 : vector<8x128xi1> to vector<8x128xi32>
    %683 = arith.sitofp %682 : vector<8x128xi32> to vector<8x128xf32>
    %684 = arith.truncf %683 : vector<8x128xf32> to vector<8x128xbf16>
    %c0_287 = arith.constant 0 : index
    %c8_288 = arith.constant 8 : index
    %c896_289 = arith.constant 896 : index
    %685 = vector.load %arg10[%c0_287, %c8_288, %c896_289] : memref<1x64x1024xbf16, #tpu.memory_space<vmem>>, vector<1x8x128xbf16>
    %686 = vector.shape_cast %685 : vector<1x8x128xbf16> to vector<8x128xbf16>
    %687 = vector.shape_cast %684 : vector<8x128xbf16> to vector<1x8x128xbf16>
    tpu.vector_store %arg10[%c0_287, %c8_288, %c896_289], %687 {strides = array<i32>} : memref<1x64x1024xbf16, #tpu.memory_space<vmem>>, vector<1x8x128xbf16>,
    %cst_290 = arith.constant 1.000000e+00 : f32
    %688 = vector.broadcast %cst_290 : f32 to vector<8x128xf32>
    %689 = arith.subf %679, %688 : vector<8x128xf32>
    %690 = arith.select %681, %689, %679 : vector<8x128xi1>, vector<8x128xf32>
    %691 = arith.addf %690, %665 : vector<8x128xf32>
    %cst_291 = arith.constant 1.000000e+00 : f32
    %692 = vector.broadcast %cst_291 : f32 to vector<8x128xf32>
    %693 = arith.cmpf oge, %691, %692 : vector<8x128xf32>
    %694 = arith.extui %693 : vector<8x128xi1> to vector<8x128xi32>
    %695 = arith.sitofp %694 : vector<8x128xi32> to vector<8x128xf32>
    %696 = arith.truncf %695 : vector<8x128xf32> to vector<8x128xbf16>
    %c0_292 = arith.constant 0 : index
    %c16_293 = arith.constant 16 : index
    %c896_294 = arith.constant 896 : index
    %697 = vector.load %arg10[%c0_292, %c16_293, %c896_294] : memref<1x64x1024xbf16, #tpu.memory_space<vmem>>, vector<1x8x128xbf16>
    %698 = vector.shape_cast %697 : vector<1x8x128xbf16> to vector<8x128xbf16>
    %699 = vector.shape_cast %696 : vector<8x128xbf16> to vector<1x8x128xbf16>
    tpu.vector_store %arg10[%c0_292, %c16_293, %c896_294], %699 {strides = array<i32>} : memref<1x64x1024xbf16, #tpu.memory_space<vmem>>, vector<1x8x128xbf16>,
    %cst_295 = arith.constant 1.000000e+00 : f32
    %700 = vector.broadcast %cst_295 : f32 to vector<8x128xf32>
    %701 = arith.subf %691, %700 : vector<8x128xf32>
    %702 = arith.select %693, %701, %691 : vector<8x128xi1>, vector<8x128xf32>
    %703 = arith.addf %702, %665 : vector<8x128xf32>
    %cst_296 = arith.constant 1.000000e+00 : f32
    %704 = vector.broadcast %cst_296 : f32 to vector<8x128xf32>
    %705 = arith.cmpf oge, %703, %704 : vector<8x128xf32>
    %706 = arith.extui %705 : vector<8x128xi1> to vector<8x128xi32>
    %707 = arith.sitofp %706 : vector<8x128xi32> to vector<8x128xf32>
    %708 = arith.truncf %707 : vector<8x128xf32> to vector<8x128xbf16>
    %c0_297 = arith.constant 0 : index
    %c24_298 = arith.constant 24 : index
    %c896_299 = arith.constant 896 : index
    %709 = vector.load %arg10[%c0_297, %c24_298, %c896_299] : memref<1x64x1024xbf16, #tpu.memory_space<vmem>>, vector<1x8x128xbf16>
    %710 = vector.shape_cast %709 : vector<1x8x128xbf16> to vector<8x128xbf16>
    %711 = vector.shape_cast %708 : vector<8x128xbf16> to vector<1x8x128xbf16>
    tpu.vector_store %arg10[%c0_297, %c24_298, %c896_299], %711 {strides = array<i32>} : memref<1x64x1024xbf16, #tpu.memory_space<vmem>>, vector<1x8x128xbf16>,
    %cst_300 = arith.constant 1.000000e+00 : f32
    %712 = vector.broadcast %cst_300 : f32 to vector<8x128xf32>
    %713 = arith.subf %703, %712 : vector<8x128xf32>
    %714 = arith.select %705, %713, %703 : vector<8x128xi1>, vector<8x128xf32>
    %715 = arith.addf %714, %665 : vector<8x128xf32>
    %cst_301 = arith.constant 1.000000e+00 : f32
    %716 = vector.broadcast %cst_301 : f32 to vector<8x128xf32>
    %717 = arith.cmpf oge, %715, %716 : vector<8x128xf32>
    %718 = arith.extui %717 : vector<8x128xi1> to vector<8x128xi32>
    %719 = arith.sitofp %718 : vector<8x128xi32> to vector<8x128xf32>
    %720 = arith.truncf %719 : vector<8x128xf32> to vector<8x128xbf16>
    %c0_302 = arith.constant 0 : index
    %c32_303 = arith.constant 32 : index
    %c896_304 = arith.constant 896 : index
    %721 = vector.load %arg10[%c0_302, %c32_303, %c896_304] : memref<1x64x1024xbf16, #tpu.memory_space<vmem>>, vector<1x8x128xbf16>
    %722 = vector.shape_cast %721 : vector<1x8x128xbf16> to vector<8x128xbf16>
    %723 = vector.shape_cast %720 : vector<8x128xbf16> to vector<1x8x128xbf16>
    tpu.vector_store %arg10[%c0_302, %c32_303, %c896_304], %723 {strides = array<i32>} : memref<1x64x1024xbf16, #tpu.memory_space<vmem>>, vector<1x8x128xbf16>,
    %cst_305 = arith.constant 1.000000e+00 : f32
    %724 = vector.broadcast %cst_305 : f32 to vector<8x128xf32>
    %725 = arith.subf %715, %724 : vector<8x128xf32>
    %726 = arith.select %717, %725, %715 : vector<8x128xi1>, vector<8x128xf32>
    %727 = arith.addf %726, %665 : vector<8x128xf32>
    %cst_306 = arith.constant 1.000000e+00 : f32
    %728 = vector.broadcast %cst_306 : f32 to vector<8x128xf32>
    %729 = arith.cmpf oge, %727, %728 : vector<8x128xf32>
    %730 = arith.extui %729 : vector<8x128xi1> to vector<8x128xi32>
    %731 = arith.sitofp %730 : vector<8x128xi32> to vector<8x128xf32>
    %732 = arith.truncf %731 : vector<8x128xf32> to vector<8x128xbf16>
    %c0_307 = arith.constant 0 : index
    %c40_308 = arith.constant 40 : index
    %c896_309 = arith.constant 896 : index
    %733 = vector.load %arg10[%c0_307, %c40_308, %c896_309] : memref<1x64x1024xbf16, #tpu.memory_space<vmem>>, vector<1x8x128xbf16>
    %734 = vector.shape_cast %733 : vector<1x8x128xbf16> to vector<8x128xbf16>
    %735 = vector.shape_cast %732 : vector<8x128xbf16> to vector<1x8x128xbf16>
    tpu.vector_store %arg10[%c0_307, %c40_308, %c896_309], %735 {strides = array<i32>} : memref<1x64x1024xbf16, #tpu.memory_space<vmem>>, vector<1x8x128xbf16>,
    %cst_310 = arith.constant 1.000000e+00 : f32
    %736 = vector.broadcast %cst_310 : f32 to vector<8x128xf32>
    %737 = arith.subf %727, %736 : vector<8x128xf32>
    %738 = arith.select %729, %737, %727 : vector<8x128xi1>, vector<8x128xf32>
    %739 = arith.addf %738, %665 : vector<8x128xf32>
    %cst_311 = arith.constant 1.000000e+00 : f32
    %740 = vector.broadcast %cst_311 : f32 to vector<8x128xf32>
    %741 = arith.cmpf oge, %739, %740 : vector<8x128xf32>
    %742 = arith.extui %741 : vector<8x128xi1> to vector<8x128xi32>
    %743 = arith.sitofp %742 : vector<8x128xi32> to vector<8x128xf32>
    %744 = arith.truncf %743 : vector<8x128xf32> to vector<8x128xbf16>
    %c0_312 = arith.constant 0 : index
    %c48_313 = arith.constant 48 : index
    %c896_314 = arith.constant 896 : index
    %745 = vector.load %arg10[%c0_312, %c48_313, %c896_314] : memref<1x64x1024xbf16, #tpu.memory_space<vmem>>, vector<1x8x128xbf16>
    %746 = vector.shape_cast %745 : vector<1x8x128xbf16> to vector<8x128xbf16>
    %747 = vector.shape_cast %744 : vector<8x128xbf16> to vector<1x8x128xbf16>
    tpu.vector_store %arg10[%c0_312, %c48_313, %c896_314], %747 {strides = array<i32>} : memref<1x64x1024xbf16, #tpu.memory_space<vmem>>, vector<1x8x128xbf16>,
    %cst_315 = arith.constant 1.000000e+00 : f32
    %748 = vector.broadcast %cst_315 : f32 to vector<8x128xf32>
    %749 = arith.subf %739, %748 : vector<8x128xf32>
    %750 = arith.select %741, %749, %739 : vector<8x128xi1>, vector<8x128xf32>
    %751 = arith.addf %750, %665 : vector<8x128xf32>
    %cst_316 = arith.constant 1.000000e+00 : f32
    %752 = vector.broadcast %cst_316 : f32 to vector<8x128xf32>
    %753 = arith.cmpf oge, %751, %752 : vector<8x128xf32>
    %754 = arith.extui %753 : vector<8x128xi1> to vector<8x128xi32>
    %755 = arith.sitofp %754 : vector<8x128xi32> to vector<8x128xf32>
    %756 = arith.truncf %755 : vector<8x128xf32> to vector<8x128xbf16>
    %c0_317 = arith.constant 0 : index
    %c56_318 = arith.constant 56 : index
    %c896_319 = arith.constant 896 : index
    %757 = vector.load %arg10[%c0_317, %c56_318, %c896_319] : memref<1x64x1024xbf16, #tpu.memory_space<vmem>>, vector<1x8x128xbf16>
    %758 = vector.shape_cast %757 : vector<1x8x128xbf16> to vector<8x128xbf16>
    %759 = vector.shape_cast %756 : vector<8x128xbf16> to vector<1x8x128xbf16>
    tpu.vector_store %arg10[%c0_317, %c56_318, %c896_319], %759 {strides = array<i32>} : memref<1x64x1024xbf16, #tpu.memory_space<vmem>>, vector<1x8x128xbf16>,
    %c0_320 = arith.constant 0 : index
    %c0_321 = arith.constant 0 : index
    %c0_322 = arith.constant 0 : index
    %760 = vector.load %arg10[%c0_320, %c0_321, %c0_322] : memref<1x64x1024xbf16, #tpu.memory_space<vmem>>, vector<1x64x1024xbf16>
    %761 = vector.shape_cast %760 : vector<1x64x1024xbf16> to vector<64x1024xbf16>
    %c0_323 = arith.constant 0 : index
    %c0_324 = arith.constant 0 : index
    %762 = vector.load %arg2[%c0_323, %c0_324] : memref<1024x512xbf16, #tpu.memory_space<vmem>>, vector<1024x512xbf16>
    %cst_325 = arith.constant dense<0.000000e+00> : vector<64x512xf32>
    %763 = tpu.matmul %761, %762, %cst_325 {dimension_numbers = #tpu.dot_dimension_numbers<[1], [0], [0], [1], [0, 0, 1, 1], [], []>} : vector<64x1024xbf16>, vector<1024x512xbf16>, vector<64x512xf32> -> vector<64x512xf32>
    %c0_326 = arith.constant 0 : index
    %c0_327 = arith.constant 0 : index
    %764 = vector.load %arg3[%c0_326, %c0_327] : memref<1x512xf32, #tpu.memory_space<vmem>>, vector<1x512xf32>
    %765 = vector.broadcast %764 : vector<1x512xf32> to vector<64x512xf32>
    %766 = arith.addf %763, %765 : vector<64x512xf32>
    %c0_328 = arith.constant 0 : index
    %c0_329 = arith.constant 0 : index
    %c0_330 = arith.constant 0 : index
    %767 = vector.load %arg11[%c0_328, %c0_329, %c0_330] : memref<1x64x512xf32, #tpu.memory_space<vmem>>, vector<1x64x512xf32>
    %768 = vector.shape_cast %767 : vector<1x64x512xf32> to vector<64x512xf32>
    %769 = vector.shape_cast %766 : vector<64x512xf32> to vector<1x64x512xf32>
    tpu.vector_store %arg11[%c0_328, %c0_329, %c0_330], %769 {strides = array<i32>} : memref<1x64x512xf32, #tpu.memory_space<vmem>>, vector<1x64x512xf32>,
    %cst_331 = arith.constant 0.000000e+00 : f32
    %770 = vector.broadcast %cst_331 : f32 to vector<8x128xf32>
    %c0_332 = arith.constant 0 : index
    %c0_333 = arith.constant 0 : index
    %c0_334 = arith.constant 0 : index
    %771 = vector.load %arg11[%c0_332, %c0_333, %c0_334] : memref<1x64x512xf32, #tpu.memory_space<vmem>>, vector<1x8x128xf32>
    %772 = vector.shape_cast %771 : vector<1x8x128xf32> to vector<8x128xf32>
    %773 = arith.addf %770, %772 : vector<8x128xf32>
    %cst_335 = arith.constant 1.000000e+00 : f32
    %774 = vector.broadcast %cst_335 : f32 to vector<8x128xf32>
    %775 = arith.cmpf oge, %773, %774 : vector<8x128xf32>
    %776 = arith.extui %775 : vector<8x128xi1> to vector<8x128xi32>
    %777 = arith.sitofp %776 : vector<8x128xi32> to vector<8x128xf32>
    %778 = arith.truncf %777 : vector<8x128xf32> to vector<8x128xbf16>
    %c0_336 = arith.constant 0 : index
    %c0_337 = arith.constant 0 : index
    %c0_338 = arith.constant 0 : index
    %779 = vector.load %arg12[%c0_336, %c0_337, %c0_338] : memref<1x64x512xbf16, #tpu.memory_space<vmem>>, vector<1x8x128xbf16>
    %780 = vector.shape_cast %779 : vector<1x8x128xbf16> to vector<8x128xbf16>
    %781 = vector.shape_cast %778 : vector<8x128xbf16> to vector<1x8x128xbf16>
    tpu.vector_store %arg12[%c0_336, %c0_337, %c0_338], %781 {strides = array<i32>} : memref<1x64x512xbf16, #tpu.memory_space<vmem>>, vector<1x8x128xbf16>,
    %cst_339 = arith.constant 1.000000e+00 : f32
    %782 = vector.broadcast %cst_339 : f32 to vector<8x128xf32>
    %783 = arith.subf %773, %782 : vector<8x128xf32>
    %784 = arith.select %775, %783, %773 : vector<8x128xi1>, vector<8x128xf32>
    %c0_340 = arith.constant 0 : index
    %c8_341 = arith.constant 8 : index
    %c0_342 = arith.constant 0 : index
    %785 = vector.load %arg11[%c0_340, %c8_341, %c0_342] : memref<1x64x512xf32, #tpu.memory_space<vmem>>, vector<1x8x128xf32>
    %786 = vector.shape_cast %785 : vector<1x8x128xf32> to vector<8x128xf32>
    %787 = arith.addf %784, %786 : vector<8x128xf32>
    %cst_343 = arith.constant 1.000000e+00 : f32
    %788 = vector.broadcast %cst_343 : f32 to vector<8x128xf32>
    %789 = arith.cmpf oge, %787, %788 : vector<8x128xf32>
    %790 = arith.extui %789 : vector<8x128xi1> to vector<8x128xi32>
    %791 = arith.sitofp %790 : vector<8x128xi32> to vector<8x128xf32>
    %792 = arith.truncf %791 : vector<8x128xf32> to vector<8x128xbf16>
    %c0_344 = arith.constant 0 : index
    %c8_345 = arith.constant 8 : index
    %c0_346 = arith.constant 0 : index
    %793 = vector.load %arg12[%c0_344, %c8_345, %c0_346] : memref<1x64x512xbf16, #tpu.memory_space<vmem>>, vector<1x8x128xbf16>
    %794 = vector.shape_cast %793 : vector<1x8x128xbf16> to vector<8x128xbf16>
    %795 = vector.shape_cast %792 : vector<8x128xbf16> to vector<1x8x128xbf16>
    tpu.vector_store %arg12[%c0_344, %c8_345, %c0_346], %795 {strides = array<i32>} : memref<1x64x512xbf16, #tpu.memory_space<vmem>>, vector<1x8x128xbf16>,
    %cst_347 = arith.constant 1.000000e+00 : f32
    %796 = vector.broadcast %cst_347 : f32 to vector<8x128xf32>
    %797 = arith.subf %787, %796 : vector<8x128xf32>
    %798 = arith.select %789, %797, %787 : vector<8x128xi1>, vector<8x128xf32>
    %c0_348 = arith.constant 0 : index
    %c16_349 = arith.constant 16 : index
    %c0_350 = arith.constant 0 : index
    %799 = vector.load %arg11[%c0_348, %c16_349, %c0_350] : memref<1x64x512xf32, #tpu.memory_space<vmem>>, vector<1x8x128xf32>
    %800 = vector.shape_cast %799 : vector<1x8x128xf32> to vector<8x128xf32>
    %801 = arith.addf %798, %800 : vector<8x128xf32>
    %cst_351 = arith.constant 1.000000e+00 : f32
    %802 = vector.broadcast %cst_351 : f32 to vector<8x128xf32>
    %803 = arith.cmpf oge, %801, %802 : vector<8x128xf32>
    %804 = arith.extui %803 : vector<8x128xi1> to vector<8x128xi32>
    %805 = arith.sitofp %804 : vector<8x128xi32> to vector<8x128xf32>
    %806 = arith.truncf %805 : vector<8x128xf32> to vector<8x128xbf16>
    %c0_352 = arith.constant 0 : index
    %c16_353 = arith.constant 16 : index
    %c0_354 = arith.constant 0 : index
    %807 = vector.load %arg12[%c0_352, %c16_353, %c0_354] : memref<1x64x512xbf16, #tpu.memory_space<vmem>>, vector<1x8x128xbf16>
    %808 = vector.shape_cast %807 : vector<1x8x128xbf16> to vector<8x128xbf16>
    %809 = vector.shape_cast %806 : vector<8x128xbf16> to vector<1x8x128xbf16>
    tpu.vector_store %arg12[%c0_352, %c16_353, %c0_354], %809 {strides = array<i32>} : memref<1x64x512xbf16, #tpu.memory_space<vmem>>, vector<1x8x128xbf16>,
    %cst_355 = arith.constant 1.000000e+00 : f32
    %810 = vector.broadcast %cst_355 : f32 to vector<8x128xf32>
    %811 = arith.subf %801, %810 : vector<8x128xf32>
    %812 = arith.select %803, %811, %801 : vector<8x128xi1>, vector<8x128xf32>
    %c0_356 = arith.constant 0 : index
    %c24_357 = arith.constant 24 : index
    %c0_358 = arith.constant 0 : index
    %813 = vector.load %arg11[%c0_356, %c24_357, %c0_358] : memref<1x64x512xf32, #tpu.memory_space<vmem>>, vector<1x8x128xf32>
    %814 = vector.shape_cast %813 : vector<1x8x128xf32> to vector<8x128xf32>
    %815 = arith.addf %812, %814 : vector<8x128xf32>
    %cst_359 = arith.constant 1.000000e+00 : f32
    %816 = vector.broadcast %cst_359 : f32 to vector<8x128xf32>
    %817 = arith.cmpf oge, %815, %816 : vector<8x128xf32>
    %818 = arith.extui %817 : vector<8x128xi1> to vector<8x128xi32>
    %819 = arith.sitofp %818 : vector<8x128xi32> to vector<8x128xf32>
    %820 = arith.truncf %819 : vector<8x128xf32> to vector<8x128xbf16>
    %c0_360 = arith.constant 0 : index
    %c24_361 = arith.constant 24 : index
    %c0_362 = arith.constant 0 : index
    %821 = vector.load %arg12[%c0_360, %c24_361, %c0_362] : memref<1x64x512xbf16, #tpu.memory_space<vmem>>, vector<1x8x128xbf16>
    %822 = vector.shape_cast %821 : vector<1x8x128xbf16> to vector<8x128xbf16>
    %823 = vector.shape_cast %820 : vector<8x128xbf16> to vector<1x8x128xbf16>
    tpu.vector_store %arg12[%c0_360, %c24_361, %c0_362], %823 {strides = array<i32>} : memref<1x64x512xbf16, #tpu.memory_space<vmem>>, vector<1x8x128xbf16>,
    %cst_363 = arith.constant 1.000000e+00 : f32
    %824 = vector.broadcast %cst_363 : f32 to vector<8x128xf32>
    %825 = arith.subf %815, %824 : vector<8x128xf32>
    %826 = arith.select %817, %825, %815 : vector<8x128xi1>, vector<8x128xf32>
    %c0_364 = arith.constant 0 : index
    %c32_365 = arith.constant 32 : index
    %c0_366 = arith.constant 0 : index
    %827 = vector.load %arg11[%c0_364, %c32_365, %c0_366] : memref<1x64x512xf32, #tpu.memory_space<vmem>>, vector<1x8x128xf32>
    %828 = vector.shape_cast %827 : vector<1x8x128xf32> to vector<8x128xf32>
    %829 = arith.addf %826, %828 : vector<8x128xf32>
    %cst_367 = arith.constant 1.000000e+00 : f32
    %830 = vector.broadcast %cst_367 : f32 to vector<8x128xf32>
    %831 = arith.cmpf oge, %829, %830 : vector<8x128xf32>
    %832 = arith.extui %831 : vector<8x128xi1> to vector<8x128xi32>
    %833 = arith.sitofp %832 : vector<8x128xi32> to vector<8x128xf32>
    %834 = arith.truncf %833 : vector<8x128xf32> to vector<8x128xbf16>
    %c0_368 = arith.constant 0 : index
    %c32_369 = arith.constant 32 : index
    %c0_370 = arith.constant 0 : index
    %835 = vector.load %arg12[%c0_368, %c32_369, %c0_370] : memref<1x64x512xbf16, #tpu.memory_space<vmem>>, vector<1x8x128xbf16>
    %836 = vector.shape_cast %835 : vector<1x8x128xbf16> to vector<8x128xbf16>
    %837 = vector.shape_cast %834 : vector<8x128xbf16> to vector<1x8x128xbf16>
    tpu.vector_store %arg12[%c0_368, %c32_369, %c0_370], %837 {strides = array<i32>} : memref<1x64x512xbf16, #tpu.memory_space<vmem>>, vector<1x8x128xbf16>,
    %cst_371 = arith.constant 1.000000e+00 : f32
    %838 = vector.broadcast %cst_371 : f32 to vector<8x128xf32>
    %839 = arith.subf %829, %838 : vector<8x128xf32>
    %840 = arith.select %831, %839, %829 : vector<8x128xi1>, vector<8x128xf32>
    %c0_372 = arith.constant 0 : index
    %c40_373 = arith.constant 40 : index
    %c0_374 = arith.constant 0 : index
    %841 = vector.load %arg11[%c0_372, %c40_373, %c0_374] : memref<1x64x512xf32, #tpu.memory_space<vmem>>, vector<1x8x128xf32>
    %842 = vector.shape_cast %841 : vector<1x8x128xf32> to vector<8x128xf32>
    %843 = arith.addf %840, %842 : vector<8x128xf32>
    %cst_375 = arith.constant 1.000000e+00 : f32
    %844 = vector.broadcast %cst_375 : f32 to vector<8x128xf32>
    %845 = arith.cmpf oge, %843, %844 : vector<8x128xf32>
    %846 = arith.extui %845 : vector<8x128xi1> to vector<8x128xi32>
    %847 = arith.sitofp %846 : vector<8x128xi32> to vector<8x128xf32>
    %848 = arith.truncf %847 : vector<8x128xf32> to vector<8x128xbf16>
    %c0_376 = arith.constant 0 : index
    %c40_377 = arith.constant 40 : index
    %c0_378 = arith.constant 0 : index
    %849 = vector.load %arg12[%c0_376, %c40_377, %c0_378] : memref<1x64x512xbf16, #tpu.memory_space<vmem>>, vector<1x8x128xbf16>
    %850 = vector.shape_cast %849 : vector<1x8x128xbf16> to vector<8x128xbf16>
    %851 = vector.shape_cast %848 : vector<8x128xbf16> to vector<1x8x128xbf16>
    tpu.vector_store %arg12[%c0_376, %c40_377, %c0_378], %851 {strides = array<i32>} : memref<1x64x512xbf16, #tpu.memory_space<vmem>>, vector<1x8x128xbf16>,
    %cst_379 = arith.constant 1.000000e+00 : f32
    %852 = vector.broadcast %cst_379 : f32 to vector<8x128xf32>
    %853 = arith.subf %843, %852 : vector<8x128xf32>
    %854 = arith.select %845, %853, %843 : vector<8x128xi1>, vector<8x128xf32>
    %c0_380 = arith.constant 0 : index
    %c48_381 = arith.constant 48 : index
    %c0_382 = arith.constant 0 : index
    %855 = vector.load %arg11[%c0_380, %c48_381, %c0_382] : memref<1x64x512xf32, #tpu.memory_space<vmem>>, vector<1x8x128xf32>
    %856 = vector.shape_cast %855 : vector<1x8x128xf32> to vector<8x128xf32>
    %857 = arith.addf %854, %856 : vector<8x128xf32>
    %cst_383 = arith.constant 1.000000e+00 : f32
    %858 = vector.broadcast %cst_383 : f32 to vector<8x128xf32>
    %859 = arith.cmpf oge, %857, %858 : vector<8x128xf32>
    %860 = arith.extui %859 : vector<8x128xi1> to vector<8x128xi32>
    %861 = arith.sitofp %860 : vector<8x128xi32> to vector<8x128xf32>
    %862 = arith.truncf %861 : vector<8x128xf32> to vector<8x128xbf16>
    %c0_384 = arith.constant 0 : index
    %c48_385 = arith.constant 48 : index
    %c0_386 = arith.constant 0 : index
    %863 = vector.load %arg12[%c0_384, %c48_385, %c0_386] : memref<1x64x512xbf16, #tpu.memory_space<vmem>>, vector<1x8x128xbf16>
    %864 = vector.shape_cast %863 : vector<1x8x128xbf16> to vector<8x128xbf16>
    %865 = vector.shape_cast %862 : vector<8x128xbf16> to vector<1x8x128xbf16>
    tpu.vector_store %arg12[%c0_384, %c48_385, %c0_386], %865 {strides = array<i32>} : memref<1x64x512xbf16, #tpu.memory_space<vmem>>, vector<1x8x128xbf16>,
    %cst_387 = arith.constant 1.000000e+00 : f32
    %866 = vector.broadcast %cst_387 : f32 to vector<8x128xf32>
    %867 = arith.subf %857, %866 : vector<8x128xf32>
    %868 = arith.select %859, %867, %857 : vector<8x128xi1>, vector<8x128xf32>
    %c0_388 = arith.constant 0 : index
    %c56_389 = arith.constant 56 : index
    %c0_390 = arith.constant 0 : index
    %869 = vector.load %arg11[%c0_388, %c56_389, %c0_390] : memref<1x64x512xf32, #tpu.memory_space<vmem>>, vector<1x8x128xf32>
    %870 = vector.shape_cast %869 : vector<1x8x128xf32> to vector<8x128xf32>
    %871 = arith.addf %868, %870 : vector<8x128xf32>
    %cst_391 = arith.constant 1.000000e+00 : f32
    %872 = vector.broadcast %cst_391 : f32 to vector<8x128xf32>
    %873 = arith.cmpf oge, %871, %872 : vector<8x128xf32>
    %874 = arith.extui %873 : vector<8x128xi1> to vector<8x128xi32>
    %875 = arith.sitofp %874 : vector<8x128xi32> to vector<8x128xf32>
    %876 = arith.truncf %875 : vector<8x128xf32> to vector<8x128xbf16>
    %c0_392 = arith.constant 0 : index
    %c56_393 = arith.constant 56 : index
    %c0_394 = arith.constant 0 : index
    %877 = vector.load %arg12[%c0_392, %c56_393, %c0_394] : memref<1x64x512xbf16, #tpu.memory_space<vmem>>, vector<1x8x128xbf16>
    %878 = vector.shape_cast %877 : vector<1x8x128xbf16> to vector<8x128xbf16>
    %879 = vector.shape_cast %876 : vector<8x128xbf16> to vector<1x8x128xbf16>
    tpu.vector_store %arg12[%c0_392, %c56_393, %c0_394], %879 {strides = array<i32>} : memref<1x64x512xbf16, #tpu.memory_space<vmem>>, vector<1x8x128xbf16>,
    %cst_395 = arith.constant 0.000000e+00 : f32
    %880 = vector.broadcast %cst_395 : f32 to vector<8x128xf32>
    %c0_396 = arith.constant 0 : index
    %c0_397 = arith.constant 0 : index
    %c128_398 = arith.constant 128 : index
    %881 = vector.load %arg11[%c0_396, %c0_397, %c128_398] : memref<1x64x512xf32, #tpu.memory_space<vmem>>, vector<1x8x128xf32>
    %882 = vector.shape_cast %881 : vector<1x8x128xf32> to vector<8x128xf32>
    %883 = arith.addf %880, %882 : vector<8x128xf32>
    %cst_399 = arith.constant 1.000000e+00 : f32
    %884 = vector.broadcast %cst_399 : f32 to vector<8x128xf32>
    %885 = arith.cmpf oge, %883, %884 : vector<8x128xf32>
    %886 = arith.extui %885 : vector<8x128xi1> to vector<8x128xi32>
    %887 = arith.sitofp %886 : vector<8x128xi32> to vector<8x128xf32>
    %888 = arith.truncf %887 : vector<8x128xf32> to vector<8x128xbf16>
    %c0_400 = arith.constant 0 : index
    %c0_401 = arith.constant 0 : index
    %c128_402 = arith.constant 128 : index
    %889 = vector.load %arg12[%c0_400, %c0_401, %c128_402] : memref<1x64x512xbf16, #tpu.memory_space<vmem>>, vector<1x8x128xbf16>
    %890 = vector.shape_cast %889 : vector<1x8x128xbf16> to vector<8x128xbf16>
    %891 = vector.shape_cast %888 : vector<8x128xbf16> to vector<1x8x128xbf16>
    tpu.vector_store %arg12[%c0_400, %c0_401, %c128_402], %891 {strides = array<i32>} : memref<1x64x512xbf16, #tpu.memory_space<vmem>>, vector<1x8x128xbf16>,
    %cst_403 = arith.constant 1.000000e+00 : f32
    %892 = vector.broadcast %cst_403 : f32 to vector<8x128xf32>
    %893 = arith.subf %883, %892 : vector<8x128xf32>
    %894 = arith.select %885, %893, %883 : vector<8x128xi1>, vector<8x128xf32>
    %c0_404 = arith.constant 0 : index
    %c8_405 = arith.constant 8 : index
    %c128_406 = arith.constant 128 : index
    %895 = vector.load %arg11[%c0_404, %c8_405, %c128_406] : memref<1x64x512xf32, #tpu.memory_space<vmem>>, vector<1x8x128xf32>
    %896 = vector.shape_cast %895 : vector<1x8x128xf32> to vector<8x128xf32>
    %897 = arith.addf %894, %896 : vector<8x128xf32>
    %cst_407 = arith.constant 1.000000e+00 : f32
    %898 = vector.broadcast %cst_407 : f32 to vector<8x128xf32>
    %899 = arith.cmpf oge, %897, %898 : vector<8x128xf32>
    %900 = arith.extui %899 : vector<8x128xi1> to vector<8x128xi32>
    %901 = arith.sitofp %900 : vector<8x128xi32> to vector<8x128xf32>
    %902 = arith.truncf %901 : vector<8x128xf32> to vector<8x128xbf16>
    %c0_408 = arith.constant 0 : index
    %c8_409 = arith.constant 8 : index
    %c128_410 = arith.constant 128 : index
    %903 = vector.load %arg12[%c0_408, %c8_409, %c128_410] : memref<1x64x512xbf16, #tpu.memory_space<vmem>>, vector<1x8x128xbf16>
    %904 = vector.shape_cast %903 : vector<1x8x128xbf16> to vector<8x128xbf16>
    %905 = vector.shape_cast %902 : vector<8x128xbf16> to vector<1x8x128xbf16>
    tpu.vector_store %arg12[%c0_408, %c8_409, %c128_410], %905 {strides = array<i32>} : memref<1x64x512xbf16, #tpu.memory_space<vmem>>, vector<1x8x128xbf16>,
    %cst_411 = arith.constant 1.000000e+00 : f32
    %906 = vector.broadcast %cst_411 : f32 to vector<8x128xf32>
    %907 = arith.subf %897, %906 : vector<8x128xf32>
    %908 = arith.select %899, %907, %897 : vector<8x128xi1>, vector<8x128xf32>
    %c0_412 = arith.constant 0 : index
    %c16_413 = arith.constant 16 : index
    %c128_414 = arith.constant 128 : index
    %909 = vector.load %arg11[%c0_412, %c16_413, %c128_414] : memref<1x64x512xf32, #tpu.memory_space<vmem>>, vector<1x8x128xf32>
    %910 = vector.shape_cast %909 : vector<1x8x128xf32> to vector<8x128xf32>
    %911 = arith.addf %908, %910 : vector<8x128xf32>
    %cst_415 = arith.constant 1.000000e+00 : f32
    %912 = vector.broadcast %cst_415 : f32 to vector<8x128xf32>
    %913 = arith.cmpf oge, %911, %912 : vector<8x128xf32>
    %914 = arith.extui %913 : vector<8x128xi1> to vector<8x128xi32>
    %915 = arith.sitofp %914 : vector<8x128xi32> to vector<8x128xf32>
    %916 = arith.truncf %915 : vector<8x128xf32> to vector<8x128xbf16>
    %c0_416 = arith.constant 0 : index
    %c16_417 = arith.constant 16 : index
    %c128_418 = arith.constant 128 : index
    %917 = vector.load %arg12[%c0_416, %c16_417, %c128_418] : memref<1x64x512xbf16, #tpu.memory_space<vmem>>, vector<1x8x128xbf16>
    %918 = vector.shape_cast %917 : vector<1x8x128xbf16> to vector<8x128xbf16>
    %919 = vector.shape_cast %916 : vector<8x128xbf16> to vector<1x8x128xbf16>
    tpu.vector_store %arg12[%c0_416, %c16_417, %c128_418], %919 {strides = array<i32>} : memref<1x64x512xbf16, #tpu.memory_space<vmem>>, vector<1x8x128xbf16>,
    %cst_419 = arith.constant 1.000000e+00 : f32
    %920 = vector.broadcast %cst_419 : f32 to vector<8x128xf32>
    %921 = arith.subf %911, %920 : vector<8x128xf32>
    %922 = arith.select %913, %921, %911 : vector<8x128xi1>, vector<8x128xf32>
    %c0_420 = arith.constant 0 : index
    %c24_421 = arith.constant 24 : index
    %c128_422 = arith.constant 128 : index
    %923 = vector.load %arg11[%c0_420, %c24_421, %c128_422] : memref<1x64x512xf32, #tpu.memory_space<vmem>>, vector<1x8x128xf32>
    %924 = vector.shape_cast %923 : vector<1x8x128xf32> to vector<8x128xf32>
    %925 = arith.addf %922, %924 : vector<8x128xf32>
    %cst_423 = arith.constant 1.000000e+00 : f32
    %926 = vector.broadcast %cst_423 : f32 to vector<8x128xf32>
    %927 = arith.cmpf oge, %925, %926 : vector<8x128xf32>
    %928 = arith.extui %927 : vector<8x128xi1> to vector<8x128xi32>
    %929 = arith.sitofp %928 : vector<8x128xi32> to vector<8x128xf32>
    %930 = arith.truncf %929 : vector<8x128xf32> to vector<8x128xbf16>
    %c0_424 = arith.constant 0 : index
    %c24_425 = arith.constant 24 : index
    %c128_426 = arith.constant 128 : index
    %931 = vector.load %arg12[%c0_424, %c24_425, %c128_426] : memref<1x64x512xbf16, #tpu.memory_space<vmem>>, vector<1x8x128xbf16>
    %932 = vector.shape_cast %931 : vector<1x8x128xbf16> to vector<8x128xbf16>
    %933 = vector.shape_cast %930 : vector<8x128xbf16> to vector<1x8x128xbf16>
    tpu.vector_store %arg12[%c0_424, %c24_425, %c128_426], %933 {strides = array<i32>} : memref<1x64x512xbf16, #tpu.memory_space<vmem>>, vector<1x8x128xbf16>,
    %cst_427 = arith.constant 1.000000e+00 : f32
    %934 = vector.broadcast %cst_427 : f32 to vector<8x128xf32>
    %935 = arith.subf %925, %934 : vector<8x128xf32>
    %936 = arith.select %927, %935, %925 : vector<8x128xi1>, vector<8x128xf32>
    %c0_428 = arith.constant 0 : index
    %c32_429 = arith.constant 32 : index
    %c128_430 = arith.constant 128 : index
    %937 = vector.load %arg11[%c0_428, %c32_429, %c128_430] : memref<1x64x512xf32, #tpu.memory_space<vmem>>, vector<1x8x128xf32>
    %938 = vector.shape_cast %937 : vector<1x8x128xf32> to vector<8x128xf32>
    %939 = arith.addf %936, %938 : vector<8x128xf32>
    %cst_431 = arith.constant 1.000000e+00 : f32
    %940 = vector.broadcast %cst_431 : f32 to vector<8x128xf32>
    %941 = arith.cmpf oge, %939, %940 : vector<8x128xf32>
    %942 = arith.extui %941 : vector<8x128xi1> to vector<8x128xi32>
    %943 = arith.sitofp %942 : vector<8x128xi32> to vector<8x128xf32>
    %944 = arith.truncf %943 : vector<8x128xf32> to vector<8x128xbf16>
    %c0_432 = arith.constant 0 : index
    %c32_433 = arith.constant 32 : index
    %c128_434 = arith.constant 128 : index
    %945 = vector.load %arg12[%c0_432, %c32_433, %c128_434] : memref<1x64x512xbf16, #tpu.memory_space<vmem>>, vector<1x8x128xbf16>
    %946 = vector.shape_cast %945 : vector<1x8x128xbf16> to vector<8x128xbf16>
    %947 = vector.shape_cast %944 : vector<8x128xbf16> to vector<1x8x128xbf16>
    tpu.vector_store %arg12[%c0_432, %c32_433, %c128_434], %947 {strides = array<i32>} : memref<1x64x512xbf16, #tpu.memory_space<vmem>>, vector<1x8x128xbf16>,
    %cst_435 = arith.constant 1.000000e+00 : f32
    %948 = vector.broadcast %cst_435 : f32 to vector<8x128xf32>
    %949 = arith.subf %939, %948 : vector<8x128xf32>
    %950 = arith.select %941, %949, %939 : vector<8x128xi1>, vector<8x128xf32>
    %c0_436 = arith.constant 0 : index
    %c40_437 = arith.constant 40 : index
    %c128_438 = arith.constant 128 : index
    %951 = vector.load %arg11[%c0_436, %c40_437, %c128_438] : memref<1x64x512xf32, #tpu.memory_space<vmem>>, vector<1x8x128xf32>
    %952 = vector.shape_cast %951 : vector<1x8x128xf32> to vector<8x128xf32>
    %953 = arith.addf %950, %952 : vector<8x128xf32>
    %cst_439 = arith.constant 1.000000e+00 : f32
    %954 = vector.broadcast %cst_439 : f32 to vector<8x128xf32>
    %955 = arith.cmpf oge, %953, %954 : vector<8x128xf32>
    %956 = arith.extui %955 : vector<8x128xi1> to vector<8x128xi32>
    %957 = arith.sitofp %956 : vector<8x128xi32> to vector<8x128xf32>
    %958 = arith.truncf %957 : vector<8x128xf32> to vector<8x128xbf16>
    %c0_440 = arith.constant 0 : index
    %c40_441 = arith.constant 40 : index
    %c128_442 = arith.constant 128 : index
    %959 = vector.load %arg12[%c0_440, %c40_441, %c128_442] : memref<1x64x512xbf16, #tpu.memory_space<vmem>>, vector<1x8x128xbf16>
    %960 = vector.shape_cast %959 : vector<1x8x128xbf16> to vector<8x128xbf16>
    %961 = vector.shape_cast %958 : vector<8x128xbf16> to vector<1x8x128xbf16>
    tpu.vector_store %arg12[%c0_440, %c40_441, %c128_442], %961 {strides = array<i32>} : memref<1x64x512xbf16, #tpu.memory_space<vmem>>, vector<1x8x128xbf16>,
    %cst_443 = arith.constant 1.000000e+00 : f32
    %962 = vector.broadcast %cst_443 : f32 to vector<8x128xf32>
    %963 = arith.subf %953, %962 : vector<8x128xf32>
    %964 = arith.select %955, %963, %953 : vector<8x128xi1>, vector<8x128xf32>
    %c0_444 = arith.constant 0 : index
    %c48_445 = arith.constant 48 : index
    %c128_446 = arith.constant 128 : index
    %965 = vector.load %arg11[%c0_444, %c48_445, %c128_446] : memref<1x64x512xf32, #tpu.memory_space<vmem>>, vector<1x8x128xf32>
    %966 = vector.shape_cast %965 : vector<1x8x128xf32> to vector<8x128xf32>
    %967 = arith.addf %964, %966 : vector<8x128xf32>
    %cst_447 = arith.constant 1.000000e+00 : f32
    %968 = vector.broadcast %cst_447 : f32 to vector<8x128xf32>
    %969 = arith.cmpf oge, %967, %968 : vector<8x128xf32>
    %970 = arith.extui %969 : vector<8x128xi1> to vector<8x128xi32>
    %971 = arith.sitofp %970 : vector<8x128xi32> to vector<8x128xf32>
    %972 = arith.truncf %971 : vector<8x128xf32> to vector<8x128xbf16>
    %c0_448 = arith.constant 0 : index
    %c48_449 = arith.constant 48 : index
    %c128_450 = arith.constant 128 : index
    %973 = vector.load %arg12[%c0_448, %c48_449, %c128_450] : memref<1x64x512xbf16, #tpu.memory_space<vmem>>, vector<1x8x128xbf16>
    %974 = vector.shape_cast %973 : vector<1x8x128xbf16> to vector<8x128xbf16>
    %975 = vector.shape_cast %972 : vector<8x128xbf16> to vector<1x8x128xbf16>
    tpu.vector_store %arg12[%c0_448, %c48_449, %c128_450], %975 {strides = array<i32>} : memref<1x64x512xbf16, #tpu.memory_space<vmem>>, vector<1x8x128xbf16>,
    %cst_451 = arith.constant 1.000000e+00 : f32
    %976 = vector.broadcast %cst_451 : f32 to vector<8x128xf32>
    %977 = arith.subf %967, %976 : vector<8x128xf32>
    %978 = arith.select %969, %977, %967 : vector<8x128xi1>, vector<8x128xf32>
    %c0_452 = arith.constant 0 : index
    %c56_453 = arith.constant 56 : index
    %c128_454 = arith.constant 128 : index
    %979 = vector.load %arg11[%c0_452, %c56_453, %c128_454] : memref<1x64x512xf32, #tpu.memory_space<vmem>>, vector<1x8x128xf32>
    %980 = vector.shape_cast %979 : vector<1x8x128xf32> to vector<8x128xf32>
    %981 = arith.addf %978, %980 : vector<8x128xf32>
    %cst_455 = arith.constant 1.000000e+00 : f32
    %982 = vector.broadcast %cst_455 : f32 to vector<8x128xf32>
    %983 = arith.cmpf oge, %981, %982 : vector<8x128xf32>
    %984 = arith.extui %983 : vector<8x128xi1> to vector<8x128xi32>
    %985 = arith.sitofp %984 : vector<8x128xi32> to vector<8x128xf32>
    %986 = arith.truncf %985 : vector<8x128xf32> to vector<8x128xbf16>
    %c0_456 = arith.constant 0 : index
    %c56_457 = arith.constant 56 : index
    %c128_458 = arith.constant 128 : index
    %987 = vector.load %arg12[%c0_456, %c56_457, %c128_458] : memref<1x64x512xbf16, #tpu.memory_space<vmem>>, vector<1x8x128xbf16>
    %988 = vector.shape_cast %987 : vector<1x8x128xbf16> to vector<8x128xbf16>
    %989 = vector.shape_cast %986 : vector<8x128xbf16> to vector<1x8x128xbf16>
    tpu.vector_store %arg12[%c0_456, %c56_457, %c128_458], %989 {strides = array<i32>} : memref<1x64x512xbf16, #tpu.memory_space<vmem>>, vector<1x8x128xbf16>,
    %cst_459 = arith.constant 0.000000e+00 : f32
    %990 = vector.broadcast %cst_459 : f32 to vector<8x128xf32>
    %c0_460 = arith.constant 0 : index
    %c0_461 = arith.constant 0 : index
    %c256_462 = arith.constant 256 : index
    %991 = vector.load %arg11[%c0_460, %c0_461, %c256_462] : memref<1x64x512xf32, #tpu.memory_space<vmem>>, vector<1x8x128xf32>
    %992 = vector.shape_cast %991 : vector<1x8x128xf32> to vector<8x128xf32>
    %993 = arith.addf %990, %992 : vector<8x128xf32>
    %cst_463 = arith.constant 1.000000e+00 : f32
    %994 = vector.broadcast %cst_463 : f32 to vector<8x128xf32>
    %995 = arith.cmpf oge, %993, %994 : vector<8x128xf32>
    %996 = arith.extui %995 : vector<8x128xi1> to vector<8x128xi32>
    %997 = arith.sitofp %996 : vector<8x128xi32> to vector<8x128xf32>
    %998 = arith.truncf %997 : vector<8x128xf32> to vector<8x128xbf16>
    %c0_464 = arith.constant 0 : index
    %c0_465 = arith.constant 0 : index
    %c256_466 = arith.constant 256 : index
    %999 = vector.load %arg12[%c0_464, %c0_465, %c256_466] : memref<1x64x512xbf16, #tpu.memory_space<vmem>>, vector<1x8x128xbf16>
    %1000 = vector.shape_cast %999 : vector<1x8x128xbf16> to vector<8x128xbf16>
    %1001 = vector.shape_cast %998 : vector<8x128xbf16> to vector<1x8x128xbf16>
    tpu.vector_store %arg12[%c0_464, %c0_465, %c256_466], %1001 {strides = array<i32>} : memref<1x64x512xbf16, #tpu.memory_space<vmem>>, vector<1x8x128xbf16>,
    %cst_467 = arith.constant 1.000000e+00 : f32
    %1002 = vector.broadcast %cst_467 : f32 to vector<8x128xf32>
    %1003 = arith.subf %993, %1002 : vector<8x128xf32>
    %1004 = arith.select %995, %1003, %993 : vector<8x128xi1>, vector<8x128xf32>
    %c0_468 = arith.constant 0 : index
    %c8_469 = arith.constant 8 : index
    %c256_470 = arith.constant 256 : index
    %1005 = vector.load %arg11[%c0_468, %c8_469, %c256_470] : memref<1x64x512xf32, #tpu.memory_space<vmem>>, vector<1x8x128xf32>
    %1006 = vector.shape_cast %1005 : vector<1x8x128xf32> to vector<8x128xf32>
    %1007 = arith.addf %1004, %1006 : vector<8x128xf32>
    %cst_471 = arith.constant 1.000000e+00 : f32
    %1008 = vector.broadcast %cst_471 : f32 to vector<8x128xf32>
    %1009 = arith.cmpf oge, %1007, %1008 : vector<8x128xf32>
    %1010 = arith.extui %1009 : vector<8x128xi1> to vector<8x128xi32>
    %1011 = arith.sitofp %1010 : vector<8x128xi32> to vector<8x128xf32>
    %1012 = arith.truncf %1011 : vector<8x128xf32> to vector<8x128xbf16>
    %c0_472 = arith.constant 0 : index
    %c8_473 = arith.constant 8 : index
    %c256_474 = arith.constant 256 : index
    %1013 = vector.load %arg12[%c0_472, %c8_473, %c256_474] : memref<1x64x512xbf16, #tpu.memory_space<vmem>>, vector<1x8x128xbf16>
    %1014 = vector.shape_cast %1013 : vector<1x8x128xbf16> to vector<8x128xbf16>
    %1015 = vector.shape_cast %1012 : vector<8x128xbf16> to vector<1x8x128xbf16>
    tpu.vector_store %arg12[%c0_472, %c8_473, %c256_474], %1015 {strides = array<i32>} : memref<1x64x512xbf16, #tpu.memory_space<vmem>>, vector<1x8x128xbf16>,
    %cst_475 = arith.constant 1.000000e+00 : f32
    %1016 = vector.broadcast %cst_475 : f32 to vector<8x128xf32>
    %1017 = arith.subf %1007, %1016 : vector<8x128xf32>
    %1018 = arith.select %1009, %1017, %1007 : vector<8x128xi1>, vector<8x128xf32>
    %c0_476 = arith.constant 0 : index
    %c16_477 = arith.constant 16 : index
    %c256_478 = arith.constant 256 : index
    %1019 = vector.load %arg11[%c0_476, %c16_477, %c256_478] : memref<1x64x512xf32, #tpu.memory_space<vmem>>, vector<1x8x128xf32>
    %1020 = vector.shape_cast %1019 : vector<1x8x128xf32> to vector<8x128xf32>
    %1021 = arith.addf %1018, %1020 : vector<8x128xf32>
    %cst_479 = arith.constant 1.000000e+00 : f32
    %1022 = vector.broadcast %cst_479 : f32 to vector<8x128xf32>
    %1023 = arith.cmpf oge, %1021, %1022 : vector<8x128xf32>
    %1024 = arith.extui %1023 : vector<8x128xi1> to vector<8x128xi32>
    %1025 = arith.sitofp %1024 : vector<8x128xi32> to vector<8x128xf32>
    %1026 = arith.truncf %1025 : vector<8x128xf32> to vector<8x128xbf16>
    %c0_480 = arith.constant 0 : index
    %c16_481 = arith.constant 16 : index
    %c256_482 = arith.constant 256 : index
    %1027 = vector.load %arg12[%c0_480, %c16_481, %c256_482] : memref<1x64x512xbf16, #tpu.memory_space<vmem>>, vector<1x8x128xbf16>
    %1028 = vector.shape_cast %1027 : vector<1x8x128xbf16> to vector<8x128xbf16>
    %1029 = vector.shape_cast %1026 : vector<8x128xbf16> to vector<1x8x128xbf16>
    tpu.vector_store %arg12[%c0_480, %c16_481, %c256_482], %1029 {strides = array<i32>} : memref<1x64x512xbf16, #tpu.memory_space<vmem>>, vector<1x8x128xbf16>,
    %cst_483 = arith.constant 1.000000e+00 : f32
    %1030 = vector.broadcast %cst_483 : f32 to vector<8x128xf32>
    %1031 = arith.subf %1021, %1030 : vector<8x128xf32>
    %1032 = arith.select %1023, %1031, %1021 : vector<8x128xi1>, vector<8x128xf32>
    %c0_484 = arith.constant 0 : index
    %c24_485 = arith.constant 24 : index
    %c256_486 = arith.constant 256 : index
    %1033 = vector.load %arg11[%c0_484, %c24_485, %c256_486] : memref<1x64x512xf32, #tpu.memory_space<vmem>>, vector<1x8x128xf32>
    %1034 = vector.shape_cast %1033 : vector<1x8x128xf32> to vector<8x128xf32>
    %1035 = arith.addf %1032, %1034 : vector<8x128xf32>
    %cst_487 = arith.constant 1.000000e+00 : f32
    %1036 = vector.broadcast %cst_487 : f32 to vector<8x128xf32>
    %1037 = arith.cmpf oge, %1035, %1036 : vector<8x128xf32>
    %1038 = arith.extui %1037 : vector<8x128xi1> to vector<8x128xi32>
    %1039 = arith.sitofp %1038 : vector<8x128xi32> to vector<8x128xf32>
    %1040 = arith.truncf %1039 : vector<8x128xf32> to vector<8x128xbf16>
    %c0_488 = arith.constant 0 : index
    %c24_489 = arith.constant 24 : index
    %c256_490 = arith.constant 256 : index
    %1041 = vector.load %arg12[%c0_488, %c24_489, %c256_490] : memref<1x64x512xbf16, #tpu.memory_space<vmem>>, vector<1x8x128xbf16>
    %1042 = vector.shape_cast %1041 : vector<1x8x128xbf16> to vector<8x128xbf16>
    %1043 = vector.shape_cast %1040 : vector<8x128xbf16> to vector<1x8x128xbf16>
    tpu.vector_store %arg12[%c0_488, %c24_489, %c256_490], %1043 {strides = array<i32>} : memref<1x64x512xbf16, #tpu.memory_space<vmem>>, vector<1x8x128xbf16>,
    %cst_491 = arith.constant 1.000000e+00 : f32
    %1044 = vector.broadcast %cst_491 : f32 to vector<8x128xf32>
    %1045 = arith.subf %1035, %1044 : vector<8x128xf32>
    %1046 = arith.select %1037, %1045, %1035 : vector<8x128xi1>, vector<8x128xf32>
    %c0_492 = arith.constant 0 : index
    %c32_493 = arith.constant 32 : index
    %c256_494 = arith.constant 256 : index
    %1047 = vector.load %arg11[%c0_492, %c32_493, %c256_494] : memref<1x64x512xf32, #tpu.memory_space<vmem>>, vector<1x8x128xf32>
    %1048 = vector.shape_cast %1047 : vector<1x8x128xf32> to vector<8x128xf32>
    %1049 = arith.addf %1046, %1048 : vector<8x128xf32>
    %cst_495 = arith.constant 1.000000e+00 : f32
    %1050 = vector.broadcast %cst_495 : f32 to vector<8x128xf32>
    %1051 = arith.cmpf oge, %1049, %1050 : vector<8x128xf32>
    %1052 = arith.extui %1051 : vector<8x128xi1> to vector<8x128xi32>
    %1053 = arith.sitofp %1052 : vector<8x128xi32> to vector<8x128xf32>
    %1054 = arith.truncf %1053 : vector<8x128xf32> to vector<8x128xbf16>
    %c0_496 = arith.constant 0 : index
    %c32_497 = arith.constant 32 : index
    %c256_498 = arith.constant 256 : index
    %1055 = vector.load %arg12[%c0_496, %c32_497, %c256_498] : memref<1x64x512xbf16, #tpu.memory_space<vmem>>, vector<1x8x128xbf16>
    %1056 = vector.shape_cast %1055 : vector<1x8x128xbf16> to vector<8x128xbf16>
    %1057 = vector.shape_cast %1054 : vector<8x128xbf16> to vector<1x8x128xbf16>
    tpu.vector_store %arg12[%c0_496, %c32_497, %c256_498], %1057 {strides = array<i32>} : memref<1x64x512xbf16, #tpu.memory_space<vmem>>, vector<1x8x128xbf16>,
    %cst_499 = arith.constant 1.000000e+00 : f32
    %1058 = vector.broadcast %cst_499 : f32 to vector<8x128xf32>
    %1059 = arith.subf %1049, %1058 : vector<8x128xf32>
    %1060 = arith.select %1051, %1059, %1049 : vector<8x128xi1>, vector<8x128xf32>
    %c0_500 = arith.constant 0 : index
    %c40_501 = arith.constant 40 : index
    %c256_502 = arith.constant 256 : index
    %1061 = vector.load %arg11[%c0_500, %c40_501, %c256_502] : memref<1x64x512xf32, #tpu.memory_space<vmem>>, vector<1x8x128xf32>
    %1062 = vector.shape_cast %1061 : vector<1x8x128xf32> to vector<8x128xf32>
    %1063 = arith.addf %1060, %1062 : vector<8x128xf32>
    %cst_503 = arith.constant 1.000000e+00 : f32
    %1064 = vector.broadcast %cst_503 : f32 to vector<8x128xf32>
    %1065 = arith.cmpf oge, %1063, %1064 : vector<8x128xf32>
    %1066 = arith.extui %1065 : vector<8x128xi1> to vector<8x128xi32>
    %1067 = arith.sitofp %1066 : vector<8x128xi32> to vector<8x128xf32>
    %1068 = arith.truncf %1067 : vector<8x128xf32> to vector<8x128xbf16>
    %c0_504 = arith.constant 0 : index
    %c40_505 = arith.constant 40 : index
    %c256_506 = arith.constant 256 : index
    %1069 = vector.load %arg12[%c0_504, %c40_505, %c256_506] : memref<1x64x512xbf16, #tpu.memory_space<vmem>>, vector<1x8x128xbf16>
    %1070 = vector.shape_cast %1069 : vector<1x8x128xbf16> to vector<8x128xbf16>
    %1071 = vector.shape_cast %1068 : vector<8x128xbf16> to vector<1x8x128xbf16>
    tpu.vector_store %arg12[%c0_504, %c40_505, %c256_506], %1071 {strides = array<i32>} : memref<1x64x512xbf16, #tpu.memory_space<vmem>>, vector<1x8x128xbf16>,
    %cst_507 = arith.constant 1.000000e+00 : f32
    %1072 = vector.broadcast %cst_507 : f32 to vector<8x128xf32>
    %1073 = arith.subf %1063, %1072 : vector<8x128xf32>
    %1074 = arith.select %1065, %1073, %1063 : vector<8x128xi1>, vector<8x128xf32>
    %c0_508 = arith.constant 0 : index
    %c48_509 = arith.constant 48 : index
    %c256_510 = arith.constant 256 : index
    %1075 = vector.load %arg11[%c0_508, %c48_509, %c256_510] : memref<1x64x512xf32, #tpu.memory_space<vmem>>, vector<1x8x128xf32>
    %1076 = vector.shape_cast %1075 : vector<1x8x128xf32> to vector<8x128xf32>
    %1077 = arith.addf %1074, %1076 : vector<8x128xf32>
    %cst_511 = arith.constant 1.000000e+00 : f32
    %1078 = vector.broadcast %cst_511 : f32 to vector<8x128xf32>
    %1079 = arith.cmpf oge, %1077, %1078 : vector<8x128xf32>
    %1080 = arith.extui %1079 : vector<8x128xi1> to vector<8x128xi32>
    %1081 = arith.sitofp %1080 : vector<8x128xi32> to vector<8x128xf32>
    %1082 = arith.truncf %1081 : vector<8x128xf32> to vector<8x128xbf16>
    %c0_512 = arith.constant 0 : index
    %c48_513 = arith.constant 48 : index
    %c256_514 = arith.constant 256 : index
    %1083 = vector.load %arg12[%c0_512, %c48_513, %c256_514] : memref<1x64x512xbf16, #tpu.memory_space<vmem>>, vector<1x8x128xbf16>
    %1084 = vector.shape_cast %1083 : vector<1x8x128xbf16> to vector<8x128xbf16>
    %1085 = vector.shape_cast %1082 : vector<8x128xbf16> to vector<1x8x128xbf16>
    tpu.vector_store %arg12[%c0_512, %c48_513, %c256_514], %1085 {strides = array<i32>} : memref<1x64x512xbf16, #tpu.memory_space<vmem>>, vector<1x8x128xbf16>,
    %cst_515 = arith.constant 1.000000e+00 : f32
    %1086 = vector.broadcast %cst_515 : f32 to vector<8x128xf32>
    %1087 = arith.subf %1077, %1086 : vector<8x128xf32>
    %1088 = arith.select %1079, %1087, %1077 : vector<8x128xi1>, vector<8x128xf32>
    %c0_516 = arith.constant 0 : index
    %c56_517 = arith.constant 56 : index
    %c256_518 = arith.constant 256 : index
    %1089 = vector.load %arg11[%c0_516, %c56_517, %c256_518] : memref<1x64x512xf32, #tpu.memory_space<vmem>>, vector<1x8x128xf32>
    %1090 = vector.shape_cast %1089 : vector<1x8x128xf32> to vector<8x128xf32>
    %1091 = arith.addf %1088, %1090 : vector<8x128xf32>
    %cst_519 = arith.constant 1.000000e+00 : f32
    %1092 = vector.broadcast %cst_519 : f32 to vector<8x128xf32>
    %1093 = arith.cmpf oge, %1091, %1092 : vector<8x128xf32>
    %1094 = arith.extui %1093 : vector<8x128xi1> to vector<8x128xi32>
    %1095 = arith.sitofp %1094 : vector<8x128xi32> to vector<8x128xf32>
    %1096 = arith.truncf %1095 : vector<8x128xf32> to vector<8x128xbf16>
    %c0_520 = arith.constant 0 : index
    %c56_521 = arith.constant 56 : index
    %c256_522 = arith.constant 256 : index
    %1097 = vector.load %arg12[%c0_520, %c56_521, %c256_522] : memref<1x64x512xbf16, #tpu.memory_space<vmem>>, vector<1x8x128xbf16>
    %1098 = vector.shape_cast %1097 : vector<1x8x128xbf16> to vector<8x128xbf16>
    %1099 = vector.shape_cast %1096 : vector<8x128xbf16> to vector<1x8x128xbf16>
    tpu.vector_store %arg12[%c0_520, %c56_521, %c256_522], %1099 {strides = array<i32>} : memref<1x64x512xbf16, #tpu.memory_space<vmem>>, vector<1x8x128xbf16>,
    %cst_523 = arith.constant 0.000000e+00 : f32
    %1100 = vector.broadcast %cst_523 : f32 to vector<8x128xf32>
    %c0_524 = arith.constant 0 : index
    %c0_525 = arith.constant 0 : index
    %c384_526 = arith.constant 384 : index
    %1101 = vector.load %arg11[%c0_524, %c0_525, %c384_526] : memref<1x64x512xf32, #tpu.memory_space<vmem>>, vector<1x8x128xf32>
    %1102 = vector.shape_cast %1101 : vector<1x8x128xf32> to vector<8x128xf32>
    %1103 = arith.addf %1100, %1102 : vector<8x128xf32>
    %cst_527 = arith.constant 1.000000e+00 : f32
    %1104 = vector.broadcast %cst_527 : f32 to vector<8x128xf32>
    %1105 = arith.cmpf oge, %1103, %1104 : vector<8x128xf32>
    %1106 = arith.extui %1105 : vector<8x128xi1> to vector<8x128xi32>
    %1107 = arith.sitofp %1106 : vector<8x128xi32> to vector<8x128xf32>
    %1108 = arith.truncf %1107 : vector<8x128xf32> to vector<8x128xbf16>
    %c0_528 = arith.constant 0 : index
    %c0_529 = arith.constant 0 : index
    %c384_530 = arith.constant 384 : index
    %1109 = vector.load %arg12[%c0_528, %c0_529, %c384_530] : memref<1x64x512xbf16, #tpu.memory_space<vmem>>, vector<1x8x128xbf16>
    %1110 = vector.shape_cast %1109 : vector<1x8x128xbf16> to vector<8x128xbf16>
    %1111 = vector.shape_cast %1108 : vector<8x128xbf16> to vector<1x8x128xbf16>
    tpu.vector_store %arg12[%c0_528, %c0_529, %c384_530], %1111 {strides = array<i32>} : memref<1x64x512xbf16, #tpu.memory_space<vmem>>, vector<1x8x128xbf16>,
    %cst_531 = arith.constant 1.000000e+00 : f32
    %1112 = vector.broadcast %cst_531 : f32 to vector<8x128xf32>
    %1113 = arith.subf %1103, %1112 : vector<8x128xf32>
    %1114 = arith.select %1105, %1113, %1103 : vector<8x128xi1>, vector<8x128xf32>
    %c0_532 = arith.constant 0 : index
    %c8_533 = arith.constant 8 : index
    %c384_534 = arith.constant 384 : index
    %1115 = vector.load %arg11[%c0_532, %c8_533, %c384_534] : memref<1x64x512xf32, #tpu.memory_space<vmem>>, vector<1x8x128xf32>
    %1116 = vector.shape_cast %1115 : vector<1x8x128xf32> to vector<8x128xf32>
    %1117 = arith.addf %1114, %1116 : vector<8x128xf32>
    %cst_535 = arith.constant 1.000000e+00 : f32
    %1118 = vector.broadcast %cst_535 : f32 to vector<8x128xf32>
    %1119 = arith.cmpf oge, %1117, %1118 : vector<8x128xf32>
    %1120 = arith.extui %1119 : vector<8x128xi1> to vector<8x128xi32>
    %1121 = arith.sitofp %1120 : vector<8x128xi32> to vector<8x128xf32>
    %1122 = arith.truncf %1121 : vector<8x128xf32> to vector<8x128xbf16>
    %c0_536 = arith.constant 0 : index
    %c8_537 = arith.constant 8 : index
    %c384_538 = arith.constant 384 : index
    %1123 = vector.load %arg12[%c0_536, %c8_537, %c384_538] : memref<1x64x512xbf16, #tpu.memory_space<vmem>>, vector<1x8x128xbf16>
    %1124 = vector.shape_cast %1123 : vector<1x8x128xbf16> to vector<8x128xbf16>
    %1125 = vector.shape_cast %1122 : vector<8x128xbf16> to vector<1x8x128xbf16>
    tpu.vector_store %arg12[%c0_536, %c8_537, %c384_538], %1125 {strides = array<i32>} : memref<1x64x512xbf16, #tpu.memory_space<vmem>>, vector<1x8x128xbf16>,
    %cst_539 = arith.constant 1.000000e+00 : f32
    %1126 = vector.broadcast %cst_539 : f32 to vector<8x128xf32>
    %1127 = arith.subf %1117, %1126 : vector<8x128xf32>
    %1128 = arith.select %1119, %1127, %1117 : vector<8x128xi1>, vector<8x128xf32>
    %c0_540 = arith.constant 0 : index
    %c16_541 = arith.constant 16 : index
    %c384_542 = arith.constant 384 : index
    %1129 = vector.load %arg11[%c0_540, %c16_541, %c384_542] : memref<1x64x512xf32, #tpu.memory_space<vmem>>, vector<1x8x128xf32>
    %1130 = vector.shape_cast %1129 : vector<1x8x128xf32> to vector<8x128xf32>
    %1131 = arith.addf %1128, %1130 : vector<8x128xf32>
    %cst_543 = arith.constant 1.000000e+00 : f32
    %1132 = vector.broadcast %cst_543 : f32 to vector<8x128xf32>
    %1133 = arith.cmpf oge, %1131, %1132 : vector<8x128xf32>
    %1134 = arith.extui %1133 : vector<8x128xi1> to vector<8x128xi32>
    %1135 = arith.sitofp %1134 : vector<8x128xi32> to vector<8x128xf32>
    %1136 = arith.truncf %1135 : vector<8x128xf32> to vector<8x128xbf16>
    %c0_544 = arith.constant 0 : index
    %c16_545 = arith.constant 16 : index
    %c384_546 = arith.constant 384 : index
    %1137 = vector.load %arg12[%c0_544, %c16_545, %c384_546] : memref<1x64x512xbf16, #tpu.memory_space<vmem>>, vector<1x8x128xbf16>
    %1138 = vector.shape_cast %1137 : vector<1x8x128xbf16> to vector<8x128xbf16>
    %1139 = vector.shape_cast %1136 : vector<8x128xbf16> to vector<1x8x128xbf16>
    tpu.vector_store %arg12[%c0_544, %c16_545, %c384_546], %1139 {strides = array<i32>} : memref<1x64x512xbf16, #tpu.memory_space<vmem>>, vector<1x8x128xbf16>,
    %cst_547 = arith.constant 1.000000e+00 : f32
    %1140 = vector.broadcast %cst_547 : f32 to vector<8x128xf32>
    %1141 = arith.subf %1131, %1140 : vector<8x128xf32>
    %1142 = arith.select %1133, %1141, %1131 : vector<8x128xi1>, vector<8x128xf32>
    %c0_548 = arith.constant 0 : index
    %c24_549 = arith.constant 24 : index
    %c384_550 = arith.constant 384 : index
    %1143 = vector.load %arg11[%c0_548, %c24_549, %c384_550] : memref<1x64x512xf32, #tpu.memory_space<vmem>>, vector<1x8x128xf32>
    %1144 = vector.shape_cast %1143 : vector<1x8x128xf32> to vector<8x128xf32>
    %1145 = arith.addf %1142, %1144 : vector<8x128xf32>
    %cst_551 = arith.constant 1.000000e+00 : f32
    %1146 = vector.broadcast %cst_551 : f32 to vector<8x128xf32>
    %1147 = arith.cmpf oge, %1145, %1146 : vector<8x128xf32>
    %1148 = arith.extui %1147 : vector<8x128xi1> to vector<8x128xi32>
    %1149 = arith.sitofp %1148 : vector<8x128xi32> to vector<8x128xf32>
    %1150 = arith.truncf %1149 : vector<8x128xf32> to vector<8x128xbf16>
    %c0_552 = arith.constant 0 : index
    %c24_553 = arith.constant 24 : index
    %c384_554 = arith.constant 384 : index
    %1151 = vector.load %arg12[%c0_552, %c24_553, %c384_554] : memref<1x64x512xbf16, #tpu.memory_space<vmem>>, vector<1x8x128xbf16>
    %1152 = vector.shape_cast %1151 : vector<1x8x128xbf16> to vector<8x128xbf16>
    %1153 = vector.shape_cast %1150 : vector<8x128xbf16> to vector<1x8x128xbf16>
    tpu.vector_store %arg12[%c0_552, %c24_553, %c384_554], %1153 {strides = array<i32>} : memref<1x64x512xbf16, #tpu.memory_space<vmem>>, vector<1x8x128xbf16>,
    %cst_555 = arith.constant 1.000000e+00 : f32
    %1154 = vector.broadcast %cst_555 : f32 to vector<8x128xf32>
    %1155 = arith.subf %1145, %1154 : vector<8x128xf32>
    %1156 = arith.select %1147, %1155, %1145 : vector<8x128xi1>, vector<8x128xf32>
    %c0_556 = arith.constant 0 : index
    %c32_557 = arith.constant 32 : index
    %c384_558 = arith.constant 384 : index
    %1157 = vector.load %arg11[%c0_556, %c32_557, %c384_558] : memref<1x64x512xf32, #tpu.memory_space<vmem>>, vector<1x8x128xf32>
    %1158 = vector.shape_cast %1157 : vector<1x8x128xf32> to vector<8x128xf32>
    %1159 = arith.addf %1156, %1158 : vector<8x128xf32>
    %cst_559 = arith.constant 1.000000e+00 : f32
    %1160 = vector.broadcast %cst_559 : f32 to vector<8x128xf32>
    %1161 = arith.cmpf oge, %1159, %1160 : vector<8x128xf32>
    %1162 = arith.extui %1161 : vector<8x128xi1> to vector<8x128xi32>
    %1163 = arith.sitofp %1162 : vector<8x128xi32> to vector<8x128xf32>
    %1164 = arith.truncf %1163 : vector<8x128xf32> to vector<8x128xbf16>
    %c0_560 = arith.constant 0 : index
    %c32_561 = arith.constant 32 : index
    %c384_562 = arith.constant 384 : index
    %1165 = vector.load %arg12[%c0_560, %c32_561, %c384_562] : memref<1x64x512xbf16, #tpu.memory_space<vmem>>, vector<1x8x128xbf16>
    %1166 = vector.shape_cast %1165 : vector<1x8x128xbf16> to vector<8x128xbf16>
    %1167 = vector.shape_cast %1164 : vector<8x128xbf16> to vector<1x8x128xbf16>
    tpu.vector_store %arg12[%c0_560, %c32_561, %c384_562], %1167 {strides = array<i32>} : memref<1x64x512xbf16, #tpu.memory_space<vmem>>, vector<1x8x128xbf16>,
    %cst_563 = arith.constant 1.000000e+00 : f32
    %1168 = vector.broadcast %cst_563 : f32 to vector<8x128xf32>
    %1169 = arith.subf %1159, %1168 : vector<8x128xf32>
    %1170 = arith.select %1161, %1169, %1159 : vector<8x128xi1>, vector<8x128xf32>
    %c0_564 = arith.constant 0 : index
    %c40_565 = arith.constant 40 : index
    %c384_566 = arith.constant 384 : index
    %1171 = vector.load %arg11[%c0_564, %c40_565, %c384_566] : memref<1x64x512xf32, #tpu.memory_space<vmem>>, vector<1x8x128xf32>
    %1172 = vector.shape_cast %1171 : vector<1x8x128xf32> to vector<8x128xf32>
    %1173 = arith.addf %1170, %1172 : vector<8x128xf32>
    %cst_567 = arith.constant 1.000000e+00 : f32
    %1174 = vector.broadcast %cst_567 : f32 to vector<8x128xf32>
    %1175 = arith.cmpf oge, %1173, %1174 : vector<8x128xf32>
    %1176 = arith.extui %1175 : vector<8x128xi1> to vector<8x128xi32>
    %1177 = arith.sitofp %1176 : vector<8x128xi32> to vector<8x128xf32>
    %1178 = arith.truncf %1177 : vector<8x128xf32> to vector<8x128xbf16>
    %c0_568 = arith.constant 0 : index
    %c40_569 = arith.constant 40 : index
    %c384_570 = arith.constant 384 : index
    %1179 = vector.load %arg12[%c0_568, %c40_569, %c384_570] : memref<1x64x512xbf16, #tpu.memory_space<vmem>>, vector<1x8x128xbf16>
    %1180 = vector.shape_cast %1179 : vector<1x8x128xbf16> to vector<8x128xbf16>
    %1181 = vector.shape_cast %1178 : vector<8x128xbf16> to vector<1x8x128xbf16>
    tpu.vector_store %arg12[%c0_568, %c40_569, %c384_570], %1181 {strides = array<i32>} : memref<1x64x512xbf16, #tpu.memory_space<vmem>>, vector<1x8x128xbf16>,
    %cst_571 = arith.constant 1.000000e+00 : f32
    %1182 = vector.broadcast %cst_571 : f32 to vector<8x128xf32>
    %1183 = arith.subf %1173, %1182 : vector<8x128xf32>
    %1184 = arith.select %1175, %1183, %1173 : vector<8x128xi1>, vector<8x128xf32>
    %c0_572 = arith.constant 0 : index
    %c48_573 = arith.constant 48 : index
    %c384_574 = arith.constant 384 : index
    %1185 = vector.load %arg11[%c0_572, %c48_573, %c384_574] : memref<1x64x512xf32, #tpu.memory_space<vmem>>, vector<1x8x128xf32>
    %1186 = vector.shape_cast %1185 : vector<1x8x128xf32> to vector<8x128xf32>
    %1187 = arith.addf %1184, %1186 : vector<8x128xf32>
    %cst_575 = arith.constant 1.000000e+00 : f32
    %1188 = vector.broadcast %cst_575 : f32 to vector<8x128xf32>
    %1189 = arith.cmpf oge, %1187, %1188 : vector<8x128xf32>
    %1190 = arith.extui %1189 : vector<8x128xi1> to vector<8x128xi32>
    %1191 = arith.sitofp %1190 : vector<8x128xi32> to vector<8x128xf32>
    %1192 = arith.truncf %1191 : vector<8x128xf32> to vector<8x128xbf16>
    %c0_576 = arith.constant 0 : index
    %c48_577 = arith.constant 48 : index
    %c384_578 = arith.constant 384 : index
    %1193 = vector.load %arg12[%c0_576, %c48_577, %c384_578] : memref<1x64x512xbf16, #tpu.memory_space<vmem>>, vector<1x8x128xbf16>
    %1194 = vector.shape_cast %1193 : vector<1x8x128xbf16> to vector<8x128xbf16>
    %1195 = vector.shape_cast %1192 : vector<8x128xbf16> to vector<1x8x128xbf16>
    tpu.vector_store %arg12[%c0_576, %c48_577, %c384_578], %1195 {strides = array<i32>} : memref<1x64x512xbf16, #tpu.memory_space<vmem>>, vector<1x8x128xbf16>,
    %cst_579 = arith.constant 1.000000e+00 : f32
    %1196 = vector.broadcast %cst_579 : f32 to vector<8x128xf32>
    %1197 = arith.subf %1187, %1196 : vector<8x128xf32>
    %1198 = arith.select %1189, %1197, %1187 : vector<8x128xi1>, vector<8x128xf32>
    %c0_580 = arith.constant 0 : index
    %c56_581 = arith.constant 56 : index
    %c384_582 = arith.constant 384 : index
    %1199 = vector.load %arg11[%c0_580, %c56_581, %c384_582] : memref<1x64x512xf32, #tpu.memory_space<vmem>>, vector<1x8x128xf32>
    %1200 = vector.shape_cast %1199 : vector<1x8x128xf32> to vector<8x128xf32>
    %1201 = arith.addf %1198, %1200 : vector<8x128xf32>
    %cst_583 = arith.constant 1.000000e+00 : f32
    %1202 = vector.broadcast %cst_583 : f32 to vector<8x128xf32>
    %1203 = arith.cmpf oge, %1201, %1202 : vector<8x128xf32>
    %1204 = arith.extui %1203 : vector<8x128xi1> to vector<8x128xi32>
    %1205 = arith.sitofp %1204 : vector<8x128xi32> to vector<8x128xf32>
    %1206 = arith.truncf %1205 : vector<8x128xf32> to vector<8x128xbf16>
    %c0_584 = arith.constant 0 : index
    %c56_585 = arith.constant 56 : index
    %c384_586 = arith.constant 384 : index
    %1207 = vector.load %arg12[%c0_584, %c56_585, %c384_586] : memref<1x64x512xbf16, #tpu.memory_space<vmem>>, vector<1x8x128xbf16>
    %1208 = vector.shape_cast %1207 : vector<1x8x128xbf16> to vector<8x128xbf16>
    %1209 = vector.shape_cast %1206 : vector<8x128xbf16> to vector<1x8x128xbf16>
    tpu.vector_store %arg12[%c0_584, %c56_585, %c384_586], %1209 {strides = array<i32>} : memref<1x64x512xbf16, #tpu.memory_space<vmem>>, vector<1x8x128xbf16>,
    %c0_587 = arith.constant 0 : index
    %c0_588 = arith.constant 0 : index
    %c0_589 = arith.constant 0 : index
    %1210 = vector.load %arg12[%c0_587, %c0_588, %c0_589] : memref<1x64x512xbf16, #tpu.memory_space<vmem>>, vector<1x64x512xbf16>
    %1211 = vector.shape_cast %1210 : vector<1x64x512xbf16> to vector<64x512xbf16>
    %c0_590 = arith.constant 0 : index
    %c0_591 = arith.constant 0 : index
    %1212 = vector.load %arg4[%c0_590, %c0_591] : memref<512x128xbf16, #tpu.memory_space<vmem>>, vector<512x128xbf16>
    %cst_592 = arith.constant dense<0.000000e+00> : vector<64x128xf32>
    %1213 = tpu.matmul %1211, %1212, %cst_592 {dimension_numbers = #tpu.dot_dimension_numbers<[1], [0], [0], [1], [0, 0, 1, 1], [], []>} : vector<64x512xbf16>, vector<512x128xbf16>, vector<64x128xf32> -> vector<64x128xf32>
    %c0_593 = arith.constant 0 : index
    %c0_594 = arith.constant 0 : index
    %1214 = vector.load %arg5[%c0_593, %c0_594] : memref<1x128xf32, #tpu.memory_space<vmem>>, vector<1x128xf32>
    %1215 = vector.broadcast %1214 : vector<1x128xf32> to vector<64x128xf32>
    %1216 = arith.addf %1213, %1215 : vector<64x128xf32>
    %c0_595 = arith.constant 0 : index
    %c0_596 = arith.constant 0 : index
    %c0_597 = arith.constant 0 : index
    %1217 = vector.load %arg13[%c0_595, %c0_596, %c0_597] : memref<1x64x128xf32, #tpu.memory_space<vmem>>, vector<1x64x128xf32>
    %1218 = vector.shape_cast %1217 : vector<1x64x128xf32> to vector<64x128xf32>
    %1219 = vector.shape_cast %1216 : vector<64x128xf32> to vector<1x64x128xf32>
    tpu.vector_store %arg13[%c0_595, %c0_596, %c0_597], %1219 {strides = array<i32>} : memref<1x64x128xf32, #tpu.memory_space<vmem>>, vector<1x64x128xf32>,
    %cst_598 = arith.constant 0.000000e+00 : f32
    %1220 = vector.broadcast %cst_598 : f32 to vector<8x128xf32>
    %cst_599 = arith.constant 0.000000e+00 : f32
    %1221 = vector.broadcast %cst_599 : f32 to vector<8x128xf32>
    %c0_600 = arith.constant 0 : index
    %c0_601 = arith.constant 0 : index
    %c0_602 = arith.constant 0 : index
    %1222 = vector.load %arg13[%c0_600, %c0_601, %c0_602] : memref<1x64x128xf32, #tpu.memory_space<vmem>>, vector<1x8x128xf32>
    %1223 = vector.shape_cast %1222 : vector<1x8x128xf32> to vector<8x128xf32>
    %1224 = arith.addf %1220, %1223 : vector<8x128xf32>
    %cst_603 = arith.constant 1.000000e+00 : f32
    %1225 = vector.broadcast %cst_603 : f32 to vector<8x128xf32>
    %1226 = arith.cmpf oge, %1224, %1225 : vector<8x128xf32>
    %1227 = arith.extui %1226 : vector<8x128xi1> to vector<8x128xi32>
    %1228 = arith.sitofp %1227 : vector<8x128xi32> to vector<8x128xf32>
    %1229 = arith.addf %1221, %1228 : vector<8x128xf32>
    %cst_604 = arith.constant 1.000000e+00 : f32
    %1230 = vector.broadcast %cst_604 : f32 to vector<8x128xf32>
    %1231 = arith.subf %1224, %1230 : vector<8x128xf32>
    %1232 = arith.select %1226, %1231, %1224 : vector<8x128xi1>, vector<8x128xf32>
    %c0_605 = arith.constant 0 : index
    %c8_606 = arith.constant 8 : index
    %c0_607 = arith.constant 0 : index
    %1233 = vector.load %arg13[%c0_605, %c8_606, %c0_607] : memref<1x64x128xf32, #tpu.memory_space<vmem>>, vector<1x8x128xf32>
    %1234 = vector.shape_cast %1233 : vector<1x8x128xf32> to vector<8x128xf32>
    %1235 = arith.addf %1232, %1234 : vector<8x128xf32>
    %cst_608 = arith.constant 1.000000e+00 : f32
    %1236 = vector.broadcast %cst_608 : f32 to vector<8x128xf32>
    %1237 = arith.cmpf oge, %1235, %1236 : vector<8x128xf32>
    %1238 = arith.extui %1237 : vector<8x128xi1> to vector<8x128xi32>
    %1239 = arith.sitofp %1238 : vector<8x128xi32> to vector<8x128xf32>
    %1240 = arith.addf %1229, %1239 : vector<8x128xf32>
    %cst_609 = arith.constant 1.000000e+00 : f32
    %1241 = vector.broadcast %cst_609 : f32 to vector<8x128xf32>
    %1242 = arith.subf %1235, %1241 : vector<8x128xf32>
    %1243 = arith.select %1237, %1242, %1235 : vector<8x128xi1>, vector<8x128xf32>
    %c0_610 = arith.constant 0 : index
    %c16_611 = arith.constant 16 : index
    %c0_612 = arith.constant 0 : index
    %1244 = vector.load %arg13[%c0_610, %c16_611, %c0_612] : memref<1x64x128xf32, #tpu.memory_space<vmem>>, vector<1x8x128xf32>
    %1245 = vector.shape_cast %1244 : vector<1x8x128xf32> to vector<8x128xf32>
    %1246 = arith.addf %1243, %1245 : vector<8x128xf32>
    %cst_613 = arith.constant 1.000000e+00 : f32
    %1247 = vector.broadcast %cst_613 : f32 to vector<8x128xf32>
    %1248 = arith.cmpf oge, %1246, %1247 : vector<8x128xf32>
    %1249 = arith.extui %1248 : vector<8x128xi1> to vector<8x128xi32>
    %1250 = arith.sitofp %1249 : vector<8x128xi32> to vector<8x128xf32>
    %1251 = arith.addf %1240, %1250 : vector<8x128xf32>
    %cst_614 = arith.constant 1.000000e+00 : f32
    %1252 = vector.broadcast %cst_614 : f32 to vector<8x128xf32>
    %1253 = arith.subf %1246, %1252 : vector<8x128xf32>
    %1254 = arith.select %1248, %1253, %1246 : vector<8x128xi1>, vector<8x128xf32>
    %c0_615 = arith.constant 0 : index
    %c24_616 = arith.constant 24 : index
    %c0_617 = arith.constant 0 : index
    %1255 = vector.load %arg13[%c0_615, %c24_616, %c0_617] : memref<1x64x128xf32, #tpu.memory_space<vmem>>, vector<1x8x128xf32>
    %1256 = vector.shape_cast %1255 : vector<1x8x128xf32> to vector<8x128xf32>
    %1257 = arith.addf %1254, %1256 : vector<8x128xf32>
    %cst_618 = arith.constant 1.000000e+00 : f32
    %1258 = vector.broadcast %cst_618 : f32 to vector<8x128xf32>
    %1259 = arith.cmpf oge, %1257, %1258 : vector<8x128xf32>
    %1260 = arith.extui %1259 : vector<8x128xi1> to vector<8x128xi32>
    %1261 = arith.sitofp %1260 : vector<8x128xi32> to vector<8x128xf32>
    %1262 = arith.addf %1251, %1261 : vector<8x128xf32>
    %cst_619 = arith.constant 1.000000e+00 : f32
    %1263 = vector.broadcast %cst_619 : f32 to vector<8x128xf32>
    %1264 = arith.subf %1257, %1263 : vector<8x128xf32>
    %1265 = arith.select %1259, %1264, %1257 : vector<8x128xi1>, vector<8x128xf32>
    %c0_620 = arith.constant 0 : index
    %c32_621 = arith.constant 32 : index
    %c0_622 = arith.constant 0 : index
    %1266 = vector.load %arg13[%c0_620, %c32_621, %c0_622] : memref<1x64x128xf32, #tpu.memory_space<vmem>>, vector<1x8x128xf32>
    %1267 = vector.shape_cast %1266 : vector<1x8x128xf32> to vector<8x128xf32>
    %1268 = arith.addf %1265, %1267 : vector<8x128xf32>
    %cst_623 = arith.constant 1.000000e+00 : f32
    %1269 = vector.broadcast %cst_623 : f32 to vector<8x128xf32>
    %1270 = arith.cmpf oge, %1268, %1269 : vector<8x128xf32>
    %1271 = arith.extui %1270 : vector<8x128xi1> to vector<8x128xi32>
    %1272 = arith.sitofp %1271 : vector<8x128xi32> to vector<8x128xf32>
    %1273 = arith.addf %1262, %1272 : vector<8x128xf32>
    %cst_624 = arith.constant 1.000000e+00 : f32
    %1274 = vector.broadcast %cst_624 : f32 to vector<8x128xf32>
    %1275 = arith.subf %1268, %1274 : vector<8x128xf32>
    %1276 = arith.select %1270, %1275, %1268 : vector<8x128xi1>, vector<8x128xf32>
    %c0_625 = arith.constant 0 : index
    %c40_626 = arith.constant 40 : index
    %c0_627 = arith.constant 0 : index
    %1277 = vector.load %arg13[%c0_625, %c40_626, %c0_627] : memref<1x64x128xf32, #tpu.memory_space<vmem>>, vector<1x8x128xf32>
    %1278 = vector.shape_cast %1277 : vector<1x8x128xf32> to vector<8x128xf32>
    %1279 = arith.addf %1276, %1278 : vector<8x128xf32>
    %cst_628 = arith.constant 1.000000e+00 : f32
    %1280 = vector.broadcast %cst_628 : f32 to vector<8x128xf32>
    %1281 = arith.cmpf oge, %1279, %1280 : vector<8x128xf32>
    %1282 = arith.extui %1281 : vector<8x128xi1> to vector<8x128xi32>
    %1283 = arith.sitofp %1282 : vector<8x128xi32> to vector<8x128xf32>
    %1284 = arith.addf %1273, %1283 : vector<8x128xf32>
    %cst_629 = arith.constant 1.000000e+00 : f32
    %1285 = vector.broadcast %cst_629 : f32 to vector<8x128xf32>
    %1286 = arith.subf %1279, %1285 : vector<8x128xf32>
    %1287 = arith.select %1281, %1286, %1279 : vector<8x128xi1>, vector<8x128xf32>
    %c0_630 = arith.constant 0 : index
    %c48_631 = arith.constant 48 : index
    %c0_632 = arith.constant 0 : index
    %1288 = vector.load %arg13[%c0_630, %c48_631, %c0_632] : memref<1x64x128xf32, #tpu.memory_space<vmem>>, vector<1x8x128xf32>
    %1289 = vector.shape_cast %1288 : vector<1x8x128xf32> to vector<8x128xf32>
    %1290 = arith.addf %1287, %1289 : vector<8x128xf32>
    %cst_633 = arith.constant 1.000000e+00 : f32
    %1291 = vector.broadcast %cst_633 : f32 to vector<8x128xf32>
    %1292 = arith.cmpf oge, %1290, %1291 : vector<8x128xf32>
    %1293 = arith.extui %1292 : vector<8x128xi1> to vector<8x128xi32>
    %1294 = arith.sitofp %1293 : vector<8x128xi32> to vector<8x128xf32>
    %1295 = arith.addf %1284, %1294 : vector<8x128xf32>
    %cst_634 = arith.constant 1.000000e+00 : f32
    %1296 = vector.broadcast %cst_634 : f32 to vector<8x128xf32>
    %1297 = arith.subf %1290, %1296 : vector<8x128xf32>
    %1298 = arith.select %1292, %1297, %1290 : vector<8x128xi1>, vector<8x128xf32>
    %c0_635 = arith.constant 0 : index
    %c56_636 = arith.constant 56 : index
    %c0_637 = arith.constant 0 : index
    %1299 = vector.load %arg13[%c0_635, %c56_636, %c0_637] : memref<1x64x128xf32, #tpu.memory_space<vmem>>, vector<1x8x128xf32>
    %1300 = vector.shape_cast %1299 : vector<1x8x128xf32> to vector<8x128xf32>
    %1301 = arith.addf %1298, %1300 : vector<8x128xf32>
    %cst_638 = arith.constant 1.000000e+00 : f32
    %1302 = vector.broadcast %cst_638 : f32 to vector<8x128xf32>
    %1303 = arith.cmpf oge, %1301, %1302 : vector<8x128xf32>
    %1304 = arith.extui %1303 : vector<8x128xi1> to vector<8x128xi32>
    %1305 = arith.sitofp %1304 : vector<8x128xi32> to vector<8x128xf32>
    %1306 = arith.addf %1295, %1305 : vector<8x128xf32>
    %c0_639 = arith.constant 0 : index
    %c0_640 = arith.constant 0 : index
    %1307 = vector.load %arg17[%c0_639, %c0_640] : memref<8x128xf32, #tpu.memory_space<vmem>>, vector<8x128xf32>
    tpu.vector_store %arg17[%c0_639, %c0_640], %1306 {strides = array<i32>} : memref<8x128xf32, #tpu.memory_space<vmem>>, vector<8x128xf32>,
    %c0_641 = arith.constant 0 : index
    %c0_642 = arith.constant 0 : index
    %1308 = vector.load %arg17[%c0_641, %c0_642] : memref<8x128xf32, #tpu.memory_space<vmem>>, vector<8x128xf32>
    %cst_643 = arith.constant 1.250000e-01 : f32
    %1309 = vector.broadcast %cst_643 : f32 to vector<8x128xf32>
    %1310 = arith.mulf %1308, %1309 : vector<8x128xf32>
    %c0_644 = arith.constant 0 : index
    %c0_645 = arith.constant 0 : index
    %1311 = vector.load %arg8[%c0_644, %c0_645] : memref<8x128xf32, #tpu.memory_space<vmem>>, vector<8x128xf32>
    tpu.vector_store %arg8[%c0_644, %c0_645], %1310 {strides = array<i32>} : memref<8x128xf32, #tpu.memory_space<vmem>>, vector<8x128xf32>,
    %c0_646 = arith.constant 0 : index
    %c0_647 = arith.constant 0 : index
    %1312 = vector.load %arg6[%c0_646, %c0_647] : memref<128x128xf32, #tpu.memory_space<vmem>>, vector<128x128xf32>
    %cst_648 = arith.constant dense<0.000000e+00> : vector<8x128xf32>
    %1313 = tpu.matmul %1310, %1312, %cst_648 {dimension_numbers = #tpu.dot_dimension_numbers<[1], [0], [0], [1], [0, 0, 1, 1], [], []>} : vector<8x128xf32>, vector<128x128xf32>, vector<8x128xf32> -> vector<8x128xf32>
    %c0_649 = arith.constant 0 : index
    %c0_650 = arith.constant 0 : index
    %1314 = vector.load %arg7[%c0_649, %c0_650] : memref<1x128xf32, #tpu.memory_space<vmem>>, vector<1x128xf32>
    %1315 = vector.broadcast %1314 : vector<1x128xf32> to vector<8x128xf32>
    %1316 = arith.addf %1313, %1315 : vector<8x128xf32>
    %c0_651 = arith.constant 0 : index
    %c0_652 = arith.constant 0 : index
    %1317 = vector.load %arg9[%c0_651, %c0_652] : memref<8x128xf32, #tpu.memory_space<vmem>>, vector<8x128xf32>
    tpu.vector_store %arg9[%c0_651, %c0_652], %1316 {strides = array<i32>} : memref<8x128xf32, #tpu.memory_space<vmem>>, vector<8x128xf32>,
    return
  }
  func.func @transform_0(%arg0: i32) -> (i32, i32) {
    %c0_i32 = arith.constant 0 : i32
    %c0_i32_0 = arith.constant 0 : i32
    return %arg0, %c0_i32 : i32, i32
  }
  func.func @transform_1(%arg0: i32) -> (i32, i32) {
    %c0_i32 = arith.constant 0 : i32
    %c0_i32_0 = arith.constant 0 : i32
    %c0_i32_1 = arith.constant 0 : i32
    return %c0_i32, %c0_i32_0 : i32, i32
  }
  func.func @transform_2(%arg0: i32) -> (i32, i32) {
    %c0_i32 = arith.constant 0 : i32
    %c0_i32_0 = arith.constant 0 : i32
    %c0_i32_1 = arith.constant 0 : i32
    return %c0_i32, %c0_i32_0 : i32, i32
  }
  func.func @transform_3(%arg0: i32) -> (i32, i32) {
    %c0_i32 = arith.constant 0 : i32
    %c0_i32_0 = arith.constant 0 : i32
    %c0_i32_1 = arith.constant 0 : i32
    return %c0_i32, %c0_i32_0 : i32, i32
  }
  func.func @transform_4(%arg0: i32) -> (i32, i32) {
    %c0_i32 = arith.constant 0 : i32
    %c0_i32_0 = arith.constant 0 : i32
    %c0_i32_1 = arith.constant 0 : i32
    return %c0_i32, %c0_i32_0 : i32, i32
  }
  func.func @transform_5(%arg0: i32) -> (i32, i32) {
    %c0_i32 = arith.constant 0 : i32
    %c0_i32_0 = arith.constant 0 : i32
    %c0_i32_1 = arith.constant 0 : i32
    return %c0_i32, %c0_i32_0 : i32, i32
  }
  func.func @transform_6(%arg0: i32) -> (i32, i32) {
    %c0_i32 = arith.constant 0 : i32
    %c0_i32_0 = arith.constant 0 : i32
    %c0_i32_1 = arith.constant 0 : i32
    return %c0_i32, %c0_i32_0 : i32, i32
  }
  func.func @transform_7(%arg0: i32) -> (i32, i32) {
    %c0_i32 = arith.constant 0 : i32
    %c0_i32_0 = arith.constant 0 : i32
    return %arg0, %c0_i32 : i32, i32
  }
  func.func @transform_8(%arg0: i32) -> (i32, i32) {
    %c0_i32 = arith.constant 0 : i32
    %c0_i32_0 = arith.constant 0 : i32
    return %arg0, %c0_i32 : i32, i32
  }
}

</mosaic_0001>

<bundles_post_ra>
// kernel: _spide_forward_impl.1
= control target key start
LH: loop header
LB: loop body
LE: loop exit
PB: predicated region body
PF: predicated region fallthrough
CT: control target
= control target key end

     0   :  { %s8859_s1 = inlined_call_operand.vmem [shape: bf16[1024,512], index: 1, kind: input, shape index: {}]   ;;  %s8860_s0 = inlined_call_operand.vmem [shape: f32[8,1024], index: 0, kind: input, shape index: {}]   ;;  %s8861_s2 = inlined_call_operand.vmem [shape: f32[1,512], index: 2, kind: input, shape index: {}]   ;;  %s8862_s3 = inlined_call_operand.vmem [shape: bf16[512,128], index: 3, kind: input, shape index: {}]   ;;  %s8863_s4 = inlined_call_operand.vmem [shape: f32[1,128], index: 4, kind: input, shape index: {}]   ;;  %s8864_s6 = inlined_call_operand.vmem [shape: f32[1,128], index: 6, kind: input, shape index: {}]   ;;  %s8865_s5 = inlined_call_operand.vmem [shape: f32[128,128], index: 5, kind: input, shape index: {}]   ;;  %s8866_s7 = inlined_call_operand.vmem [shape: f32[8,128], index: 7, kind: output, shape index: {0}]   ;;  %s8867_s8 = inlined_call_operand.vmem [shape: f32[8,128], index: 8, kind: output, shape index: {1}]  }
   0x1   :  { %v4467_v0 = vld [vmem:[%s8859_s1 + $0xe0] sm:$0xf]  ;;  %v5706_v1 = vld [vmem:[%s8859_s1 + $0xec] sm:$0xf0] }
   0x2   :  { %v4595_v2 = vld [vmem:[%s8859_s1 + $0x1e0] sm:$0xf]  ;;  %v4468_v3 = vor.u32 %v5706_v1, %v4467_v0  ;;  %v5738_v4 = vld [vmem:[%s8859_s1 + $0x1ec] sm:$0xf0] }
   0x3   :  { %v4723_v5 = vld [vmem:[%s8859_s1 + $0x2e0] sm:$0xf]  ;;  %v5770_v6 = vld [vmem:[%s8859_s1 + $0x2ec] sm:$0xf0]  ;;  %v4596_v7 = vor.u32 %v5738_v4, %v4595_v2 }
   0x4   :  { %v4724_v8 = vor.u32 %v5770_v6, %v4723_v5  ;;  %v4851_v9 = vld [vmem:[%s8859_s1 + $0x3e0] sm:$0xf]  ;;  %v5802_v10 = vld [vmem:[%s8859_s1 + $0x3ec] sm:$0xf0]  ;;  %2270 = vmatpush.bf16.msra.mxu0 %v4468_v3 }
   0x5   :  { %v4451_v11 = vld [vmem:[%s8859_s1 + $0xc0] sm:$0xf]  ;;  %v4852_v12 = vor.u32 %v5802_v10, %v4851_v9  ;;  %v5702_v13 = vld [vmem:[%s8859_s1 + $0xcc] sm:$0xf0]  ;;  %2299 = vmatpush.bf16.msra.mxu1 %v4596_v7 }
   0x6   :  { %v4579_v14 = vld [vmem:[%s8859_s1 + $0x1c0] sm:$0xf]  ;;  %v5734_v15 = vld [vmem:[%s8859_s1 + $0x1cc] sm:$0xf0]  ;;  %2328 = vmatpush.bf16.msra.mxu2 %v4724_v8  ;;  %v4452_v16 = vor.u32 %v5702_v13, %v4451_v11 }
   0x7   :  { %v4580_v17 = vor.u32 %v5734_v15, %v4579_v14  ;;  %v4707_v18 = vld [vmem:[%s8859_s1 + $0x2c0] sm:$0xf]  ;;  %v5766_v19 = vld [vmem:[%s8859_s1 + $0x2cc] sm:$0xf0]  ;;  %2357 = vmatpush.bf16.msra.mxu3 %v4852_v12 }
   0x8   :  { %v4835_v20 = vld [vmem:[%s8859_s1 + $0x3c0] sm:$0xf]  ;;  %v4708_v21 = vor.u32 %v5766_v19, %v4707_v18  ;;  %v5798_v22 = vld [vmem:[%s8859_s1 + $0x3cc] sm:$0xf0]  ;;  %2271 = vmatpush.bf16.msra.mxu0 %v4452_v16 }
   0x9   :  { %v4435_v23 = vld [vmem:[%s8859_s1 + $0xa0] sm:$0xf]  ;;  %v5698_v24 = vld [vmem:[%s8859_s1 + $0xac] sm:$0xf0]  ;;  %v4836_v25 = vor.u32 %v5798_v22, %v4835_v20  ;;  %2300 = vmatpush.bf16.msra.mxu1 %v4580_v17 }
   0xa   :  { %v4563_v26 = vld [vmem:[%s8859_s1 + $0x1a0] sm:$0xf]  ;;  %v5730_v27 = vld [vmem:[%s8859_s1 + $0x1ac] sm:$0xf0]  ;;  %v4436_v29 = vor.u32 %v5698_v24, %v4435_v23  ;;  %2329 = vmatpush.bf16.msra.mxu2 %v4708_v21 }
   0xb   :  { %v4691_v28 = vld [vmem:[%s8859_s1 + $0x2a0] sm:$0xf]  ;;  %v5762_v30 = vld [vmem:[%s8859_s1 + $0x2ac] sm:$0xf0]  ;;  %v4564_v33 = vor.u32 %v5730_v27, %v4563_v26  ;;  %2358 = vmatpush.bf16.msra.mxu3 %v4836_v25 }
   0xc   :  { %v4819_v31 = vld [vmem:[%s8859_s1 + $0x3a0] sm:$0xf]  ;;  %v5794_v32 = vld [vmem:[%s8859_s1 + $0x3ac] sm:$0xf0]  ;;  %v4692_v34 = vor.u32 %v5762_v30, %v4691_v28  ;;  %2272 = vmatpush.bf16.msra.mxu0 %v4436_v29 }
   0xd   :  { %v4419_v35 = vld [vmem:[%s8859_s1 + $0x80] sm:$0xf]  ;;  %v5694_v36 = vld [vmem:[%s8859_s1 + $0x8c] sm:$0xf0]  ;;  %v4820_v38 = vor.u32 %v5794_v32, %v4819_v31  ;;  %2301 = vmatpush.bf16.msra.mxu1 %v4564_v33  ;;  %v6276_v32 = vld [vmem:[%s8860_s0 + $0x8] sm:$0xff] }
   0xe   :  { %v4547_v37 = vld [vmem:[%s8859_s1 + $0x180] sm:$0xf]  ;;  %v5726_v39 = vld [vmem:[%s8859_s1 + $0x18c] sm:$0xf0]  ;;  %v4420_v44 = vor.u32 %v5694_v36, %v4419_v35  ;;  %2330 = vmatpush.bf16.msra.mxu2 %v4692_v34  ;;  %vm93_vm1 = vcmp.ge.f32.partialorder %v6276_v32, 1.0  ;;  %v6291_v36 = vld [vmem:[%s8860_s0 + $0x18] sm:$0xff] }
   0xf   :  { %v4675_v40 = vld [vmem:[%s8859_s1 + $0x280] sm:$0xf]  ;;  %v5758_v41 = vld [vmem:[%s8859_s1 + $0x28c] sm:$0xf0]  ;;  %v4548_v47 = vor.u32 %v5726_v39, %v4547_v37  ;;  %2359 = vmatpush.bf16.msra.mxu3 %v4820_v38  ;;  %v8868_v37 = vmov 0.0   ;;  %vm219_vm3 = vcmp.ge.f32.partialorder %v6291_v36, 1.0 }
  0x10   :  { %v4803_v42 = vld [vmem:[%s8859_s1 + $0x380] sm:$0xf]  ;;  %v5790_v43 = vld [vmem:[%s8859_s1 + $0x38c] sm:$0xf0]  ;;  %v4676_v48 = vor.u32 %v5758_v41, %v4675_v40  ;;  %2273 = vmatpush.bf16.msra.mxu0 %v4420_v44  ;;  %v4120_v39 = vsel %vm93_vm1, 1.0, %v8868_v37  ;;  %v4121_v40 = vadd.f32 -1.0, %v6276_v32 }
  0x11   :  { %v4403_v45 = vld [vmem:[%s8859_s1 + $0x60] sm:$0xf]  ;;  %v5690_v46 = vld [vmem:[%s8859_s1 + $0x6c] sm:$0xf0]  ;;  %v4804_v52 = vor.u32 %v5790_v43, %v4803_v42  ;;  %2302 = vmatpush.bf16.msra.mxu1 %v4548_v47  ;;  %v96_v44 = vpack.c.bf16 %v4120_v39, %v4120_v39 }
  0x12   :  { %v4531_v49 = vld [vmem:[%s8859_s1 + $0x160] sm:$0xf]  ;;  %v5722_v50 = vld [vmem:[%s8859_s1 + $0x16c] sm:$0xf0]  ;;  %v4404_v61 = vor.u32 %v5690_v46, %v4403_v45  ;;  %2331 = vmatpush.bf16.msra.mxu2 %v4676_v48  ;;  %v99_v48 = vsel %vm93_vm1, %v4121_v40, %v6276_v32 }
  0x13   :  { %v4659_v51 = vld [vmem:[%s8859_s1 + $0x260] sm:$0xf]  ;;  %v5754_v53 = vld [vmem:[%s8859_s1 + $0x26c] sm:$0xf0]  ;;  %v4532_v1 = vor.u32 %v5722_v50, %v4531_v49  ;;  %2360 = vmatpush.bf16.msra.mxu3 %v4804_v52  ;;  %v4151_v52 = vadd.f32 -1.0, %v6291_v36 }
  0x14   :  { %v4787_v54 = vld [vmem:[%s8859_s1 + $0x360] sm:$0xf]  ;;  %v5786_v55 = vld [vmem:[%s8859_s1 + $0x36c] sm:$0xf0]  ;;  %v4660_v2 = vor.u32 %v5754_v53, %v4659_v51  ;;  %2274 = vmatpush.bf16.msra.mxu0 %v4404_v61  ;;  %v100_v51 = vadd.f32 %v99_v48, %v6276_v32  ;;  %97 = vst [vmem:[#allocation2 + $0x4] sm:$0xf] %v96_v44 }
  0x15   :  { %v4387_v56 = vld [vmem:[%s8859_s1 + $0x40] sm:$0xf]  ;;  %v5686_v57 = vld [vmem:[%s8859_s1 + $0x4c] sm:$0xf0]  ;;  %v4788_v6 = vor.u32 %v5786_v55, %v4787_v54  ;;  %2303 = vmatpush.bf16.msra.mxu1 %v4532_v1 }
  0x16   :  { %v4515_v58 = vld [vmem:[%s8859_s1 + $0x140] sm:$0xf]  ;;  %v5718_v59 = vld [vmem:[%s8859_s1 + $0x14c] sm:$0xf0]  ;;  %v4388_v13 = vor.u32 %v5686_v57, %v4387_v56  ;;  %2332 = vmatpush.bf16.msra.mxu2 %v4660_v2  ;;  %v4150_v56 = vsel %vm219_vm3, 1.0, %v8868_v37  ;;  %vm101_vm5 = vcmp.ge.f32.partialorder %v100_v51, 1.0 }
  0x17   :  { %v4643_v60 = vld [vmem:[%s8859_s1 + $0x240] sm:$0xf]  ;;  %v5750_v62 = vld [vmem:[%s8859_s1 + $0x24c] sm:$0xf0]  ;;  %v4516_v14 = vor.u32 %v5718_v59, %v4515_v58  ;;  %2361 = vmatpush.bf16.msra.mxu3 %v4788_v6  ;;  %v4122_v2 = vsel %vm101_vm5, 1.0, %v8868_v37 }
  0x18   :  { %v4771_v63 = vld [vmem:[%s8859_s1 + $0x340] sm:$0xf]  ;;  %v5782_v0 = vld [vmem:[%s8859_s1 + $0x34c] sm:$0xf0]  ;;  %v4644_v15 = vor.u32 %v5750_v62, %v4643_v60  ;;  %2275 = vmatpush.bf16.msra.mxu0 %v4388_v13  ;;  %v4123_v60 = vadd.f32 -1.0, %v100_v51 }
  0x19   :  { %v6177_v3 = vld [vmem:[%s8859_s1 + $0x20] sm:$0xf]  ;;  %v6182_v4 = vld [vmem:[%s8859_s1 + $0x2c] sm:$0xf0]  ;;  %v4772_v16 = vor.u32 %v5782_v0, %v4771_v63  ;;  %2304 = vmatpush.bf16.msra.mxu1 %v4516_v14 }
  0x1a   :  { %v6187_v5 = vld [vmem:[%s8859_s1 + $0x120] sm:$0xf]  ;;  %v6192_v7 = vld [vmem:[%s8859_s1 + $0x12c] sm:$0xf0]  ;;  %v4372_v20 = vor.u32 %v6182_v4, %v6177_v3  ;;  %2333 = vmatpush.bf16.msra.mxu2 %v4644_v15  ;;  %v222_v3 = vpack.c.bf16 %v4150_v56, %v4150_v56  ;;  %v225_v15 = vsel %vm219_vm3, %v4151_v52, %v6291_v36 }
  0x1b   :  { %v6197_v8 = vld [vmem:[%s8859_s1 + $0x220] sm:$0xf]  ;;  %v6202_v9 = vld [vmem:[%s8859_s1 + $0x22c] sm:$0xf0]  ;;  %v4500_v21 = vor.u32 %v6192_v7, %v6187_v5  ;;  %2362 = vmatpush.bf16.msra.mxu3 %v4772_v16  ;;  %v104_v7 = vpack.c.bf16 %v4122_v2, %v4122_v2 }
  0x1c   :  { %v6207_v10 = vld [vmem:[%s8859_s1 + $0x320] sm:$0xf]  ;;  %v6212_v11 = vld [vmem:[%s8859_s1 + $0x32c] sm:$0xf0]  ;;  %v4628_v22 = vor.u32 %v6202_v9, %v6197_v8  ;;  %2276 = vmatpush.bf16.msra.mxu0 %v4372_v20  ;;  %v107_v8 = vsel %vm101_vm5, %v4123_v60, %v100_v51  ;;  %223 = vst [vmem:[#allocation2 + $0xc] sm:$0xf] %v222_v3 }
  0x1d   :  { %v6217_v12 = vld [vmem:[%s8859_s1] sm:$0xf]  ;;  %v6222_v17 = vld [vmem:[%s8859_s1 + $0xc] sm:$0xf0]  ;;  %v4756_v26 = vor.u32 %v6212_v11, %v6207_v10  ;;  %2305 = vmatpush.bf16.msra.mxu1 %v4500_v21  ;;  %v6360_v11 = vadd.f32 %v107_v8, %v6276_v32  ;;  %105 = vst [vmem:[#allocation2 + $0x24] sm:$0xf] %v104_v7 }
  0x1e   :  { %v6227_v18 = vld [vmem:[%s8859_s1 + $0x100] sm:$0xf]  ;;  %v6232_v19 = vld [vmem:[%s8859_s1 + $0x10c] sm:$0xf0]  ;;  %v4356_v27 = vor.u32 %v6222_v17, %v6217_v12  ;;  %2334 = vmatpush.bf16.msra.mxu2 %v4628_v22  ;;  %v226_v17 = vadd.f32 %v225_v15, %v6291_v36 }
  0x1f   :  { %v6243_v23 = vld [vmem:[%s8859_s1 + $0x200] sm:$0xf]  ;;  %v6248_v24 = vld [vmem:[%s8859_s1 + $0x20c] sm:$0xf0]  ;;  %v4484_v28 = vor.u32 %v6232_v19, %v6227_v18  ;;  %2363 = vmatpush.bf16.msra.mxu3 %v4756_v26  ;;  %vm109_vm9 = vcmp.ge.f32.partialorder %v6360_v11, 1.0 }
  0x20   :  { %v6253_v25 = vld [vmem:[%s8859_s1 + $0x300] sm:$0xf]  ;;  %v4612_v29 = vor.u32 %v6248_v24, %v6243_v23  ;;  %v6266_v30 = vld [vmem:[%s8859_s1 + $0x30c] sm:$0xf0]  ;;  %2277 = vmatpush.bf16.msra.mxu0 %v4356_v27  ;;  %vm227_vm7 = vcmp.ge.f32.partialorder %v226_v17, 1.0 }
  0x21   :  { %v6271_v31 = vld [vmem:[%s8860_s0] sm:$0xff]  ;;  %v4740_v33 = vor.u32 %v6266_v30, %v6253_v25  ;;  %v6286_v35 = vld [vmem:[%s8860_s0 + $0x10] sm:$0xff]  ;;  %2306 = vmatpush.bf16.msra.mxu1 %v4484_v28  ;;  %v4153_v28 = vadd.f32 -1.0, %v226_v17  ;;  %v4152_v30 = vsel %vm227_vm7, 1.0, %v8868_v37 }
  0x22   :  { %vm30_vm0 = vcmp.ge.f32.partialorder %v6271_v31, 1.0  ;;  %v4106_v34 = vadd.f32 -1.0, %v6271_v31  ;;  %vm156_vm2 = vcmp.ge.f32.partialorder %v6286_v35, 1.0  ;;  %v6302_v41 = vld [vmem:[%s8859_s1 + $0x6e0] sm:$0xf]  ;;  %v4136_v50 = vadd.f32 -1.0, %v6286_v35  ;;  %2335 = vmatpush.bf16.msra.mxu2 %v4612_v29 }
  0x23   :  { %v4105_v38 = vsel %vm30_vm0, 1.0, %v8868_v37  ;;  %v4135_v45 = vsel %vm156_vm2, 1.0, %v8868_v37  ;;  %v5898_v46 = vld [vmem:[%s8859_s1 + $0x6ec] sm:$0xf0]  ;;  %v4979_v57 = vld [vmem:[%s8859_s1 + $0x4e0] sm:$0xf]  ;;  %2364 = vmatpush.bf16.msra.mxu3 %v4740_v33  ;;  %v230_v39 = vpack.c.bf16 %v4152_v30, %v4152_v30  ;;  %v233_v40 = vsel %vm227_vm7, %v4153_v28, %v226_v17 }
  0x24   :  { %v33_v42 = vpack.c.bf16 %v4105_v38, %v4105_v38  ;;  %v36_v43 = vsel %vm30_vm0, %v4106_v34, %v6271_v31  ;;  %v159_v49 = vpack.c.bf16 %v4135_v45, %v4135_v45  ;;  %v5236_v53 = vor.u32 %v5898_v46, %v6302_v41  ;;  %v5834_v58 = vld [vmem:[%s8859_s1 + $0x4ec] sm:$0xf0]  ;;  %v5363_v62 = vld [vmem:[%s8859_s1 + $0x7e0] sm:$0xf]  ;;  %v5644_v25 = vld [vmem:[#allocation2 + $0x4] sm:$0xf] }
  0x25   :  { %v37_v47 = vadd.f32 %v36_v43, %v6271_v31  ;;  %v162_v55 = vsel %vm156_vm2, %v4136_v50, %v6286_v35  ;;  %v5930_v63 = vld [vmem:[%s8859_s1 + $0x7ec] sm:$0xf0]  ;;  %v5107_v4 = vld [vmem:[%s8859_s1 + $0x5e0] sm:$0xf]  ;;  %v4980_v20 = vor.u32 %v5834_v58, %v4979_v57  ;;  %v6404_v46 = vadd.f32 %v233_v40, %v6291_v36  ;;  %231 = vst [vmem:[#allocation2 + $0x2c] sm:$0xf] %v230_v39 }
  0x26   :  { %34 = vst [vmem:[#allocation2] sm:$0xf] %v33_v42  ;;  %v163_v61 = vadd.f32 %v162_v55, %v6286_v35  ;;  %v5866_v5 = vld [vmem:[%s8859_s1 + $0x5ec] sm:$0xf0]  ;;  %v5219_v9 = vld [vmem:[%s8859_s1 + $0x6c0] sm:$0xf]  ;;  %2444 = vmatpush.bf16.msrb.mxu2 %v5236_v53  ;;  %v5364_v19 = vor.u32 %v5930_v63, %v5363_v62 }
  0x27   :  { %vm38_vm4 = vcmp.ge.f32.partialorder %v37_v47, 1.0  ;;  %v4108_v54 = vadd.f32 -1.0, %v37_v47  ;;  %160 = vst [vmem:[#allocation2 + $0x8] sm:$0xf] %v159_v49  ;;  %v5894_v10 = vld [vmem:[%s8859_s1 + $0x6cc] sm:$0xf0]  ;;  %v5108_v23 = vor.u32 %v5866_v5, %v5107_v4  ;;  %2386 = vmatpush.bf16.msrb.mxu0 %v4980_v20 }
  0x28   :  { %v4107_v59 = vsel %vm38_vm4, 1.0, %v8868_v37  ;;  %vm164_vm6 = vcmp.ge.f32.partialorder %v163_v61, 1.0  ;;  %v4138_v14 = vadd.f32 -1.0, %v163_v61  ;;  %v4963_v16 = vld [vmem:[%s8859_s1 + $0x4c0] sm:$0xf]  ;;  %v5220_v29 = vor.u32 %v5894_v10, %v5219_v9  ;;  %2473 = vmatpush.bf16.msrb.mxu3 %v5364_v19 }
  0x29   :  { %v41_v0 = vpack.c.bf16 %v4107_v59, %v4107_v59  ;;  %v44_v1 = vsel %vm38_vm4, %v4108_v54, %v37_v47  ;;  %v4137_v13 = vsel %vm164_vm6, 1.0, %v8868_v37  ;;  %v5830_v21 = vld [vmem:[%s8859_s1 + $0x4cc] sm:$0xf0]  ;;  %v5347_v22 = vld [vmem:[%s8859_s1 + $0x7c0] sm:$0xf]  ;;  %2415 = vmatpush.bf16.msrb.mxu1 %v5108_v23  ;;  %v4124_v53 = vsel %vm109_vm9, 1.0, %v8868_v37 }
  0x2a   :  { %v45_v6 = vadd.f32 %v44_v1, %v6271_v31  ;;  %v167_v12 = vpack.c.bf16 %v4137_v13, %v4137_v13  ;;  %v170_v18 = vsel %vm164_vm6, %v4138_v14, %v163_v61  ;;  %v5926_v24 = vld [vmem:[%s8859_s1 + $0x7cc] sm:$0xf0]  ;;  %v4964_v33 = vor.u32 %v5830_v21, %v4963_v16  ;;  %v5091_v38 = vld [vmem:[%s8859_s1 + $0x5c0] sm:$0xf]  ;;  %2445 = vmatpush.bf16.msrb.mxu2 %v5220_v29  ;;  %v4229_v57 = vld [vmem:[#allocation2 + $0x20] sm:$0xf0] }
  0x2b   :  { %42 = vst [vmem:[#allocation2 + $0x20] sm:$0xf] %v41_v0  ;;  %v171_v27 = vadd.f32 %v170_v18, %v6286_v35  ;;  %v5348_v34 = vor.u32 %v5926_v24, %v5347_v22  ;;  %v5862_v41 = vld [vmem:[%s8859_s1 + $0x5cc] sm:$0xf0]  ;;  %v5203_v44 = vld [vmem:[%s8859_s1 + $0x6a0] sm:$0xf]  ;;  %v112_v59 = vpack.c.bf16 %v4124_v53, %v4124_v53  ;;  %v6424_v61 = vor.u32 %v5644_v25, %v4229_v57 }
  0x2c   :  { %168 = vst [vmem:[#allocation2 + $0x28] sm:$0xf] %v167_v12  ;;  %vm46_vm8 = vcmp.ge.f32.partialorder %v45_v6, 1.0  ;;  %v4110_v43 = vadd.f32 -1.0, %v45_v6  ;;  %v5092_v47 = vor.u32 %v5862_v41, %v5091_v38  ;;  %v5890_v49 = vld [vmem:[%s8859_s1 + $0x6ac] sm:$0xf0]  ;;  %2387 = vmatpush.bf16.msrb.mxu0 %v4964_v33 }
  0x2d   :  { %v4227_v26 = vld [vmem:[#allocation2] sm:$0xf]  ;;  %v4109_v42 = vsel %vm46_vm8, 1.0, %v8868_v37  ;;  %v4125_v54 = vadd.f32 -1.0, %v6360_v11  ;;  %v5204_v55 = vor.u32 %v5890_v49, %v5203_v44  ;;  %2474 = vmatpush.bf16.msrb.mxu3 %v5348_v34  ;;  %v5826_v60 = vld [vmem:[%s8859_s1 + $0x4ac] sm:$0xf0]  ;;  %2307 = vmatmul.bf16.vlgmr.msra.gmra.mxu1 %v6424_v61 }
  0x2e   :  { %v4235_v45 = vld [vmem:[#allocation2 + $0x8] sm:$0xf]  ;;  %v49_v48 = vpack.c.bf16 %v4109_v42, %v4109_v42  ;;  %v4947_v50 = vld [vmem:[%s8859_s1 + $0x4a0] sm:$0xf]  ;;  %v52_v52 = vsel %vm46_vm8, %v4110_v43, %v45_v6  ;;  %2416 = vmatpush.bf16.msrb.mxu1 %v5092_v47  ;;  %vm172_vm10 = vcmp.ge.f32.partialorder %v171_v27, 1.0  ;;  %v4140_v63 = vadd.f32 -1.0, %v171_v27 }
  0x2f   :  { %v53_v58 = vadd.f32 %v52_v52, %v6271_v31  ;;  %v115_v62 = vsel %vm109_vm9, %v4125_v54, %v6360_v11  ;;  %113 = vst [vmem:[#allocation2 + $0x44] sm:$0xf] %v112_v59  ;;  %2446 = vmatpush.bf16.msrb.mxu2 %v5204_v55  ;;  %v4948_v3 = vor.u32 %v5826_v60, %v4947_v50  ;;  %v5645_v5 = vld [vmem:[#allocation2 + $0xc] sm:$0xf]  ;;  %v4139_v7 = vsel %vm172_vm10, 1.0, %v8868_v37 }
  0x30   :  { %50 = vst [vmem:[#allocation2 + $0x40] sm:$0xf] %v49_v48  ;;  %v116_v2 = vadd.f32 %v115_v62, %v6276_v32  ;;  %v178_v8 = vsel %vm172_vm10, %v4140_v63, %v171_v27  ;;  %v5331_v13 = vld [vmem:[%s8859_s1 + $0x7a0] sm:$0xf]  ;;  %v5922_v14 = vld [vmem:[%s8859_s1 + $0x7ac] sm:$0xf0]  ;;  %v175_v12 = vpack.c.bf16 %v4139_v7, %v4139_v7 }
  0x31   :  { %vm54_vm11 = vcmp.ge.f32.partialorder %v53_v58, 1.0  ;;  %v4112_v1 = vadd.f32 -1.0, %v53_v58  ;;  %2388 = vmatpush.bf16.msrb.mxu0 %v4948_v3  ;;  %v179_v17 = vadd.f32 %v178_v8, %v6286_v35  ;;  %v5075_v20 = vld [vmem:[%s8859_s1 + $0x5a0] sm:$0xf]  ;;  %v5858_v21 = vld [vmem:[%s8859_s1 + $0x5ac] sm:$0xf0]  ;;  %v5332_v38 = vor.u32 %v5922_v14, %v5331_v13 }
  0x32   :  { %v5648_v51 = vld [vmem:[#allocation2 + $0x1c] sm:$0xf0]  ;;  %v4111_v6 = vsel %vm54_vm11, 1.0, %v8868_v37  ;;  %vm117_vm12 = vcmp.ge.f32.partialorder %v116_v2, 1.0  ;;  %v4127_v11 = vadd.f32 -1.0, %v116_v2  ;;  %vm235_vm13 = vcmp.ge.f32.partialorder %v6404_v46, 1.0 }
  0x33   :  { %v6418_v56 = vor.u32 %v5648_v51, %v4227_v26  ;;  %v5649_v0 = vld [vmem:[#allocation2 + $0x24] sm:$0xf0]  ;;  %v57_v9 = vpack.c.bf16 %v4111_v6, %v4111_v6  ;;  %v60_v10 = vsel %vm54_vm11, %v4112_v1, %v53_v58  ;;  %v4126_v16 = vsel %vm117_vm12, 1.0, %v8868_v37  ;;  %v5187_v22 = vld [vmem:[%s8859_s1 + $0x680] sm:$0xf]  ;;  %2475 = vmatpush.bf16.msrb.mxu3 %v5332_v38 }
  0x34   :  { %v6432_v4 = vor.u32 %v5649_v0, %v4235_v45  ;;  %v6444_v15 = vadd.f32 %v60_v10, %v6271_v31  ;;  %v5886_v18 = vld [vmem:[%s8859_s1 + $0x68c] sm:$0xf0]  ;;  %v4237_v19 = vld [vmem:[#allocation2 + $0x28] sm:$0xf0]  ;;  %v120_v23 = vpack.c.bf16 %v4126_v16, %v4126_v16  ;;  %v123_v24 = vsel %vm117_vm12, %v4127_v11, %v116_v2  ;;  %176 = vst [vmem:[#allocation2 + $0x48] sm:$0xf] %v175_v12 }
  0x35   :  { %2278 = vmatmul.bf16.vlgmr.msra.gmra.mxu0 %v6418_v56  ;;  %58 = vst [vmem:[#allocation2 + $0x60] sm:$0xf] %v57_v9  ;;  %v4155_v26 = vadd.f32 -1.0, %v6404_v46  ;;  %v6464_v27 = vor.u32 %v5645_v5, %v4237_v19  ;;  %v6467_v28 = vadd.f32 %v123_v24, %v6276_v32  ;;  %vm180_vm14 = vcmp.ge.f32.partialorder %v179_v17, 1.0  ;;  %v4931_v25 = vld [vmem:[%s8859_s1 + $0x480] sm:$0xf] }
  0x36   :  { %2336 = vmatmul.bf16.vlgmr.msra.gmra.mxu2 %v6432_v4  ;;  %v4142_v29 = vadd.f32 -1.0, %v179_v17  ;;  %121 = vst [vmem:[#allocation2 + $0x64] sm:$0xf] %v120_v23  ;;  %v4141_v30 = vsel %vm180_vm14, 1.0, %v8868_v37  ;;  %v4154_v33 = vsel %vm235_vm13, 1.0, %v8868_v37  ;;  %v5076_v47 = vor.u32 %v5858_v21, %v5075_v20 }
  0x37   :  { %8898 = vst [vmem:[#allocation10_spill] sm:$0xff] %v6464_v27  ;;  %v241_v34 = vsel %vm235_vm13, %v4155_v26, %v6404_v46  ;;  %v5822_v39 = vld [vmem:[%s8859_s1 + $0x48c] sm:$0xf0]  ;;  %2365 = vmatmul.bf16.vlgmr.msra.gmra.mxu3 %v6464_v27  ;;  %v183_v40 = vpack.c.bf16 %v4141_v30, %v4141_v30  ;;  %v238_v42 = vpack.c.bf16 %v4154_v33, %v4154_v33  ;;  %v5315_v44 = vld [vmem:[%s8859_s1 + $0x780] sm:$0xf]  ;;  %vm62_vm0 = vcmp.ge.f32.partialorder %v6444_v15, 1.0 }
  0x38   :  { %v186_v41 = vsel %vm180_vm14, %v4142_v29, %v179_v17  ;;  %v242_v43 = vadd.f32 %v241_v34, %v6291_v36  ;;  %v5918_v45 = vld [vmem:[%s8859_s1 + $0x78c] sm:$0xf0]  ;;  %v5188_v48 = vor.u32 %v5886_v18, %v5187_v22  ;;  %v4932_v49 = vor.u32 %v5822_v39, %v4931_v25  ;;  %v5059_v50 = vld [vmem:[%s8859_s1 + $0x580] sm:$0xf]  ;;  %2417 = vmatpush.bf16.msrb.mxu1 %v5076_v47  ;;  %v5652_v60 = vld [vmem:[#allocation2 + $0x44] sm:$0xf] }
  0x39   :  { %v187_v46 = vadd.f32 %v186_v41, %v6286_v35  ;;  %v5854_v51 = vld [vmem:[%s8859_s1 + $0x58c] sm:$0xf0]  ;;  %v4259_v52 = vld [vmem:[#allocation2 + $0x40] sm:$0xf]  ;;  %184 = vst [vmem:[#allocation2 + $0x68] sm:$0xf] %v183_v40  ;;  %v5316_v54 = vor.u32 %v5918_v45, %v5315_v44 }
  0x3a   :  { %vm243_vm15 = vcmp.ge.f32.partialorder %v242_v43, 1.0  ;;  %v4157_v53 = vadd.f32 -1.0, %v242_v43  ;;  %v5060_v55 = vor.u32 %v5854_v51, %v5059_v50  ;;  %239 = vst [vmem:[#allocation2 + $0x4c] sm:$0xf] %v238_v42  ;;  %2447 = vmatpush.bf16.msrb.mxu2 %v5188_v48  ;;  %v4114_v58 = vadd.f32 -1.0, %v6444_v15  ;;  %2389 = vmatpush.bf16.msrb.mxu0 %v4932_v49 }
  0x3b   :  { %v4156_v57 = vsel %vm243_vm15, 1.0, %v8868_v37  ;;  %vm125_vm1 = vcmp.ge.f32.partialorder %v6467_v28, 1.0  ;;  %v4113_v0 = vsel %vm62_vm0, 1.0, %v8868_v37  ;;  %v4267_v3 = vld [vmem:[#allocation2 + $0x48] sm:$0xf]  ;;  %2476 = vmatpush.bf16.msrb.mxu3 %v5316_v54  ;;  %v4129_v11 = vadd.f32 -1.0, %v6467_v28 }
  0x3c   :  { %v5656_v59 = vld [vmem:[#allocation2 + $0x5c] sm:$0xf0]  ;;  %v246_v62 = vpack.c.bf16 %v4156_v57, %v4156_v57  ;;  %v249_v63 = vsel %vm243_vm15, %v4157_v53, %v242_v43  ;;  %v4128_v1 = vsel %vm125_vm1, 1.0, %v8868_v37  ;;  %v65_v6 = vpack.c.bf16 %v4113_v0, %v4113_v0  ;;  %2418 = vmatpush.bf16.msrb.mxu1 %v5060_v55  ;;  %v5882_v24 = vld [vmem:[%s8859_s1 + $0x66c] sm:$0xf0] }
  0x3d   :  { %v6501_v2 = vor.u32 %v5656_v59, %v4259_v52  ;;  %v250_v5 = vadd.f32 %v249_v63, %v6291_v36  ;;  %v68_v7 = vsel %vm62_vm0, %v4114_v58, %v6444_v15  ;;  %v4261_v8 = vld [vmem:[#allocation2 + $0x60] sm:$0xf0]  ;;  %v128_v10 = vpack.c.bf16 %v4128_v1, %v4128_v1  ;;  %v5171_v20 = vld [vmem:[%s8859_s1 + $0x660] sm:$0xf]  ;;  %v5818_v33 = vld [vmem:[%s8859_s1 + $0x46c] sm:$0xf0] }
  0x3e   :  { %247 = vst [vmem:[#allocation2 + $0x6c] sm:$0xf] %v246_v62  ;;  %v69_v9 = vadd.f32 %v68_v7, %v6271_v31  ;;  %vm188_vm2 = vcmp.ge.f32.partialorder %v187_v46, 1.0  ;;  %v6507_v13 = vor.u32 %v5652_v60, %v4261_v8  ;;  %v4144_v16 = vadd.f32 -1.0, %v187_v46  ;;  %v4915_v30 = vld [vmem:[%s8859_s1 + $0x460] sm:$0xf] }
  0x3f   :  { %8899 = vst [vmem:[#allocation11_spill] sm:$0xff] %v6501_v2  ;;  %v4143_v14 = vsel %vm188_vm2, 1.0, %v8868_v37  ;;  %vm251_vm3 = vcmp.ge.f32.partialorder %v250_v5, 1.0  ;;  %v131_v15 = vsel %vm125_vm1, %v4129_v11, %v6467_v28  ;;  %v4159_v25 = vadd.f32 -1.0, %v250_v5  ;;  %v5299_v34 = vld [vmem:[%s8859_s1 + $0x760] sm:$0xf] }
  0x40   :  { %8900 = vst [vmem:[#allocation12_spill] sm:$0xff] %v6507_v13  ;;  %vm70_vm4 = vcmp.ge.f32.partialorder %v69_v9, 1.0  ;;  %v4116_v12 = vadd.f32 -1.0, %v69_v9  ;;  %v191_v17 = vpack.c.bf16 %v4143_v14, %v4143_v14  ;;  %v5657_v21 = vld [vmem:[#allocation2 + $0x64] sm:$0xf0]  ;;  %v132_v18 = vadd.f32 %v131_v15, %v6276_v32  ;;  %2312 = vmatmul.bf16.gmra.mxu1 %v6507_v13 }
  0x41   :  { %66 = vst [vmem:[#allocation2 + $0x80] sm:$0xf] %v65_v6  ;;  %v4115_v22 = vsel %vm70_vm4, 1.0, %v8868_v37  ;;  %v194_v19 = vsel %vm188_vm2, %v4144_v16, %v187_v46  ;;  %v4158_v23 = vsel %vm251_vm3, 1.0, %v8868_v37  ;;  %v6528_v26 = vor.u32 %v5657_v21, %v4267_v3  ;;  %v5914_v38 = vld [vmem:[%s8859_s1 + $0x76c] sm:$0xf0] }
  0x42   :  { %129 = vst [vmem:[#allocation2 + $0x84] sm:$0xf] %v128_v10  ;;  %v73_v28 = vpack.c.bf16 %v4115_v22, %v4115_v22  ;;  %v76_v29 = vsel %vm70_vm4, %v4116_v12, %v69_v9  ;;  %v5653_v39 = vld [vmem:[#allocation2 + $0x4c] sm:$0xf]  ;;  %vm133_vm5 = vcmp.ge.f32.partialorder %v132_v18, 1.0  ;;  %v4131_v41 = vadd.f32 -1.0, %v132_v18 }
  0x43   :  { %8901 = vst [vmem:[#allocation13_spill] sm:$0xff] %v6528_v26  ;;  %v6544_v40 = vadd.f32 %v76_v29, %v6271_v31  ;;  %v195_v42 = vadd.f32 %v194_v19, %v6286_v35  ;;  %v5043_v43 = vld [vmem:[%s8859_s1 + $0x560] sm:$0xf]  ;;  %v5850_v44 = vld [vmem:[%s8859_s1 + $0x56c] sm:$0xf0]  ;;  %v4130_v45 = vsel %vm133_vm5, 1.0, %v8868_v37  ;;  %v254_v46 = vpack.c.bf16 %v4158_v23, %v4158_v23 }
  0x44   :  { %192 = vst [vmem:[#allocation2 + $0x88] sm:$0xf] %v191_v17  ;;  %v257_v47 = vsel %vm251_vm3, %v4159_v25, %v250_v5  ;;  %v5172_v48 = vor.u32 %v5882_v24, %v5171_v20  ;;  %v5155_v49 = vld [vmem:[%s8859_s1 + $0x640] sm:$0xf]  ;;  %v136_v51 = vpack.c.bf16 %v4130_v45, %v4130_v45  ;;  %v139_v52 = vsel %vm133_vm5, %v4131_v41, %v132_v18  ;;  %v5878_v54 = vld [vmem:[%s8859_s1 + $0x64c] sm:$0xf0] }
  0x45   :  { %2283 = vmatmul.bf16.gmra.mxu0 %v6501_v2  ;;  %74 = vst [vmem:[#allocation2 + $0xa0] sm:$0xf] %v73_v28  ;;  %v4269_v50 = vld [vmem:[#allocation2 + $0x68] sm:$0xf0]  ;;  %vm196_vm6 = vcmp.ge.f32.partialorder %v195_v42, 1.0  ;;  %v4146_v53 = vadd.f32 -1.0, %v195_v42  ;;  %v140_v57 = vadd.f32 %v139_v52, %v6276_v32  ;;  %v258_v59 = vadd.f32 %v257_v47, %v6291_v36 }
  0x46   :  { %2341 = vmatmul.bf16.gmra.mxu2 %v6528_v26  ;;  %v6562_v55 = vor.u32 %v5653_v39, %v4269_v50  ;;  %v4145_v58 = vsel %vm196_vm6, 1.0, %v8868_v37  ;;  %255 = vst [vmem:[#allocation2 + $0x8c] sm:$0xf] %v254_v46  ;;  %v4899_v60 = vld [vmem:[%s8859_s1 + $0x440] sm:$0xf]  ;;  %v4916_v0 = vor.u32 %v5818_v33, %v4915_v30  ;;  %v5300_v1 = vor.u32 %v5914_v38, %v5299_v34 }
  0x47   :  { %2448 = vmatpush.bf16.msrb.mxu2 %v5172_v48  ;;  %137 = vst [vmem:[#allocation2 + $0xa4] sm:$0xf] %v136_v51  ;;  %v199_v62 = vpack.c.bf16 %v4145_v58, %v4145_v58  ;;  %v202_v63 = vsel %vm196_vm6, %v4146_v53, %v195_v42  ;;  %v5814_v3 = vld [vmem:[%s8859_s1 + $0x44c] sm:$0xf0]  ;;  %vm259_vm7 = vcmp.ge.f32.partialorder %v258_v59, 1.0  ;;  %v4161_v6 = vadd.f32 -1.0, %v258_v59 }
  0x48   :  { %8902 = vst [vmem:[#allocation14_spill] sm:$0xff] %v6562_v55  ;;  %2370 = vmatmul.bf16.gmra.mxu3 %v6562_v55  ;;  %v6575_v5 = vadd.f32 %v202_v63, %v6286_v35  ;;  %v5044_v7 = vor.u32 %v5850_v44, %v5043_v43  ;;  %v5283_v8 = vld [vmem:[%s8859_s1 + $0x740] sm:$0xf]  ;;  %v5910_v9 = vld [vmem:[%s8859_s1 + $0x74c] sm:$0xf0]  ;;  %v4160_v11 = vsel %vm259_vm7, 1.0, %v8868_v37  ;;  %2390 = vmatpush.bf16.msrb.mxu0 %v4916_v0 }
  0x49   :  { %v4291_v10 = vld [vmem:[#allocation2 + $0x80] sm:$0xf]  ;;  %200 = vst [vmem:[#allocation2 + $0xa8] sm:$0xf] %v199_v62  ;;  %2477 = vmatpush.bf16.msrb.mxu3 %v5300_v1  ;;  %v5156_v14 = vor.u32 %v5878_v54, %v5155_v49  ;;  %v4900_v16 = vor.u32 %v5814_v3, %v4899_v60  ;;  %vm78_vm8 = vcmp.ge.f32.partialorder %v6544_v40, 1.0  ;;  %v262_v12 = vpack.c.bf16 %v4160_v11, %v4160_v11 }
  0x4a   :  { %v265_v15 = vsel %vm259_vm7, %v4161_v6, %v258_v59  ;;  %2419 = vmatpush.bf16.msrb.mxu1 %v5044_v7  ;;  %v5284_v17 = vor.u32 %v5910_v9, %v5283_v8  ;;  %v5027_v20 = vld [vmem:[%s8859_s1 + $0x540] sm:$0xf]  ;;  %v5846_v21 = vld [vmem:[%s8859_s1 + $0x54c] sm:$0xf0]  ;;  %v4117_v22 = vsel %vm78_vm8, 1.0, %v8868_v37  ;;  %v4118_v29 = vadd.f32 -1.0, %v6544_v40 }
  0x4b   :  { %v5660_v19 = vld [vmem:[#allocation2 + $0x84] sm:$0xf]  ;;  %v6595_v23 = vadd.f32 %v265_v15, %v6291_v36  ;;  %2449 = vmatpush.bf16.msrb.mxu2 %v5156_v14  ;;  %v5028_v24 = vor.u32 %v5846_v21, %v5027_v20  ;;  %v81_v28 = vpack.c.bf16 %v4117_v22, %v4117_v22  ;;  %v4299_v25 = vld [vmem:[#allocation2 + $0x88] sm:$0xf]  ;;  %263 = vst [vmem:[#allocation2 + $0xac] sm:$0xf] %v262_v12 }
  0x4c   :  { %v5664_v18 = vld [vmem:[#allocation2 + $0x9c] sm:$0xf0]  ;;  %vm141_vm9 = vcmp.ge.f32.partialorder %v140_v57, 1.0  ;;  %v4133_v30 = vadd.f32 -1.0, %v140_v57  ;;  %vm204_vm10 = vcmp.ge.f32.partialorder %v6575_v5, 1.0  ;;  %2391 = vmatpush.bf16.msrb.mxu0 %v4900_v16  ;;  %v84_v34 = vsel %vm78_vm8, %v4118_v29, %v6544_v40  ;;  %v6667_v12 = vld [vmem:[%s8860_s0 + $0x28] sm:$0xff] }
  0x4d   :  { %v6599_v33 = vor.u32 %v5664_v18, %v4291_v10  ;;  %2478 = vmatpush.bf16.msrb.mxu3 %v5284_v17  ;;  %82 = vst [vmem:[#allocation2 + $0xc0] sm:$0xf] %v81_v28  ;;  %v4132_v38 = vsel %vm141_vm9, 1.0, %v8868_v37  ;;  %v4147_v39 = vsel %vm204_vm10, 1.0, %v8868_v37  ;;  %v5139_v41 = vld [vmem:[%s8859_s1 + $0x620] sm:$0xf]  ;;  %v85_v43 = vadd.f32 %v84_v34, %v6271_v31 }
  0x4e   :  { %v4293_v42 = vld [vmem:[#allocation2 + $0xa0] sm:$0xf0]  ;;  %2420 = vmatpush.bf16.msrb.mxu1 %v5028_v24  ;;  %v144_v44 = vpack.c.bf16 %v4132_v38, %v4132_v38  ;;  %v147_v45 = vsel %vm141_vm9, %v4133_v30, %v140_v57  ;;  %v207_v46 = vpack.c.bf16 %v4147_v39, %v4147_v39  ;;  %v5874_v40 = vld [vmem:[%s8859_s1 + $0x62c] sm:$0xf0]  ;;  %v4883_v47 = vld [vmem:[%s8859_s1 + $0x420] sm:$0xf] }
  0x4f   :  { %8903 = vst [vmem:[#allocation15_spill] sm:$0xff] %v6599_v33  ;;  %v6618_v48 = vor.u32 %v5660_v19, %v4293_v42  ;;  %v5661_v49 = vld [vmem:[#allocation2 + $0x8c] sm:$0xf]  ;;  %v148_v50 = vadd.f32 %v147_v45, %v6276_v32  ;;  %v4148_v51 = vadd.f32 -1.0, %v6575_v5  ;;  %vm267_vm11 = vcmp.ge.f32.partialorder %v6595_v23, 1.0  ;;  %v6632_v53 = vld [vmem:[%s8860_s0 + $0x20] sm:$0xff] }
  0x50   :  { %v5810_v31 = vld [vmem:[%s8859_s1 + $0x42c] sm:$0xf0]  ;;  %v5267_v52 = vld [vmem:[%s8859_s1 + $0x720] sm:$0xf]  ;;  %v5665_v54 = vld [vmem:[#allocation2 + $0xa4] sm:$0xf0]  ;;  %v5140_v57 = vor.u32 %v5874_v40, %v5139_v41 }
  0x51   :  { %8904 = vst [vmem:[#allocation16_spill] sm:$0xff] %v6618_v48  ;;  %vm86_vm12 = vcmp.ge.f32.partialorder %v85_v43, 1.0  ;;  %v4162_v32 = vsel %vm267_vm11, 1.0, %v8868_v37  ;;  %v4884_v58 = vor.u32 %v5810_v31, %v4883_v47  ;;  %v6638_v59 = vor.u32 %v5665_v54, %v4299_v25  ;;  %v5906_v63 = vld [vmem:[%s8859_s1 + $0x72c] sm:$0xf0]  ;;  %2317 = vmatmul.bf16.gmra.mxu1 %v6618_v48 }
  0x52   :  { %145 = vst [vmem:[#allocation2 + $0xc4] sm:$0xf] %v144_v44  ;;  %v4119_v60 = vsel %vm86_vm12, 1.0, %v8868_v37  ;;  %vm149_vm13 = vcmp.ge.f32.partialorder %v148_v50, 1.0  ;;  %v210_v62 = vsel %vm204_vm10, %v4148_v51, %v6575_v5  ;;  %v270_v6 = vpack.c.bf16 %v4162_v32, %v4162_v32  ;;  %2450 = vmatpush.bf16.msrb.mxu2 %v5140_v57  ;;  %v5011_v7 = vld [vmem:[%s8859_s1 + $0x520] sm:$0xf] }
  0x53   :  { %8905 = vst [vmem:[#allocation17_spill] sm:$0xff] %v6638_v59  ;;  %v89_v0 = vpack.c.bf16 %v4119_v60, %v4119_v60  ;;  %v4134_v1 = vsel %vm149_vm13, 1.0, %v8868_v37  ;;  %v211_v3 = vadd.f32 %v210_v62, %v6286_v35  ;;  %v5842_v5 = vld [vmem:[%s8859_s1 + $0x52c] sm:$0xf0]  ;;  %v4301_v8 = vld [vmem:[#allocation2 + $0xa8] sm:$0xf0]  ;;  %2392 = vmatpush.bf16.msrb.mxu0 %v4884_v58  ;;  %v5268_v11 = vor.u32 %v5906_v63, %v5267_v52 }
  0x54   :  { %208 = vst [vmem:[#allocation2 + $0xc8] sm:$0xf] %v207_v46  ;;  %v152_v9 = vpack.c.bf16 %v4134_v1, %v4134_v1  ;;  %v4163_v10 = vadd.f32 -1.0, %v6595_v23  ;;  %v5012_v14 = vor.u32 %v5842_v5, %v5011_v7  ;;  %v5123_v35 = vld [vmem:[%s8859_s1 + $0x600] sm:$0xf]  ;;  %v6661_v16 = vor.u32 %v5661_v49, %v4301_v8  ;;  %v6689_v29 = vld [vmem:[%s8860_s0 + $0x30] sm:$0xff] }
  0x55   :  { %2288 = vmatmul.bf16.gmra.mxu0 %v6599_v33  ;;  %90 = vst [vmem:[#allocation2 + $0xe0] sm:$0xf] %v89_v0  ;;  %vm212_vm14 = vcmp.ge.f32.partialorder %v211_v3, 1.0  ;;  %vm282_vm15 = vcmp.ge.f32.partialorder %v6632_v53, 1.0  ;;  %2479 = vmatpush.bf16.msrb.mxu3 %v5268_v11  ;;  %v5870_v20 = vld [vmem:[%s8859_s1 + $0x60c] sm:$0xf0] }
  0x56   :  { %2346 = vmatmul.bf16.gmra.mxu2 %v6638_v59  ;;  %8906 = vst [vmem:[#allocation18_spill] sm:$0xff] %v6661_v16  ;;  %v4149_v15 = vsel %vm212_vm14, 1.0, %v8868_v37  ;;  %v273_v17 = vsel %vm267_vm11, %v4163_v10, %v6595_v23  ;;  %2421 = vmatpush.bf16.msrb.mxu1 %v5012_v14  ;;  %v4165_v21 = vsel %vm282_vm15, 1.0, %v8868_v37  ;;  %v5124_v19 = vor.u32 %v5870_v20, %v5123_v35  ;;  %v4867_v24 = vld [vmem:[%s8859_s1 + $0x400] sm:$0xf]  ;;  %v6716_v49 = vld [vmem:[%s8860_s0 + $0x38] sm:$0xff] }
  0x57   :  { %153 = vst [vmem:[#allocation2 + $0xe4] sm:$0xf] %v152_v9  ;;  %v215_v22 = vpack.c.bf16 %v4149_v15, %v4149_v15  ;;  %v274_v18 = vadd.f32 %v273_v17, %v6291_v36  ;;  %v5806_v23 = vld [vmem:[%s8859_s1 + $0x40c] sm:$0xf0]  ;;  %v285_v28 = vpack.c.bf16 %v4165_v21, %v4165_v21  ;;  %v4323_v25 = vld [vmem:[#allocation2 + $0xc0] sm:$0xf] }
  0x58   :  { %271 = vst [vmem:[#allocation2 + $0xcc] sm:$0xf] %v270_v6  ;;  %v4868_v30 = vor.u32 %v5806_v23, %v4867_v24  ;;  %v5251_v36 = vld [vmem:[%s8859_s1 + $0x700] sm:$0xf]  ;;  %v5902_v34 = vld [vmem:[%s8859_s1 + $0x70c] sm:$0xf0]  ;;  %2375 = vmatmul.bf16.gmra.mxu3 %v6661_v16  ;;  %2451 = vmatpush.bf16.msrb.mxu2 %v5124_v19 }
  0x59   :  { %v5668_v38 = vld [vmem:[#allocation2 + $0xc4] sm:$0xf]  ;;  %216 = vst [vmem:[#allocation2 + $0xe8] sm:$0xf] %v215_v22  ;;  %vm275_vm0 = vcmp.ge.f32.partialorder %v274_v18, 1.0  ;;  %v5252_v39 = vor.u32 %v5902_v34, %v5251_v36  ;;  %v4166_v41 = vadd.f32 -1.0, %v6632_v53 }
  0x5a   :  { %v4164_v42 = vsel %vm275_vm0, 1.0, %v8868_v37  ;;  %2393 = vmatpush.bf16.msrb.mxu0 %v4868_v30  ;;  %v4995_v43 = vld [vmem:[%s8859_s1 + $0x500] sm:$0xf]  ;;  %v5838_v44 = vld [vmem:[%s8859_s1 + $0x50c] sm:$0xf0]  ;;  %vm345_vm1 = vcmp.ge.f32.partialorder %v6667_v12, 1.0 }
  0x5b   :  { %v278_v45 = vpack.c.bf16 %v4164_v42, %v4164_v42  ;;  %2480 = vmatpush.bf16.msrb.mxu3 %v5252_v39  ;;  %v4996_v46 = vor.u32 %v5838_v44, %v4995_v43  ;;  %286 = vst [vmem:[#allocation2 + $0x10] sm:$0xf] %v285_v28  ;;  %v288_v40 = vsel %vm282_vm15, %v4166_v41, %v6632_v53  ;;  %v4180_v47 = vsel %vm345_vm1, 1.0, %v8868_v37  ;;  %v5768_v50 = vld [vmem:[%s8859_s1 + $0x2e4] sm:$0xf] }
  0x5c   :  { %v5672_v51 = vld [vmem:[#allocation2 + $0xdc] sm:$0xf0]  ;;  %v289_v31 = vadd.f32 %v288_v40, %v6632_v53  ;;  %v348_v52 = vpack.c.bf16 %v4180_v47, %v4180_v47  ;;  %v4181_v54 = vadd.f32 -1.0, %v6667_v12  ;;  %vm408_vm2 = vcmp.ge.f32.partialorder %v6689_v29, 1.0  ;;  %v4725_v32 = vld [vmem:[%s8859_s1 + $0x2f0] sm:$0xf0] }
  0x5d   :  { %v6727_v57 = vor.u32 %v5672_v51, %v4323_v25  ;;  %279 = vst [vmem:[#allocation2 + $0xec] sm:$0xf] %v278_v45  ;;  %2422 = vmatpush.bf16.msrb.mxu1 %v4996_v46  ;;  %v4195_v60 = vsel %vm408_vm2, 1.0, %v8868_v37  ;;  %v4196_v62 = vadd.f32 -1.0, %v6689_v29  ;;  %v4728_v63 = vor.u32 %v5768_v50, %v4725_v32  ;;  %v4331_v1 = vld [vmem:[#allocation2 + $0xc8] sm:$0xf] }
  0x5e   :  { %v4325_v58 = vld [vmem:[#allocation2 + $0xe0] sm:$0xf0]  ;;  %vm290_vm3 = vcmp.ge.f32.partialorder %v289_v31, 1.0  ;;  %v4168_v3 = vadd.f32 -1.0, %v289_v31  ;;  %349 = vst [vmem:[#allocation2 + $0x14] sm:$0xf] %v348_v52  ;;  %v351_v6 = vsel %vm345_vm1, %v4181_v54, %v6667_v12  ;;  %v411_v8 = vpack.c.bf16 %v4195_v60, %v4195_v60 }
  0x5f   :  { %8907 = vst [vmem:[#allocation19_spill] sm:$0xff] %v6727_v57  ;;  %v6733_v0 = vor.u32 %v5668_v38, %v4325_v58  ;;  %v4167_v7 = vsel %vm290_vm3, 1.0, %v8868_v37  ;;  %v352_v5 = vadd.f32 %v351_v6, %v6667_v12  ;;  %v414_v9 = vsel %vm408_vm2, %v4196_v62, %v6689_v29  ;;  %2560 = vmatpush.bf16.msra.mxu2 %v4728_v63  ;;  %v5704_v10 = vld [vmem:[%s8859_s1 + $0xe4] sm:$0xf]  ;;  %v4469_v11 = vld [vmem:[%s8859_s1 + $0xf0] sm:$0xf0] }
  0x60   :  { %v5673_v14 = vld [vmem:[#allocation2 + $0xe4] sm:$0xf0]  ;;  %v293_v35 = vpack.c.bf16 %v4167_v7, %v4167_v7  ;;  %v296_v15 = vsel %vm290_vm3, %v4168_v3, %v289_v31  ;;  %v415_v17 = vadd.f32 %v414_v9, %v6689_v29  ;;  %vm471_vm4 = vcmp.ge.f32.partialorder %v6716_v49, 1.0  ;;  %v5800_v20 = vld [vmem:[%s8859_s1 + $0x3e4] sm:$0xf] }
  0x61   :  { %8908 = vst [vmem:[#allocation20_spill] sm:$0xff] %v6733_v0  ;;  %v6754_v21 = vor.u32 %v5673_v14, %v4331_v1  ;;  %vm353_vm5 = vcmp.ge.f32.partialorder %v352_v5, 1.0  ;;  %v4183_v22 = vadd.f32 -1.0, %v352_v5  ;;  %v4853_v18 = vld [vmem:[%s8859_s1 + $0x3f0] sm:$0xf0]  ;;  %v4472_v23 = vor.u32 %v5704_v10, %v4469_v11  ;;  %2322 = vmatmul.bf16.gmra.mxu1 %v6733_v0 }
  0x62   :  { %412 = vst [vmem:[#allocation2 + $0x18] sm:$0xf] %v411_v8  ;;  %v5669_v19 = vld [vmem:[#allocation2 + $0xcc] sm:$0xf]  ;;  %v4182_v24 = vsel %vm353_vm5, 1.0, %v8868_v37  ;;  %vm416_vm6 = vcmp.ge.f32.partialorder %v415_v17, 1.0  ;;  %v4856_v28 = vor.u32 %v5800_v20, %v4853_v18  ;;  %v297_v25 = vadd.f32 %v296_v15, %v6632_v53 }
  0x63   :  { %8909 = vst [vmem:[#allocation21_spill] sm:$0xff] %v6754_v21  ;;  %v356_v30 = vpack.c.bf16 %v4182_v24, %v4182_v24  ;;  %v4197_v36 = vsel %vm416_vm6, 1.0, %v8868_v37  ;;  %v4198_v34 = vadd.f32 -1.0, %v415_v17  ;;  %v5736_v38 = vld [vmem:[%s8859_s1 + $0x1e4] sm:$0xf]  ;;  %v359_v42 = vsel %vm353_vm5, %v4183_v22, %v352_v5  ;;  %2502 = vmatpush.bf16.msra.mxu0 %v4472_v23 }
  0x64   :  { %294 = vst [vmem:[#allocation2 + $0x30] sm:$0xf] %v293_v35  ;;  %v4597_v39 = vld [vmem:[%s8859_s1 + $0x1f0] sm:$0xf0]  ;;  %v4333_v41 = vld [vmem:[#allocation2 + $0xe8] sm:$0xf0]  ;;  %v419_v43 = vpack.c.bf16 %v4197_v36, %v4197_v36  ;;  %2589 = vmatpush.bf16.msra.mxu3 %v4856_v28  ;;  %v360_v62 = vadd.f32 %v359_v42, %v6667_v12 }
  0x65   :  { %2293 = vmatmul.bf16.gmra.mxu0 %v6727_v57  ;;  %v4210_v44 = vsel %vm471_vm4, 1.0, %v8868_v37  ;;  %v4211_v45 = vadd.f32 -1.0, %v6716_v49  ;;  %v5764_v46 = vld [vmem:[%s8859_s1 + $0x2c4] sm:$0xf]  ;;  %v6781_v40 = vor.u32 %v5669_v19, %v4333_v41  ;;  %v4243_v47 = vld [vmem:[#allocation2 + $0x10] sm:$0xf]  ;;  %v422_v50 = vsel %vm416_vm6, %v4198_v34, %v415_v17 }
  0x66   :  { %2351 = vmatmul.bf16.gmra.mxu2 %v6754_v21  ;;  %357 = vst [vmem:[#allocation2 + $0x34] sm:$0xf] %v356_v30  ;;  %v474_v51 = vpack.c.bf16 %v4210_v44, %v4210_v44  ;;  %v4709_v31 = vld [vmem:[%s8859_s1 + $0x2d0] sm:$0xf0]  ;;  %v4600_v54 = vor.u32 %v5736_v38, %v4597_v39  ;;  %v5700_v58 = vld [vmem:[%s8859_s1 + $0xc4] sm:$0xf]  ;;  %v423_v7 = vadd.f32 %v422_v50, %v6689_v29 }
  0x67   :  { %8910 = vst [vmem:[#allocation22_spill] sm:$0xff] %v6781_v40  ;;  %v477_v52 = vsel %vm471_vm4, %v4211_v45, %v6716_v49  ;;  %v4712_v32 = vor.u32 %v5764_v46, %v4709_v31  ;;  %v4453_v60 = vld [vmem:[%s8859_s1 + $0xd0] sm:$0xf0]  ;;  %v5796_v3 = vld [vmem:[%s8859_s1 + $0x3c4] sm:$0xf]  ;;  %vm298_vm8 = vcmp.ge.f32.partialorder %v297_v25, 1.0 }
  0x68   :  { %420 = vst [vmem:[#allocation2 + $0x38] sm:$0xf] %v419_v43  ;;  %v478_v63 = vadd.f32 %v477_v52, %v6716_v49  ;;  %v4456_v1 = vor.u32 %v5700_v58, %v4453_v60  ;;  %v4837_v6 = vld [vmem:[%s8859_s1 + $0x3d0] sm:$0xf0]  ;;  %2531 = vmatpush.bf16.msra.mxu1 %v4600_v54  ;;  %v5732_v8 = vld [vmem:[%s8859_s1 + $0x1c4] sm:$0xf]  ;;  %2380 = vmatmul.bf16.gmra.mxu3 %v6781_v40 }
  0x69   :  { %475 = vst [vmem:[#allocation2 + $0x1c] sm:$0xf] %v474_v51  ;;  %2561 = vmatpush.bf16.msra.mxu2 %v4712_v32  ;;  %v4840_v5 = vor.u32 %v5796_v3, %v4837_v6  ;;  %v4581_v9 = vld [vmem:[%s8859_s1 + $0x1d0] sm:$0xf0]  ;;  %v4169_v20 = vsel %vm298_vm8, 1.0, %v8868_v37  ;;  %v4170_v22 = vadd.f32 -1.0, %v297_v25 }
  0x6a   :  { %vm479_vm7 = vcmp.ge.f32.partialorder %v478_v63, 1.0  ;;  %v4213_v11 = vadd.f32 -1.0, %v478_v63  ;;  %2503 = vmatpush.bf16.msra.mxu0 %v4456_v1  ;;  %v4584_v14 = vor.u32 %v5732_v8, %v4581_v9  ;;  %v5646_v15 = vld [vmem:[#allocation2 + $0x14] sm:$0xf]  ;;  %v4251_v18 = vld [vmem:[#allocation2 + $0x18] sm:$0xf]  ;;  %v301_v23 = vpack.c.bf16 %v4169_v20, %v4169_v20 }
  0x6b   :  { %v5650_v10 = vld [vmem:[#allocation2 + $0x2c] sm:$0xf0]  ;;  %v4212_v17 = vsel %vm479_vm7, 1.0, %v8868_v37  ;;  %2590 = vmatpush.bf16.msra.mxu3 %v4840_v5  ;;  %vm361_vm9 = vcmp.ge.f32.partialorder %v360_v62, 1.0  ;;  %v304_v36 = vsel %vm298_vm8, %v4170_v22, %v297_v25  ;;  %v4185_v38 = vadd.f32 -1.0, %v360_v62 }
  0x6c   :  { %v6812_v35 = vor.u32 %v5650_v10, %v4243_v47  ;;  %v482_v19 = vpack.c.bf16 %v4212_v17, %v4212_v17  ;;  %v485_v24 = vsel %vm479_vm7, %v4213_v11, %v478_v63  ;;  %2532 = vmatpush.bf16.msra.mxu1 %v4584_v14  ;;  %v4184_v34 = vsel %vm361_vm9, 1.0, %v8868_v37  ;;  %302 = vst [vmem:[#allocation2 + $0x50] sm:$0xf] %v301_v23  ;;  %v5760_v58 = vld [vmem:[%s8859_s1 + $0x2a4] sm:$0xf] }
  0x6d   :  { %v4245_v28 = vld [vmem:[#allocation2 + $0x30] sm:$0xf0]  ;;  %v486_v30 = vadd.f32 %v485_v24, %v6716_v49  ;;  %v305_v42 = vadd.f32 %v304_v36, %v6632_v53  ;;  %v364_v43 = vpack.c.bf16 %v4184_v34, %v4184_v34  ;;  %vm424_vm10 = vcmp.ge.f32.partialorder %v423_v7, 1.0  ;;  %v5696_v3 = vld [vmem:[%s8859_s1 + $0xa4] sm:$0xf] }
  0x6e   :  { %8911 = vst [vmem:[#allocation23_spill] sm:$0xff] %v6812_v35  ;;  %v6818_v39 = vor.u32 %v5646_v15, %v4245_v28  ;;  %v367_v45 = vsel %vm361_vm9, %v4185_v38, %v360_v62  ;;  %v4199_v46 = vsel %vm424_vm10, 1.0, %v8868_v37  ;;  %v4200_v47 = vadd.f32 -1.0, %v423_v7  ;;  %v4693_v60 = vld [vmem:[%s8859_s1 + $0x2b0] sm:$0xf0] }
  0x6f   :  { %v5651_v41 = vld [vmem:[#allocation2 + $0x34] sm:$0xf0]  ;;  %483 = vst [vmem:[#allocation2 + $0x3c] sm:$0xf] %v482_v19  ;;  %vm306_vm11 = vcmp.ge.f32.partialorder %v305_v42, 1.0  ;;  %v4172_v25 = vadd.f32 -1.0, %v305_v42  ;;  %v368_v50 = vadd.f32 %v367_v45, %v6667_v12  ;;  %v427_v51 = vpack.c.bf16 %v4199_v46, %v4199_v46 }
  0x70   :  { %v6821_v44 = vor.u32 %v5651_v41, %v4251_v18  ;;  %365 = vst [vmem:[#allocation2 + $0x54] sm:$0xf] %v364_v43  ;;  %v5647_v31 = vld [vmem:[#allocation2 + $0x1c] sm:$0xf]  ;;  %v4171_v52 = vsel %vm306_vm11, 1.0, %v8868_v37  ;;  %v430_v54 = vsel %vm424_vm10, %v4200_v47, %v423_v7  ;;  %vm487_vm12 = vcmp.ge.f32.partialorder %v486_v30, 1.0 }
  0x71   :  { %v4215_v32 = vadd.f32 -1.0, %v486_v30  ;;  %v309_v62 = vpack.c.bf16 %v4171_v52, %v4171_v52  ;;  %v312_v63 = vsel %vm306_vm11, %v4172_v25, %v305_v42  ;;  %vm369_vm13 = vcmp.ge.f32.partialorder %v368_v50, 1.0  ;;  %428 = vst [vmem:[#allocation2 + $0x58] sm:$0xf] %v427_v51  ;;  %v4437_v6 = vld [vmem:[%s8859_s1 + $0xb0] sm:$0xf0]  ;;  %2423 = vmatmul.bf16.vlgmr.msrb.gmra.mxu1 %v6818_v39 }
  0x72   :  { %v4187_v1 = vadd.f32 -1.0, %v368_v50  ;;  %v5792_v7 = vld [vmem:[%s8859_s1 + $0x3a4] sm:$0xf]  ;;  %v4821_v5 = vld [vmem:[%s8859_s1 + $0x3b0] sm:$0xf0]  ;;  %v6846_v8 = vadd.f32 %v312_v63, %v6632_v53  ;;  %v4186_v9 = vsel %vm369_vm13, 1.0, %v8868_v37  ;;  %v431_v10 = vadd.f32 %v430_v54, %v6689_v29 }
  0x73   :  { %v4214_v11 = vsel %vm487_vm12, 1.0, %v8868_v37  ;;  %v5728_v14 = vld [vmem:[%s8859_s1 + $0x1a4] sm:$0xf]  ;;  %v4565_v15 = vld [vmem:[%s8859_s1 + $0x1b0] sm:$0xf0]  ;;  %v372_v17 = vpack.c.bf16 %v4186_v9, %v4186_v9  ;;  %v493_v36 = vsel %vm487_vm12, %v4215_v32, %v486_v30  ;;  %v4696_v43 = vor.u32 %v5760_v58, %v4693_v60 }
  0x74   :  { %310 = vst [vmem:[#allocation2 + $0x70] sm:$0xf] %v309_v62  ;;  %v375_v20 = vsel %vm369_vm13, %v4187_v1, %v368_v50  ;;  %v490_v22 = vpack.c.bf16 %v4214_v11, %v4214_v11  ;;  %v5756_v18 = vld [vmem:[%s8859_s1 + $0x284] sm:$0xf]  ;;  %v4677_v19 = vld [vmem:[%s8859_s1 + $0x290] sm:$0xf0]  ;;  %v494_v42 = vadd.f32 %v493_v36, %v6716_v49  ;;  %v4440_v25 = vor.u32 %v5696_v3, %v4437_v6 }
  0x75   :  { %2394 = vmatmul.bf16.vlgmr.msrb.gmra.mxu0 %v6812_v35  ;;  %v6868_v23 = vadd.f32 %v375_v20, %v6667_v12  ;;  %vm432_vm14 = vcmp.ge.f32.partialorder %v431_v10, 1.0  ;;  %v4202_v28 = vadd.f32 -1.0, %v431_v10  ;;  %v5692_v34 = vld [vmem:[%s8859_s1 + $0x84] sm:$0xf]  ;;  %373 = vst [vmem:[#allocation2 + $0x74] sm:$0xf] %v372_v17  ;;  %v4824_v50 = vor.u32 %v5792_v7, %v4821_v5  ;;  %2562 = vmatpush.bf16.msra.mxu2 %v4696_v43 }
  0x76   :  { %v4253_v24 = vld [vmem:[#allocation2 + $0x38] sm:$0xf0]  ;;  %2452 = vmatmul.bf16.vlgmr.msrb.gmra.mxu2 %v6821_v44  ;;  %v4201_v41 = vsel %vm432_vm14, 1.0, %v8868_v37  ;;  %v4421_v45 = vld [vmem:[%s8859_s1 + $0x90] sm:$0xf0]  ;;  %vm495_vm15 = vcmp.ge.f32.partialorder %v494_v42, 1.0  ;;  %v4568_v54 = vor.u32 %v5728_v14, %v4565_v15  ;;  %2504 = vmatpush.bf16.msra.mxu0 %v4440_v25  ;;  %v4680_v63 = vor.u32 %v5756_v18, %v4677_v19 }
  0x77   :  { %v6875_v38 = vor.u32 %v5647_v31, %v4253_v24  ;;  %v4275_v46 = vld [vmem:[#allocation2 + $0x50] sm:$0xf]  ;;  %v435_v30 = vpack.c.bf16 %v4201_v41, %v4201_v41  ;;  %v438_v47 = vsel %vm432_vm14, %v4202_v28, %v431_v10  ;;  %491 = vst [vmem:[#allocation2 + $0x5c] sm:$0xf] %v490_v22  ;;  %v5788_v51 = vld [vmem:[%s8859_s1 + $0x384] sm:$0xf]  ;;  %2591 = vmatpush.bf16.msra.mxu3 %v4824_v50 }
  0x78   :  { %v6886_v31 = vadd.f32 %v438_v47, %v6689_v29  ;;  %v4217_v52 = vadd.f32 -1.0, %v494_v42  ;;  %v4805_v32 = vld [vmem:[%s8859_s1 + $0x390] sm:$0xf0]  ;;  %v5724_v58 = vld [vmem:[%s8859_s1 + $0x184] sm:$0xf]  ;;  %v4216_v62 = vsel %vm495_vm15, 1.0, %v8868_v37  ;;  %v4424_v1 = vor.u32 %v5692_v34, %v4421_v45  ;;  %2533 = vmatpush.bf16.msra.mxu1 %v4568_v54 }
  0x79   :  { %v5654_v60 = vld [vmem:[#allocation2 + $0x54] sm:$0xf]  ;;  %436 = vst [vmem:[#allocation2 + $0x78] sm:$0xf] %v435_v30  ;;  %vm314_vm0 = vcmp.ge.f32.partialorder %v6846_v8, 1.0  ;;  %2481 = vmatmul.bf16.vlgmr.msrb.gmra.mxu3 %v6875_v38  ;;  %v498_v3 = vpack.c.bf16 %v4216_v62, %v4216_v62  ;;  %v4808_v7 = vor.u32 %v5788_v51, %v4805_v32  ;;  %v4174_v20 = vadd.f32 -1.0, %v6846_v8  ;;  %2563 = vmatpush.bf16.msra.mxu2 %v4680_v63 }
  0x7a   :  { %v501_v6 = vsel %vm495_vm15, %v4217_v52, %v494_v42  ;;  %v4549_v5 = vld [vmem:[%s8859_s1 + $0x190] sm:$0xf0]  ;;  %v4173_v9 = vsel %vm314_vm0, 1.0, %v8868_v37  ;;  %v5752_v10 = vld [vmem:[%s8859_s1 + $0x264] sm:$0xf]  ;;  %vm377_vm1 = vcmp.ge.f32.partialorder %v6868_v23, 1.0  ;;  %2505 = vmatpush.bf16.msra.mxu0 %v4424_v1 }
  0x7b   :  { %v5658_v11 = vld [vmem:[#allocation2 + $0x6c] sm:$0xf0]  ;;  %v6909_v14 = vadd.f32 %v501_v6, %v6716_v49  ;;  %v4552_v15 = vor.u32 %v5724_v58, %v4549_v5  ;;  %v317_v17 = vpack.c.bf16 %v4173_v9, %v4173_v9  ;;  %v4661_v22 = vld [vmem:[%s8859_s1 + $0x270] sm:$0xf0]  ;;  %499 = vst [vmem:[#allocation2 + $0x7c] sm:$0xf] %v498_v3  ;;  %2592 = vmatpush.bf16.msra.mxu3 %v4808_v7 }
  0x7c   :  { %v6915_v18 = vor.u32 %v5658_v11, %v4275_v46  ;;  %v4189_v19 = vadd.f32 -1.0, %v6868_v23  ;;  %vm440_vm2 = vcmp.ge.f32.partialorder %v6886_v31, 1.0  ;;  %v4277_v24 = vld [vmem:[#allocation2 + $0x70] sm:$0xf0]  ;;  %v320_v28 = vsel %vm314_vm0, %v4174_v20, %v6846_v8  ;;  %v4283_v43 = vld [vmem:[#allocation2 + $0x58] sm:$0xf] }
  0x7d   :  { %318 = vst [vmem:[#allocation2 + $0x90] sm:$0xf] %v317_v17  ;;  %v4188_v36 = vsel %vm377_vm1, 1.0, %v8868_v37  ;;  %v4203_v34 = vsel %vm440_vm2, 1.0, %v8868_v37  ;;  %v4664_v41 = vor.u32 %v5752_v10, %v4661_v22  ;;  %v6929_v42 = vor.u32 %v5654_v60, %v4277_v24  ;;  %2534 = vmatpush.bf16.msra.mxu1 %v4552_v15  ;;  %v5688_v30 = vld [vmem:[%s8859_s1 + $0x64] sm:$0xf] }
  0x7e   :  { %v321_v45 = vadd.f32 %v320_v28, %v6632_v53  ;;  %v380_v46 = vpack.c.bf16 %v4188_v36, %v4188_v36  ;;  %v383_v8 = vsel %vm377_vm1, %v4189_v19, %v6868_v23  ;;  %v4405_v47 = vld [vmem:[%s8859_s1 + $0x70] sm:$0xf0]  ;;  %v5655_v25 = vld [vmem:[#allocation2 + $0x5c] sm:$0xf]  ;;  %v443_v51 = vpack.c.bf16 %v4203_v34, %v4203_v34  ;;  %v5784_v23 = vld [vmem:[%s8859_s1 + $0x364] sm:$0xf] }
  0x7f   :  { %v384_v50 = vadd.f32 %v383_v8, %v6667_v12  ;;  %v4204_v52 = vadd.f32 -1.0, %v6886_v31  ;;  %vm503_vm3 = vcmp.ge.f32.partialorder %v6909_v14, 1.0  ;;  %v4789_v54 = vld [vmem:[%s8859_s1 + $0x370] sm:$0xf0]  ;;  %2564 = vmatpush.bf16.msra.mxu2 %v4664_v41  ;;  %v4408_v60 = vor.u32 %v5688_v30, %v4405_v47  ;;  %v5720_v10 = vld [vmem:[%s8859_s1 + $0x164] sm:$0xf] }
  0x80   :  { %v5659_v32 = vld [vmem:[#allocation2 + $0x74] sm:$0xf0]  ;;  %vm322_vm4 = vcmp.ge.f32.partialorder %v321_v45, 1.0  ;;  %v4176_v58 = vadd.f32 -1.0, %v321_v45  ;;  %381 = vst [vmem:[#allocation2 + $0x94] sm:$0xf] %v380_v46  ;;  %v4792_v62 = vor.u32 %v5784_v23, %v4789_v54 }
  0x81   :  { %v6950_v63 = vor.u32 %v5659_v32, %v4283_v43  ;;  %v4175_v1 = vsel %vm322_vm4, 1.0, %v8868_v37  ;;  %vm385_vm5 = vcmp.ge.f32.partialorder %v384_v50, 1.0  ;;  %v4191_v3 = vadd.f32 -1.0, %v384_v50  ;;  %444 = vst [vmem:[#allocation2 + $0x98] sm:$0xf] %v443_v51  ;;  %2506 = vmatpush.bf16.msra.mxu0 %v4408_v60  ;;  %2428 = vmatmul.bf16.gmra.mxu1 %v6929_v42 }
  0x82   :  { %v325_v6 = vpack.c.bf16 %v4175_v1, %v4175_v1  ;;  %v328_v7 = vsel %vm322_vm4, %v4176_v58, %v321_v45  ;;  %v4190_v5 = vsel %vm385_vm5, 1.0, %v8868_v37  ;;  %v446_v9 = vsel %vm440_vm2, %v4204_v52, %v6886_v31  ;;  %2593 = vmatpush.bf16.msra.mxu3 %v4792_v62  ;;  %v4533_v11 = vld [vmem:[%s8859_s1 + $0x170] sm:$0xf0]  ;;  %v4285_v15 = vld [vmem:[#allocation2 + $0x78] sm:$0xf0] }
  0x83   :  { %v6965_v17 = vadd.f32 %v328_v7, %v6632_v53  ;;  %v388_v20 = vpack.c.bf16 %v4190_v5, %v4190_v5  ;;  %v391_v22 = vsel %vm385_vm5, %v4191_v3, %v384_v50  ;;  %v447_v31 = vadd.f32 %v446_v9, %v6689_v29  ;;  %v5748_v19 = vld [vmem:[%s8859_s1 + $0x244] sm:$0xf]  ;;  %v4645_v24 = vld [vmem:[%s8859_s1 + $0x250] sm:$0xf0] }
  0x84   :  { %v6975_v28 = vor.u32 %v5655_v25, %v4285_v15  ;;  %326 = vst [vmem:[#allocation2 + $0xb0] sm:$0xf] %v325_v6  ;;  %v4218_v36 = vsel %vm503_vm3, 1.0, %v8868_v37  ;;  %v4219_v34 = vadd.f32 -1.0, %v6909_v14  ;;  %v4536_v45 = vor.u32 %v5720_v10, %v4533_v11  ;;  %v5684_v46 = vld [vmem:[%s8859_s1 + $0x44] sm:$0xf] }
  0x85   :  { %2399 = vmatmul.bf16.gmra.mxu0 %v6915_v18  ;;  %389 = vst [vmem:[#allocation2 + $0xb4] sm:$0xf] %v388_v20  ;;  %vm448_vm6 = vcmp.ge.f32.partialorder %v447_v31, 1.0  ;;  %v4206_v41 = vadd.f32 -1.0, %v447_v31  ;;  %v506_v43 = vpack.c.bf16 %v4218_v36, %v4218_v36  ;;  %v392_v8 = vadd.f32 %v391_v22, %v6667_v12  ;;  %v4389_v50 = vld [vmem:[%s8859_s1 + $0x50] sm:$0xf0] }
  0x86   :  { %2457 = vmatmul.bf16.gmra.mxu2 %v6950_v63  ;;  %v4205_v30 = vsel %vm448_vm6, 1.0, %v8868_v37  ;;  %v509_v47 = vsel %vm503_vm3, %v4219_v34, %v6909_v14  ;;  %v4648_v25 = vor.u32 %v5748_v19, %v4645_v24  ;;  %v5780_v51 = vld [vmem:[%s8859_s1 + $0x344] sm:$0xf]  ;;  %v4307_v52 = vld [vmem:[#allocation2 + $0x90] sm:$0xf]  ;;  %2535 = vmatpush.bf16.msra.mxu1 %v4536_v45  ;;  %vm330_vm7 = vcmp.ge.f32.partialorder %v6965_v17, 1.0 }
  0x87   :  { %v451_v23 = vpack.c.bf16 %v4205_v30, %v4205_v30  ;;  %v454_v54 = vsel %vm448_vm6, %v4206_v41, %v447_v31  ;;  %507 = vst [vmem:[#allocation2 + $0x9c] sm:$0xf] %v506_v43  ;;  %v510_v32 = vadd.f32 %v509_v47, %v6716_v49  ;;  %v4773_v14 = vld [vmem:[%s8859_s1 + $0x350] sm:$0xf0]  ;;  %v4392_v62 = vor.u32 %v5684_v46, %v4389_v50  ;;  %v5716_v3 = vld [vmem:[%s8859_s1 + $0x144] sm:$0xf] }
  0x88   :  { %v5662_v58 = vld [vmem:[#allocation2 + $0x94] sm:$0xf]  ;;  %v455_v60 = vadd.f32 %v454_v54, %v6689_v29  ;;  %2565 = vmatpush.bf16.msra.mxu2 %v4648_v25  ;;  %v4776_v1 = vor.u32 %v5780_v51, %v4773_v14  ;;  %v4177_v9 = vsel %vm330_vm7, 1.0, %v8868_v37  ;;  %v4178_v15 = vadd.f32 -1.0, %v6965_v17  ;;  %v5744_v20 = vld [vmem:[%s8859_s1 + $0x224] sm:$0xf] }
  0x89   :  { %v4517_v6 = vld [vmem:[%s8859_s1 + $0x150] sm:$0xf0]  ;;  %452 = vst [vmem:[#allocation2 + $0xb8] sm:$0xf] %v451_v23  ;;  %vm511_vm8 = vcmp.ge.f32.partialorder %v510_v32, 1.0  ;;  %v4221_v7 = vadd.f32 -1.0, %v510_v32  ;;  %2486 = vmatmul.bf16.gmra.mxu3 %v6975_v28  ;;  %2507 = vmatpush.bf16.msra.mxu0 %v4392_v62  ;;  %v333_v11 = vpack.c.bf16 %v4177_v9, %v4177_v9 }
  0x8a   :  { %v4520_v5 = vor.u32 %v5716_v3, %v4517_v6  ;;  %v4220_v10 = vsel %vm511_vm8, 1.0, %v8868_v37  ;;  %vm393_vm9 = vcmp.ge.f32.partialorder %v392_v8, 1.0  ;;  %2594 = vmatpush.bf16.msra.mxu3 %v4776_v1  ;;  %v4193_v36 = vadd.f32 -1.0, %v392_v8  ;;  %v4629_v34 = vld [vmem:[%s8859_s1 + $0x230] sm:$0xf0] }
  0x8b   :  { %v5666_v22 = vld [vmem:[#allocation2 + $0xac] sm:$0xf0]  ;;  %v514_v31 = vpack.c.bf16 %v4220_v10, %v4220_v10  ;;  %v517_v19 = vsel %vm511_vm8, %v4221_v7, %v510_v32  ;;  %v4192_v24 = vsel %vm393_vm9, 1.0, %v8868_v37  ;;  %v4315_v45 = vld [vmem:[#allocation2 + $0x98] sm:$0xf]  ;;  %v336_v30 = vsel %vm330_vm7, %v4178_v15, %v6965_v17 }
  0x8c   :  { %2536 = vmatpush.bf16.msra.mxu1 %v4520_v5  ;;  %v7022_v41 = vor.u32 %v5666_v22, %v4307_v52  ;;  %v4309_v43 = vld [vmem:[#allocation2 + $0xb0] sm:$0xf0]  ;;  %v518_v46 = vadd.f32 %v517_v19, %v6716_v49  ;;  %334 = vst [vmem:[#allocation2 + $0xd0] sm:$0xf] %v333_v11  ;;  %v396_v47 = vpack.c.bf16 %v4192_v24, %v4192_v24  ;;  %vm456_vm10 = vcmp.ge.f32.partialorder %v455_v60, 1.0 }
  0x8d   :  { %v7028_v25 = vor.u32 %v5662_v58, %v4309_v43  ;;  %515 = vst [vmem:[#allocation2 + $0xbc] sm:$0xf] %v514_v31  ;;  %v337_v50 = vadd.f32 %v336_v30, %v6632_v53  ;;  %v399_v51 = vsel %vm393_vm9, %v4193_v36, %v392_v8  ;;  %v5680_v52 = vld [vmem:[%s8859_s1 + $0x24] sm:$0xf]  ;;  %v4207_v54 = vsel %vm456_vm10, 1.0, %v8868_v37 }
  0x8e   :  { %397 = vst [vmem:[#allocation2 + $0xd4] sm:$0xf] %v396_v47  ;;  %v400_v23 = vadd.f32 %v399_v51, %v6667_v12  ;;  %v4208_v17 = vadd.f32 -1.0, %v455_v60  ;;  %v4632_v32 = vor.u32 %v5744_v20, %v4629_v34  ;;  %v4373_v14 = vld [vmem:[%s8859_s1 + $0x30] sm:$0xf0]  ;;  %v459_v53 = vpack.c.bf16 %v4207_v54, %v4207_v54 }
  0x8f   :  { %vm338_vm11 = vcmp.ge.f32.partialorder %v337_v50, 1.0  ;;  %vm519_vm12 = vcmp.ge.f32.partialorder %v518_v46, 1.0  ;;  %v4223_v8 = vadd.f32 -1.0, %v518_v46  ;;  %v5776_v58 = vld [vmem:[%s8859_s1 + $0x324] sm:$0xf]  ;;  %v4376_v22 = vor.u32 %v5680_v52, %v4373_v14 }
  0x90   :  { %v5667_v62 = vld [vmem:[#allocation2 + $0xb4] sm:$0xf0]  ;;  %v4179_v12 = vsel %vm338_vm11, 1.0, %v8868_v37  ;;  %vm401_vm13 = vcmp.ge.f32.partialorder %v400_v23, 1.0  ;;  %v462_v1 = vsel %vm456_vm10, %v4208_v17, %v455_v60  ;;  %v4222_v3 = vsel %vm519_vm12, 1.0, %v8868_v37  ;;  %2566 = vmatpush.bf16.msra.mxu2 %v4632_v32 }
  0x91   :  { %v7048_v6 = vor.u32 %v5667_v62, %v4315_v45  ;;  %v341_v7 = vpack.c.bf16 %v4179_v12, %v4179_v12  ;;  %v4194_v5 = vsel %vm401_vm13, 1.0, %v8868_v37  ;;  %460 = vst [vmem:[#allocation2 + $0xd8] sm:$0xf] %v459_v53  ;;  %v463_v9 = vadd.f32 %v462_v1, %v6689_v29  ;;  %v4757_v10 = vld [vmem:[%s8859_s1 + $0x330] sm:$0xf0]  ;;  %2433 = vmatmul.bf16.gmra.mxu1 %v7028_v25 }
  0x92   :  { %v5663_v11 = vld [vmem:[#allocation2 + $0x9c] sm:$0xf]  ;;  %v404_v15 = vpack.c.bf16 %v4194_v5, %v4194_v5  ;;  %v522_v20 = vpack.c.bf16 %v4222_v3, %v4222_v3  ;;  %v525_v60 = vsel %vm519_vm12, %v4223_v8, %v518_v46  ;;  %v5712_v31 = vld [vmem:[%s8859_s1 + $0x124] sm:$0xf]  ;;  %v4501_v19 = vld [vmem:[%s8859_s1 + $0x130] sm:$0xf0]  ;;  %v4760_v24 = vor.u32 %v5776_v58, %v4757_v10  ;;  %2508 = vmatpush.bf16.msra.mxu0 %v4376_v22 }
  0x93   :  { %342 = vst [vmem:[#allocation2 + $0xf0] sm:$0xf] %v341_v7  ;;  %vm464_vm14 = vcmp.ge.f32.partialorder %v463_v9, 1.0  ;;  %v526_v29 = vadd.f32 %v525_v60, %v6716_v49  ;;  %v4504_v36 = vor.u32 %v5712_v31, %v4501_v19  ;;  %v5740_v34 = vld [vmem:[%s8859_s1 + $0x204] sm:$0xf] }
  0x94   :  { %v4317_v43 = vld [vmem:[#allocation2 + $0xb8] sm:$0xf0]  ;;  %405 = vst [vmem:[#allocation2 + $0xf4] sm:$0xf] %v404_v15  ;;  %v4209_v45 = vsel %vm464_vm14, 1.0, %v8868_v37  ;;  %2595 = vmatpush.bf16.msra.mxu3 %v4760_v24 }
  0x95   :  { %2404 = vmatmul.bf16.gmra.mxu0 %v7022_v41  ;;  %v467_v46 = vpack.c.bf16 %v4209_v45, %v4209_v45  ;;  %523 = vst [vmem:[#allocation2 + $0xdc] sm:$0xf] %v522_v20  ;;  %vm527_vm15 = vcmp.ge.f32.partialorder %v526_v29, 1.0  ;;  %2537 = vmatpush.bf16.msra.mxu1 %v4504_v36  ;;  %v7070_v49 = vor.u32 %v5663_v11, %v4317_v43  ;;  %v4613_v47 = vld [vmem:[%s8859_s1 + $0x210] sm:$0xf0] }
  0x96   :  { %2462 = vmatmul.bf16.gmra.mxu2 %v7048_v6  ;;  %v4224_v30 = vsel %vm527_vm15, 1.0, %v8868_v37  ;;  %v5676_v50 = vld [vmem:[%s8859_s1 + $0x4] sm:$0xf]  ;;  %v4616_v52 = vor.u32 %v5740_v34, %v4613_v47  ;;  %v4357_v23 = vld [vmem:[%s8859_s1 + $0x10] sm:$0xf0] }
  0x97   :  { %468 = vst [vmem:[#allocation2 + $0xf8] sm:$0xf] %v467_v46  ;;  %v530_v51 = vpack.c.bf16 %v4224_v30, %v4224_v30  ;;  %v5772_v54 = vld [vmem:[%s8859_s1 + $0x304] sm:$0xf]  ;;  %v4360_v17 = vor.u32 %v5676_v50, %v4357_v23  ;;  %v4741_v32 = vld [vmem:[%s8859_s1 + $0x310] sm:$0xf0] }
  0x98   :  { %v5708_v14 = vld [vmem:[%s8859_s1 + $0x104] sm:$0xf]  ;;  %2567 = vmatpush.bf16.msra.mxu2 %v4616_v52  ;;  %v4744_v53 = vor.u32 %v5772_v54, %v4741_v32  ;;  %v4485_v8 = vld [vmem:[%s8859_s1 + $0x110] sm:$0xf0]  ;;  %v4339_v58 = vld [vmem:[#allocation2 + $0xd0] sm:$0xf] }
  0x99   :  { %531 = vst [vmem:[#allocation2 + $0xfc] sm:$0xf] %v530_v51  ;;  %2491 = vmatmul.bf16.gmra.mxu3 %v7070_v49  ;;  %2509 = vmatpush.bf16.msra.mxu0 %v4360_v17  ;;  %v4488_v62 = vor.u32 %v5708_v14, %v4485_v8  ;;  %v5896_v12 = vld [vmem:[%s8859_s1 + $0x6e4] sm:$0xf]  ;;  %v5670_v1 = vld [vmem:[#allocation2 + $0xd4] sm:$0xf] }
  0x9a   :  { %2596 = vmatpush.bf16.msra.mxu3 %v4744_v53  ;;  %v5237_v3 = vld [vmem:[%s8859_s1 + $0x6f0] sm:$0xf0]  ;;  %v5832_v7 = vld [vmem:[%s8859_s1 + $0x4e4] sm:$0xf]  ;;  %v5674_v5 = vld [vmem:[#allocation2 + $0xec] sm:$0xf0] }
  0x9b   :  { %2538 = vmatpush.bf16.msra.mxu1 %v4488_v62  ;;  %v5240_v9 = vor.u32 %v5896_v12, %v5237_v3  ;;  %v4981_v10 = vld [vmem:[%s8859_s1 + $0x4f0] sm:$0xf0]  ;;  %v5928_v11 = vld [vmem:[%s8859_s1 + $0x7e4] sm:$0xf]  ;;  %v4347_v20 = vld [vmem:[#allocation2 + $0xd8] sm:$0xf]  ;;  %v7119_v36 = vor.u32 %v5674_v5, %v4339_v58 }
  0x9c   :  { %v4341_v15 = vld [vmem:[#allocation2 + $0xf0] sm:$0xf0]  ;;  %v4984_v60 = vor.u32 %v5832_v7, %v4981_v10  ;;  %v5864_v29 = vld [vmem:[%s8859_s1 + $0x5e4] sm:$0xf]  ;;  %v5671_v32 = vld [vmem:[#allocation2 + $0xdc] sm:$0xf] }
  0x9d   :  { %v5365_v22 = vld [vmem:[%s8859_s1 + $0x7f0] sm:$0xf0]  ;;  %2676 = vmatpush.bf16.msrb.mxu2 %v5240_v9  ;;  %v5892_v43 = vld [vmem:[%s8859_s1 + $0x6c4] sm:$0xf]  ;;  %v7130_v30 = vor.u32 %v5670_v1, %v4341_v15 }
  0x9e   :  { %v5675_v31 = vld [vmem:[#allocation2 + $0xf4] sm:$0xf0]  ;;  %v5368_v19 = vor.u32 %v5928_v11, %v5365_v22  ;;  %v5109_v24 = vld [vmem:[%s8859_s1 + $0x5f0] sm:$0xf0]  ;;  %2618 = vmatpush.bf16.msrb.mxu0 %v4984_v60  ;;  %v5828_v46 = vld [vmem:[%s8859_s1 + $0x4c4] sm:$0xf] }
  0x9f   :  { %v5112_v34 = vor.u32 %v5864_v29, %v5109_v24  ;;  %v5221_v45 = vld [vmem:[%s8859_s1 + $0x6d0] sm:$0xf0]  ;;  %v5924_v51 = vld [vmem:[%s8859_s1 + $0x7c4] sm:$0xf]  ;;  %v7141_v54 = vor.u32 %v5675_v31, %v4347_v20 }
  0xa0   :  { %2705 = vmatpush.bf16.msrb.mxu3 %v5368_v19  ;;  %v5224_v47 = vor.u32 %v5892_v43, %v5221_v45  ;;  %v4965_v50 = vld [vmem:[%s8859_s1 + $0x4d0] sm:$0xf0]  ;;  %v4349_v14 = vld [vmem:[#allocation2 + $0xf8] sm:$0xf0]  ;;  %v5860_v8 = vld [vmem:[%s8859_s1 + $0x5c4] sm:$0xf] }
  0xa1   :  { %2647 = vmatpush.bf16.msrb.mxu1 %v5112_v34  ;;  %v4968_v52 = vor.u32 %v5828_v46, %v4965_v50  ;;  %v5349_v23 = vld [vmem:[%s8859_s1 + $0x7d0] sm:$0xf0]  ;;  %v7146_v53 = vor.u32 %v5671_v32, %v4349_v14  ;;  %v5888_v12 = vld [vmem:[%s8859_s1 + $0x6a4] sm:$0xf] }
  0xa2   :  { %2677 = vmatpush.bf16.msrb.mxu2 %v5224_v47  ;;  %v5352_v17 = vor.u32 %v5924_v51, %v5349_v23  ;;  %2438 = vmatmul.bf16.gmra.mxu1 %v7130_v30  ;;  %v5093_v58 = vld [vmem:[%s8859_s1 + $0x5d0] sm:$0xf0]  ;;  %v5824_v3 = vld [vmem:[%s8859_s1 + $0x4a4] sm:$0xf] }
  0xa3   :  { %2619 = vmatpush.bf16.msrb.mxu0 %v4968_v52  ;;  %v5096_v62 = vor.u32 %v5860_v8, %v5093_v58  ;;  %v5205_v1 = vld [vmem:[%s8859_s1 + $0x6b0] sm:$0xf0]  ;;  %v5920_v9 = vld [vmem:[%s8859_s1 + $0x7a4] sm:$0xf] }
  0xa4   :  { %2706 = vmatpush.bf16.msrb.mxu3 %v5352_v17  ;;  %v5208_v7 = vor.u32 %v5888_v12, %v5205_v1  ;;  %v4949_v5 = vld [vmem:[%s8859_s1 + $0x4b0] sm:$0xf0]  ;;  %v5856_v20 = vld [vmem:[%s8859_s1 + $0x5a4] sm:$0xf] }
  0xa5   :  { %2409 = vmatmul.bf16.gmra.mxu0 %v7119_v36  ;;  %2648 = vmatpush.bf16.msrb.mxu1 %v5096_v62  ;;  %v5333_v10 = vld [vmem:[%s8859_s1 + $0x7b0] sm:$0xf0]  ;;  %v4952_v11 = vor.u32 %v5824_v3, %v4949_v5  ;;  %v5884_v22 = vld [vmem:[%s8859_s1 + $0x684] sm:$0xf] }
  0xa6   :  { %2467 = vmatmul.bf16.gmra.mxu2 %v7141_v54  ;;  %v5336_v15 = vor.u32 %v5920_v9, %v5333_v10  ;;  %v5077_v60 = vld [vmem:[%s8859_s1 + $0x5b0] sm:$0xf0]  ;;  %v5820_v29 = vld [vmem:[%s8859_s1 + $0x484] sm:$0xf] }
  0xa7   :  { %2678 = vmatpush.bf16.msrb.mxu2 %v5208_v7  ;;  %2620 = vmatpush.bf16.msrb.mxu0 %v4952_v11  ;;  %v5080_v31 = vor.u32 %v5856_v20, %v5077_v60  ;;  %v5189_v19 = vld [vmem:[%s8859_s1 + $0x690] sm:$0xf0]  ;;  %v5916_v46 = vld [vmem:[%s8859_s1 + $0x784] sm:$0xf] }
  0xa8   :  { %2707 = vmatpush.bf16.msrb.mxu3 %v5336_v15  ;;  %v4933_v24 = vld [vmem:[%s8859_s1 + $0x490] sm:$0xf0]  ;;  %v5192_v43 = vor.u32 %v5884_v22, %v5189_v19  ;;  %v5852_v52 = vld [vmem:[%s8859_s1 + $0x584] sm:$0xf] }
  0xa9   :  { %2496 = vmatmul.bf16.gmra.mxu3 %v7146_v53  ;;  %v4936_v45 = vor.u32 %v5820_v29, %v4933_v24  ;;  %v5317_v47 = vld [vmem:[%s8859_s1 + $0x790] sm:$0xf0]  ;;  %2649 = vmatpush.bf16.msrb.mxu1 %v5080_v31  ;;  %v5880_v58 = vld [vmem:[%s8859_s1 + $0x664] sm:$0xf] }
  0xaa   :  { %v7199_v50 = vpop.f32.mrf.mxu1  ;;  %v5320_v51 = vor.u32 %v5916_v46, %v5317_v47  ;;  %v5061_v23 = vld [vmem:[%s8859_s1 + $0x590] sm:$0xf0]  ;;  %v5816_v12 = vld [vmem:[%s8859_s1 + $0x464] sm:$0xf] }
  0xab   :  { %2679 = vmatpush.bf16.msrb.mxu2 %v5192_v43  ;;  %2621 = vmatpush.bf16.msrb.mxu0 %v4936_v45  ;;  %v5064_v17 = vor.u32 %v5852_v52, %v5061_v23  ;;  %v5173_v62 = vld [vmem:[%s8859_s1 + $0x670] sm:$0xf0]  ;;  %v5912_v7 = vld [vmem:[%s8859_s1 + $0x764] sm:$0xf] }
  0xac   :  { %2708 = vmatpush.bf16.msrb.mxu3 %v5320_v51  ;;  %v5176_v1 = vor.u32 %v5880_v58, %v5173_v62  ;;  %v4917_v3 = vld [vmem:[%s8859_s1 + $0x470] sm:$0xf0]  ;;  %v5848_v15 = vld [vmem:[%s8859_s1 + $0x564] sm:$0xf] }
  0xad   :  { %2650 = vmatpush.bf16.msrb.mxu1 %v5064_v17  ;;  %v5301_v5 = vld [vmem:[%s8859_s1 + $0x770] sm:$0xf0]  ;;  %v4920_v9 = vor.u32 %v5816_v12, %v4917_v3  ;;  %v5876_v60 = vld [vmem:[%s8859_s1 + $0x644] sm:$0xf] }
  0xae   :  { %v5304_v10 = vor.u32 %v5912_v7, %v5301_v5  ;;  %v5045_v20 = vld [vmem:[%s8859_s1 + $0x570] sm:$0xf0]  ;;  %v5812_v19 = vld [vmem:[%s8859_s1 + $0x444] sm:$0xf] }
  0xaf   :  { %2680 = vmatpush.bf16.msrb.mxu2 %v5176_v1  ;;  %2622 = vmatpush.bf16.msrb.mxu0 %v4920_v9  ;;  %v5048_v22 = vor.u32 %v5848_v15, %v5045_v20  ;;  %v5157_v31 = vld [vmem:[%s8859_s1 + $0x650] sm:$0xf0]  ;;  %v5908_v46 = vld [vmem:[%s8859_s1 + $0x744] sm:$0xf] }
  0xb0   :  { %2709 = vmatpush.bf16.msrb.mxu3 %v5304_v10  ;;  %v4901_v29 = vld [vmem:[%s8859_s1 + $0x450] sm:$0xf0]  ;;  %v5160_v43 = vor.u32 %v5876_v60, %v5157_v31  ;;  %v5844_v58 = vld [vmem:[%s8859_s1 + $0x544] sm:$0xf] }
  0xb1   :  { %v4904_v45 = vor.u32 %v5812_v19, %v4901_v29  ;;  %v5285_v47 = vld [vmem:[%s8859_s1 + $0x750] sm:$0xf0]  ;;  %2651 = vmatpush.bf16.msrb.mxu1 %v5048_v22  ;;  %v5872_v5 = vld [vmem:[%s8859_s1 + $0x624] sm:$0xf] }
  0xb2   :  { %v7191_v34 = vpop.f32.mrf.mxu0  ;;  %2539 = vmatmul.bf16.vlgmr.msra.gmra.mxu1 %v6424_v61  ;;  %v7214_v8 = vpop.f32.mrf.mxu1  ;;  %v5288_v23 = vor.u32 %v5908_v46, %v5285_v47  ;;  %v5029_v62 = vld [vmem:[%s8859_s1 + $0x550] sm:$0xf0]  ;;  %v5808_v10 = vld [vmem:[%s8859_s1 + $0x424] sm:$0xf] }
  0xb3   :  { %2681 = vmatpush.bf16.msrb.mxu2 %v5160_v43  ;;  %2623 = vmatpush.bf16.msrb.mxu0 %v4904_v45  ;;  %v5032_v12 = vor.u32 %v5844_v58, %v5029_v62  ;;  %v5141_v9 = vld [vmem:[%s8859_s1 + $0x630] sm:$0xf0]  ;;  %v5904_v60 = vld [vmem:[%s8859_s1 + $0x724] sm:$0xf] }
  0xb4   :  { %2710 = vmatpush.bf16.msrb.mxu3 %v5288_v23  ;;  %v5144_v15 = vor.u32 %v5872_v5, %v5141_v9  ;;  %v4885_v20 = vld [vmem:[%s8859_s1 + $0x430] sm:$0xf0]  ;;  %v5840_v43 = vld [vmem:[%s8859_s1 + $0x524] sm:$0xf] }
  0xb5   :  { %2510 = vmatmul.bf16.vlgmr.msra.gmra.mxu0 %v6418_v56  ;;  %2652 = vmatpush.bf16.msrb.mxu1 %v5032_v12  ;;  %v5269_v22 = vld [vmem:[%s8859_s1 + $0x730] sm:$0xf0]  ;;  %v4888_v31 = vor.u32 %v5808_v10, %v4885_v20  ;;  %v5868_v46 = vld [vmem:[%s8859_s1 + $0x604] sm:$0xf] }
  0xb6   :  { %2568 = vmatmul.bf16.vlgmr.msra.gmra.mxu2 %v6432_v4  ;;  %v5272_v19 = vor.u32 %v5904_v60, %v5269_v22  ;;  %v5013_v45 = vld [vmem:[%s8859_s1 + $0x530] sm:$0xf0]  ;;  %v5804_v58 = vld [vmem:[%s8859_s1 + $0x404] sm:$0xf] }
  0xb7   :  { %2682 = vmatpush.bf16.msrb.mxu2 %v5144_v15  ;;  %2624 = vmatpush.bf16.msrb.mxu0 %v4888_v31  ;;  %v5016_v47 = vor.u32 %v5840_v43, %v5013_v45  ;;  %v5125_v23 = vld [vmem:[%s8859_s1 + $0x610] sm:$0xf0]  ;;  %v5900_v10 = vld [vmem:[%s8859_s1 + $0x704] sm:$0xf] }
  0xb8   :  { %2711 = vmatpush.bf16.msrb.mxu3 %v5272_v19  ;;  %v4869_v62 = vld [vmem:[%s8859_s1 + $0x410] sm:$0xf0]  ;;  %v5128_v5 = vor.u32 %v5868_v46, %v5125_v23  ;;  %v5836_v31 = vld [vmem:[%s8859_s1 + $0x504] sm:$0xf] }
  0xb9   :  { %v7212_v14 = vpop.f32.mrf.mxu2  ;;  %2597 = vmatmul.bf16.vlgmr.msra.gmra.mxu3 %v6464_v27  ;;  %v4872_v9 = vor.u32 %v5804_v58, %v4869_v62  ;;  %v5253_v15 = vld [vmem:[%s8859_s1 + $0x710] sm:$0xf0]  ;;  %2653 = vmatpush.bf16.msrb.mxu1 %v5016_v47  ;;  %v4731_v58 = vld [vmem:[%s8859_s1 + $0x2e8] sm:$0xf]  ;;  %v5771_v62 = vld [vmem:[%s8859_s1 + $0x2f4] sm:$0xf0] }
  0xba   :  { %v7210_v32 = vpop.f32.mrf.mxu0  ;;  %v7235_v11 = vpop.f32.mrf.mxu3  ;;  %v5256_v22 = vor.u32 %v5900_v10, %v5253_v15  ;;  %v4997_v19 = vld [vmem:[%s8859_s1 + $0x510] sm:$0xf0]  ;;  %v5707_v10 = vld [vmem:[%s8859_s1 + $0xf4] sm:$0xf0]  ;;  %v4859_v15 = vld [vmem:[%s8859_s1 + $0x3e8] sm:$0xf] }
  0xbb   :  { %2683 = vmatpush.bf16.msrb.mxu2 %v5128_v5  ;;  %2625 = vmatpush.bf16.msrb.mxu0 %v4872_v9  ;;  %v5000_v45 = vor.u32 %v5836_v31, %v4997_v19  ;;  %v4475_v5 = vld [vmem:[%s8859_s1 + $0xe8] sm:$0xf]  ;;  %v4732_v9 = vor.u32 %v5771_v62, %v4731_v58  ;;  %v7376_v58 = vld [vmem:[%s8861_s2] sm:$0xf] }
  0xbc   :  { %2712 = vmatpush.bf16.msrb.mxu3 %v5256_v22  ;;  %v5803_v22 = vld [vmem:[%s8859_s1 + $0x3f4] sm:$0xf0]  ;;  %v4476_v31 = vor.u32 %v5707_v10, %v4475_v5  ;;  %8912 = vst [vmem:[#allocation24_spill] sm:$0xff] %v7376_v58  ;;  %v4603_v5 = vld [vmem:[%s8859_s1 + $0x1e8] sm:$0xf] }
  0xbd   :  { %v7265_v52 = vpop.f32.mrf.mxu1  ;;  %2654 = vmatpush.bf16.msrb.mxu1 %v5000_v45  ;;  %v4860_v19 = vor.u32 %v5803_v22, %v4859_v15  ;;  %v4715_v10 = vld [vmem:[%s8859_s1 + $0x2c8] sm:$0xf] }
  0xbf   :  { %2792 = vmatpush.bf16.msra.mxu2 %v4732_v9  ;;  %2734 = vmatpush.bf16.msra.mxu0 %v4476_v31  ;;  %v5739_v9 = vld [vmem:[%s8859_s1 + $0x1f4] sm:$0xf0] }
  0xc0   :  { %2821 = vmatpush.bf16.msra.mxu3 %v4860_v19  ;;  %v4604_v22 = vor.u32 %v5739_v9, %v4603_v5  ;;  %v5767_v31 = vld [vmem:[%s8859_s1 + $0x2d4] sm:$0xf0]  ;;  %v4459_v19 = vld [vmem:[%s8859_s1 + $0xc8] sm:$0xf] }
  0xc1   :  { %v7263_v51 = vpop.f32.mrf.mxu2  ;;  %v4843_v5 = vld [vmem:[%s8859_s1 + $0x3c8] sm:$0xf]  ;;  %v5799_v9 = vld [vmem:[%s8859_s1 + $0x3d4] sm:$0xf0] }
  0xc2   :  { %v7255_v24 = vpop.f32.mrf.mxu0  ;;  %2544 = vmatmul.bf16.gmra.mxu1 %v6507_v13  ;;  %v7269_v17 = vpop.f32.mrf.mxu3 }
  0xc3   :  { %2763 = vmatpush.bf16.msra.mxu1 %v4604_v22 }
  0xc5   :  { %2515 = vmatmul.bf16.gmra.mxu0 %v6501_v2  ;;  %v7282_v7 = vpop.f32.mrf.mxu1 }
  0xc6   :  { %2573 = vmatmul.bf16.gmra.mxu2 %v6528_v26 }
  0xc9   :  { %v7280_v3 = vpop.f32.mrf.mxu2  ;;  %2602 = vmatmul.bf16.gmra.mxu3 %v6562_v55 }
  0xca   :  { %v7278_v1 = vpop.f32.mrf.mxu0 }
  0xcb   :  { %v7303_v29 = vpop.f32.mrf.mxu3 }
  0xce   :  { %v7333_v60 = vpop.f32.mrf.mxu1 }
  0xd1   :  { %v7331_v20 = vpop.f32.mrf.mxu2 }
  0xd2   :  { %v7323_v12 = vpop.f32.mrf.mxu0  ;;  %2549 = vmatmul.bf16.gmra.mxu1 %v6618_v48 }
  0xd3   :  { %v7343_v43 = vpop.f32.mrf.mxu3 }
  0xd5   :  { %2520 = vmatmul.bf16.gmra.mxu0 %v6599_v33  ;;  %v4844_v33 = vor.u32 %v5799_v9, %v4843_v5  ;;  %v4443_v5 = vld [vmem:[%s8859_s1 + $0xa8] sm:$0xf] }
  0xd6   :  { %2578 = vmatmul.bf16.gmra.mxu2 %v6638_v59  ;;  %v7350_v23 = vpop.f32.mrf.mxu1  ;;  %v7385_v59 = vperm.slane %v7376_v58, 0  ;;  %v4716_v58 = vor.u32 %v5767_v31, %v4715_v10 }
  0xd7   :  { %2822 = vmatpush.bf16.msra.mxu3 %v4844_v33  ;;  %v5699_v33 = vld [vmem:[%s8859_s1 + $0xb4] sm:$0xf0] }
  0xd8   :  { %2793 = vmatpush.bf16.msra.mxu2 %v4716_v58  ;;  %v5763_v58 = vld [vmem:[%s8859_s1 + $0x2b4] sm:$0xf0] }
  0xd9   :  { %v7348_v47 = vpop.f32.mrf.mxu2  ;;  %2607 = vmatmul.bf16.gmra.mxu3 %v6661_v16 }
  0xda   :  { %v7346_v46 = vpop.f32.mrf.mxu0 }
  0xdb   :  { %v7371_v45 = vpop.f32.mrf.mxu3 }
  0xde   :  { %v7382_v16 = vpop.f32.mrf.mxu1 }
  0xe1   :  { %v7380_v37 = vpop.f32.mrf.mxu2 }
  0xe2   :  { %v7378_v62 = vpop.f32.mrf.mxu0  ;;  %2554 = vmatmul.bf16.gmra.mxu1 %v6733_v0  ;;  %v5703_v0 = vld [vmem:[%s8859_s1 + $0xd4] sm:$0xf0] }
  0xe3   :  { %v7398_v15 = vpop.f32.mrf.mxu3  ;;  %v4460_v48 = vor.u32 %v5703_v0, %v4459_v19  ;;  %v5735_v0 = vld [vmem:[%s8859_s1 + $0x1d4] sm:$0xf0] }
  0xe5   :  { %2525 = vmatmul.bf16.gmra.mxu0 %v6727_v57  ;;  %v2280_v57 = vadd.f32 %v7191_v34, %v7385_v59  ;;  %v4587_v34 = vld [vmem:[%s8859_s1 + $0x1c8] sm:$0xf] }
  0xe6   :  { %2583 = vmatmul.bf16.gmra.mxu2 %v6754_v21  ;;  %2735 = vmatpush.bf16.msra.mxu0 %v4460_v48  ;;  %v7428_v31 = vpop.f32.mrf.mxu1  ;;  %v4588_v19 = vor.u32 %v5735_v0, %v4587_v34  ;;  %v4699_v48 = vld [vmem:[%s8859_s1 + $0x2a8] sm:$0xf]  ;;  %v4444_v34 = vor.u32 %v5699_v33, %v4443_v5  ;;  %v5695_v33 = vld [vmem:[%s8859_s1 + $0x94] sm:$0xf0] }
  0xe7   :  { %v2309_v22 = vadd.f32 %v7199_v50, %v2280_v57  ;;  %v4700_v9 = vor.u32 %v5763_v58, %v4699_v48  ;;  %v4827_v57 = vld [vmem:[%s8859_s1 + $0x3a8] sm:$0xf]  ;;  %v5795_v50 = vld [vmem:[%s8859_s1 + $0x3b4] sm:$0xf0]  ;;  %v2282_v48 = vadd.f32 %v7210_v32, %v7385_v59 }
  0xe8   :  { %2764 = vmatpush.bf16.msra.mxu1 %v4588_v19  ;;  %v4828_v0 = vor.u32 %v5795_v50, %v4827_v57  ;;  %v4571_v5 = vld [vmem:[%s8859_s1 + $0x1a8] sm:$0xf] }
  0xe9   :  { %v7426_v10 = vpop.f32.mrf.mxu2  ;;  %2612 = vmatmul.bf16.gmra.mxu3 %v6781_v40  ;;  %2794 = vmatpush.bf16.msra.mxu2 %v4700_v9  ;;  %v2338_v19 = vadd.f32 %v7212_v14, %v2309_v22  ;;  %v5731_v9 = vld [vmem:[%s8859_s1 + $0x1b4] sm:$0xf0]  ;;  %v4683_v14 = vld [vmem:[%s8859_s1 + $0x288] sm:$0xf]  ;;  %v2311_v57 = vadd.f32 %v7214_v8, %v2282_v48 }
  0xea   :  { %v7418_v55 = vpop.f32.mrf.mxu0  ;;  %2736 = vmatpush.bf16.msra.mxu0 %v4444_v34  ;;  %2823 = vmatpush.bf16.msra.mxu3 %v4828_v0  ;;  %v4572_v32 = vor.u32 %v5731_v9, %v4571_v5  ;;  %v5759_v22 = vld [vmem:[%s8859_s1 + $0x294] sm:$0xf0] }
  0xeb   :  { %v7450_v40 = vpop.f32.mrf.mxu3  ;;  %v2367_v13 = vadd.f32 %v7235_v11, %v2338_v19  ;;  %v4427_v11 = vld [vmem:[%s8859_s1 + $0x88] sm:$0xf]  ;;  %v4684_v34 = vor.u32 %v5759_v22, %v4683_v14  ;;  %v5791_v5 = vld [vmem:[%s8859_s1 + $0x394] sm:$0xf0]  ;;  %v2340_v2 = vadd.f32 %v7263_v51, %v2311_v57 }
  0xec   :  { %v4428_v0 = vor.u32 %v5695_v33, %v4427_v11  ;;  %v4811_v19 = vld [vmem:[%s8859_s1 + $0x388] sm:$0xf]  ;;  %2765 = vmatpush.bf16.msra.mxu1 %v4572_v32  ;;  %v5727_v14 = vld [vmem:[%s8859_s1 + $0x194] sm:$0xf0] }
  0xed   :  { %2795 = vmatpush.bf16.msra.mxu2 %v4684_v34  ;;  %v5755_v33 = vld [vmem:[%s8859_s1 + $0x274] sm:$0xf0]  ;;  %v4411_v57 = vld [vmem:[%s8859_s1 + $0x68] sm:$0xf] }
  0xee   :  { %v2424_v26 = vpop.f32.mrf.mxu1  ;;  %2737 = vmatpush.bf16.msra.mxu0 %v4428_v0 }
  0xf1   :  { %v7455_v21 = vpop.f32.mrf.mxu2 }
  0xf2   :  { %v2395_v58 = vpop.f32.mrf.mxu0  ;;  %2655 = vmatmul.bf16.vlgmr.msrb.gmra.mxu1 %v6818_v39 }
  0xf3   :  { %v2396_v50 = vadd.f32 %v2395_v58, %v2367_v13  ;;  %v7485_v9 = vpop.f32.mrf.mxu3  ;;  %v2285_v13 = vadd.f32 %v7255_v24, %v7385_v59  ;;  %v4555_v58 = vld [vmem:[%s8859_s1 + $0x188] sm:$0xf]  ;;  %v2369_v24 = vadd.f32 %v7269_v17, %v2340_v2  ;;  %v5691_v2 = vld [vmem:[%s8859_s1 + $0x74] sm:$0xf0] }
  0xf4   :  { %v4556_v22 = vor.u32 %v5727_v14, %v4555_v58  ;;  %v5787_v17 = vld [vmem:[%s8859_s1 + $0x374] sm:$0xf0]  ;;  %v4412_v0 = vor.u32 %v5691_v2, %v4411_v57  ;;  %v2287_v58 = vadd.f32 %v7278_v1, %v7385_v59 }
  0xf5   :  { %2626 = vmatmul.bf16.vlgmr.msrb.gmra.mxu0 %v6812_v35  ;;  %v4812_v35 = vor.u32 %v5791_v5, %v4811_v19  ;;  %v2425_v8 = vadd.f32 %v2424_v26, %v2396_v50  ;;  %v2314_v11 = vadd.f32 %v7265_v52, %v2285_v13  ;;  %v4667_v26 = vld [vmem:[%s8859_s1 + $0x268] sm:$0xf]  ;;  %v5723_v1 = vld [vmem:[%s8859_s1 + $0x174] sm:$0xf0] }
  0xf6   :  { %2684 = vmatmul.bf16.vlgmr.msrb.gmra.mxu2 %v6821_v44  ;;  %v2426_v51 = vpop.f32.mrf.mxu1  ;;  %2766 = vmatpush.bf16.msra.mxu1 %v4556_v22  ;;  %v4668_v50 = vor.u32 %v5755_v33, %v4667_v26  ;;  %v4795_v52 = vld [vmem:[%s8859_s1 + $0x368] sm:$0xf]  ;;  %v8913_v22 = vmov 0.0  }
  0xf7   :  { %2824 = vmatpush.bf16.msra.mxu3 %v4812_v35  ;;  %v4796_v19 = vor.u32 %v5787_v17, %v4795_v52  ;;  %v2343_v13 = vadd.f32 %v7280_v3, %v2314_v11  ;;  %2738 = vmatpush.bf16.msra.mxu0 %v4412_v0  ;;  %v4539_v3 = vld [vmem:[%s8859_s1 + $0x168] sm:$0xf]  ;;  %v2316_v11 = vadd.f32 %v7282_v7, %v2287_v58  ;;  %v5687_v17 = vld [vmem:[%s8859_s1 + $0x54] sm:$0xf0] }
  0xf8   :  { %2796 = vmatpush.bf16.msra.mxu2 %v4668_v50  ;;  %v4395_v52 = vld [vmem:[%s8859_s1 + $0x48] sm:$0xf] }
  0xf9   :  { %v2453_v32 = vpop.f32.mrf.mxu2  ;;  %2713 = vmatmul.bf16.vlgmr.msrb.gmra.mxu3 %v6875_v38  ;;  %v2372_v57 = vadd.f32 %v7303_v29, %v2343_v13  ;;  %v5751_v29 = vld [vmem:[%s8859_s1 + $0x254] sm:$0xf0]  ;;  %v4396_v0 = vor.u32 %v5687_v17, %v4395_v52 }
  0xfa   :  { %v2397_v48 = vpop.f32.mrf.mxu0  ;;  %v2454_v35 = vadd.f32 %v2453_v32, %v2425_v8  ;;  %v5683_v17 = vld [vmem:[%s8859_s1 + $0x34] sm:$0xf0] }
  0xfb   :  { %v2398_v34 = vadd.f32 %v2397_v48, %v2369_v24  ;;  %2825 = vmatpush.bf16.msra.mxu3 %v4796_v19  ;;  %v4779_v19 = vld [vmem:[%s8859_s1 + $0x348] sm:$0xf]  ;;  %2739 = vmatpush.bf16.msra.mxu0 %v4396_v0 }
  0xfc   :  { %v2482_v5 = vpop.f32.mrf.mxu3 }
  0xfd   :  { %v2483_v8 = vadd.f32 %v2482_v5, %v2454_v35  ;;  %v2427_v14 = vadd.f32 %v2426_v51, %v2398_v34  ;;  %v4651_v51 = vld [vmem:[%s8859_s1 + $0x248] sm:$0xf]  ;;  %v4540_v35 = vor.u32 %v5723_v1, %v4539_v3  ;;  %v5783_v5 = vld [vmem:[%s8859_s1 + $0x354] sm:$0xf0] }
  0xfe   :  { %v2429_v24 = vpop.f32.mrf.mxu1  ;;  %v4652_v7 = vor.u32 %v5751_v29, %v4651_v51  ;;  %v4780_v58 = vor.u32 %v5783_v5, %v4779_v19  ;;  %v4523_v1 = vld [vmem:[%s8859_s1 + $0x148] sm:$0xf]  ;;  %v5779_v5 = vld [vmem:[%s8859_s1 + $0x334] sm:$0xf0] }
  0xff   :  { %vm3232_vm0 = vcmp.ge.f32.partialorder %v2483_v8, 1.0  ;;  %v5378_v33 = vadd.f32 -1.0, %v2483_v8  ;;  %2767 = vmatpush.bf16.msra.mxu1 %v4540_v35  ;;  %v5747_v35 = vld [vmem:[%s8859_s1 + $0x234] sm:$0xf0]  ;;  %v4763_v19 = vld [vmem:[%s8859_s1 + $0x328] sm:$0xf] }
 0x100   :  { %v5377_v26 = vsel %vm3232_vm0, 1.0, %v8913_v22  ;;  %2797 = vmatpush.bf16.msra.mxu2 %v4652_v7  ;;  %2826 = vmatpush.bf16.msra.mxu3 %v4780_v58  ;;  %v4764_v58 = vor.u32 %v5779_v5, %v4763_v19 }
 0x101   :  { %v2455_v48 = vpop.f32.mrf.mxu2  ;;  %v3235_v50 = vpack.c.bf16 %v5377_v26, %v5377_v26 }
 0x102   :  { %v2400_v32 = vpop.f32.mrf.mxu0  ;;  %v2456_v2 = vadd.f32 %v2455_v48, %v2427_v14  ;;  %2660 = vmatmul.bf16.gmra.mxu1 %v6929_v42  ;;  %v2345_v14 = vadd.f32 %v7331_v20, %v2316_v11  ;;  %v3238_v48 = vsel %vm3232_vm0, %v5378_v33, %v2483_v8  ;;  %v5719_v20 = vld [vmem:[%s8859_s1 + $0x154] sm:$0xf0] }
 0x103   :  { %3236 = vst [vmem:[#allocation4] sm:$0xf] %v3235_v50  ;;  %v2401_v34 = vadd.f32 %v2400_v32, %v2372_v57  ;;  %v2290_v32 = vadd.f32 %v7323_v12, %v7385_v59  ;;  %v4524_v51 = vor.u32 %v5719_v20, %v4523_v1  ;;  %v4507_v20 = vld [vmem:[%s8859_s1 + $0x128] sm:$0xf] }
 0x104   :  { %v2484_v13 = vpop.f32.mrf.mxu3  ;;  %v2374_v11 = vadd.f32 %v7343_v43, %v2345_v14  ;;  %2827 = vmatpush.bf16.msra.mxu3 %v4764_v58 }
 0x105   :  { %2631 = vmatmul.bf16.gmra.mxu0 %v6915_v18  ;;  %v2485_v26 = vadd.f32 %v2484_v13, %v2456_v2  ;;  %v2430_v50 = vadd.f32 %v2429_v24, %v2401_v34  ;;  %v2319_v8 = vadd.f32 %v7333_v60, %v2290_v32  ;;  %v4635_v24 = vld [vmem:[%s8859_s1 + $0x228] sm:$0xf]  ;;  %2768 = vmatpush.bf16.msra.mxu1 %v4524_v51 }
 0x106   :  { %2689 = vmatmul.bf16.gmra.mxu2 %v6950_v63  ;;  %v2431_v2 = vpop.f32.mrf.mxu1  ;;  %v4636_v43 = vor.u32 %v5747_v35, %v4635_v24  ;;  %v4379_v60 = vld [vmem:[%s8859_s1 + $0x28] sm:$0xf] }
 0x107   :  { %v3240_v57 = vadd.f32 %v3238_v48, %v2485_v26  ;;  %v4380_v0 = vor.u32 %v5683_v17, %v4379_v60  ;;  %v2348_v14 = vadd.f32 %v7348_v47, %v2319_v8  ;;  %v2292_v48 = vadd.f32 %v7346_v46, %v7385_v59  ;;  %v5715_v47 = vld [vmem:[%s8859_s1 + $0x134] sm:$0xf0]  ;;  %v4619_v46 = vld [vmem:[%s8859_s1 + $0x208] sm:$0xf] }
 0x108   :  { %2798 = vmatpush.bf16.msra.mxu2 %v4636_v43 }
 0x109   :  { %v2458_v12 = vpop.f32.mrf.mxu2  ;;  %2718 = vmatmul.bf16.gmra.mxu3 %v6975_v28  ;;  %vm3241_vm1 = vcmp.ge.f32.partialorder %v3240_v57, 1.0  ;;  %v5380_v52 = vadd.f32 -1.0, %v3240_v57  ;;  %2740 = vmatpush.bf16.msra.mxu0 %v4380_v0  ;;  %v4491_v0 = vld [vmem:[%s8859_s1 + $0x108] sm:$0xf] }
 0x10a   :  { %v2402_v3 = vpop.f32.mrf.mxu0  ;;  %v2459_v33 = vadd.f32 %v2458_v12, %v2430_v50  ;;  %v5379_v29 = vsel %vm3241_vm1, 1.0, %v8913_v22 }
 0x10b   :  { %v3244_v34 = vpack.c.bf16 %v5379_v29, %v5379_v29  ;;  %v2403_v7 = vadd.f32 %v2402_v3, %v2374_v11  ;;  %v3247_v26 = vsel %vm3241_vm1, %v5380_v52, %v3240_v57  ;;  %v4508_v11 = vor.u32 %v5715_v47, %v4507_v20  ;;  %v5679_v29 = vld [vmem:[%s8859_s1 + $0x14] sm:$0xf0] }
 0x10c   :  { %v2487_v13 = vpop.f32.mrf.mxu3  ;;  %v2377_v57 = vadd.f32 %v7371_v45, %v2348_v14  ;;  %v4363_v45 = vld [vmem:[%s8859_s1 + $0x8] sm:$0xf]  ;;  %v2321_v52 = vadd.f32 %v7350_v23, %v2292_v48  ;;  %v2295_v23 = vadd.f32 %v7378_v62, %v7385_v59 }
 0x10d   :  { %v2488_v32 = vadd.f32 %v2487_v13, %v2459_v33  ;;  %3245 = vst [vmem:[#allocation4 + $0x10] sm:$0xf] %v3244_v34  ;;  %v2432_v3 = vadd.f32 %v2431_v2, %v2403_v7  ;;  %v5743_v2 = vld [vmem:[%s8859_s1 + $0x214] sm:$0xf0]  ;;  %2769 = vmatpush.bf16.msra.mxu1 %v4508_v11  ;;  %v4364_v17 = vor.u32 %v5679_v29, %v4363_v45  ;;  %v4747_v34 = vld [vmem:[%s8859_s1 + $0x308] sm:$0xf] }
 0x10e   :  { %v2434_v51 = vpop.f32.mrf.mxu1  ;;  %v4620_v35 = vor.u32 %v5743_v2, %v4619_v46  ;;  %v5775_v7 = vld [vmem:[%s8859_s1 + $0x314] sm:$0xf0]  ;;  %v2350_v58 = vadd.f32 %v7380_v37, %v2321_v52  ;;  %v5371_v45 = vld [vmem:[%s8859_s1 + $0x7e8] sm:$0xf]  ;;  %v2297_v29 = vadd.f32 %v7418_v55, %v7385_v59 }
 0x10f   :  { %v3249_v50 = vadd.f32 %v3247_v26, %v2488_v32  ;;  %v4748_v5 = vor.u32 %v5775_v7, %v4747_v34  ;;  %v5711_v13 = vld [vmem:[%s8859_s1 + $0x114] sm:$0xf0]  ;;  %2741 = vmatpush.bf16.msra.mxu0 %v4364_v17  ;;  %v5115_v7 = vld [vmem:[%s8859_s1 + $0x5e8] sm:$0xf] }
 0x110   :  { %2799 = vmatpush.bf16.msra.mxu2 %v4620_v35  ;;  %v4492_v32 = vor.u32 %v5711_v13, %v4491_v0  ;;  %v2379_v47 = vadd.f32 %v7398_v15, %v2350_v58  ;;  %v5243_v15 = vld [vmem:[%s8859_s1 + $0x6e8] sm:$0xf]  ;;  %v5931_v34 = vld [vmem:[%s8859_s1 + $0x7f4] sm:$0xf0] }
 0x111   :  { %v2460_v12 = vpop.f32.mrf.mxu2  ;;  %vm3250_vm2 = vcmp.ge.f32.partialorder %v3249_v50, 1.0  ;;  %v5382_v33 = vadd.f32 -1.0, %v3249_v50  ;;  %2828 = vmatpush.bf16.msra.mxu3 %v4748_v5  ;;  %v4987_v35 = vld [vmem:[%s8859_s1 + $0x4e8] sm:$0xf]  ;;  %v5867_v0 = vld [vmem:[%s8859_s1 + $0x5f4] sm:$0xf0]  ;;  %v5372_v55 = vor.u32 %v5931_v34, %v5371_v45 }
 0x112   :  { %v2405_v1 = vpop.f32.mrf.mxu0  ;;  %v2461_v8 = vadd.f32 %v2460_v12, %v2432_v3  ;;  %v5381_v24 = vsel %vm3250_vm2, 1.0, %v8913_v22  ;;  %2665 = vmatmul.bf16.gmra.mxu1 %v7028_v25  ;;  %v2324_v12 = vadd.f32 %v7382_v16, %v2295_v23  ;;  %v5899_v16 = vld [vmem:[%s8859_s1 + $0x6f4] sm:$0xf0]  ;;  %v5116_v59 = vor.u32 %v5867_v0, %v5115_v7  ;;  %v5227_v5 = vld [vmem:[%s8859_s1 + $0x6c8] sm:$0xf] }
 0x113   :  { %v3253_v43 = vpack.c.bf16 %v5381_v24, %v5381_v24  ;;  %v2406_v60 = vadd.f32 %v2405_v1, %v2377_v57  ;;  %v3256_v26 = vsel %vm3250_vm2, %v5382_v33, %v3249_v50  ;;  %2770 = vmatpush.bf16.msra.mxu1 %v4492_v32  ;;  %v5244_v24 = vor.u32 %v5899_v16, %v5243_v15  ;;  %v5895_v13 = vld [vmem:[%s8859_s1 + $0x6d4] sm:$0xf0]  ;;  %v4971_v58 = vld [vmem:[%s8859_s1 + $0x4c8] sm:$0xf] }
 0x114   :  { %v2489_v19 = vpop.f32.mrf.mxu3  ;;  %v5211_v45 = vld [vmem:[%s8859_s1 + $0x6a8] sm:$0xf] }
 0x115   :  { %2636 = vmatmul.bf16.gmra.mxu0 %v7022_v41  ;;  %v2490_v14 = vadd.f32 %v2489_v19, %v2461_v8  ;;  %3254 = vst [vmem:[#allocation4 + $0x20] sm:$0xf] %v3253_v43  ;;  %v2435_v62 = vadd.f32 %v2434_v51, %v2406_v60  ;;  %v2353_v51 = vadd.f32 %v7426_v10, %v2324_v12  ;;  %v5835_v10 = vld [vmem:[%s8859_s1 + $0x4f4] sm:$0xf0] }
 0x116   :  { %2694 = vmatmul.bf16.gmra.mxu2 %v7048_v6  ;;  %v2436_v20 = vpop.f32.mrf.mxu1  ;;  %v4988_v17 = vor.u32 %v5835_v10, %v4987_v35  ;;  %2937 = vmatpush.bf16.msrb.mxu3 %v5372_v55 }
 0x117   :  { %v3258_v48 = vadd.f32 %v3256_v26, %v2490_v14  ;;  %2908 = vmatpush.bf16.msrb.mxu2 %v5244_v24  ;;  %v2382_v14 = vadd.f32 %v7450_v40, %v2353_v51  ;;  %v5228_v26 = vor.u32 %v5895_v13, %v5227_v5  ;;  %2879 = vmatpush.bf16.msrb.mxu1 %v5116_v59  ;;  %v5083_v13 = vld [vmem:[%s8859_s1 + $0x5a8] sm:$0xf] }
 0x118   :  { %2850 = vmatpush.bf16.msrb.mxu0 %v4988_v17  ;;  %v5827_v17 = vld [vmem:[%s8859_s1 + $0x4b4] sm:$0xf0] }
 0x119   :  { %v2463_v1 = vpop.f32.mrf.mxu2  ;;  %2723 = vmatmul.bf16.gmra.mxu3 %v7070_v49  ;;  %vm3259_vm3 = vcmp.ge.f32.partialorder %v3258_v48, 1.0  ;;  %v5384_v57 = vadd.f32 -1.0, %v3258_v48 }
 0x11a   :  { %v2407_v3 = vpop.f32.mrf.mxu0  ;;  %v2464_v37 = vadd.f32 %v2463_v1, %v2435_v62  ;;  %v5383_v11 = vsel %vm3259_vm3, 1.0, %v8913_v22  ;;  %v5355_v62 = vld [vmem:[%s8859_s1 + $0x7c8] sm:$0xf] }
 0x11b   :  { %v3262_v8 = vpack.c.bf16 %v5383_v11, %v5383_v11  ;;  %v2408_v50 = vadd.f32 %v2407_v3, %v2379_v47  ;;  %v3265_v33 = vsel %vm3259_vm3, %v5384_v57, %v3258_v48  ;;  %v5831_v48 = vld [vmem:[%s8859_s1 + $0x4d4] sm:$0xf0]  ;;  %v2326_v47 = vadd.f32 %v7428_v31, %v2297_v29  ;;  %2909 = vmatpush.bf16.msrb.mxu2 %v5228_v26  ;;  %v5195_v26 = vld [vmem:[%s8859_s1 + $0x688] sm:$0xf] }
 0x11c   :  { %v2492_v46 = vpop.f32.mrf.mxu3  ;;  %v4972_v40 = vor.u32 %v5831_v48, %v4971_v58  ;;  %v5863_v31 = vld [vmem:[%s8859_s1 + $0x5d4] sm:$0xf0] }
 0x11d   :  { %v2493_v2 = vadd.f32 %v2492_v46, %v2464_v37  ;;  %3263 = vst [vmem:[#allocation4 + $0x30] sm:$0xf] %v3262_v8  ;;  %v2437_v43 = vadd.f32 %v2436_v20, %v2408_v50  ;;  %v5927_v20 = vld [vmem:[%s8859_s1 + $0x7d4] sm:$0xf0]  ;;  %v2355_v8 = vadd.f32 %v7455_v21, %v2326_v47  ;;  %v5099_v46 = vld [vmem:[%s8859_s1 + $0x5c8] sm:$0xf] }
 0x11e   :  { %v5356_v11 = vor.u32 %v5927_v20, %v5355_v62  ;;  %2851 = vmatpush.bf16.msrb.mxu0 %v4972_v40  ;;  %v5891_v29 = vld [vmem:[%s8859_s1 + $0x6b4] sm:$0xf0]  ;;  %v4939_v62 = vld [vmem:[%s8859_s1 + $0x488] sm:$0xf] }
 0x11f   :  { %v3267_v52 = vadd.f32 %v3265_v33, %v2493_v2  ;;  %v2439_v19 = vpop.f32.mrf.mxu1  ;;  %v5100_v2 = vor.u32 %v5863_v31, %v5099_v46  ;;  %v2384_v35 = vadd.f32 %v7485_v9, %v2355_v8  ;;  %v4955_v9 = vld [vmem:[%s8859_s1 + $0x4a8] sm:$0xf]  ;;  %v5859_v58 = vld [vmem:[%s8859_s1 + $0x5b4] sm:$0xf0] }
 0x120   :  { %2938 = vmatpush.bf16.msrb.mxu3 %v5356_v11  ;;  %v4956_v0 = vor.u32 %v5827_v17, %v4955_v9  ;;  %v5887_v48 = vld [vmem:[%s8859_s1 + $0x694] sm:$0xf0] }
 0x121   :  { %v2465_v23 = vpop.f32.mrf.mxu2  ;;  %vm3268_vm4 = vcmp.ge.f32.partialorder %v3267_v52, 1.0  ;;  %v5386_v3 = vadd.f32 -1.0, %v3267_v52  ;;  %2880 = vmatpush.bf16.msrb.mxu1 %v5100_v2  ;;  %v5196_v20 = vor.u32 %v5887_v48, %v5195_v26  ;;  %v5823_v47 = vld [vmem:[%s8859_s1 + $0x494] sm:$0xf0]  ;;  %v4907_v48 = vld [vmem:[%s8859_s1 + $0x448] sm:$0xf] }
 0x122   :  { %v2410_v60 = vpop.f32.mrf.mxu0  ;;  %v2466_v32 = vadd.f32 %v2465_v23, %v2437_v43  ;;  %v5385_v1 = vsel %vm3268_vm4, 1.0, %v8913_v22  ;;  %2670 = vmatmul.bf16.gmra.mxu1 %v7130_v30  ;;  %v5339_v23 = vld [vmem:[%s8859_s1 + $0x7a8] sm:$0xf]  ;;  %2852 = vmatpush.bf16.msrb.mxu0 %v4956_v0  ;;  %v4940_v8 = vor.u32 %v5823_v47, %v4939_v62  ;;  %v5879_v26 = vld [vmem:[%s8859_s1 + $0x654] sm:$0xf0] }
 0x123   :  { %v3271_v12 = vpack.c.bf16 %v5385_v1, %v5385_v1  ;;  %v2411_v37 = vadd.f32 %v2410_v60, %v2382_v14  ;;  %v3274_v51 = vsel %vm3268_vm4, %v5386_v3, %v3267_v52  ;;  %v5212_v60 = vor.u32 %v5891_v29, %v5211_v45  ;;  %v5911_v47 = vld [vmem:[%s8859_s1 + $0x754] sm:$0xf0] }
 0x124   :  { %v2494_v57 = vpop.f32.mrf.mxu3 }
 0x125   :  { %2641 = vmatmul.bf16.gmra.mxu0 %v7119_v36  ;;  %v2495_v50 = vadd.f32 %v2494_v57, %v2466_v32  ;;  %3272 = vst [vmem:[#allocation4 + $0x40] sm:$0xf] %v3271_v12  ;;  %v2440_v16 = vadd.f32 %v2439_v19, %v2411_v37  ;;  %v5923_v19 = vld [vmem:[%s8859_s1 + $0x7b4] sm:$0xf0]  ;;  %2910 = vmatpush.bf16.msrb.mxu2 %v5212_v60  ;;  %v5323_v12 = vld [vmem:[%s8859_s1 + $0x788] sm:$0xf] }
 0x126   :  { %2699 = vmatmul.bf16.gmra.mxu2 %v7141_v54  ;;  %v5340_v59 = vor.u32 %v5923_v19, %v5339_v23  ;;  %v5084_v32 = vor.u32 %v5859_v58, %v5083_v13  ;;  %v5919_v37 = vld [vmem:[%s8859_s1 + $0x794] sm:$0xf0]  ;;  %2853 = vmatpush.bf16.msrb.mxu0 %v4940_v8  ;;  %v5307_v19 = vld [vmem:[%s8859_s1 + $0x768] sm:$0xf] }
 0x127   :  { %v3276_v15 = vadd.f32 %v3274_v51, %v2495_v50  ;;  %v2441_v24 = vpop.f32.mrf.mxu1  ;;  %v5324_v50 = vor.u32 %v5919_v37, %v5323_v12  ;;  %v5883_v60 = vld [vmem:[%s8859_s1 + $0x674] sm:$0xf0]  ;;  %v5051_v13 = vld [vmem:[%s8859_s1 + $0x568] sm:$0xf] }
 0x128   :  { %2939 = vmatpush.bf16.msrb.mxu3 %v5340_v59  ;;  %2881 = vmatpush.bf16.msrb.mxu1 %v5084_v32  ;;  %v5851_v58 = vld [vmem:[%s8859_s1 + $0x574] sm:$0xf0]  ;;  %v5163_v32 = vld [vmem:[%s8859_s1 + $0x648] sm:$0xf] }
 0x129   :  { %v2468_v33 = vpop.f32.mrf.mxu2  ;;  %2728 = vmatmul.bf16.gmra.mxu3 %v7146_v53  ;;  %vm3277_vm5 = vcmp.ge.f32.partialorder %v3276_v15, 1.0  ;;  %v5388_v43 = vadd.f32 -1.0, %v3276_v15  ;;  %2911 = vmatpush.bf16.msrb.mxu2 %v5196_v20  ;;  %v5291_v20 = vld [vmem:[%s8859_s1 + $0x748] sm:$0xf] }
 0x12a   :  { %v2412_v21 = vpop.f32.mrf.mxu0  ;;  %v2469_v10 = vadd.f32 %v2468_v33, %v2440_v16  ;;  %v5387_v52 = vsel %vm3277_vm5, 1.0, %v8913_v22  ;;  %v5855_v33 = vld [vmem:[%s8859_s1 + $0x594] sm:$0xf0]  ;;  %v5292_v8 = vor.u32 %v5911_v47, %v5291_v20  ;;  %v5259_v20 = vld [vmem:[%s8859_s1 + $0x708] sm:$0xf] }
 0x12b   :  { %v3280_v34 = vpack.c.bf16 %v5387_v52, %v5387_v52  ;;  %v2413_v7 = vadd.f32 %v2412_v21, %v2384_v35  ;;  %v3283_v14 = vsel %vm3277_vm5, %v5388_v43, %v3276_v15  ;;  %v5067_v21 = vld [vmem:[%s8859_s1 + $0x588] sm:$0xf]  ;;  %v5903_v47 = vld [vmem:[%s8859_s1 + $0x714] sm:$0xf0] }
 0x12c   :  { %v2497_v55 = vpop.f32.mrf.mxu3  ;;  %2940 = vmatpush.bf16.msrb.mxu3 %v5324_v50  ;;  %v5068_v35 = vor.u32 %v5855_v33, %v5067_v21  ;;  %v5179_v43 = vld [vmem:[%s8859_s1 + $0x668] sm:$0xf] }
 0x12d   :  { %v2498_v5 = vadd.f32 %v2497_v55, %v2469_v10  ;;  %3281 = vst [vmem:[#allocation4 + $0x50] sm:$0xf] %v3280_v34  ;;  %v2442_v1 = vadd.f32 %v2441_v24, %v2413_v7  ;;  %v5180_v17 = vor.u32 %v5883_v60, %v5179_v43  ;;  %v4923_v34 = vld [vmem:[%s8859_s1 + $0x468] sm:$0xf]  ;;  %v5819_v7 = vld [vmem:[%s8859_s1 + $0x474] sm:$0xf0] }
 0x12e   :  { %2882 = vmatpush.bf16.msrb.mxu1 %v5068_v35  ;;  %v4924_v23 = vor.u32 %v5819_v7, %v4923_v34  ;;  %v5915_v55 = vld [vmem:[%s8859_s1 + $0x774] sm:$0xf0]  ;;  %v8914_v50 = vld [vmem:[#allocation11_spill] sm:$0xff]  ;;  %v8917_v35 = vld [vmem:[#allocation14_spill] sm:$0xff] }
 0x12f   :  { %v3285_v3 = vadd.f32 %v3283_v14, %v2498_v5  ;;  %v7743_v57 = vpop.f32.mrf.mxu1  ;;  %2912 = vmatpush.bf16.msrb.mxu2 %v5180_v17  ;;  %v5308_v5 = vor.u32 %v5915_v55, %v5307_v19  ;;  %v5052_v14 = vor.u32 %v5851_v58, %v5051_v13  ;;  %v5875_v43 = vld [vmem:[%s8859_s1 + $0x634] sm:$0xf0]  ;;  %v4891_v60 = vld [vmem:[%s8859_s1 + $0x428] sm:$0xf] }
 0x130   :  { %2854 = vmatpush.bf16.msrb.mxu0 %v4924_v23  ;;  %v5811_v17 = vld [vmem:[%s8859_s1 + $0x434] sm:$0xf0]  ;;  %v5275_v34 = vld [vmem:[%s8859_s1 + $0x728] sm:$0xf] }
 0x131   :  { %v2470_v11 = vpop.f32.mrf.mxu2  ;;  %vm3286_vm6 = vcmp.ge.f32.partialorder %v3285_v3, 1.0  ;;  %v5390_v31 = vadd.f32 -1.0, %v3285_v3  ;;  %2941 = vmatpush.bf16.msrb.mxu3 %v5308_v5  ;;  %v5907_v7 = vld [vmem:[%s8859_s1 + $0x734] sm:$0xf0]  ;;  %v5019_v55 = vld [vmem:[%s8859_s1 + $0x528] sm:$0xf] }
 0x132   :  { %v7732_v40 = vpop.f32.mrf.mxu0  ;;  %v2471_v46 = vadd.f32 %v2470_v11, %v2442_v1  ;;  %v5389_v51 = vsel %vm3286_vm6, 1.0, %v8913_v22  ;;  %2771 = vmatmul.bf16.vlgmr.msra.gmra.mxu1 %v6424_v61  ;;  %v5815_v1 = vld [vmem:[%s8859_s1 + $0x454] sm:$0xf0]  ;;  %v5276_v23 = vor.u32 %v5907_v7, %v5275_v34  ;;  %v5131_v13 = vld [vmem:[%s8859_s1 + $0x608] sm:$0xf] }
 0x133   :  { %v3289_v2 = vpack.c.bf16 %v5389_v51, %v5389_v51  ;;  %v3292_v24 = vsel %vm3286_vm6, %v5390_v31, %v3285_v3  ;;  %v5164_v3 = vor.u32 %v5879_v26, %v5163_v32  ;;  %2883 = vmatpush.bf16.msrb.mxu1 %v5052_v14  ;;  %v4908_v11 = vor.u32 %v5815_v1, %v4907_v48  ;;  %v8916_v51 = vld [vmem:[#allocation13_spill] sm:$0xff]  ;;  %v4875_v32 = vld [vmem:[%s8859_s1 + $0x408] sm:$0xf] }
 0x134   :  { %v2499_v15 = vpop.f32.mrf.mxu3  ;;  %v5843_v5 = vld [vmem:[%s8859_s1 + $0x534] sm:$0xf0] }
 0x135   :  { %2742 = vmatmul.bf16.vlgmr.msra.gmra.mxu0 %v6418_v56  ;;  %v2500_v16 = vadd.f32 %v2499_v15, %v2471_v46  ;;  %3290 = vst [vmem:[#allocation4 + $0x60] sm:$0xf] %v3289_v2  ;;  %2913 = vmatpush.bf16.msrb.mxu2 %v5164_v3  ;;  %v8915_v46 = vld [vmem:[#allocation12_spill] sm:$0xff]  ;;  %v5035_v2 = vld [vmem:[%s8859_s1 + $0x548] sm:$0xf]  ;;  %v5020_v58 = vor.u32 %v5843_v5, %v5019_v55 }
 0x136   :  { %2800 = vmatmul.bf16.vlgmr.msra.gmra.mxu2 %v6432_v4  ;;  %2942 = vmatpush.bf16.msrb.mxu3 %v5292_v8  ;;  %v5847_v15 = vld [vmem:[%s8859_s1 + $0x554] sm:$0xf0]  ;;  %v5769_v55 = vld [vmem:[%s8859_s1 + $0x2ec] sm:$0xf]  ;;  %v4733_v5 = vld [vmem:[%s8859_s1 + $0x2f8] sm:$0xf0] }
 0x137   :  { %v3294_v10 = vadd.f32 %v3292_v24, %v2500_v16  ;;  %v7759_v52 = vpop.f32.mrf.mxu1  ;;  %2855 = vmatpush.bf16.msrb.mxu0 %v4908_v11  ;;  %v5036_v16 = vor.u32 %v5847_v15, %v5035_v2  ;;  %v5871_v14 = vld [vmem:[%s8859_s1 + $0x614] sm:$0xf0]  ;;  %v5260_v2 = vor.u32 %v5903_v47, %v5259_v20  ;;  %v8918_v15 = vld [vmem:[#allocation15_spill] sm:$0xff] }
 0x138   :  { %v5807_v26 = vld [vmem:[%s8859_s1 + $0x414] sm:$0xf0]  ;;  %v5132_v3 = vor.u32 %v5871_v14, %v5131_v13  ;;  %v5705_v13 = vld [vmem:[%s8859_s1 + $0xec] sm:$0xf]  ;;  %v4477_v14 = vld [vmem:[%s8859_s1 + $0xf8] sm:$0xf0] }
 0x139   :  { %v7757_v29 = vpop.f32.mrf.mxu2  ;;  %vm3295_vm7 = vcmp.ge.f32.partialorder %v3294_v10, 1.0  ;;  %2829 = vmatmul.bf16.vlgmr.msra.gmra.mxu3 %v6464_v27  ;;  %2884 = vmatpush.bf16.msrb.mxu1 %v5036_v16  ;;  %v5147_v10 = vld [vmem:[%s8859_s1 + $0x628] sm:$0xf]  ;;  %v4876_v1 = vor.u32 %v5807_v26, %v4875_v32  ;;  %v8919_v16 = vld [vmem:[#allocation16_spill] sm:$0xff]  ;;  %v5801_v32 = vld [vmem:[%s8859_s1 + $0x3ec] sm:$0xf] }
 0x13a   :  { %v7755_v45 = vpop.f32.mrf.mxu0  ;;  %v5391_v9 = vsel %vm3295_vm7, 1.0, %v8913_v22  ;;  %2943 = vmatpush.bf16.msrb.mxu3 %v5276_v23  ;;  %v8921_v23 = vld [vmem:[#allocation18_spill] sm:$0xff]  ;;  %v4861_v26 = vld [vmem:[%s8859_s1 + $0x3f8] sm:$0xf0] }
 0x13b   :  { %v3298_v0 = vpack.c.bf16 %v5391_v9, %v5391_v9  ;;  %v5148_v9 = vor.u32 %v5875_v43, %v5147_v10  ;;  %v5003_v10 = vld [vmem:[%s8859_s1 + $0x508] sm:$0xf]  ;;  %v5839_v43 = vld [vmem:[%s8859_s1 + $0x514] sm:$0xf0] }
 0x13c   :  { %v7781_v59 = vpop.f32.mrf.mxu3 }
 0x13d   :  { %3299 = vst [vmem:[#allocation4 + $0x70] sm:$0xf] %v3298_v0  ;;  %v4892_v0 = vor.u32 %v5811_v17, %v4891_v60  ;;  %2914 = vmatpush.bf16.msrb.mxu2 %v5148_v9  ;;  %2885 = vmatpush.bf16.msrb.mxu1 %v5020_v58  ;;  %v5004_v9 = vor.u32 %v5839_v43, %v5003_v10  ;;  %v8920_v17 = vld [vmem:[#allocation17_spill] sm:$0xff]  ;;  %v8922_v43 = vld [vmem:[#allocation24_spill] sm:$0xff] }
 0x13e   :  { %2944 = vmatpush.bf16.msrb.mxu3 %v5260_v2  ;;  %v4736_v58 = vor.u32 %v5769_v55, %v4733_v5  ;;  %v8923_v55 = vld [vmem:[#allocation19_spill] sm:$0xff]  ;;  %v8924_v5 = vld [vmem:[#allocation20_spill] sm:$0xff] }
 0x13f   :  { %v7811_v37 = vpop.f32.mrf.mxu1  ;;  %2856 = vmatpush.bf16.msrb.mxu0 %v4892_v0 }
 0x141   :  { %v7809_v12 = vpop.f32.mrf.mxu2  ;;  %2915 = vmatpush.bf16.msrb.mxu2 %v5132_v3  ;;  %2886 = vmatpush.bf16.msrb.mxu1 %v5004_v9  ;;  %v4480_v3 = vor.u32 %v5705_v13, %v4477_v14  ;;  %v7926_v9 = vperm.slane %v8922_v43, 1  ;;  %v5737_v13 = vld [vmem:[%s8859_s1 + $0x1ec] sm:$0xf]  ;;  %v4461_v43 = vld [vmem:[%s8859_s1 + $0xd8] sm:$0xf0] }
 0x142   :  { %v7798_v62 = vpop.f32.mrf.mxu0  ;;  %2776 = vmatmul.bf16.gmra.mxu1 %v8915_v46  ;;  %v5765_v14 = vld [vmem:[%s8859_s1 + $0x2cc] sm:$0xf] }
 0x143   :  { %2857 = vmatpush.bf16.msrb.mxu0 %v4876_v1  ;;  %v4864_v1 = vor.u32 %v5801_v32, %v4861_v26 }
 0x144   :  { %v7815_v31 = vpop.f32.mrf.mxu3 }
 0x145   :  { %2747 = vmatmul.bf16.gmra.mxu0 %v8914_v50  ;;  %3024 = vmatpush.bf16.msra.mxu2 %v4736_v58  ;;  %v4605_v58 = vld [vmem:[%s8859_s1 + $0x1f8] sm:$0xf0] }
 0x146   :  { %2805 = vmatmul.bf16.gmra.mxu2 %v8916_v51  ;;  %3053 = vmatpush.bf16.msra.mxu3 %v4864_v1  ;;  %v4608_v26 = vor.u32 %v5737_v13, %v4605_v58  ;;  %v5701_v1 = vld [vmem:[%s8859_s1 + $0xcc] sm:$0xf]  ;;  %v4845_v58 = vld [vmem:[%s8859_s1 + $0x3d8] sm:$0xf0] }
 0x147   :  { %v7828_v24 = vpop.f32.mrf.mxu1  ;;  %2966 = vmatpush.bf16.msra.mxu0 %v4480_v3  ;;  %v4717_v3 = vld [vmem:[%s8859_s1 + $0x2d8] sm:$0xf0]  ;;  %v5797_v13 = vld [vmem:[%s8859_s1 + $0x3cc] sm:$0xf] }
 0x148   :  { %2995 = vmatpush.bf16.msra.mxu1 %v4608_v26 }
 0x149   :  { %v7826_v33 = vpop.f32.mrf.mxu2  ;;  %2834 = vmatmul.bf16.gmra.mxu3 %v8917_v35 }
 0x14a   :  { %v7824_v21 = vpop.f32.mrf.mxu0 }
 0x14c   :  { %v7849_v19 = vpop.f32.mrf.mxu3 }
 0x14f   :  { %v7879_v8 = vpop.f32.mrf.mxu1 }
 0x151   :  { %v7877_v11 = vpop.f32.mrf.mxu2 }
 0x152   :  { %v7869_v48 = vpop.f32.mrf.mxu0  ;;  %2781 = vmatmul.bf16.gmra.mxu1 %v8919_v16  ;;  %v4848_v16 = vor.u32 %v5797_v13, %v4845_v58  ;;  %v8926_v13 = vld [vmem:[#allocation22_spill] sm:$0xff]  ;;  %v5697_v58 = vld [vmem:[%s8859_s1 + $0xac] sm:$0xf] }
 0x154   :  { %v7889_v60 = vpop.f32.mrf.mxu3  ;;  %3054 = vmatpush.bf16.msra.mxu3 %v4848_v16  ;;  %v5793_v16 = vld [vmem:[%s8859_s1 + $0x3ac] sm:$0xf] }
 0x155   :  { %2752 = vmatmul.bf16.gmra.mxu0 %v8918_v15 }
 0x156   :  { %2810 = vmatmul.bf16.gmra.mxu2 %v8920_v17  ;;  %v4464_v17 = vor.u32 %v5701_v1, %v4461_v43 }
 0x157   :  { %v7896_v0 = vpop.f32.mrf.mxu1 }
 0x158   :  { %2967 = vmatpush.bf16.msra.mxu0 %v4464_v17  ;;  %v5761_v17 = vld [vmem:[%s8859_s1 + $0x2ac] sm:$0xf] }
 0x159   :  { %v7894_v7 = vpop.f32.mrf.mxu2  ;;  %2839 = vmatmul.bf16.gmra.mxu3 %v8921_v23  ;;  %v4720_v23 = vor.u32 %v5765_v14, %v4717_v3  ;;  %v4589_v14 = vld [vmem:[%s8859_s1 + $0x1d8] sm:$0xf0] }
 0x15a   :  { %v7892_v34 = vpop.f32.mrf.mxu0 }
 0x15b   :  { %3025 = vmatpush.bf16.msra.mxu2 %v4720_v23  ;;  %v4701_v23 = vld [vmem:[%s8859_s1 + $0x2b8] sm:$0xf0] }
 0x15c   :  { %v7917_v20 = vpop.f32.mrf.mxu3 }
 0x15f   :  { %v7923_v10 = vpop.f32.mrf.mxu1 }
 0x161   :  { %v7921_v2 = vpop.f32.mrf.mxu2 }
 0x162   :  { %v7919_v47 = vpop.f32.mrf.mxu0  ;;  %2786 = vmatmul.bf16.gmra.mxu1 %v8924_v5  ;;  %v2512_v5 = vadd.f32 %v7732_v40, %v7926_v9  ;;  %v5733_v40 = vld [vmem:[%s8859_s1 + $0x1cc] sm:$0xf] }
 0x163   :  { %v4592_v43 = vor.u32 %v5733_v40, %v4589_v14 }
 0x164   :  { %v7939_v32 = vpop.f32.mrf.mxu3  ;;  %v2541_v26 = vadd.f32 %v7743_v57, %v2512_v5  ;;  %v4445_v57 = vld [vmem:[%s8859_s1 + $0xb8] sm:$0xf0] }
 0x165   :  { %2757 = vmatmul.bf16.gmra.mxu0 %v8923_v55  ;;  %v8925_v55 = vld [vmem:[#allocation21_spill] sm:$0xff]  ;;  %2996 = vmatpush.bf16.msra.mxu1 %v4592_v43  ;;  %v4448_v40 = vor.u32 %v5697_v58, %v4445_v57  ;;  %v5729_v58 = vld [vmem:[%s8859_s1 + $0x1ac] sm:$0xf] }
 0x166   :  { %2815 = vmatmul.bf16.gmra.mxu2 %v8925_v55  ;;  %v4704_v55 = vor.u32 %v5761_v17, %v4701_v23  ;;  %v4829_v5 = vld [vmem:[%s8859_s1 + $0x3b8] sm:$0xf0]  ;;  %v2570_v43 = vadd.f32 %v7757_v29, %v2541_v26  ;;  %v2514_v17 = vadd.f32 %v7755_v45, %v7926_v9  ;;  %v5757_v29 = vld [vmem:[%s8859_s1 + $0x28c] sm:$0xf] }
 0x167   :  { %v7969_v1 = vpop.f32.mrf.mxu1  ;;  %v4832_v14 = vor.u32 %v5793_v16, %v4829_v5  ;;  %2968 = vmatpush.bf16.msra.mxu0 %v4448_v40  ;;  %v8927_v26 = vld [vmem:[#allocation23_spill] sm:$0xff]  ;;  %v4685_v57 = vld [vmem:[%s8859_s1 + $0x298] sm:$0xf0] }
 0x168   :  { %3026 = vmatpush.bf16.msra.mxu2 %v4704_v55  ;;  %v2599_v46 = vadd.f32 %v7781_v59, %v2570_v43  ;;  %v4573_v55 = vld [vmem:[%s8859_s1 + $0x1b8] sm:$0xf0]  ;;  %v5693_v59 = vld [vmem:[%s8859_s1 + $0x8c] sm:$0xf]  ;;  %v2543_v5 = vadd.f32 %v7759_v52, %v2514_v17  ;;  %v2517_v52 = vadd.f32 %v7798_v62, %v7926_v9 }
 0x169   :  { %v7967_v3 = vpop.f32.mrf.mxu2  ;;  %2844 = vmatmul.bf16.gmra.mxu3 %v8926_v13  ;;  %v4576_v45 = vor.u32 %v5729_v58, %v4573_v55  ;;  %v4429_v16 = vld [vmem:[%s8859_s1 + $0x98] sm:$0xf0]  ;;  %v5789_v58 = vld [vmem:[%s8859_s1 + $0x38c] sm:$0xf] }
 0x16a   :  { %v7959_v15 = vpop.f32.mrf.mxu0  ;;  %3055 = vmatpush.bf16.msra.mxu3 %v4832_v14  ;;  %v4688_v14 = vor.u32 %v5757_v29, %v4685_v57  ;;  %v4432_v43 = vor.u32 %v5693_v59, %v4429_v16  ;;  %v4813_v55 = vld [vmem:[%s8859_s1 + $0x398] sm:$0xf0]  ;;  %v2572_v27 = vadd.f32 %v7809_v12, %v2543_v5  ;;  %v2546_v59 = vadd.f32 %v7811_v37, %v2517_v52  ;;  %v5689_v5 = vld [vmem:[%s8859_s1 + $0x6c] sm:$0xf] }
 0x16b   :  { %2997 = vmatpush.bf16.msra.mxu1 %v4576_v45  ;;  %v4816_v50 = vor.u32 %v5789_v58, %v4813_v55  ;;  %v4557_v29 = vld [vmem:[%s8859_s1 + $0x198] sm:$0xf0]  ;;  %v5785_v37 = vld [vmem:[%s8859_s1 + $0x36c] sm:$0xf] }
 0x16c   :  { %v7991_v13 = vpop.f32.mrf.mxu3  ;;  %2969 = vmatpush.bf16.msra.mxu0 %v4432_v43  ;;  %3027 = vmatpush.bf16.msra.mxu2 %v4688_v14  ;;  %v2601_v62 = vadd.f32 %v7815_v31, %v2572_v27  ;;  %v4669_v16 = vld [vmem:[%s8859_s1 + $0x278] sm:$0xf0]  ;;  %v2575_v52 = vadd.f32 %v7826_v33, %v2546_v59  ;;  %v5721_v33 = vld [vmem:[%s8859_s1 + $0x16c] sm:$0xf] }
 0x16d   :  { %v4413_v27 = vld [vmem:[%s8859_s1 + $0x78] sm:$0xf0] }
 0x16e   :  { %3056 = vmatpush.bf16.msra.mxu3 %v4816_v50  ;;  %v4797_v31 = vld [vmem:[%s8859_s1 + $0x378] sm:$0xf0]  ;;  %v4416_v43 = vor.u32 %v5689_v5, %v4413_v27  ;;  %v5685_v27 = vld [vmem:[%s8859_s1 + $0x4c] sm:$0xf] }
 0x16f   :  { %v2656_v51 = vpop.f32.mrf.mxu1  ;;  %v4800_v58 = vor.u32 %v5785_v37, %v4797_v31  ;;  %v4397_v37 = vld [vmem:[%s8859_s1 + $0x58] sm:$0xf0] }
 0x170   :  { %2970 = vmatpush.bf16.msra.mxu0 %v4416_v43  ;;  %v5781_v43 = vld [vmem:[%s8859_s1 + $0x34c] sm:$0xf] }
 0x171   :  { %v7996_v35 = vpop.f32.mrf.mxu2 }
 0x172   :  { %v2627_v23 = vpop.f32.mrf.mxu0  ;;  %2887 = vmatmul.bf16.vlgmr.msrb.gmra.mxu1 %v6818_v39  ;;  %3057 = vmatpush.bf16.msra.mxu3 %v4800_v58  ;;  %v4781_v58 = vld [vmem:[%s8859_s1 + $0x358] sm:$0xf0] }
 0x173   :  { %v2628_v40 = vadd.f32 %v2627_v23, %v2599_v46  ;;  %v5725_v23 = vld [vmem:[%s8859_s1 + $0x18c] sm:$0xf] }
 0x174   :  { %v4560_v57 = vor.u32 %v5725_v23, %v4557_v29  ;;  %v2519_v23 = vadd.f32 %v7824_v21, %v7926_v9  ;;  %v4541_v21 = vld [vmem:[%s8859_s1 + $0x178] sm:$0xf0] }
 0x175   :  { %2858 = vmatmul.bf16.vlgmr.msrb.gmra.mxu0 %v8927_v26  ;;  %v8026_v26 = vpop.f32.mrf.mxu3  ;;  %v2657_v46 = vadd.f32 %v2656_v51, %v2628_v40  ;;  %v5753_v51 = vld [vmem:[%s8859_s1 + $0x26c] sm:$0xf] }
 0x176   :  { %2916 = vmatmul.bf16.vlgmr.msrb.gmra.mxu2 %v6821_v44  ;;  %2998 = vmatpush.bf16.msra.mxu1 %v4560_v57  ;;  %v4672_v40 = vor.u32 %v5753_v51, %v4669_v16  ;;  %v2604_v16 = vadd.f32 %v7849_v19, %v2575_v52  ;;  %v2548_v59 = vadd.f32 %v7828_v24, %v2519_v23  ;;  %v4653_v19 = vld [vmem:[%s8859_s1 + $0x258] sm:$0xf0] }
 0x177   :  { %v2658_v12 = vpop.f32.mrf.mxu1  ;;  %v4784_v52 = vor.u32 %v5781_v43, %v4781_v58  ;;  %v4765_v43 = vld [vmem:[%s8859_s1 + $0x338] sm:$0xf0] }
 0x178   :  { %3028 = vmatpush.bf16.msra.mxu2 %v4672_v40  ;;  %v2577_v23 = vadd.f32 %v7877_v11, %v2548_v59  ;;  %v4525_v11 = vld [vmem:[%s8859_s1 + $0x158] sm:$0xf0] }
 0x179   :  { %v2685_v45 = vpop.f32.mrf.mxu2  ;;  %2945 = vmatmul.bf16.vlgmr.msrb.gmra.mxu3 %v6875_v38  ;;  %v4637_v59 = vld [vmem:[%s8859_s1 + $0x238] sm:$0xf0] }
 0x17a   :  { %v2629_v17 = vpop.f32.mrf.mxu0  ;;  %v2686_v50 = vadd.f32 %v2685_v45, %v2657_v46  ;;  %3058 = vmatpush.bf16.msra.mxu3 %v4784_v52 }
 0x17b   :  { %v2630_v14 = vadd.f32 %v2629_v17, %v2601_v62 }
 0x17d   :  { %v2714_v55 = vpop.f32.mrf.mxu3  ;;  %v2659_v29 = vadd.f32 %v2658_v12, %v2630_v14  ;;  %v5749_v12 = vld [vmem:[%s8859_s1 + $0x24c] sm:$0xf]  ;;  %v4400_v14 = vor.u32 %v5685_v27, %v4397_v37  ;;  %v4381_v27 = vld [vmem:[%s8859_s1 + $0x38] sm:$0xf0] }
 0x17e   :  { %v2715_v46 = vadd.f32 %v2714_v55, %v2686_v50  ;;  %v4544_v50 = vor.u32 %v5721_v33, %v4541_v21  ;;  %v4656_v24 = vor.u32 %v5749_v12, %v4653_v19  ;;  %v5717_v33 = vld [vmem:[%s8859_s1 + $0x14c] sm:$0xf]  ;;  %v2606_v12 = vadd.f32 %v7889_v60, %v2577_v23 }
 0x17f   :  { %v2661_v62 = vpop.f32.mrf.mxu1  ;;  %2971 = vmatpush.bf16.msra.mxu0 %v4400_v14  ;;  %v4528_v21 = vor.u32 %v5717_v33, %v4525_v11  ;;  %v5777_v14 = vld [vmem:[%s8859_s1 + $0x32c] sm:$0xf] }
 0x180   :  { %vm3302_vm8 = vcmp.ge.f32.partialorder %v2715_v46, 1.0  ;;  %v5393_v51 = vadd.f32 -1.0, %v2715_v46  ;;  %2999 = vmatpush.bf16.msra.mxu1 %v4544_v50  ;;  %3029 = vmatpush.bf16.msra.mxu2 %v4656_v24  ;;  %v5713_v33 = vld [vmem:[%s8859_s1 + $0x12c] sm:$0xf] }
 0x181   :  { %v5392_v57 = vsel %vm3302_vm8, 1.0, %v8913_v22  ;;  %v2687_v17 = vpop.f32.mrf.mxu2 }
 0x182   :  { %v2632_v45 = vpop.f32.mrf.mxu0  ;;  %v3305_v5 = vpack.c.bf16 %v5392_v57, %v5392_v57  ;;  %v2688_v40 = vadd.f32 %v2687_v17, %v2659_v29  ;;  %2892 = vmatmul.bf16.gmra.mxu1 %v6929_v42  ;;  %v2522_v29 = vadd.f32 %v7869_v48, %v7926_v9  ;;  %v3308_v57 = vsel %vm3302_vm8, %v5393_v51, %v2715_v46 }
 0x183   :  { %v2633_v31 = vadd.f32 %v2632_v45, %v2604_v16 }
 0x184   :  { %3306 = vst [vmem:[#allocation4 + $0x4] sm:$0xf] %v3305_v5  ;;  %v2551_v46 = vadd.f32 %v7879_v8, %v2522_v29  ;;  %3000 = vmatpush.bf16.msra.mxu1 %v4528_v21  ;;  %v5681_v8 = vld [vmem:[%s8859_s1 + $0x2c] sm:$0xf] }
 0x185   :  { %2863 = vmatmul.bf16.gmra.mxu0 %v6915_v18  ;;  %v2716_v55 = vpop.f32.mrf.mxu3  ;;  %v2662_v16 = vadd.f32 %v2661_v62, %v2633_v31  ;;  %v5745_v62 = vld [vmem:[%s8859_s1 + $0x22c] sm:$0xf]  ;;  %v4384_v24 = vor.u32 %v5681_v8, %v4381_v27 }
 0x186   :  { %v2717_v45 = vadd.f32 %v2716_v55, %v2688_v40  ;;  %2921 = vmatmul.bf16.gmra.mxu2 %v6950_v63  ;;  %v4640_v60 = vor.u32 %v5745_v62, %v4637_v59  ;;  %v4768_v55 = vor.u32 %v5777_v14, %v4765_v43  ;;  %v2580_v52 = vadd.f32 %v7894_v7, %v2551_v46  ;;  %v4509_v7 = vld [vmem:[%s8859_s1 + $0x138] sm:$0xf0]  ;;  %v5773_v27 = vld [vmem:[%s8859_s1 + $0x30c] sm:$0xf] }
 0x187   :  { %v2663_v40 = vpop.f32.mrf.mxu1  ;;  %2972 = vmatpush.bf16.msra.mxu0 %v4384_v24  ;;  %v4512_v21 = vor.u32 %v5713_v33, %v4509_v7  ;;  %v4365_v59 = vld [vmem:[%s8859_s1 + $0x18] sm:$0xf0] }
 0x188   :  { %v3310_v17 = vadd.f32 %v3308_v57, %v2717_v45  ;;  %3030 = vmatpush.bf16.msra.mxu2 %v4640_v60  ;;  %3059 = vmatpush.bf16.msra.mxu3 %v4768_v55  ;;  %v2524_v45 = vadd.f32 %v7892_v34, %v7926_v9  ;;  %v5741_v34 = vld [vmem:[%s8859_s1 + $0x20c] sm:$0xf]  ;;  %v4493_v43 = vld [vmem:[%s8859_s1 + $0x118] sm:$0xf0] }
 0x189   :  { %v2690_v48 = vpop.f32.mrf.mxu2  ;;  %2950 = vmatmul.bf16.gmra.mxu3 %v6975_v28  ;;  %3001 = vmatpush.bf16.msra.mxu1 %v4512_v21 }
 0x18a   :  { %v2634_v5 = vpop.f32.mrf.mxu0  ;;  %v2691_v51 = vadd.f32 %v2690_v48, %v2662_v16  ;;  %vm3311_vm9 = vcmp.ge.f32.partialorder %v3310_v17, 1.0  ;;  %v5395_v19 = vadd.f32 -1.0, %v3310_v17 }
 0x18b   :  { %v5394_v50 = vsel %vm3311_vm9, 1.0, %v8913_v22  ;;  %v2635_v31 = vadd.f32 %v2634_v5, %v2606_v12 }
 0x18c   :  { %v3314_v37 = vpack.c.bf16 %v5394_v50, %v5394_v50  ;;  %v3317_v29 = vsel %vm3311_vm9, %v5395_v19, %v3310_v17  ;;  %v2609_v17 = vadd.f32 %v7917_v20, %v2580_v52  ;;  %v5677_v20 = vld [vmem:[%s8859_s1 + $0xc] sm:$0xf]  ;;  %v2553_v50 = vadd.f32 %v7896_v0, %v2524_v45 }
 0x18d   :  { %v2719_v58 = vpop.f32.mrf.mxu3  ;;  %v2664_v16 = vadd.f32 %v2663_v40, %v2635_v31  ;;  %v4621_v40 = vld [vmem:[%s8859_s1 + $0x218] sm:$0xf0]  ;;  %v4368_v8 = vor.u32 %v5677_v20, %v4365_v59  ;;  %v5709_v31 = vld [vmem:[%s8859_s1 + $0x10c] sm:$0xf]  ;;  %v2527_v0 = vadd.f32 %v7919_v47, %v7926_v9  ;;  %v2529_v20 = vadd.f32 %v7959_v15, %v7926_v9 }
 0x18e   :  { %v2720_v23 = vadd.f32 %v2719_v58, %v2691_v51  ;;  %3315 = vst [vmem:[#allocation4 + $0x14] sm:$0xf] %v3314_v37  ;;  %v4624_v62 = vor.u32 %v5741_v34, %v4621_v40  ;;  %v4749_v37 = vld [vmem:[%s8859_s1 + $0x318] sm:$0xf0]  ;;  %v2582_v58 = vadd.f32 %v7921_v2, %v2553_v50  ;;  %v4496_v52 = vor.u32 %v5709_v31, %v4493_v43  ;;  %v5829_v43 = vld [vmem:[%s8859_s1 + $0x4cc] sm:$0xf] }
 0x18f   :  { %v2666_v48 = vpop.f32.mrf.mxu1  ;;  %v4752_v14 = vor.u32 %v5773_v27, %v4749_v37  ;;  %2973 = vmatpush.bf16.msra.mxu0 %v4368_v8  ;;  %v2556_v7 = vadd.f32 %v7923_v10, %v2527_v0  ;;  %v5245_v10 = vld [vmem:[%s8859_s1 + $0x6f8] sm:$0xf0]  ;;  %v5865_v27 = vld [vmem:[%s8859_s1 + $0x5ec] sm:$0xf] }
 0x190   :  { %v3319_v57 = vadd.f32 %v3317_v29, %v2720_v23  ;;  %3031 = vmatpush.bf16.msra.mxu2 %v4624_v62  ;;  %3002 = vmatpush.bf16.msra.mxu1 %v4496_v52  ;;  %v2611_v33 = vadd.f32 %v7939_v32, %v2582_v58  ;;  %v5897_v32 = vld [vmem:[%s8859_s1 + $0x6ec] sm:$0xf]  ;;  %v5373_v8 = vld [vmem:[%s8859_s1 + $0x7f8] sm:$0xf0] }
 0x191   :  { %v2692_v11 = vpop.f32.mrf.mxu2  ;;  %3060 = vmatpush.bf16.msra.mxu3 %v4752_v14  ;;  %v5929_v62 = vld [vmem:[%s8859_s1 + $0x7ec] sm:$0xf]  ;;  %v5117_v37 = vld [vmem:[%s8859_s1 + $0x5f8] sm:$0xf0] }
 0x192   :  { %v2637_v5 = vpop.f32.mrf.mxu0  ;;  %v2693_v12 = vadd.f32 %v2692_v11, %v2664_v16  ;;  %vm3320_vm10 = vcmp.ge.f32.partialorder %v3319_v57, 1.0  ;;  %v5397_v46 = vadd.f32 -1.0, %v3319_v57  ;;  %2897 = vmatmul.bf16.gmra.mxu1 %v7028_v25  ;;  %v5376_v15 = vor.u32 %v5929_v62, %v5373_v8  ;;  %v5229_v14 = vld [vmem:[%s8859_s1 + $0x6d8] sm:$0xf0] }
 0x193   :  { %v5396_v51 = vsel %vm3320_vm10, 1.0, %v8913_v22  ;;  %v2638_v60 = vadd.f32 %v2637_v5, %v2609_v17  ;;  %v5120_v9 = vor.u32 %v5865_v27, %v5117_v37  ;;  %v5213_v62 = vld [vmem:[%s8859_s1 + $0x6b8] sm:$0xf0]  ;;  %v5921_v37 = vld [vmem:[%s8859_s1 + $0x7ac] sm:$0xf] }
 0x194   :  { %v3323_v19 = vpack.c.bf16 %v5396_v51, %v5396_v51  ;;  %v3326_v23 = vsel %vm3320_vm10, %v5397_v46, %v3319_v57  ;;  %v5248_v46 = vor.u32 %v5897_v32, %v5245_v10  ;;  %v5833_v51 = vld [vmem:[%s8859_s1 + $0x4ec] sm:$0xf] }
 0x195   :  { %2868 = vmatmul.bf16.gmra.mxu0 %v7022_v41  ;;  %v2721_v24 = vpop.f32.mrf.mxu3  ;;  %v2667_v47 = vadd.f32 %v2666_v48, %v2638_v60  ;;  %v2585_v48 = vadd.f32 %v7967_v3, %v2556_v7  ;;  %v4989_v3 = vld [vmem:[%s8859_s1 + $0x4f8] sm:$0xf0]  ;;  %3169 = vmatpush.bf16.msrb.mxu3 %v5376_v15 }
 0x196   :  { %v2722_v55 = vadd.f32 %v2721_v24, %v2693_v12  ;;  %3324 = vst [vmem:[#allocation4 + $0x24] sm:$0xf] %v3323_v19  ;;  %2926 = vmatmul.bf16.gmra.mxu2 %v7048_v6  ;;  %v4992_v60 = vor.u32 %v5833_v51, %v4989_v3  ;;  %v5893_v24 = vld [vmem:[%s8859_s1 + $0x6cc] sm:$0xf]  ;;  %3111 = vmatpush.bf16.msrb.mxu1 %v5120_v9 }
 0x197   :  { %v2668_v5 = vpop.f32.mrf.mxu1  ;;  %3140 = vmatpush.bf16.msrb.mxu2 %v5248_v46  ;;  %v2614_v58 = vadd.f32 %v7991_v13, %v2585_v48  ;;  %v5232_v52 = vor.u32 %v5893_v24, %v5229_v14  ;;  %v5889_v3 = vld [vmem:[%s8859_s1 + $0x6ac] sm:$0xf]  ;;  %v5085_v14 = vld [vmem:[%s8859_s1 + $0x5b8] sm:$0xf0] }
 0x198   :  { %v3328_v29 = vadd.f32 %v3326_v23, %v2722_v55  ;;  %3082 = vmatpush.bf16.msrb.mxu0 %v4992_v60  ;;  %v4973_v23 = vld [vmem:[%s8859_s1 + $0x4d8] sm:$0xf0]  ;;  %v5857_v24 = vld [vmem:[%s8859_s1 + $0x5ac] sm:$0xf] }
 0x199   :  { %v2695_v16 = vpop.f32.mrf.mxu2  ;;  %2955 = vmatmul.bf16.gmra.mxu3 %v7070_v49  ;;  %v4976_v13 = vor.u32 %v5829_v43, %v4973_v23  ;;  %v5821_v23 = vld [vmem:[%s8859_s1 + $0x48c] sm:$0xf] }
 0x19a   :  { %v2639_v45 = vpop.f32.mrf.mxu0  ;;  %v2696_v2 = vadd.f32 %v2695_v16, %v2667_v47  ;;  %vm3329_vm11 = vcmp.ge.f32.partialorder %v3328_v29, 1.0  ;;  %v5399_v21 = vadd.f32 -1.0, %v3328_v29  ;;  %v5357_v16 = vld [vmem:[%s8859_s1 + $0x7d8] sm:$0xf0] }
 0x19b   :  { %v5398_v11 = vsel %vm3329_vm11, 1.0, %v8913_v22  ;;  %v2640_v57 = vadd.f32 %v2639_v45, %v2611_v33  ;;  %3141 = vmatpush.bf16.msrb.mxu2 %v5232_v52  ;;  %v5197_v52 = vld [vmem:[%s8859_s1 + $0x698] sm:$0xf0] }
 0x19c   :  { %v3332_v17 = vpack.c.bf16 %v5398_v11, %v5398_v11  ;;  %v3335_v40 = vsel %vm3329_vm11, %v5399_v21, %v3328_v29  ;;  %v5925_v29 = vld [vmem:[%s8859_s1 + $0x7cc] sm:$0xf]  ;;  %3083 = vmatpush.bf16.msrb.mxu0 %v4976_v13 }
 0x19d   :  { %v2724_v12 = vpop.f32.mrf.mxu3  ;;  %v2669_v50 = vadd.f32 %v2668_v5, %v2640_v57  ;;  %v2558_v5 = vadd.f32 %v7969_v1, %v2529_v20  ;;  %v5861_v57 = vld [vmem:[%s8859_s1 + $0x5cc] sm:$0xf]  ;;  %v5101_v1 = vld [vmem:[%s8859_s1 + $0x5d8] sm:$0xf0] }
 0x19e   :  { %v2725_v34 = vadd.f32 %v2724_v12, %v2696_v2  ;;  %3333 = vst [vmem:[#allocation4 + $0x34] sm:$0xf] %v3332_v17  ;;  %v5360_v2 = vor.u32 %v5925_v29, %v5357_v16  ;;  %v5104_v48 = vor.u32 %v5861_v57, %v5101_v1  ;;  %v4941_v16 = vld [vmem:[%s8859_s1 + $0x498] sm:$0xf0] }
 0x19f   :  { %v2671_v0 = vpop.f32.mrf.mxu1  ;;  %v2587_v21 = vadd.f32 %v7996_v35, %v2558_v5  ;;  %v5917_v5 = vld [vmem:[%s8859_s1 + $0x78c] sm:$0xf] }
 0x1a0   :  { %v3337_v59 = vadd.f32 %v3335_v40, %v2725_v34  ;;  %3170 = vmatpush.bf16.msrb.mxu3 %v5360_v2  ;;  %3112 = vmatpush.bf16.msrb.mxu1 %v5104_v48 }
 0x1a1   :  { %v2697_v31 = vpop.f32.mrf.mxu2  ;;  %v2616_v46 = vadd.f32 %v8026_v26, %v2587_v21  ;;  %v5825_v26 = vld [vmem:[%s8859_s1 + $0x4ac] sm:$0xf] }
 0x1a2   :  { %v2642_v19 = vpop.f32.mrf.mxu0  ;;  %v2698_v55 = vadd.f32 %v2697_v31, %v2669_v50  ;;  %vm3338_vm12 = vcmp.ge.f32.partialorder %v3337_v59, 1.0  ;;  %v5401_v47 = vadd.f32 -1.0, %v3337_v59  ;;  %2902 = vmatmul.bf16.gmra.mxu1 %v7130_v30  ;;  %v5216_v50 = vor.u32 %v5889_v3, %v5213_v62  ;;  %v5341_v31 = vld [vmem:[%s8859_s1 + $0x7b8] sm:$0xf0]  ;;  %v5881_v3 = vld [vmem:[%s8859_s1 + $0x66c] sm:$0xf] }
 0x1a3   :  { %v5400_v45 = vsel %vm3338_vm12, 1.0, %v8913_v22  ;;  %v2643_v7 = vadd.f32 %v2642_v19, %v2614_v58  ;;  %v4957_v19 = vld [vmem:[%s8859_s1 + $0x4b8] sm:$0xf0]  ;;  %v5344_v15 = vor.u32 %v5921_v37, %v5341_v31  ;;  %v5088_v58 = vor.u32 %v5857_v24, %v5085_v14  ;;  %v5877_v24 = vld [vmem:[%s8859_s1 + $0x64c] sm:$0xf] }
 0x1a4   :  { %v3341_v33 = vpack.c.bf16 %v5400_v45, %v5400_v45  ;;  %v3344_v12 = vsel %vm3338_vm12, %v5401_v47, %v3337_v59  ;;  %v4960_v27 = vor.u32 %v5825_v26, %v4957_v19  ;;  %3142 = vmatpush.bf16.msrb.mxu2 %v5216_v50  ;;  %v5181_v62 = vld [vmem:[%s8859_s1 + $0x678] sm:$0xf0]  ;;  %v5817_v50 = vld [vmem:[%s8859_s1 + $0x46c] sm:$0xf] }
 0x1a5   :  { %2873 = vmatmul.bf16.gmra.mxu0 %v7119_v36  ;;  %v2726_v11 = vpop.f32.mrf.mxu3  ;;  %v2672_v32 = vadd.f32 %v2671_v0, %v2643_v7  ;;  %3171 = vmatpush.bf16.msrb.mxu3 %v5344_v15  ;;  %v4925_v26 = vld [vmem:[%s8859_s1 + $0x478] sm:$0xf0] }
 0x1a6   :  { %v2727_v17 = vadd.f32 %v2726_v11, %v2698_v55  ;;  %3342 = vst [vmem:[#allocation4 + $0x44] sm:$0xf] %v3341_v33  ;;  %2931 = vmatmul.bf16.gmra.mxu2 %v7141_v54  ;;  %3084 = vmatpush.bf16.msrb.mxu0 %v4960_v27  ;;  %v5885_v55 = vld [vmem:[%s8859_s1 + $0x68c] sm:$0xf]  ;;  %v5325_v33 = vld [vmem:[%s8859_s1 + $0x798] sm:$0xf0]  ;;  %v4944_v11 = vor.u32 %v5821_v23, %v4941_v16 }
 0x1a7   :  { %v2673_v40 = vpop.f32.mrf.mxu1  ;;  %v5200_v13 = vor.u32 %v5885_v55, %v5197_v52  ;;  %3113 = vmatpush.bf16.msrb.mxu1 %v5088_v58  ;;  %v5328_v21 = vor.u32 %v5917_v5, %v5325_v33  ;;  %v5309_v27 = vld [vmem:[%s8859_s1 + $0x778] sm:$0xf0]  ;;  %v5909_v23 = vld [vmem:[%s8859_s1 + $0x74c] sm:$0xf] }
 0x1a8   :  { %v3346_v34 = vadd.f32 %v3344_v12, %v2727_v17  ;;  %v5053_v15 = vld [vmem:[%s8859_s1 + $0x578] sm:$0xf0]  ;;  %v8929_v33 = vld [vmem:[#allocation11_spill] sm:$0xff] }
 0x1a9   :  { %v2700_v10 = vpop.f32.mrf.mxu2  ;;  %2960 = vmatmul.bf16.gmra.mxu3 %v7146_v53  ;;  %3143 = vmatpush.bf16.msrb.mxu2 %v5200_v13  ;;  %v5165_v14 = vld [vmem:[%s8859_s1 + $0x658] sm:$0xf0] }
 0x1aa   :  { %v2644_v35 = vpop.f32.mrf.mxu0  ;;  %v2701_v51 = vadd.f32 %v2700_v10, %v2672_v32  ;;  %vm3347_vm13 = vcmp.ge.f32.partialorder %v3346_v34, 1.0  ;;  %v5403_v59 = vadd.f32 -1.0, %v3346_v34  ;;  %3172 = vmatpush.bf16.msrb.mxu3 %v5328_v21  ;;  %3085 = vmatpush.bf16.msrb.mxu0 %v4944_v11  ;;  %v5853_v32 = vld [vmem:[%s8859_s1 + $0x58c] sm:$0xf]  ;;  %v5168_v55 = vor.u32 %v5877_v24, %v5165_v14  ;;  %v4909_v52 = vld [vmem:[%s8859_s1 + $0x458] sm:$0xf0] }
 0x1ab   :  { %v5402_v20 = vsel %vm3347_vm13, 1.0, %v8913_v22  ;;  %v2645_v8 = vadd.f32 %v2644_v35, %v2616_v46  ;;  %v5069_v35 = vld [vmem:[%s8859_s1 + $0x598] sm:$0xf0]  ;;  %v5901_v14 = vld [vmem:[%s8859_s1 + $0x70c] sm:$0xf] }
 0x1ac   :  { %v3350_v60 = vpack.c.bf16 %v5402_v20, %v5402_v20  ;;  %v3353_v43 = vsel %vm3347_vm13, %v5403_v59, %v3346_v34  ;;  %v5184_v59 = vor.u32 %v5881_v3, %v5181_v62  ;;  %v8931_v21 = vld [vmem:[#allocation13_spill] sm:$0xff]  ;;  %v5905_v3 = vld [vmem:[%s8859_s1 + $0x72c] sm:$0xf] }
 0x1ad   :  { %v2729_v0 = vpop.f32.mrf.mxu3  ;;  %v2674_v47 = vadd.f32 %v2673_v40, %v2645_v8  ;;  %v5913_v8 = vld [vmem:[%s8859_s1 + $0x76c] sm:$0xf]  ;;  %v5277_v62 = vld [vmem:[%s8859_s1 + $0x738] sm:$0xf0] }
 0x1ae   :  { %v2730_v9 = vadd.f32 %v2729_v0, %v2701_v51  ;;  %3351 = vst [vmem:[#allocation4 + $0x54] sm:$0xf] %v3350_v60  ;;  %v4928_v60 = vor.u32 %v5817_v50, %v4925_v26  ;;  %3144 = vmatpush.bf16.msrb.mxu2 %v5184_v59  ;;  %v5312_v31 = vor.u32 %v5913_v8, %v5309_v27  ;;  %v5849_v0 = vld [vmem:[%s8859_s1 + $0x56c] sm:$0xf]  ;;  %v5133_v27 = vld [vmem:[%s8859_s1 + $0x618] sm:$0xf0] }
 0x1af   :  { %v8284_v2 = vpop.f32.mrf.mxu1  ;;  %v5280_v59 = vor.u32 %v5905_v3, %v5277_v62  ;;  %v5841_v26 = vld [vmem:[%s8859_s1 + $0x52c] sm:$0xf]  ;;  %v8451_v3 = vld [vmem:[%s8861_s2] sm:$0xf] }
 0x1b0   :  { %v3355_v29 = vadd.f32 %v3353_v43, %v2730_v9  ;;  %3086 = vmatpush.bf16.msrb.mxu0 %v4928_v60  ;;  %3173 = vmatpush.bf16.msrb.mxu3 %v5312_v31  ;;  %v5056_v9 = vor.u32 %v5849_v0, %v5053_v15  ;;  %v5813_v43 = vld [vmem:[%s8859_s1 + $0x44c] sm:$0xf]  ;;  %v4877_v0 = vld [vmem:[%s8859_s1 + $0x418] sm:$0xf0]  ;;  %v8454_v62 = vperm.slane %v8451_v3, 2 }
 0x1b1   :  { %v2702_v7 = vpop.f32.mrf.mxu2  ;;  %v4912_v16 = vor.u32 %v5813_v43, %v4909_v52  ;;  %v5869_v60 = vld [vmem:[%s8859_s1 + $0x60c] sm:$0xf]  ;;  %v5261_v43 = vld [vmem:[%s8859_s1 + $0x718] sm:$0xf0] }
 0x1b2   :  { %v8273_v45 = vpop.f32.mrf.mxu0  ;;  %v2703_v17 = vadd.f32 %v2702_v7, %v2674_v47  ;;  %vm3356_vm14 = vcmp.ge.f32.partialorder %v3355_v29, 1.0  ;;  %v5405_v57 = vadd.f32 -1.0, %v3355_v29  ;;  %3003 = vmatmul.bf16.vlgmr.msra.gmra.mxu1 %v6424_v61  ;;  %3145 = vmatpush.bf16.msrb.mxu2 %v5168_v55  ;;  %v8930_v7 = vld [vmem:[#allocation12_spill] sm:$0xff]  ;;  %v5805_v31 = vld [vmem:[%s8859_s1 + $0x40c] sm:$0xf] }
 0x1b3   :  { %v5404_v1 = vsel %vm3356_vm14, 1.0, %v8913_v22  ;;  %v4880_v24 = vor.u32 %v5805_v31, %v4877_v0 }
 0x1b4   :  { %v3359_v12 = vpack.c.bf16 %v5404_v1, %v5404_v1  ;;  %v3362_v10 = vsel %vm3356_vm14, %v5405_v57, %v3355_v29  ;;  %v5293_v29 = vld [vmem:[%s8859_s1 + $0x758] sm:$0xf0]  ;;  %3087 = vmatpush.bf16.msrb.mxu0 %v4912_v16  ;;  %v8934_v16 = vld [vmem:[#allocation16_spill] sm:$0xff] }
 0x1b5   :  { %2974 = vmatmul.bf16.vlgmr.msra.gmra.mxu0 %v6418_v56  ;;  %v2731_v48 = vpop.f32.mrf.mxu3  ;;  %v5072_v56 = vor.u32 %v5853_v32, %v5069_v35  ;;  %v5296_v5 = vor.u32 %v5909_v23, %v5293_v29  ;;  %v5037_v57 = vld [vmem:[%s8859_s1 + $0x558] sm:$0xf0]  ;;  %v8932_v32 = vld [vmem:[#allocation14_spill] sm:$0xff]  ;;  %v5873_v35 = vld [vmem:[%s8859_s1 + $0x62c] sm:$0xf]  ;;  %v5264_v23 = vor.u32 %v5901_v14, %v5261_v43 }
 0x1b6   :  { %v2732_v34 = vadd.f32 %v2731_v48, %v2703_v17  ;;  %3360 = vst [vmem:[#allocation4 + $0x64] sm:$0xf] %v3359_v12  ;;  %3032 = vmatmul.bf16.vlgmr.msra.gmra.mxu2 %v6432_v4  ;;  %v8928_v4 = vld [vmem:[#allocation10_spill] sm:$0xff]  ;;  %v5845_v17 = vld [vmem:[%s8859_s1 + $0x54c] sm:$0xf] }
 0x1b7   :  { %v8300_v51 = vpop.f32.mrf.mxu1  ;;  %3114 = vmatpush.bf16.msrb.mxu1 %v5072_v56  ;;  %3174 = vmatpush.bf16.msrb.mxu3 %v5296_v5  ;;  %v5040_v1 = vor.u32 %v5845_v17, %v5037_v57  ;;  %v5809_v56 = vld [vmem:[%s8859_s1 + $0x42c] sm:$0xf]  ;;  %v8935_v17 = vld [vmem:[#allocation17_spill] sm:$0xff] }
 0x1b8   :  { %v3364_v40 = vadd.f32 %v3362_v10, %v2732_v34  ;;  %v5149_v10 = vld [vmem:[%s8859_s1 + $0x638] sm:$0xf0]  ;;  %v8933_v29 = vld [vmem:[#allocation15_spill] sm:$0xff] }
 0x1b9   :  { %v8298_v61 = vpop.f32.mrf.mxu2  ;;  %3061 = vmatmul.bf16.vlgmr.msra.gmra.mxu3 %v8928_v4  ;;  %v4893_v4 = vld [vmem:[%s8859_s1 + $0x438] sm:$0xf0]  ;;  %v5837_v5 = vld [vmem:[%s8859_s1 + $0x50c] sm:$0xf] }
 0x1ba   :  { %v8296_v46 = vpop.f32.mrf.mxu0  ;;  %vm3365_vm15 = vcmp.ge.f32.partialorder %v3364_v40, 1.0  ;;  %v5152_v40 = vor.u32 %v5873_v35, %v5149_v10  ;;  %v8936_v35 = vld [vmem:[#allocation18_spill] sm:$0xff] }
 0x1bb   :  { %v5406_v20 = vsel %vm3365_vm15, 1.0, %v8913_v22  ;;  %3115 = vmatpush.bf16.msrb.mxu1 %v5056_v9  ;;  %3175 = vmatpush.bf16.msrb.mxu3 %v5280_v59  ;;  %v5136_v9 = vor.u32 %v5869_v60, %v5133_v27  ;;  %v8938_v59 = vld [vmem:[#allocation20_spill] sm:$0xff]  ;;  %v8939_v60 = vld [vmem:[#allocation21_spill] sm:$0xff]  ;;  %v2746_v43 = vadd.f32 %v8296_v46, %v8454_v62 }
 0x1bc   :  { %v3368_v19 = vpack.c.bf16 %v5406_v20, %v5406_v20  ;;  %v4896_v20 = vor.u32 %v5809_v56, %v4893_v4  ;;  %3146 = vmatpush.bf16.msrb.mxu2 %v5152_v40 }
 0x1bd   :  { %v8322_v37 = vpop.f32.mrf.mxu3 }
 0x1be   :  { %3369 = vst [vmem:[#allocation4 + $0x74] sm:$0xf] %v3368_v19  ;;  %3088 = vmatpush.bf16.msrb.mxu0 %v4896_v20  ;;  %v5021_v19 = vld [vmem:[%s8859_s1 + $0x538] sm:$0xf0]  ;;  %v8937_v20 = vld [vmem:[#allocation19_spill] sm:$0xff] }
 0x1bf   :  { %v8352_v13 = vpop.f32.mrf.mxu1  ;;  %3116 = vmatpush.bf16.msrb.mxu1 %v5040_v1  ;;  %v5024_v8 = vor.u32 %v5841_v26, %v5021_v19  ;;  %3176 = vmatpush.bf16.msrb.mxu3 %v5264_v23  ;;  %v2744_v19 = vadd.f32 %v8273_v45, %v8454_v62 }
 0x1c0   :  { %3147 = vmatpush.bf16.msrb.mxu2 %v5136_v9  ;;  %v8940_v9 = vld [vmem:[#allocation22_spill] sm:$0xff] }
 0x1c1   :  { %v8350_v47 = vpop.f32.mrf.mxu2  ;;  %v2773_v0 = vadd.f32 %v8284_v2, %v2744_v19 }
 0x1c2   :  { %v8339_v58 = vpop.f32.mrf.mxu0  ;;  %3008 = vmatmul.bf16.gmra.mxu1 %v8930_v7  ;;  %3089 = vmatpush.bf16.msrb.mxu0 %v4880_v24 }
 0x1c3   :  { %3117 = vmatpush.bf16.msrb.mxu1 %v5024_v8  ;;  %v2802_v14 = vadd.f32 %v8298_v61, %v2773_v0  ;;  %v2749_v46 = vadd.f32 %v8339_v58, %v8454_v62  ;;  %v5954_v0 = vld [vmem:[%s8862_s3 + $0x30] sm:$0xff] }
 0x1c5   :  { %2979 = vmatmul.bf16.gmra.mxu0 %v8929_v33  ;;  %v8356_v11 = vpop.f32.mrf.mxu3  ;;  %v5005_v33 = vld [vmem:[%s8859_s1 + $0x518] sm:$0xf0] }
 0x1c6   :  { %3037 = vmatmul.bf16.gmra.mxu2 %v8931_v21  ;;  %v5008_v21 = vor.u32 %v5837_v5, %v5005_v33  ;;  %v8941_v5 = vld [vmem:[#allocation23_spill] sm:$0xff]  ;;  %v2775_v33 = vadd.f32 %v8300_v51, %v2746_v43  ;;  %v5955_v51 = vld [vmem:[%s8862_s3 + $0x38] sm:$0xff] }
 0x1c7   :  { %v8369_v34 = vpop.f32.mrf.mxu1  ;;  %3866 = vmatpush.bf16.msra.mxu0 %v5955_v51  ;;  %v5952_v51 = vld [vmem:[%s8862_s3 + $0x20] sm:$0xff] }
 0x1c8   :  { %3118 = vmatpush.bf16.msrb.mxu1 %v5008_v21  ;;  %v2804_v61 = vadd.f32 %v8350_v47, %v2775_v33  ;;  %v5971_v47 = vld [vmem:[%s8862_s3 + $0xb8] sm:$0xff]  ;;  %v5953_v33 = vld [vmem:[%s8862_s3 + $0x28] sm:$0xff] }
 0x1c9   :  { %v8367_v48 = vpop.f32.mrf.mxu2  ;;  %3066 = vmatmul.bf16.gmra.mxu3 %v8932_v32  ;;  %3924 = vmatpush.bf16.msra.mxu2 %v5971_v47 }
 0x1ca   :  { %v8365_v12 = vpop.f32.mrf.mxu0  ;;  %v2833_v58 = vadd.f32 %v8356_v11, %v2804_v61 }
 0x1cb   :  { %3867 = vmatpush.bf16.msra.mxu0 %v5954_v0 }
 0x1cd   :  { %v8390_v50 = vpop.f32.mrf.mxu3 }
 0x1cf   :  { %v8420_v52 = vpop.f32.mrf.mxu1  ;;  %3868 = vmatpush.bf16.msra.mxu0 %v5953_v33 }
 0x1d1   :  { %v8418_v55 = vpop.f32.mrf.mxu2 }
 0x1d2   :  { %v8410_v15 = vpop.f32.mrf.mxu0  ;;  %3013 = vmatmul.bf16.gmra.mxu1 %v8934_v16  ;;  %v2831_v16 = vadd.f32 %v8322_v37, %v2802_v14  ;;  %v2751_v14 = vadd.f32 %v8365_v12, %v8454_v62  ;;  %v5969_v12 = vld [vmem:[%s8862_s3 + $0xa8] sm:$0xff] }
 0x1d3   :  { %3869 = vmatpush.bf16.msra.mxu0 %v5952_v51 }
 0x1d5   :  { %2984 = vmatmul.bf16.gmra.mxu0 %v8933_v29  ;;  %v8430_v7 = vpop.f32.mrf.mxu3 }
 0x1d6   :  { %3042 = vmatmul.bf16.gmra.mxu2 %v8935_v17 }
 0x1d7   :  { %v8437_v32 = vpop.f32.mrf.mxu1 }
 0x1d9   :  { %v8435_v1 = vpop.f32.mrf.mxu2  ;;  %3071 = vmatmul.bf16.gmra.mxu3 %v8936_v35 }
 0x1da   :  { %v8433_v57 = vpop.f32.mrf.mxu0 }
 0x1db   :  { %v2756_v33 = vadd.f32 %v8433_v57, %v8454_v62 }
 0x1dd   :  { %v8440_v10 = vpop.f32.mrf.mxu3 }
 0x1df   :  { %v8446_v4 = vpop.f32.mrf.mxu1 }
 0x1e1   :  { %v8444_v40 = vpop.f32.mrf.mxu2 }
 0x1e2   :  { %v8442_v56 = vpop.f32.mrf.mxu0  ;;  %3018 = vmatmul.bf16.gmra.mxu1 %v8938_v59 }
 0x1e5   :  { %2989 = vmatmul.bf16.gmra.mxu0 %v8937_v20  ;;  %v8458_v26 = vpop.f32.mrf.mxu3 }
 0x1e6   :  { %3047 = vmatmul.bf16.gmra.mxu2 %v8939_v60 }
 0x1e7   :  { %v8467_v31 = vpop.f32.mrf.mxu1 }
 0x1e9   :  { %v8465_v27 = vpop.f32.mrf.mxu2  ;;  %3076 = vmatmul.bf16.gmra.mxu3 %v8940_v9  ;;  %v5962_v9 = vld [vmem:[%s8862_s3 + $0x70] sm:$0xff] }
 0x1ea   :  { %v8463_v8 = vpop.f32.mrf.mxu0 }
 0x1ed   :  { %v8471_v24 = vpop.f32.mrf.mxu3 }
 0x1ef   :  { %v2888_v29 = vpop.f32.mrf.mxu1 }
 0x1f1   :  { %v8476_v23 = vpop.f32.mrf.mxu2 }
 0x1f2   :  { %v2859_v45 = vpop.f32.mrf.mxu0  ;;  %3119 = vmatmul.bf16.vlgmr.msrb.gmra.mxu1 %v6818_v39  ;;  %v5963_v39 = vld [vmem:[%s8862_s3 + $0x78] sm:$0xff] }
 0x1f3   :  { %v2860_v2 = vadd.f32 %v2859_v45, %v2831_v16  ;;  %3895 = vmatpush.bf16.msra.mxu1 %v5963_v39 }
 0x1f5   :  { %3090 = vmatmul.bf16.vlgmr.msrb.gmra.mxu0 %v8941_v5  ;;  %v8482_v21 = vpop.f32.mrf.mxu3  ;;  %v2889_v17 = vadd.f32 %v2888_v29, %v2860_v2 }
 0x1f6   :  { %3148 = vmatmul.bf16.vlgmr.msrb.gmra.mxu2 %v6821_v44  ;;  %v2778_v44 = vadd.f32 %v8352_v13, %v2749_v46  ;;  %v5970_v13 = vld [vmem:[%s8862_s3 + $0xb0] sm:$0xff] }
 0x1f7   :  { %v2890_v37 = vpop.f32.mrf.mxu1  ;;  %3896 = vmatpush.bf16.msra.mxu1 %v5962_v9  ;;  %3925 = vmatpush.bf16.msra.mxu2 %v5970_v13 }
 0x1f9   :  { %v2917_v20 = vpop.f32.mrf.mxu2  ;;  %3177 = vmatmul.bf16.vlgmr.msrb.gmra.mxu3 %v6875_v38  ;;  %v2807_v38 = vadd.f32 %v8367_v48, %v2778_v44  ;;  %v5961_v48 = vld [vmem:[%s8862_s3 + $0x68] sm:$0xff] }
 0x1fa   :  { %v2861_v35 = vpop.f32.mrf.mxu0  ;;  %v2918_v59 = vadd.f32 %v2917_v20, %v2889_v17 }
 0x1fb   :  { %v2862_v19 = vadd.f32 %v2861_v35, %v2833_v58  ;;  %v2836_v2 = vadd.f32 %v8390_v50, %v2807_v38  ;;  %3897 = vmatpush.bf16.msra.mxu1 %v5961_v48  ;;  %v2780_v35 = vadd.f32 %v8369_v34, %v2751_v14  ;;  %3926 = vmatpush.bf16.msra.mxu2 %v5969_v12  ;;  %v5960_v50 = vld [vmem:[%s8862_s3 + $0x60] sm:$0xff] }
 0x1fd   :  { %v2946_v60 = vpop.f32.mrf.mxu3  ;;  %v2891_v43 = vadd.f32 %v2890_v37, %v2862_v19  ;;  %v2809_v34 = vadd.f32 %v8418_v55, %v2780_v35  ;;  %v5951_v55 = vld [vmem:[%s8862_s3 + $0x18] sm:$0xff]  ;;  %v5965_v35 = vld [vmem:[%s8862_s3 + $0x88] sm:$0xff] }
 0x1fe   :  { %v2947_v11 = vadd.f32 %v2946_v60, %v2918_v59  ;;  %3870 = vmatpush.bf16.msra.mxu0 %v5951_v55 }
 0x1ff   :  { %v2893_v5 = vpop.f32.mrf.mxu1  ;;  %3898 = vmatpush.bf16.msra.mxu1 %v5960_v50  ;;  %v2838_v0 = vadd.f32 %v8430_v7, %v2809_v34  ;;  %v2785_v50 = vadd.f32 %v8437_v32, %v2756_v33 }
 0x200   :  { %vm3372_vm0 = vcmp.ge.f32.partialorder %v2947_v11, 1.0  ;;  %v5408_v17 = vadd.f32 -1.0, %v2947_v11 }
 0x201   :  { %v5407_v29 = vsel %vm3372_vm0, 1.0, %v8913_v22  ;;  %v2919_v16 = vpop.f32.mrf.mxu2  ;;  %v2814_v32 = vadd.f32 %v8444_v40, %v2785_v50 }
 0x202   :  { %v2864_v45 = vpop.f32.mrf.mxu0  ;;  %v3375_v61 = vpack.c.bf16 %v5407_v29, %v5407_v29  ;;  %v2920_v46 = vadd.f32 %v2919_v16, %v2891_v43  ;;  %3124 = vmatmul.bf16.gmra.mxu1 %v6929_v42  ;;  %v2754_v42 = vadd.f32 %v8410_v15, %v8454_v62  ;;  %v3378_v47 = vsel %vm3372_vm0, %v5408_v17, %v2947_v11  ;;  %v5959_v15 = vld [vmem:[%s8862_s3 + $0x58] sm:$0xff]  ;;  %v5950_v29 = vld [vmem:[%s8862_s3 + $0x10] sm:$0xff]  ;;  %v5949_v17 = vld [vmem:[%s8862_s3 + $0x8] sm:$0xff] }
 0x203   :  { %v2865_v20 = vadd.f32 %v2864_v45, %v2836_v2  ;;  %3899 = vmatpush.bf16.msra.mxu1 %v5959_v15  ;;  %3871 = vmatpush.bf16.msra.mxu0 %v5950_v29  ;;  %v2843_v15 = vadd.f32 %v8458_v26, %v2814_v32  ;;  %v2761_v26 = vadd.f32 %v8463_v8, %v8454_v62 }
 0x204   :  { %3376 = vst [vmem:[#allocation4 + $0x8] sm:$0xf] %v3375_v61  ;;  %v2783_v9 = vadd.f32 %v8420_v52, %v2754_v42  ;;  %v5958_v52 = vld [vmem:[%s8862_s3 + $0x50] sm:$0xff] }
 0x205   :  { %3095 = vmatmul.bf16.gmra.mxu0 %v6915_v18  ;;  %v2948_v37 = vpop.f32.mrf.mxu3  ;;  %v5968_v18 = vld [vmem:[%s8862_s3 + $0xa0] sm:$0xff]  ;;  %v2894_v44 = vadd.f32 %v2893_v5, %v2865_v20 }
 0x206   :  { %v2949_v39 = vadd.f32 %v2948_v37, %v2920_v46  ;;  %3153 = vmatmul.bf16.gmra.mxu2 %v6950_v63  ;;  %v5967_v63 = vld [vmem:[%s8862_s3 + $0x98] sm:$0xff]  ;;  %v2812_v7 = vadd.f32 %v8435_v1, %v2783_v9  ;;  %v5957_v1 = vld [vmem:[%s8862_s3 + $0x48] sm:$0xff] }
 0x207   :  { %v2895_v60 = vpop.f32.mrf.mxu1  ;;  %3927 = vmatpush.bf16.msra.mxu2 %v5968_v18  ;;  %3900 = vmatpush.bf16.msra.mxu1 %v5958_v52 }
 0x208   :  { %v3380_v58 = vadd.f32 %v3378_v47, %v2949_v39  ;;  %v2841_v57 = vadd.f32 %v8440_v10, %v2812_v7  ;;  %3872 = vmatpush.bf16.msra.mxu0 %v5949_v17  ;;  %v5948_v10 = vld [vmem:[%s8862_s3] sm:$0xff] }
 0x209   :  { %v2922_v19 = vpop.f32.mrf.mxu2  ;;  %3182 = vmatmul.bf16.gmra.mxu3 %v6975_v28  ;;  %v5966_v28 = vld [vmem:[%s8862_s3 + $0x90] sm:$0xff]  ;;  %v5956_v39 = vld [vmem:[%s8862_s3 + $0x40] sm:$0xff] }
 0x20a   :  { %v2866_v59 = vpop.f32.mrf.mxu0  ;;  %v2923_v13 = vadd.f32 %v2922_v19, %v2894_v44  ;;  %vm3381_vm1 = vcmp.ge.f32.partialorder %v3380_v58, 1.0  ;;  %v5410_v11 = vadd.f32 -1.0, %v3380_v58 }
 0x20b   :  { %v5409_v38 = vsel %vm3381_vm1, 1.0, %v8913_v22  ;;  %v2867_v43 = vadd.f32 %v2866_v59, %v2838_v0  ;;  %3928 = vmatpush.bf16.msra.mxu2 %v5967_v63  ;;  %3901 = vmatpush.bf16.msra.mxu1 %v5957_v1 }
 0x20c   :  { %v3384_v14 = vpack.c.bf16 %v5409_v38, %v5409_v38  ;;  %v3387_v5 = vsel %vm3381_vm1, %v5410_v11, %v3380_v58  ;;  %3873 = vmatpush.bf16.msra.mxu0 %v5948_v10 }
 0x20d   :  { %v2951_v45 = vpop.f32.mrf.mxu3  ;;  %v2896_v12 = vadd.f32 %v2895_v60, %v2867_v43 }
 0x20e   :  { %v2952_v16 = vadd.f32 %v2951_v45, %v2923_v13  ;;  %3385 = vst [vmem:[#allocation4 + $0x18] sm:$0xf] %v3384_v14 }
 0x20f   :  { %v2898_v46 = vpop.f32.mrf.mxu1  ;;  %3929 = vmatpush.bf16.msra.mxu2 %v5966_v28  ;;  %3902 = vmatpush.bf16.msra.mxu1 %v5956_v39  ;;  %v5932_v39 = vld [vmem:[#allocation4 + $0x4] sm:$0xf] }
 0x210   :  { %v3389_v48 = vadd.f32 %v3387_v5, %v2952_v16 }
 0x211   :  { %v2924_v61 = vpop.f32.mrf.mxu2 }
 0x212   :  { %v2869_v2 = vpop.f32.mrf.mxu0  ;;  %v2925_v20 = vadd.f32 %v2924_v61, %v2896_v12  ;;  %vm3390_vm2 = vcmp.ge.f32.partialorder %v3389_v48, 1.0  ;;  %v5412_v37 = vadd.f32 -1.0, %v3389_v48  ;;  %3129 = vmatmul.bf16.gmra.mxu1 %v7028_v25  ;;  %v2759_v25 = vadd.f32 %v8442_v56, %v8454_v62 }
 0x213   :  { %v5411_v51 = vsel %vm3390_vm2, 1.0, %v8913_v22  ;;  %v2870_v34 = vadd.f32 %v2869_v2, %v2841_v57  ;;  %3930 = vmatpush.bf16.msra.mxu2 %v5965_v35 }
 0x214   :  { %v3393_v18 = vpack.c.bf16 %v5411_v51, %v5411_v51  ;;  %v3396_v58 = vsel %vm3390_vm2, %v5412_v37, %v3389_v48  ;;  %v2788_v40 = vadd.f32 %v8446_v4, %v2759_v25  ;;  %v5441_v51 = vld [vmem:[#allocation4 + $0x10] sm:$0xf0] }
 0x215   :  { %3100 = vmatmul.bf16.gmra.mxu0 %v7022_v41  ;;  %v2953_v42 = vpop.f32.mrf.mxu3  ;;  %v5964_v41 = vld [vmem:[%s8862_s3 + $0x80] sm:$0xff]  ;;  %v2899_v59 = vadd.f32 %v2898_v46, %v2870_v34  ;;  %v5444_v25 = vor.u32 %v5932_v39, %v5441_v51 }
 0x216   :  { %v2954_v47 = vadd.f32 %v2953_v42, %v2925_v20  ;;  %3394 = vst [vmem:[#allocation4 + $0x28] sm:$0xf] %v3393_v18  ;;  %3158 = vmatmul.bf16.gmra.mxu2 %v7048_v6  ;;  %v2817_v38 = vadd.f32 %v8465_v27, %v2788_v40  ;;  %v2790_v27 = vadd.f32 %v8467_v31, %v2761_v26  ;;  %v5457_v26 = vld [vmem:[#allocation4 + $0x30] sm:$0xf0] }
 0x217   :  { %v2900_v55 = vpop.f32.mrf.mxu1  ;;  %3931 = vmatpush.bf16.msra.mxu2 %v5964_v41  ;;  %v5935_v41 = vld [vmem:[#allocation4 + $0x14] sm:$0xf0] }
 0x218   :  { %v3398_v44 = vadd.f32 %v3396_v58, %v2954_v47  ;;  %v2846_v52 = vadd.f32 %v8471_v24, %v2817_v38  ;;  %v2819_v8 = vadd.f32 %v8476_v23, %v2790_v27 }
 0x219   :  { %v2927_v60 = vpop.f32.mrf.mxu2  ;;  %3187 = vmatmul.bf16.gmra.mxu3 %v7070_v49 }
 0x21a   :  { %v2871_v19 = vpop.f32.mrf.mxu0  ;;  %v2928_v56 = vadd.f32 %v2927_v60, %v2899_v59  ;;  %vm3399_vm3 = vcmp.ge.f32.partialorder %v3398_v44, 1.0  ;;  %v5414_v63 = vadd.f32 -1.0, %v3398_v44 }
 0x21b   :  { %v5413_v6 = vsel %vm3399_vm3, 1.0, %v8913_v22  ;;  %v2872_v9 = vadd.f32 %v2871_v19, %v2843_v15  ;;  %v5979_v15 = vld [vmem:[%s8862_s3 + $0xf8] sm:$0xff] }
 0x21c   :  { %v3402_v0 = vpack.c.bf16 %v5413_v6, %v5413_v6  ;;  %v3405_v14 = vsel %vm3399_vm3, %v5414_v63, %v3398_v44  ;;  %v5447_v44 = vld [vmem:[#allocation4 + $0x8] sm:$0xf]  ;;  %3953 = vmatpush.bf16.msra.mxu3 %v5979_v15  ;;  %v5974_v15 = vld [vmem:[%s8862_s3 + $0xd0] sm:$0xff] }
 0x21d   :  { %v2956_v13 = vpop.f32.mrf.mxu3  ;;  %v2901_v4 = vadd.f32 %v2900_v55, %v2872_v9  ;;  %v5448_v19 = vor.u32 %v5935_v41, %v5447_v44  ;;  %v5487_v41 = vld [vmem:[#allocation4 + $0x60] sm:$0xf] }
 0x21e   :  { %v2957_v11 = vadd.f32 %v2956_v13, %v2928_v56  ;;  %3403 = vst [vmem:[#allocation4 + $0x38] sm:$0xf] %v3402_v0 }
 0x21f   :  { %v2903_v29 = vpop.f32.mrf.mxu1 }
 0x220   :  { %v3407_v43 = vadd.f32 %v3405_v14, %v2957_v11  ;;  %v5938_v11 = vld [vmem:[#allocation4 + $0x2c] sm:$0xf0] }
 0x221   :  { %v2929_v49 = vpop.f32.mrf.mxu2  ;;  %v5978_v14 = vld [vmem:[%s8862_s3 + $0xf0] sm:$0xff] }
 0x222   :  { %v2874_v45 = vpop.f32.mrf.mxu0  ;;  %v2930_v28 = vadd.f32 %v2929_v49, %v2901_v4  ;;  %vm3408_vm4 = vcmp.ge.f32.partialorder %v3407_v43, 1.0  ;;  %v5416_v7 = vadd.f32 -1.0, %v3407_v43  ;;  %3134 = vmatmul.bf16.gmra.mxu1 %v7130_v30  ;;  %v5455_v4 = vld [vmem:[#allocation4 + $0x20] sm:$0xf]  ;;  %3954 = vmatpush.bf16.msra.mxu3 %v5978_v14  ;;  %v5973_v14 = vld [vmem:[%s8862_s3 + $0xc8] sm:$0xff] }
 0x223   :  { %v5415_v16 = vsel %vm3408_vm4, 1.0, %v8913_v22  ;;  %v2875_v33 = vadd.f32 %v2874_v45, %v2846_v52  ;;  %v5936_v52 = vld [vmem:[#allocation4 + $0x24] sm:$0xf] }
 0x224   :  { %v3411_v5 = vpack.c.bf16 %v5415_v16, %v5415_v16  ;;  %v3414_v24 = vsel %vm3408_vm4, %v5416_v7, %v3407_v43  ;;  %v5460_v7 = vor.u32 %v5936_v52, %v5457_v26  ;;  %v5463_v16 = vld [vmem:[#allocation4 + $0x28] sm:$0xf] }
 0x225   :  { %3105 = vmatmul.bf16.gmra.mxu0 %v7119_v36  ;;  %v2958_v62 = vpop.f32.mrf.mxu3  ;;  %v2904_v2 = vadd.f32 %v2903_v29, %v2875_v33  ;;  %v2848_v36 = vadd.f32 %v8482_v21, %v2819_v8  ;;  %v5439_v21 = vld [vmem:[#allocation4] sm:$0xf]  ;;  %v5456_v29 = vor.u32 %v5938_v11, %v5455_v4  ;;  %v5977_v33 = vld [vmem:[%s8862_s3 + $0xe8] sm:$0xff] }
 0x226   :  { %v2959_v48 = vadd.f32 %v2958_v62, %v2930_v28  ;;  %3412 = vst [vmem:[#allocation4 + $0x48] sm:$0xf] %v3411_v5  ;;  %3163 = vmatmul.bf16.gmra.mxu2 %v7141_v54  ;;  %v5934_v54 = vld [vmem:[#allocation4 + $0xc] sm:$0xf0]  ;;  %v5939_v28 = vld [vmem:[#allocation4 + $0x34] sm:$0xf0]  ;;  %3955 = vmatpush.bf16.msra.mxu3 %v5977_v33 }
 0x227   :  { %v2905_v17 = vpop.f32.mrf.mxu1  ;;  %v5440_v10 = vor.u32 %v5934_v54, %v5439_v21  ;;  %v5464_v27 = vor.u32 %v5939_v28, %v5463_v16 }
 0x228   :  { %v3416_v12 = vadd.f32 %v3414_v24, %v2959_v48 }
 0x229   :  { %v2932_v46 = vpop.f32.mrf.mxu2  ;;  %3192 = vmatmul.bf16.gmra.mxu3 %v7146_v53 }
 0x22a   :  { %v2876_v61 = vpop.f32.mrf.mxu0  ;;  %v2933_v31 = vadd.f32 %v2932_v46, %v2904_v2  ;;  %vm3417_vm5 = vcmp.ge.f32.partialorder %v3416_v12, 1.0  ;;  %v5418_v1 = vadd.f32 -1.0, %v3416_v12  ;;  %v5976_v2 = vld [vmem:[%s8862_s3 + $0xe0] sm:$0xff] }
 0x22b   :  { %v5417_v30 = vsel %vm3417_vm5, 1.0, %v8913_v22  ;;  %v2877_v35 = vadd.f32 %v2876_v61, %v2848_v36  ;;  %v5473_v61 = vld [vmem:[#allocation4 + $0x50] sm:$0xf0]  ;;  %3956 = vmatpush.bf16.msra.mxu3 %v5976_v2 }
 0x22c   :  { %v3420_v23 = vpack.c.bf16 %v5417_v30, %v5417_v30  ;;  %v3423_v37 = vsel %vm3417_vm5, %v5418_v1, %v3416_v12  ;;  %v5942_v12 = vld [vmem:[#allocation4 + $0x4c] sm:$0xf0]  ;;  %v5940_v1 = vld [vmem:[#allocation4 + $0x44] sm:$0xf] }
 0x22d   :  { %v2961_v57 = vpop.f32.mrf.mxu3  ;;  %v2906_v18 = vadd.f32 %v2905_v17, %v2877_v35  ;;  %v5471_v17 = vld [vmem:[#allocation4 + $0x40] sm:$0xf]  ;;  %v5476_v35 = vor.u32 %v5940_v1, %v5473_v61 }
 0x22e   :  { %v2962_v20 = vadd.f32 %v2961_v57, %v2933_v31  ;;  %3421 = vst [vmem:[#allocation4 + $0x58] sm:$0xf] %v3420_v23  ;;  %v5472_v30 = vor.u32 %v5942_v12, %v5471_v17  ;;  %v5479_v57 = vld [vmem:[#allocation4 + $0x48] sm:$0xf] }
 0x22f   :  { %v8614_v53 = vpop.f32.mrf.mxu1 }
 0x230   :  { %v3425_v50 = vadd.f32 %v3423_v37, %v2962_v20  ;;  %v5975_v37 = vld [vmem:[%s8862_s3 + $0xd8] sm:$0xff] }
 0x231   :  { %v2934_v42 = vpop.f32.mrf.mxu2  ;;  %3957 = vmatpush.bf16.msra.mxu3 %v5975_v37 }
 0x232   :  { %v8612_v34 = vpop.f32.mrf.mxu0  ;;  %v2935_v32 = vadd.f32 %v2934_v42, %v2906_v18  ;;  %vm3426_vm6 = vcmp.ge.f32.partialorder %v3425_v50, 1.0  ;;  %v5420_v47 = vadd.f32 -1.0, %v3425_v50  ;;  %3903 = vmatmul.bf16.vlgmr.msra.gmra.mxu1 %v5444_v25  ;;  %v5946_v42 = vld [vmem:[#allocation4 + $0x6c] sm:$0xf0] }
 0x233   :  { %v5419_v58 = vsel %vm3426_vm6, 1.0, %v8913_v22 }
 0x234   :  { %v3429_v59 = vpack.c.bf16 %v5419_v58, %v5419_v58  ;;  %v3432_v40 = vsel %vm3426_vm6, %v5420_v47, %v3425_v50  ;;  %v5488_v47 = vor.u32 %v5946_v42, %v5487_v41  ;;  %v5944_v58 = vld [vmem:[#allocation4 + $0x64] sm:$0xf] }
 0x235   :  { %3874 = vmatmul.bf16.vlgmr.msra.gmra.mxu0 %v5440_v10  ;;  %v2963_v60 = vpop.f32.mrf.mxu3  ;;  %v5943_v23 = vld [vmem:[#allocation4 + $0x54] sm:$0xf0]  ;;  %v5489_v10 = vld [vmem:[#allocation4 + $0x70] sm:$0xf0]  ;;  %3958 = vmatpush.bf16.msra.mxu3 %v5974_v15 }
 0x236   :  { %v2964_v55 = vadd.f32 %v2963_v60, %v2935_v32  ;;  %3430 = vst [vmem:[#allocation4 + $0x68] sm:$0xf] %v3429_v59  ;;  %3932 = vmatmul.bf16.vlgmr.msra.gmra.mxu2 %v5448_v19  ;;  %v5480_v20 = vor.u32 %v5943_v23, %v5479_v57  ;;  %v8680_v59 = vperm.slane %v8451_v3, 3  ;;  %v5492_v19 = vor.u32 %v5944_v58, %v5489_v10 }
 0x237   :  { %v8624_v0 = vpop.f32.mrf.mxu1 }
 0x238   :  { %v3434_v56 = vadd.f32 %v3432_v40, %v2964_v55 }
 0x239   :  { %v8622_v63 = vpop.f32.mrf.mxu2  ;;  %3959 = vmatpush.bf16.msra.mxu3 %v5973_v14 }
 0x23a   :  { %v8620_v6 = vpop.f32.mrf.mxu0  ;;  %vm3435_vm7 = vcmp.ge.f32.partialorder %v3434_v56, 1.0  ;;  %v2976_v56 = vadd.f32 %v8612_v34, %v8680_v59 }
 0x23b   :  { %v5421_v9 = vsel %vm3435_vm7, 1.0, %v8913_v22  ;;  %v2978_v34 = vadd.f32 %v8620_v6, %v8680_v59 }
 0x23c   :  { %v3438_v13 = vpack.c.bf16 %v5421_v9, %v5421_v9  ;;  %v3005_v11 = vadd.f32 %v8614_v53, %v2976_v56  ;;  %v5972_v53 = vld [vmem:[%s8862_s3 + $0xc0] sm:$0xff] }
 0x23d   :  { %v8627_v38 = vpop.f32.mrf.mxu3  ;;  %v5495_v60 = vld [vmem:[#allocation4 + $0x68] sm:$0xf]  ;;  %v3007_v16 = vadd.f32 %v8624_v0, %v2978_v34  ;;  %3960 = vmatpush.bf16.msra.mxu3 %v5972_v53 }
 0x23e   :  { %3439 = vst [vmem:[#allocation4 + $0x78] sm:$0xf] %v3438_v13  ;;  %v3034_v4 = vadd.f32 %v8622_v63, %v3005_v11 }
 0x23f   :  { %v8636_v49 = vpop.f32.mrf.mxu1 }
 0x241   :  { %v8634_v45 = vpop.f32.mrf.mxu2 }
 0x242   :  { %v8632_v43 = vpop.f32.mrf.mxu0  ;;  %3908 = vmatmul.bf16.gmra.mxu1 %v5460_v7  ;;  %v3063_v7 = vadd.f32 %v8627_v38, %v3034_v4  ;;  %v3036_v63 = vadd.f32 %v8634_v45, %v3007_v16 }
 0x243   :  { %v2981_v6 = vadd.f32 %v8632_v43, %v8680_v59 }
 0x245   :  { %3879 = vmatmul.bf16.gmra.mxu0 %v5456_v29  ;;  %v8638_v5 = vpop.f32.mrf.mxu3  ;;  %v5947_v44 = vld [vmem:[#allocation4 + $0x74] sm:$0xf0] }
 0x246   :  { %3937 = vmatmul.bf16.gmra.mxu2 %v5464_v27  ;;  %v5496_v55 = vor.u32 %v5947_v44, %v5495_v60  ;;  %v3065_v38 = vadd.f32 %v8638_v5, %v3036_v63 }
 0x247   :  { %v8647_v48 = vpop.f32.mrf.mxu1 }
 0x249   :  { %v8645_v8 = vpop.f32.mrf.mxu2 }
 0x24a   :  { %v8643_v62 = vpop.f32.mrf.mxu0 }
 0x24b   :  { %v2983_v45 = vadd.f32 %v8643_v62, %v8680_v59 }
 0x24d   :  { %v8649_v24 = vpop.f32.mrf.mxu3  ;;  %v3012_v58 = vadd.f32 %v8647_v48, %v2983_v45 }
 0x24f   :  { %v8658_v31 = vpop.f32.mrf.mxu1 }
 0x251   :  { %v8656_v36 = vpop.f32.mrf.mxu2 }
 0x252   :  { %v8654_v46 = vpop.f32.mrf.mxu0  ;;  %3913 = vmatmul.bf16.gmra.mxu1 %v5476_v35  ;;  %v3041_v62 = vadd.f32 %v8656_v36, %v3012_v58 }
 0x255   :  { %3884 = vmatmul.bf16.gmra.mxu0 %v5472_v30  ;;  %v8660_v54 = vpop.f32.mrf.mxu3  ;;  %v3010_v30 = vadd.f32 %v8636_v49, %v2981_v6 }
 0x256   :  { %3942 = vmatmul.bf16.gmra.mxu2 %v5480_v20  ;;  %v3070_v4 = vadd.f32 %v8660_v54, %v3041_v62 }
 0x257   :  { %v8669_v18 = vpop.f32.mrf.mxu1  ;;  %v3039_v35 = vadd.f32 %v8645_v8, %v3010_v30 }
 0x259   :  { %v8667_v50 = vpop.f32.mrf.mxu2  ;;  %v3068_v5 = vadd.f32 %v8649_v24, %v3039_v35 }
 0x25a   :  { %v8665_v51 = vpop.f32.mrf.mxu0 }
 0x25b   :  { %v2988_v63 = vadd.f32 %v8665_v51, %v8680_v59 }
 0x25d   :  { %v8671_v21 = vpop.f32.mrf.mxu3 }
 0x25f   :  { %v8677_v25 = vpop.f32.mrf.mxu1 }
 0x261   :  { %v8675_v32 = vpop.f32.mrf.mxu2 }
 0x262   :  { %v8673_v39 = vpop.f32.mrf.mxu0  ;;  %3918 = vmatmul.bf16.gmra.mxu1 %v5492_v19  ;;  %v2986_v19 = vadd.f32 %v8654_v46, %v8680_v59 }
 0x263   :  { %v2991_v45 = vadd.f32 %v8673_v39, %v8680_v59 }
 0x264   :  { %v3015_v48 = vadd.f32 %v8658_v31, %v2986_v19 }
 0x265   :  { %3889 = vmatmul.bf16.gmra.mxu0 %v5488_v47  ;;  %v8685_v40 = vpop.f32.mrf.mxu3 }
 0x266   :  { %3947 = vmatmul.bf16.gmra.mxu2 %v5496_v55  ;;  %v3044_v53 = vadd.f32 %v8667_v50, %v3015_v48  ;;  %v3017_v50 = vadd.f32 %v8669_v18, %v2988_v63 }
 0x267   :  { %v8693_v13 = vpop.f32.mrf.mxu1 }
 0x268   :  { %v3046_v51 = vadd.f32 %v8675_v32, %v3017_v50 }
 0x269   :  { %v8691_v3 = vpop.f32.mrf.mxu2 }
 0x26a   :  { %v8689_v9 = vpop.f32.mrf.mxu0  ;;  %v3075_v18 = vadd.f32 %v8685_v40, %v3046_v51 }
 0x26d   :  { %v8699_v26 = vpop.f32.mrf.mxu3 }
 0x26f   :  { %v3120_v28 = vpop.f32.mrf.mxu1 }
 0x271   :  { %v8704_v52 = vpop.f32.mrf.mxu2 }
 0x272   :  { %v3091_v29 = vpop.f32.mrf.mxu0 }
 0x273   :  { %v3092_v27 = vadd.f32 %v3091_v29, %v3063_v7 }
 0x275   :  { %v8711_v33 = vpop.f32.mrf.mxu3  ;;  %v3121_v12 = vadd.f32 %v3120_v28, %v3092_v27 }
 0x277   :  { %v3122_v17 = vpop.f32.mrf.mxu1 }
 0x279   :  { %v3149_v61 = vpop.f32.mrf.mxu2 }
 0x27a   :  { %v3093_v2 = vpop.f32.mrf.mxu0  ;;  %v3150_v1 = vadd.f32 %v3149_v61, %v3121_v12  ;;  %v3073_v61 = vadd.f32 %v8671_v21, %v3044_v53 }
 0x27b   :  { %v3094_v23 = vadd.f32 %v3093_v2, %v3065_v38 }
 0x27d   :  { %v3178_v0 = vpop.f32.mrf.mxu3  ;;  %v3123_v20 = vadd.f32 %v3122_v17, %v3094_v23 }
 0x27e   :  { %v3179_v57 = vadd.f32 %v3178_v0, %v3150_v1 }
 0x27f   :  { %v3125_v10 = vpop.f32.mrf.mxu1 }
 0x280   :  { %vm3442_vm8 = vcmp.ge.f32.partialorder %v3179_v57, 1.0  ;;  %v5423_v47 = vadd.f32 -1.0, %v3179_v57 }
 0x281   :  { %v5422_v37 = vsel %vm3442_vm8, 1.0, %v8913_v22  ;;  %v3151_v42 = vpop.f32.mrf.mxu2 }
 0x282   :  { %v3096_v43 = vpop.f32.mrf.mxu0  ;;  %v3445_v49 = vpack.c.bf16 %v5422_v37, %v5422_v37  ;;  %v3152_v41 = vadd.f32 %v3151_v42, %v3123_v20  ;;  %v3448_v55 = vsel %vm3442_vm8, %v5423_v47, %v3179_v57 }
 0x283   :  { %v3097_v8 = vadd.f32 %v3096_v43, %v3068_v5 }
 0x284   :  { %3446 = vst [vmem:[#allocation4 + $0xc] sm:$0xf] %v3445_v49  ;;  %v3020_v49 = vadd.f32 %v8677_v25, %v2991_v45 }
 0x285   :  { %v3180_v44 = vpop.f32.mrf.mxu3  ;;  %v3126_v56 = vadd.f32 %v3125_v10, %v3097_v8 }
 0x286   :  { %v3181_v60 = vadd.f32 %v3180_v44, %v3152_v41  ;;  %v3049_v62 = vadd.f32 %v8691_v3, %v3020_v49 }
 0x287   :  { %v3127_v14 = vpop.f32.mrf.mxu1 }
 0x288   :  { %v3450_v15 = vadd.f32 %v3448_v55, %v3181_v60  ;;  %v2993_v55 = vadd.f32 %v8689_v9, %v8680_v59 }
 0x289   :  { %v3154_v24 = vpop.f32.mrf.mxu2 }
 0x28a   :  { %v3098_v11 = vpop.f32.mrf.mxu0  ;;  %v3155_v34 = vadd.f32 %v3154_v24, %v3126_v56  ;;  %vm3451_vm9 = vcmp.ge.f32.partialorder %v3450_v15, 1.0  ;;  %v5425_v29 = vadd.f32 -1.0, %v3450_v15  ;;  %v3022_v48 = vadd.f32 %v8693_v13, %v2993_v55  ;;  %v8776_v55 = vld [vmem:[%s8863_s4] ss:$0 sm:$0xff] }
 0x28b   :  { %v5424_v36 = vsel %vm3451_vm9, 1.0, %v8913_v22  ;;  %v3099_v7 = vadd.f32 %v3098_v11, %v3070_v4  ;;  %v5933_v35 = vld [vmem:[#allocation4 + $0xc] sm:$0xf]  ;;  %v3078_v11 = vadd.f32 %v8699_v26, %v3049_v62 }
 0x28c   :  { %v3454_v28 = vpack.c.bf16 %v5424_v36, %v5424_v36  ;;  %v3457_v27 = vsel %vm3451_vm9, %v5425_v29, %v3450_v15  ;;  %v3051_v59 = vadd.f32 %v8704_v52, %v3022_v48 }
 0x28d   :  { %v3183_v46 = vpop.f32.mrf.mxu3  ;;  %v3128_v54 = vadd.f32 %v3127_v14, %v3099_v7 }
 0x28e   :  { %v3184_v16 = vadd.f32 %v3183_v46, %v3155_v34  ;;  %3455 = vst [vmem:[#allocation4 + $0x1c] sm:$0xf] %v3454_v28 }
 0x28f   :  { %v3130_v2 = vpop.f32.mrf.mxu1 }
 0x290   :  { %v3459_v6 = vadd.f32 %v3457_v27, %v3184_v16 }
 0x291   :  { %v3156_v31 = vpop.f32.mrf.mxu2 }
 0x292   :  { %v3101_v12 = vpop.f32.mrf.mxu0  ;;  %v3157_v17 = vadd.f32 %v3156_v31, %v3128_v54  ;;  %vm3460_vm10 = vcmp.ge.f32.partialorder %v3459_v6, 1.0  ;;  %v5427_v38 = vadd.f32 -1.0, %v3459_v6 }
 0x293   :  { %v5426_v30 = vsel %vm3460_vm10, 1.0, %v8913_v22  ;;  %v3102_v23 = vadd.f32 %v3101_v12, %v3073_v61 }
 0x294   :  { %v3463_v1 = vpack.c.bf16 %v5426_v30, %v5426_v30  ;;  %v3466_v43 = vsel %vm3460_vm10, %v5427_v38, %v3459_v6  ;;  %v3080_v6 = vadd.f32 %v8711_v33, %v3051_v59  ;;  %v4062_v59 = vld [vmem:[%s8865_s5 + $0x30] sm:$0xff] }
 0x295   :  { %v3185_v0 = vpop.f32.mrf.mxu3  ;;  %v5449_v57 = vld [vmem:[#allocation4 + $0x18] sm:$0xf0]  ;;  %v3131_v42 = vadd.f32 %v3130_v2, %v3102_v23 }
 0x296   :  { %v3186_v20 = vadd.f32 %v3185_v0, %v3157_v17  ;;  %3464 = vst [vmem:[#allocation4 + $0x2c] sm:$0xf] %v3463_v1  ;;  %v5452_v21 = vor.u32 %v5933_v35, %v5449_v57 }
 0x297   :  { %v3132_v58 = vpop.f32.mrf.mxu1 }
 0x298   :  { %v3468_v37 = vadd.f32 %v3466_v43, %v3186_v20  ;;  %3961 = vmatmul.bf16.vlgmr.msra.gmra.mxu3 %v5452_v21 }
 0x299   :  { %v3159_v5 = vpop.f32.mrf.mxu2 }
 0x29a   :  { %v3103_v10 = vpop.f32.mrf.mxu0  ;;  %v3160_v41 = vadd.f32 %v3159_v5, %v3131_v42  ;;  %vm3469_vm11 = vcmp.ge.f32.partialorder %v3468_v37, 1.0  ;;  %v5429_v47 = vadd.f32 -1.0, %v3468_v37 }
 0x29b   :  { %v5428_v32 = vsel %vm3469_vm11, 1.0, %v8913_v22  ;;  %v3104_v8 = vadd.f32 %v3103_v10, %v3075_v18 }
 0x29c   :  { %v3472_v39 = vpack.c.bf16 %v5428_v32, %v5428_v32  ;;  %v3475_v60 = vsel %vm3469_vm11, %v5429_v47, %v3468_v37  ;;  %v4070_v47 = vld [vmem:[%s8865_s5 + $0x70] sm:$0xff] }
 0x29d   :  { %v3188_v44 = vpop.f32.mrf.mxu3  ;;  %v3133_v15 = vadd.f32 %v3132_v58, %v3104_v8  ;;  %v5937_v28 = vld [vmem:[#allocation4 + $0x2c] sm:$0xf]  ;;  %v4068_v8 = vld [vmem:[%s8865_s5 + $0x60] sm:$0xff] }
 0x29e   :  { %v3189_v19 = vadd.f32 %v3188_v44, %v3160_v41  ;;  %3473 = vst [vmem:[#allocation4 + $0x3c] sm:$0xf] %v3472_v39  ;;  %v4071_v41 = vld [vmem:[%s8865_s5 + $0x78] sm:$0xff]  ;;  %v4069_v39 = vld [vmem:[%s8865_s5 + $0x68] sm:$0xff] }
 0x29f   :  { %v3135_v36 = vpop.f32.mrf.mxu1  ;;  %4076 = vmatpush.msrb.mxu0 %v4071_v41 }
 0x2a0   :  { %v3477_v40 = vadd.f32 %v3475_v60, %v3189_v19  ;;  %v4067_v19 = vld [vmem:[%s8865_s5 + $0x58] sm:$0xff]  ;;  %v4066_v60 = vld [vmem:[%s8865_s5 + $0x50] sm:$0xff] }
 0x2a1   :  { %v3161_v56 = vpop.f32.mrf.mxu2  ;;  %4077 = vmatpush.msrb.mxu0 %v4070_v47 }
 0x2a2   :  { %v3106_v25 = vpop.f32.mrf.mxu0  ;;  %v3162_v24 = vadd.f32 %v3161_v56, %v3133_v15  ;;  %vm3478_vm12 = vcmp.ge.f32.partialorder %v3477_v40, 1.0  ;;  %v5431_v14 = vadd.f32 -1.0, %v3477_v40 }
 0x2a3   :  { %v5430_v4 = vsel %vm3478_vm12, 1.0, %v8913_v22  ;;  %v3107_v34 = vadd.f32 %v3106_v25, %v3078_v11  ;;  %4078 = vmatpush.msrb.mxu0 %v4069_v39  ;;  %v4065_v11 = vld [vmem:[%s8865_s5 + $0x48] sm:$0xff] }
 0x2a4   :  { %v3481_v3 = vpack.c.bf16 %v5430_v4, %v5430_v4  ;;  %v3484_v53 = vsel %vm3478_vm12, %v5431_v14, %v3477_v40 }
 0x2a5   :  { %v3190_v29 = vpop.f32.mrf.mxu3  ;;  %v5465_v7 = vld [vmem:[#allocation4 + $0x38] sm:$0xf0]  ;;  %v3136_v16 = vadd.f32 %v3135_v36, %v3107_v34  ;;  %4079 = vmatpush.msrb.mxu0 %v4068_v8 }
 0x2a6   :  { %v3191_v9 = vadd.f32 %v3190_v29, %v3162_v24  ;;  %3482 = vst [vmem:[#allocation4 + $0x4c] sm:$0xf] %v3481_v3  ;;  %v5468_v46 = vor.u32 %v5937_v28, %v5465_v7  ;;  %v4064_v24 = vld [vmem:[%s8865_s5 + $0x40] sm:$0xff]  ;;  %v4063_v7 = vld [vmem:[%s8865_s5 + $0x38] sm:$0xff] }
 0x2a7   :  { %v3137_v38 = vpop.f32.mrf.mxu1  ;;  %4080 = vmatpush.msrb.mxu0 %v4067_v19 }
 0x2a8   :  { %v3486_v26 = vadd.f32 %v3484_v53, %v3191_v9  ;;  %3966 = vmatmul.bf16.gmra.mxu3 %v5468_v46 }
 0x2a9   :  { %v3164_v27 = vpop.f32.mrf.mxu2  ;;  %4081 = vmatpush.msrb.mxu0 %v4066_v60  ;;  %v4056_v60 = vld [vmem:[%s8865_s5] sm:$0xff] }
 0x2aa   :  { %v3108_v63 = vpop.f32.mrf.mxu0  ;;  %v3165_v13 = vadd.f32 %v3164_v27, %v3136_v16  ;;  %vm3487_vm13 = vcmp.ge.f32.partialorder %v3486_v26, 1.0  ;;  %v5433_v54 = vadd.f32 -1.0, %v3486_v26 }
 0x2ab   :  { %v5432_v12 = vsel %vm3487_vm13, 1.0, %v8913_v22  ;;  %v3109_v2 = vadd.f32 %v3108_v63, %v3080_v6  ;;  %4082 = vmatpush.msrb.mxu0 %v4065_v11 }
 0x2ac   :  { %v3490_v31 = vpack.c.bf16 %v5432_v12, %v5432_v12  ;;  %v3493_v17 = vsel %vm3487_vm13, %v5433_v54, %v3486_v26 }
 0x2ad   :  { %v3193_v61 = vpop.f32.mrf.mxu3  ;;  %v3138_v50 = vadd.f32 %v3137_v38, %v3109_v2  ;;  %v5941_v51 = vld [vmem:[#allocation4 + $0x4c] sm:$0xf]  ;;  %4083 = vmatpush.msrb.mxu0 %v4064_v24  ;;  %v4060_v2 = vld [vmem:[%s8865_s5 + $0x20] sm:$0xff] }
 0x2ae   :  { %v3194_v52 = vadd.f32 %v3193_v61, %v3165_v13  ;;  %3491 = vst [vmem:[#allocation4 + $0x5c] sm:$0xf] %v3490_v31  ;;  %v4061_v31 = vld [vmem:[%s8865_s5 + $0x28] sm:$0xff] }
 0x2af   :  { %v3904_v58 = vpop.f32.mrf.mxu1  ;;  %4084 = vmatpush.msrb.mxu0 %v4063_v7 }
 0x2b0   :  { %v3495_v30 = vadd.f32 %v3493_v17, %v3194_v52 }
 0x2b1   :  { %v3166_v1 = vpop.f32.mrf.mxu2  ;;  %4085 = vmatpush.msrb.mxu0 %v4062_v59 }
 0x2b2   :  { %v3167_v23 = vadd.f32 %v3166_v1, %v3138_v50  ;;  %vm3496_vm14 = vcmp.ge.f32.partialorder %v3495_v30, 1.0  ;;  %v5435_v0 = vadd.f32 -1.0, %v3495_v30  ;;  %v3875_v32 = vpop.f32.mrf.mxu0 }
 0x2b3   :  { %v5434_v33 = vsel %vm3496_vm14, 1.0, %v8913_v22  ;;  %v3876_v25 = vadd.f32 %v8776_v55, %v3875_v32  ;;  %4086 = vmatpush.msrb.mxu0 %v4061_v31 }
 0x2b4   :  { %v3499_v35 = vpack.c.bf16 %v5434_v33, %v5434_v33  ;;  %v3502_v43 = vsel %vm3496_vm14, %v5435_v0, %v3495_v30 }
 0x2b5   :  { %v3195_v57 = vpop.f32.mrf.mxu3  ;;  %v5481_v45 = vld [vmem:[#allocation4 + $0x58] sm:$0xf0]  ;;  %v3905_v14 = vadd.f32 %v3904_v58, %v3876_v25  ;;  %4087 = vmatpush.msrb.mxu0 %v4060_v2 }
 0x2b6   :  { %v3196_v20 = vadd.f32 %v3195_v57, %v3167_v23  ;;  %3500 = vst [vmem:[#allocation4 + $0x6c] sm:$0xf] %v3499_v35  ;;  %v5484_v21 = vor.u32 %v5941_v51, %v5481_v45  ;;  %v4059_v35 = vld [vmem:[%s8865_s5 + $0x18] sm:$0xff]  ;;  %v4058_v57 = vld [vmem:[%s8865_s5 + $0x10] sm:$0xff] }
 0x2b7   :  { %v3906_v40 = vpop.f32.mrf.mxu1  ;;  %4088 = vmatpush.msrb.mxu0 %v4059_v35 }
 0x2b8   :  { %v3504_v37 = vadd.f32 %v3502_v43, %v3196_v20  ;;  %3971 = vmatmul.bf16.gmra.mxu3 %v5484_v21 }
 0x2b9   :  { %v3933_v44 = vpop.f32.mrf.mxu2  ;;  %4089 = vmatpush.msrb.mxu0 %v4058_v57 }
 0x2ba   :  { %vm3505_vm15 = vcmp.ge.f32.partialorder %v3504_v37, 1.0  ;;  %v3877_v62 = vpop.f32.mrf.mxu0  ;;  %v3934_v4 = vadd.f32 %v3933_v44, %v3905_v14  ;;  %v4057_v44 = vld [vmem:[%s8865_s5 + $0x8] sm:$0xff] }
 0x2bb   :  { %v5436_v42 = vsel %vm3505_vm15, 1.0, %v8913_v22  ;;  %v3878_v3 = vadd.f32 %v8776_v55, %v3877_v62  ;;  %4090 = vmatpush.msrb.mxu0 %v4057_v44 }
 0x2bc   :  { %v3508_v10 = vpack.c.bf16 %v5436_v42, %v5436_v42 }
 0x2bd   :  { %v5945_v5 = vld [vmem:[#allocation4 + $0x6c] sm:$0xf]  ;;  %v3907_v28 = vadd.f32 %v3906_v40, %v3878_v3  ;;  %4091 = vmatpush.msrb.mxu0 %v4056_v60 }
 0x2be   :  { %3509 = vst [vmem:[#allocation4 + $0x7c] sm:$0xf] %v3508_v10 }
 0x2bf   :  { %v3909_v34 = vpop.f32.mrf.mxu1 }
 0x2c1   :  { %v3935_v15 = vpop.f32.mrf.mxu2 }
 0x2c2   :  { %v3880_v56 = vpop.f32.mrf.mxu0  ;;  %v3936_v53 = vadd.f32 %v3935_v15, %v3907_v28 }
 0x2c3   :  { %v3881_v16 = vadd.f32 %v8776_v55, %v3880_v56 }
 0x2c5   :  { %v5497_v18 = vld [vmem:[#allocation4 + $0x78] sm:$0xf0]  ;;  %v3910_v12 = vadd.f32 %v3909_v34, %v3881_v16 }
 0x2c6   :  { %v5500_v49 = vor.u32 %v5945_v5, %v5497_v18 }
 0x2c7   :  { %v3911_v6 = vpop.f32.mrf.mxu1 }
 0x2c8   :  { %3976 = vmatmul.bf16.gmra.mxu3 %v5500_v49 }
 0x2c9   :  { %v3938_v29 = vpop.f32.mrf.mxu2 }
 0x2ca   :  { %v3882_v9 = vpop.f32.mrf.mxu0  ;;  %v3939_v52 = vadd.f32 %v3938_v29, %v3910_v12 }
 0x2cb   :  { %v3883_v30 = vadd.f32 %v8776_v55, %v3882_v9 }
 0x2cd   :  { %v3912_v0 = vadd.f32 %v3911_v6, %v3883_v30 }
 0x2cf   :  { %v3914_v33 = vpop.f32.mrf.mxu1 }
 0x2d1   :  { %v3940_v54 = vpop.f32.mrf.mxu2 }
 0x2d2   :  { %v3885_v17 = vpop.f32.mrf.mxu0  ;;  %v3941_v20 = vadd.f32 %v3940_v54, %v3912_v0 }
 0x2d3   :  { %v3886_v43 = vadd.f32 %v8776_v55, %v3885_v17 }
 0x2d5   :  { %v3915_v18 = vadd.f32 %v3914_v33, %v3886_v43 }
 0x2d7   :  { %v3916_v47 = vpop.f32.mrf.mxu1 }
 0x2d9   :  { %v3943_v51 = vpop.f32.mrf.mxu2 }
 0x2da   :  { %v3887_v42 = vpop.f32.mrf.mxu0  ;;  %v3944_v41 = vadd.f32 %v3943_v51, %v3915_v18 }
 0x2db   :  { %v3888_v39 = vadd.f32 %v8776_v55, %v3887_v42 }
 0x2dd   :  { %v3917_v15 = vadd.f32 %v3916_v47, %v3888_v39 }
 0x2e1   :  { %v3945_v32 = vpop.f32.mrf.mxu2 }
 0x2e2   :  { %v3890_v40 = vpop.f32.mrf.mxu0  ;;  %v3946_v56 = vadd.f32 %v3945_v32, %v3917_v15 }
 0x2e3   :  { %v3891_v24 = vadd.f32 %v8776_v55, %v3890_v40 }
 0x2ea   :  { %v3892_v28 = vpop.f32.mrf.mxu0 }
 0x31b   :  { %v3962_v48 = vpop.f32.mrf.mxu3 }
 0x31c   :  { %v8786_v36 = vadd.f32 %v3962_v48, %v3934_v4  ;;  %v3919_v4 = vpop.f32.mrf.mxu1  ;;  %v3948_v48 = vpop.f32.mrf.mxu2 }
 0x31d   :  { %v3920_v29 = vadd.f32 %v3919_v4, %v3891_v24 }
 0x31e   :  { %v5630_v46 = vadd.f32 -1.0, %v8786_v36  ;;  %vm3992_vm0 = vcmp.ge.f32.partialorder %v8786_v36, 1.0 }
 0x31f   :  { %v3949_v59 = vadd.f32 %v3948_v48, %v3920_v29  ;;  %v5629_v16 = vsel %vm3992_vm0, 1.0, %v8913_v22 }
 0x320   :  { %v3997_v63 = vsel %vm3992_vm0, %v5630_v46, %v8786_v36 }
 0x323   :  { %v3964_v26 = vpop.f32.mrf.mxu3 }
 0x324   :  { %v3965_v27 = vadd.f32 %v3964_v26, %v3936_v53  ;;  %v3893_v53 = vadd.f32 %v8776_v55, %v3892_v28  ;;  %v3921_v12 = vpop.f32.mrf.mxu1  ;;  %v3950_v31 = vpop.f32.mrf.mxu2 }
 0x326   :  { %v8800_v13 = vadd.f32 %v3997_v63, %v3965_v27  ;;  %v3922_v2 = vadd.f32 %v3921_v12, %v3893_v53 }
 0x328   :  { %v5632_v61 = vadd.f32 -1.0, %v8800_v13  ;;  %vm4000_vm1 = vcmp.ge.f32.partialorder %v8800_v13, 1.0  ;;  %v3951_v36 = vadd.f32 %v3950_v31, %v3922_v2 }
 0x329   :  { %v5631_v9 = vsel %vm4000_vm1, 1.0, %v8913_v22 }
 0x32a   :  { %v4005_v1 = vsel %vm4000_vm1, %v5632_v61, %v8800_v13  ;;  %v4003_v6 = vadd.f32 %v5631_v9, %v5629_v16 }
 0x32b   :  { %v3967_v38 = vpop.f32.mrf.mxu3 }
 0x32c   :  { %v3968_v50 = vadd.f32 %v3967_v38, %v3939_v52 }
 0x32e   :  { %v4007_v23 = vadd.f32 %v4005_v1, %v3968_v50 }
 0x330   :  { %v5634_v45 = vadd.f32 -1.0, %v4007_v23  ;;  %vm4008_vm2 = vcmp.ge.f32.partialorder %v4007_v23, 1.0 }
 0x331   :  { %v5633_v27 = vsel %vm4008_vm2, 1.0, %v8913_v22 }
 0x332   :  { %v4013_v10 = vsel %vm4008_vm2, %v5634_v45, %v4007_v23  ;;  %v4011_v61 = vadd.f32 %v5633_v27, %v4003_v6 }
 0x333   :  { %v3969_v21 = vpop.f32.mrf.mxu3 }
 0x334   :  { %v3970_v37 = vadd.f32 %v3969_v21, %v3941_v20  ;;  %v5982_v21 = vld [vmem:[%s8864_s6] ss:$0 sm:$0xff] }
 0x336   :  { %v4015_v5 = vadd.f32 %v4013_v10, %v3970_v37 }
 0x338   :  { %v5636_v49 = vadd.f32 -1.0, %v4015_v5  ;;  %vm4016_vm3 = vcmp.ge.f32.partialorder %v4015_v5, 1.0 }
 0x339   :  { %v5635_v13 = vsel %vm4016_vm3, 1.0, %v8913_v22 }
 0x33a   :  { %v4021_v62 = vsel %vm4016_vm3, %v5636_v49, %v4015_v5  ;;  %v4019_v17 = vadd.f32 %v5635_v13, %v4011_v61 }
 0x33b   :  { %v3972_v58 = vpop.f32.mrf.mxu3 }
 0x33c   :  { %v3973_v8 = vadd.f32 %v3972_v58, %v3944_v41 }
 0x33e   :  { %v4023_v19 = vadd.f32 %v4021_v62, %v3973_v8 }
 0x340   :  { %v5638_v25 = vadd.f32 -1.0, %v4023_v19  ;;  %vm4024_vm4 = vcmp.ge.f32.partialorder %v4023_v19, 1.0 }
 0x341   :  { %v5637_v55 = vsel %vm4024_vm4, 1.0, %v8913_v22 }
 0x342   :  { %v4029_v3 = vsel %vm4024_vm4, %v5638_v25, %v4023_v19  ;;  %v4027_v50 = vadd.f32 %v5637_v55, %v4019_v17 }
 0x343   :  { %v3974_v11 = vpop.f32.mrf.mxu3 }
 0x344   :  { %v3975_v14 = vadd.f32 %v3974_v11, %v3946_v56 }
 0x346   :  { %v4031_v34 = vadd.f32 %v4029_v3, %v3975_v14 }
 0x348   :  { %v5640_v7 = vadd.f32 -1.0, %v4031_v34  ;;  %vm4032_vm5 = vcmp.ge.f32.partialorder %v4031_v34, 1.0 }
 0x349   :  { %v5639_v38 = vsel %vm4032_vm5, 1.0, %v8913_v22 }
 0x34a   :  { %v4037_v63 = vsel %vm4032_vm5, %v5640_v7, %v4031_v34  ;;  %v4035_v33 = vadd.f32 %v5639_v38, %v4027_v50 }
 0x34b   :  { %v3977_v46 = vpop.f32.mrf.mxu3 }
 0x34c   :  { %v3978_v26 = vadd.f32 %v3977_v46, %v3949_v59 }
 0x34e   :  { %v4039_v54 = vadd.f32 %v4037_v63, %v3978_v26 }
 0x350   :  { %v5642_v52 = vadd.f32 -1.0, %v4039_v54  ;;  %vm4040_vm6 = vcmp.ge.f32.partialorder %v4039_v54, 1.0 }
 0x351   :  { %v5641_v23 = vsel %vm4040_vm6, 1.0, %v8913_v22 }
 0x352   :  { %v4045_v0 = vsel %vm4040_vm6, %v5642_v52, %v4039_v54  ;;  %v4043_v57 = vadd.f32 %v5641_v23, %v4035_v33 }
 0x353   :  { %v3979_v30 = vpop.f32.mrf.mxu3 }
 0x354   :  { %v3980_v1 = vadd.f32 %v3979_v30, %v3951_v36 }
 0x356   :  { %v4047_v35 = vadd.f32 %v4045_v0, %v3980_v1 }
 0x358   :  { %vm4048_vm7 = vcmp.ge.f32.partialorder %v4047_v35, 1.0 }
 0x359   :  { %v5643_v51 = vsel %vm4048_vm7, 1.0, %v8913_v22 }
 0x35a   :  { %v4051_v45 = vadd.f32 %v5643_v51, %v4043_v57 }
 0x35c   :  { %v4054_v20 = vmul.f32 0.125, %v4051_v45 }
 0x35e   :  { %4055 = vst [vmem:[%s8866_s7] sm:$0xff] %v4054_v20  ;;  %4092 = vmatmul.f32.vlgmr.msrb.gmra.mxu0 %v4054_v20 }
 0x3db   :  { %v4093_v43 = vpop.f32.mrf.mxu0 }
 0x3dc   :  { %v4094_v37 = vadd.f32 %v5982_v21, %v4093_v43 }
 0x3de   :  { %4096 = vst [vmem:[%s8867_s8] sm:$0xff] %v4094_v37 }

</bundles_post_ra>
